<compile_context>
chip_gen: v7x
topology: tpu7x:2x2x1
jax: 0.10.0
libtpu: 0.0.40
codegen_flags: <defaults>
</compile_context>

<pallas_src>
import functools

import jax
import jax.numpy as jnp
from jax.experimental import pallas as pl

MULTI_VIEW = 5                      # CNN embeddings feeding the action head
H_IN, W_IN = 45, 57
C_IN, C1, C2, K = 3, 6, 6, 5
OH1, OW1 = 21, 27                   # conv1 output (stride 2, VALID)
OH2, OW2 = 9, 12                    # conv2 output (stride 2, VALID)
GRP = 256                           # lane stride of one (ki, image) group
Q_VALID = OH2 * OW1                 # 243 valid lanes per group (q = r*27 + j)

# ---- packed weight-slab row offsets (all multiples of 128) ------------------
OFF_WSC = 0                         # scatter-padded fc1 weight, 6 x 256 rows
OFF_WFOLD = OFF_WSC + C2 * GRP      # fc2 folded into a1 obs blocks, 5 x 128
OFF_A1MAP = OFF_WFOLD + MULTI_VIEW * 128
OFF_M1 = OFF_A1MAP + 128
OFF_M2 = OFF_M1 + 128
OFF_M3 = OFF_M2 + 128
OFF_A2 = OFF_M3 + 128
OFF_A3 = OFF_A2 + 128
OFF_A4 = OFF_A3 + 128
WSLAB_ROWS = OFF_A4 + 128           # 3072

# ---- bias-slab rows ----------------------------------------------------------
ROW_FC1B, ROW_A1B, ROW_M1B, ROW_M2B, ROW_M3B, ROW_A2B, ROW_A3B, ROW_A4B = range(8)


# --------------------------- deterministic params ----------------------------
def _uniform(key, shape, bound):
    return jax.random.uniform(key, shape, jnp.float32, -bound, bound)


def init_linear(key, in_f, out_f):
    kw, kb = jax.random.split(key)
    bound = 1.0 / (in_f ** 0.5)
    return _uniform(kw, (out_f, in_f), bound), _uniform(kb, (out_f,), bound)


def init_conv(key, cin, cout, k):
    kw, kb = jax.random.split(key)
    bound = 1.0 / ((cin * k * k) ** 0.5)
    return _uniform(kw, (cout, cin, k, k), bound), _uniform(kb, (cout,), bound)


def init_params(key):
    ks = jax.random.split(key, 11)
    p = {}
    p['c1_w'], p['c1_b'] = init_conv(ks[0], 3, 6, 5)
    p['c2_w'], p['c2_b'] = init_conv(ks[1], 6, 6, 5)
    p['fc1_w'], p['fc1_b'] = init_linear(ks[2], 648, 128)
    p['fc2_w'], p['fc2_b'] = init_linear(ks[3], 128, 32)
    p['m1_w'], p['m1_b'] = init_linear(ks[4], 25, 64)
    p['m2_w'], p['m2_b'] = init_linear(ks[5], 64, 128)
    p['m3_w'], p['m3_b'] = init_linear(ks[6], 128, 128)
    p['a1_w'], p['a1_b'] = init_linear(ks[7], 32 * MULTI_VIEW + 128, 128)
    p['a2_w'], p['a2_b'] = init_linear(ks[8], 128, 64)
    p['a3_w'], p['a3_b'] = init_linear(ks[9], 64, 16)
    p['a4_w'], p['a4_b'] = init_linear(ks[10], 16, 5)
    return p


# ------------------------------ weight prep ----------------------------------
def prepare_params(p):
    """One-time weight re-layout / packing (outside the jitted forward)."""
    f32 = jnp.float32
    t = lambda w: jnp.asarray(w, f32).T

    # conv1 weight with bias folded in as an extra input row (matched by the
    # constant-one row appended to the patch matrix).  bf16 for the MXU.
    w1b = jnp.concatenate(
        [p['c1_w'].reshape(C1, C_IN * K * K), p['c1_b'].reshape(C1, 1)], axis=1)

    # conv2 weights: one (ch_out, ch_in) matrix per kernel tap t = ki*5 + kj.
    w2k = p['c2_w'].transpose(2, 3, 0, 1).reshape(K * K, C2, C1)
    b2 = p['c2_b'].reshape(C2, 1)

    # fc1, scattered to the conv2 accumulator lane layout q = r*27 + 2c.  Every
    # OTHER row is zero: this is what makes the padded / off-grid / relu(bias)
    # garbage lanes of the conv pipeline contribute exactly 0 to fc1.
    q_idx = (OW1 * jnp.arange(OH2)[:, None] + 2 * jnp.arange(OW2)[None, :]).reshape(-1)
    assert int(q_idx.max()) < Q_VALID and len(set(q_idx.tolist())) == OH2 * OW2
    fc1_wT = t(p['fc1_w']).reshape(C2, OH2 * OW2, 128)      # (6, 108, 128)
    wsc = jnp.zeros((C2, GRP, 128), f32).at[:, q_idx, :].set(fc1_wT)
    wsc = wsc.reshape(C2 * GRP, 128)

    # fc2 folded into the per-view column blocks of the first action layer.
    a1 = p['a1_w']
    fc2T = t(p['fc2_w'])                                     # (128, 32)
    blocks = [a1[:, 32 * v:32 * (v + 1)].T for v in range(MULTI_VIEW)]   # (32,128)
    wfold = jnp.concatenate([fc2T @ blk for blk in blocks], axis=0)      # (640,128)
    a1_b_tot = p['a1_b'] + p['fc2_b'] @ sum(blocks)
    a1map = a1[:, 32 * MULTI_VIEW:].T                        # (128, 128)

    def sec(w):                                              # 128x128 zero-padded block
        out = jnp.zeros((128, 128), f32)
        return out.at[:w.shape[0], :w.shape[1]].set(w)

    wslab = jnp.concatenate(
        [wsc, wfold, sec(a1map), sec(t(p['m1_w'])), sec(t(p['m2_w'])),
         sec(t(p['m3_w'])), sec(t(p['a2_w'])), sec(t(p['a3_w'])), sec(t(p['a4_w']))],
        axis=0)
    assert wslab.shape == (WSLAB_ROWS, 128)

    def brow(b):
        return jnp.zeros((128,), f32).at[:b.shape[0]].set(b)

    bias = jnp.stack(
        [brow(p['fc1_b']), brow(a1_b_tot), brow(p['m1_b']), brow(p['m2_b']),
         brow(p['m3_b']), brow(p['a2_b']), brow(p['a3_b']), brow(p['a4_b'])], axis=0)

    return {'w1b': w1b.astype(jnp.bfloat16), 'w2k': w2k.astype(f32),
            'b2': b2.astype(f32), 'wslab': wslab.astype(f32), 'bias': bias.astype(f32)}


# ------------------------------ layout glue -----------------------------------
def build_conv_patches(imgs, dtype=jnp.bfloat16):
    """conv1 im2col with conv2's row subsampling (i = 2r + ki) pre-applied.

    Result: (C_IN*K*K + 1, K*N*GRP + 128) where
      row  = ch*25 + di*5 + dj   (+ one trailing constant-1 row -> conv1 bias)
      lane = ki*(N*GRP) + n*GRP + r*OW1 + j   (r < 9 conv2 rows, j < 27 conv1 cols)
    Lanes outside the Q_VALID=243 region of each group (and the trailing
    128-lane block) are zeros; they only feed lanes the scatter-padded fc1
    weight zeroes out in the kernel.
    """
    n = imgs.shape[0]
    groups = []
    for ki in range(K):
        taps = []
        for di in range(K):
            rows = imgs[:, :, 2 * ki + di: 2 * ki + di + 4 * (OH2 - 1) + 1: 4, :]
            for dj in range(K):
                taps.append(rows[:, :, :, dj: dj + 2 * (OW1 - 1) + 1: 2])
        t = jnp.stack(taps, axis=2)                              # (N, C, 25, 9, 27)
        t = t.transpose(1, 2, 0, 3, 4).reshape(C_IN * K * K, n, OH2 * OW1)
        groups.append(t)
    p = jnp.stack(groups, axis=1)                                # (75, K, N, 243)
    p = jnp.pad(p, ((0, 0), (0, 0), (0, 0), (0, GRP - Q_VALID)))
    p = p.reshape(C_IN * K * K, K * n * GRP)
    p = jnp.concatenate([p, jnp.ones((1, p.shape[1]), p.dtype)], axis=0)
    p = jnp.pad(p, ((0, 0), (0, 128)))                           # head-room for kj shifts
    assert p.shape == (C_IN * K * K + 1, K * n * GRP + 128)
    return p.astype(dtype)


# ------------------------------ fused kernel ----------------------------------
def _fused_forward_kernel(p1k_ref, maps_ref, w1b_ref, w2k_ref, b2_ref,
                          wsl_ref, bias_ref, o_ref, *, n_imgs, batch, views):
    f32 = jnp.float32
    dot = functools.partial(jnp.dot, preferred_element_type=f32)
    relu = lambda v: jnp.maximum(v, 0.0)
    accw = n_imgs * GRP            # lanes covering every image's conv2 grid
    kgrp = n_imgs * GRP            # lane stride between ki row-groups of p1k / y

    # conv1 (bias folded in via the constant-one patch row), bf16 MXU matmul.
    y = relu(dot(w1b_ref[...], p1k_ref[...]))                   # (6, K*kgrp + 128) f32

    # conv2 = sum of 25 shifted (6,6) matmuls.  Lane m = n*256 + r*27 + 2c of
    # `acc` holds the conv2 pre-activation of image n, pixel (r, c); every other
    # lane is finite garbage that the zero rows of the fc1 scatter weight kill.
    acc = jnp.zeros((C2, accw), f32)
    for t in range(K * K):
        ki, kj = divmod(t, K)
        off = ki * kgrp + kj
        acc = acc + dot(w2k_ref[t], y[:, off:off + accw])
    c2 = relu(acc + b2_ref[...])                                # (6, n_imgs*256)

    # fc1: lane-aligned reshape + 6 per-channel MXU matmuls (no slice/concat
    # shuffles) against the scatter-padded weight slab sections.
    c2 = c2.reshape(C2, n_imgs, GRP)
    h = jnp.zeros((n_imgs, 128), f32)
    for ch in range(C2):
        h = h + dot(c2[ch], wsl_ref[OFF_WSC + ch * GRP:OFF_WSC + (ch + 1) * GRP, :])
    h = relu(h + bias_ref[ROW_FC1B:ROW_FC1B + 1, :])            # (n_imgs, 128)

    # map-encoder MLP (all sections 128-padded with zeros; pads stay exactly 0).
    m = maps_ref[...]
    m = relu(dot(m, wsl_ref[OFF_M1:OFF_M1 + 128, :]) + bias_ref[ROW_M1B:ROW_M1B + 1, :])
    m = relu(dot(m, wsl_ref[OFF_M2:OFF_M2 + 128, :]) + bias_ref[ROW_M2B:ROW_M2B + 1, :])
    m = dot(m, wsl_ref[OFF_M3:OFF_M3 + 128, :]) + bias_ref[ROW_M3B:ROW_M3B + 1, :]

    # action head.  fc2 is folded into the wfold slab section, so the per-view
    # embeddings collapse into one lane concat + a single (B,640)x(640,128) dot.
    hcat = jnp.concatenate(
        [h[v * batch:(v + 1) * batch, :] for v in range(views)], axis=1)   # (B, 640)
    a = (dot(hcat, wsl_ref[OFF_WFOLD:OFF_WFOLD + views * 128, :])
         + dot(m, wsl_ref[OFF_A1MAP:OFF_A1MAP + 128, :])
         + bias_ref[ROW_A1B:ROW_A1B + 1, :])
    a = relu(a)
    a = relu(dot(a, wsl_ref[OFF_A2:OFF_A2 + 128, :]) + bias_ref[ROW_A2B:ROW_A2B + 1, :])
    a = relu(dot(a, wsl_ref[OFF_A3:OFF_A3 + 128, :]) + bias_ref[ROW_A3B:ROW_A3B + 1, :])
    a = dot(a, wsl_ref[OFF_A4:OFF_A4 + 128, :]) + bias_ref[ROW_A4B:ROW_A4B + 1, :]
    o_ref[...] = a[:, :o_ref.shape[1]]


# ------------------------------ forward pass ----------------------------------
def forward(prep, x, maps, fov):
    B, V, C, H, W = x.shape
    views = V + 1
    n_imgs = views * B
    assert views == MULTI_VIEW and (C, H, W) == (C_IN, H_IN, W_IN)

    # view-major image order (image n = v*B + b, fov is view V), so each view's
    # fc1 rows form a contiguous sublane block inside the kernel.
    imgs = jnp.concatenate(
        [jnp.moveaxis(x, 1, 0).reshape(V * B, C, H, W), fov], axis=0)
    p1k = build_conv_patches(imgs)
    maps_pad = jnp.zeros((B, 128), jnp.float32).at[:, :maps.shape[1] * maps.shape[2]].set(
        maps.reshape(B, -1))

    kernel = functools.partial(_fused_forward_kernel,
                               n_imgs=n_imgs, batch=B, views=views)
    # TODO(synk): a 2-way "parallel" image split could engage v7x's second
    # TensorCore, but the fused body is only a few microseconds of work.
    return pl.pallas_call(
        kernel,
        out_shape=jax.ShapeDtypeStruct((B, 5), jnp.float32),
    )(p1k, maps_pad, prep['w1b'], prep['w2k'], prep['b2'],
      prep['wslab'], prep['bias'])


# ------------------------------ pure-JAX reference -----------------------------
def reference_forward(params, x, maps, fov):
    relu = lambda v: jnp.maximum(v, 0.0)
    hi = jax.lax.Precision.HIGHEST

    def conv(xx, w, b, s):
        out = jax.lax.conv_general_dilated(
            xx, w, (s, s), 'VALID',
            dimension_numbers=('NCHW', 'OIHW', 'NCHW'), precision=hi)
        return out + b[None, :, None, None]

    def linear(xx, w, b):
        return jnp.dot(xx, w.T, precision=hi) + b

    def cnn(im):
        h = relu(conv(im, params['c1_w'], params['c1_b'], 2))
        h = relu(conv(h, params['c2_w'], params['c2_b'], 2))
        h = h.reshape(h.shape[0], -1)
        h = relu(linear(h, params['fc1_w'], params['fc1_b']))
        return linear(h, params['fc2_w'], params['fc2_b'])

    B, V = x.shape[:2]
    obs = [cnn(x[:, i]) for i in range(V)]
    obs.append(cnn(fov))
    m = maps.reshape(B, -1)
    m = relu(linear(m, params['m1_w'], params['m1_b']))
    m = relu(linear(m, params['m2_w'], params['m2_b']))
    obs.append(linear(m, params['m3_w'], params['m3_b']))
    e = jnp.concatenate(obs, axis=1)
    e = relu(linear(e, params['a1_w'], params['a1_b']))
    e = relu(linear(e, params['a2_w'], params['a2_b']))
    e = relu(linear(e, params['a3_w'], params['a3_b']))
    return linear(e, params['a4_w'], params['a4_b'])


if __name__ == "__main__":
    key = jax.random.PRNGKey(0)
    kp, kx, km, kf = jax.random.split(key, 4)
    params = init_params(kp)
    prep = prepare_params(params)

    B, V = 2, MULTI_VIEW - 1        # 4 camera views + fov -> 5 CNN embeddings
    x = jax.random.normal(kx, (B, V, C_IN, H_IN, W_IN), jnp.float32)
    maps = jax.random.normal(km, (B, 5, 5), jnp.float32)
    fov = jax.random.normal(kf, (B, C_IN, H_IN, W_IN), jnp.float32)

    out = jax.block_until_ready(jax.jit(forward)(prep, x, maps, fov))
    assert out.shape == (B, 5), out.shape

    ref = jax.block_until_ready(jax.jit(reference_forward)(params, x, maps, fov))
    err = float(jnp.max(jnp.abs(out - ref)))
    # 5e-3 (vs 2e-2 before): the reference now runs at Precision.HIGHEST; the
    # only reduced-precision terms left are the bf16 conv1 patches/weights and
    # MXU pass rounding, which bound the end-to-end error well below this.
    if not jnp.allclose(out, ref, rtol=5e-3, atol=5e-3):
        raise SystemExit(f"mismatch vs reference, max abs err = {err}")
    print("KERNEL_OK")
</pallas_src>

<mosaic_0001>
module attributes {stable_mosaic.version = 11 : i64} {
  func.func @_fused_forward_kernel(%arg0: memref<76x12928xbf16, #tpu.memory_space<vmem>>, %arg1: memref<2x128xf32, #tpu.memory_space<vmem>>, %arg2: memref<6x76xbf16, #tpu.memory_space<vmem>>, %arg3: memref<25x6x6xf32, #tpu.memory_space<vmem>>, %arg4: memref<6x1xf32, #tpu.memory_space<vmem>>, %arg5: memref<3072x128xf32, #tpu.memory_space<vmem>>, %arg6: memref<8x128xf32, #tpu.memory_space<vmem>>, %arg7: memref<2x5xf32, #tpu.memory_space<vmem>>) attributes {dimension_semantics = [], scalar_prefetch = 0 : i64, scratch_operands = 0 : i64, tpu.core_type = #tpu.core_type<tc>} {
    %c0 = arith.constant 0 : index
    %c0_0 = arith.constant 0 : index
    %0 = vector.load %arg2[%c0, %c0_0] : memref<6x76xbf16, #tpu.memory_space<vmem>>, vector<6x76xbf16>
    %c0_1 = arith.constant 0 : index
    %c0_2 = arith.constant 0 : index
    %1 = vector.load %arg0[%c0_1, %c0_2] : memref<76x12928xbf16, #tpu.memory_space<vmem>>, vector<76x12928xbf16>
    %cst = arith.constant dense<0.000000e+00> : vector<6x12928xf32>
    %2 = tpu.matmul %0, %1, %cst {dimension_numbers = #tpu.dot_dimension_numbers<[1], [0], [0], [1], [0, 0, 1, 1], [], []>} : vector<6x76xbf16>, vector<76x12928xbf16>, vector<6x12928xf32> -> vector<6x12928xf32>
    %cst_3 = arith.constant 0.000000e+00 : f32
    %3 = vector.broadcast %cst_3 : f32 to vector<6x12928xf32>
    %4 = arith.maximumf %2, %3 : vector<6x12928xf32>
    %cst_4 = arith.constant 0.000000e+00 : f32
    %5 = vector.broadcast %cst_4 : f32 to vector<6x2560xf32>
    %c0_5 = arith.constant 0 : index
    %c0_6 = arith.constant 0 : index
    %c0_7 = arith.constant 0 : index
    %6 = vector.load %arg3[%c0_5, %c0_6, %c0_7] : memref<25x6x6xf32, #tpu.memory_space<vmem>>, vector<1x6x6xf32>
    %7 = vector.shape_cast %6 : vector<1x6x6xf32> to vector<6x6xf32>
    %8 = vector.extract_strided_slice %4 {offsets = [0, 0], sizes = [6, 2560], strides = [1, 1]} : vector<6x12928xf32> to vector<6x2560xf32>
    %cst_8 = arith.constant dense<0.000000e+00> : vector<6x2560xf32>
    %9 = tpu.matmul %7, %8, %cst_8 {dimension_numbers = #tpu.dot_dimension_numbers<[1], [0], [0], [1], [0, 0, 1, 1], [], []>} : vector<6x6xf32>, vector<6x2560xf32>, vector<6x2560xf32> -> vector<6x2560xf32>
    %10 = arith.addf %5, %9 : vector<6x2560xf32>
    %c1 = arith.constant 1 : index
    %c0_9 = arith.constant 0 : index
    %c0_10 = arith.constant 0 : index
    %11 = vector.load %arg3[%c1, %c0_9, %c0_10] : memref<25x6x6xf32, #tpu.memory_space<vmem>>, vector<1x6x6xf32>
    %12 = vector.shape_cast %11 : vector<1x6x6xf32> to vector<6x6xf32>
    %13 = vector.extract_strided_slice %4 {offsets = [0, 1], sizes = [6, 2560], strides = [1, 1]} : vector<6x12928xf32> to vector<6x2560xf32>
    %cst_11 = arith.constant dense<0.000000e+00> : vector<6x2560xf32>
    %14 = tpu.matmul %12, %13, %cst_11 {dimension_numbers = #tpu.dot_dimension_numbers<[1], [0], [0], [1], [0, 0, 1, 1], [], []>} : vector<6x6xf32>, vector<6x2560xf32>, vector<6x2560xf32> -> vector<6x2560xf32>
    %15 = arith.addf %10, %14 : vector<6x2560xf32>
    %c2 = arith.constant 2 : index
    %c0_12 = arith.constant 0 : index
    %c0_13 = arith.constant 0 : index
    %16 = vector.load %arg3[%c2, %c0_12, %c0_13] : memref<25x6x6xf32, #tpu.memory_space<vmem>>, vector<1x6x6xf32>
    %17 = vector.shape_cast %16 : vector<1x6x6xf32> to vector<6x6xf32>
    %18 = vector.extract_strided_slice %4 {offsets = [0, 2], sizes = [6, 2560], strides = [1, 1]} : vector<6x12928xf32> to vector<6x2560xf32>
    %cst_14 = arith.constant dense<0.000000e+00> : vector<6x2560xf32>
    %19 = tpu.matmul %17, %18, %cst_14 {dimension_numbers = #tpu.dot_dimension_numbers<[1], [0], [0], [1], [0, 0, 1, 1], [], []>} : vector<6x6xf32>, vector<6x2560xf32>, vector<6x2560xf32> -> vector<6x2560xf32>
    %20 = arith.addf %15, %19 : vector<6x2560xf32>
    %c3 = arith.constant 3 : index
    %c0_15 = arith.constant 0 : index
    %c0_16 = arith.constant 0 : index
    %21 = vector.load %arg3[%c3, %c0_15, %c0_16] : memref<25x6x6xf32, #tpu.memory_space<vmem>>, vector<1x6x6xf32>
    %22 = vector.shape_cast %21 : vector<1x6x6xf32> to vector<6x6xf32>
    %23 = vector.extract_strided_slice %4 {offsets = [0, 3], sizes = [6, 2560], strides = [1, 1]} : vector<6x12928xf32> to vector<6x2560xf32>
    %cst_17 = arith.constant dense<0.000000e+00> : vector<6x2560xf32>
    %24 = tpu.matmul %22, %23, %cst_17 {dimension_numbers = #tpu.dot_dimension_numbers<[1], [0], [0], [1], [0, 0, 1, 1], [], []>} : vector<6x6xf32>, vector<6x2560xf32>, vector<6x2560xf32> -> vector<6x2560xf32>
    %25 = arith.addf %20, %24 : vector<6x2560xf32>
    %c4 = arith.constant 4 : index
    %c0_18 = arith.constant 0 : index
    %c0_19 = arith.constant 0 : index
    %26 = vector.load %arg3[%c4, %c0_18, %c0_19] : memref<25x6x6xf32, #tpu.memory_space<vmem>>, vector<1x6x6xf32>
    %27 = vector.shape_cast %26 : vector<1x6x6xf32> to vector<6x6xf32>
    %28 = vector.extract_strided_slice %4 {offsets = [0, 4], sizes = [6, 2560], strides = [1, 1]} : vector<6x12928xf32> to vector<6x2560xf32>
    %cst_20 = arith.constant dense<0.000000e+00> : vector<6x2560xf32>
    %29 = tpu.matmul %27, %28, %cst_20 {dimension_numbers = #tpu.dot_dimension_numbers<[1], [0], [0], [1], [0, 0, 1, 1], [], []>} : vector<6x6xf32>, vector<6x2560xf32>, vector<6x2560xf32> -> vector<6x2560xf32>
    %30 = arith.addf %25, %29 : vector<6x2560xf32>
    %c5 = arith.constant 5 : index
    %c0_21 = arith.constant 0 : index
    %c0_22 = arith.constant 0 : index
    %31 = vector.load %arg3[%c5, %c0_21, %c0_22] : memref<25x6x6xf32, #tpu.memory_space<vmem>>, vector<1x6x6xf32>
    %32 = vector.shape_cast %31 : vector<1x6x6xf32> to vector<6x6xf32>
    %33 = vector.extract_strided_slice %4 {offsets = [0, 2560], sizes = [6, 2560], strides = [1, 1]} : vector<6x12928xf32> to vector<6x2560xf32>
    %cst_23 = arith.constant dense<0.000000e+00> : vector<6x2560xf32>
    %34 = tpu.matmul %32, %33, %cst_23 {dimension_numbers = #tpu.dot_dimension_numbers<[1], [0], [0], [1], [0, 0, 1, 1], [], []>} : vector<6x6xf32>, vector<6x2560xf32>, vector<6x2560xf32> -> vector<6x2560xf32>
    %35 = arith.addf %30, %34 : vector<6x2560xf32>
    %c6 = arith.constant 6 : index
    %c0_24 = arith.constant 0 : index
    %c0_25 = arith.constant 0 : index
    %36 = vector.load %arg3[%c6, %c0_24, %c0_25] : memref<25x6x6xf32, #tpu.memory_space<vmem>>, vector<1x6x6xf32>
    %37 = vector.shape_cast %36 : vector<1x6x6xf32> to vector<6x6xf32>
    %38 = vector.extract_strided_slice %4 {offsets = [0, 2561], sizes = [6, 2560], strides = [1, 1]} : vector<6x12928xf32> to vector<6x2560xf32>
    %cst_26 = arith.constant dense<0.000000e+00> : vector<6x2560xf32>
    %39 = tpu.matmul %37, %38, %cst_26 {dimension_numbers = #tpu.dot_dimension_numbers<[1], [0], [0], [1], [0, 0, 1, 1], [], []>} : vector<6x6xf32>, vector<6x2560xf32>, vector<6x2560xf32> -> vector<6x2560xf32>
    %40 = arith.addf %35, %39 : vector<6x2560xf32>
    %c7 = arith.constant 7 : index
    %c0_27 = arith.constant 0 : index
    %c0_28 = arith.constant 0 : index
    %41 = vector.load %arg3[%c7, %c0_27, %c0_28] : memref<25x6x6xf32, #tpu.memory_space<vmem>>, vector<1x6x6xf32>
    %42 = vector.shape_cast %41 : vector<1x6x6xf32> to vector<6x6xf32>
    %43 = vector.extract_strided_slice %4 {offsets = [0, 2562], sizes = [6, 2560], strides = [1, 1]} : vector<6x12928xf32> to vector<6x2560xf32>
    %cst_29 = arith.constant dense<0.000000e+00> : vector<6x2560xf32>
    %44 = tpu.matmul %42, %43, %cst_29 {dimension_numbers = #tpu.dot_dimension_numbers<[1], [0], [0], [1], [0, 0, 1, 1], [], []>} : vector<6x6xf32>, vector<6x2560xf32>, vector<6x2560xf32> -> vector<6x2560xf32>
    %45 = arith.addf %40, %44 : vector<6x2560xf32>
    %c8 = arith.constant 8 : index
    %c0_30 = arith.constant 0 : index
    %c0_31 = arith.constant 0 : index
    %46 = vector.load %arg3[%c8, %c0_30, %c0_31] : memref<25x6x6xf32, #tpu.memory_space<vmem>>, vector<1x6x6xf32>
    %47 = vector.shape_cast %46 : vector<1x6x6xf32> to vector<6x6xf32>
    %48 = vector.extract_strided_slice %4 {offsets = [0, 2563], sizes = [6, 2560], strides = [1, 1]} : vector<6x12928xf32> to vector<6x2560xf32>
    %cst_32 = arith.constant dense<0.000000e+00> : vector<6x2560xf32>
    %49 = tpu.matmul %47, %48, %cst_32 {dimension_numbers = #tpu.dot_dimension_numbers<[1], [0], [0], [1], [0, 0, 1, 1], [], []>} : vector<6x6xf32>, vector<6x2560xf32>, vector<6x2560xf32> -> vector<6x2560xf32>
    %50 = arith.addf %45, %49 : vector<6x2560xf32>
    %c9 = arith.constant 9 : index
    %c0_33 = arith.constant 0 : index
    %c0_34 = arith.constant 0 : index
    %51 = vector.load %arg3[%c9, %c0_33, %c0_34] : memref<25x6x6xf32, #tpu.memory_space<vmem>>, vector<1x6x6xf32>
    %52 = vector.shape_cast %51 : vector<1x6x6xf32> to vector<6x6xf32>
    %53 = vector.extract_strided_slice %4 {offsets = [0, 2564], sizes = [6, 2560], strides = [1, 1]} : vector<6x12928xf32> to vector<6x2560xf32>
    %cst_35 = arith.constant dense<0.000000e+00> : vector<6x2560xf32>
    %54 = tpu.matmul %52, %53, %cst_35 {dimension_numbers = #tpu.dot_dimension_numbers<[1], [0], [0], [1], [0, 0, 1, 1], [], []>} : vector<6x6xf32>, vector<6x2560xf32>, vector<6x2560xf32> -> vector<6x2560xf32>
    %55 = arith.addf %50, %54 : vector<6x2560xf32>
    %c10 = arith.constant 10 : index
    %c0_36 = arith.constant 0 : index
    %c0_37 = arith.constant 0 : index
    %56 = vector.load %arg3[%c10, %c0_36, %c0_37] : memref<25x6x6xf32, #tpu.memory_space<vmem>>, vector<1x6x6xf32>
    %57 = vector.shape_cast %56 : vector<1x6x6xf32> to vector<6x6xf32>
    %58 = vector.extract_strided_slice %4 {offsets = [0, 5120], sizes = [6, 2560], strides = [1, 1]} : vector<6x12928xf32> to vector<6x2560xf32>
    %cst_38 = arith.constant dense<0.000000e+00> : vector<6x2560xf32>
    %59 = tpu.matmul %57, %58, %cst_38 {dimension_numbers = #tpu.dot_dimension_numbers<[1], [0], [0], [1], [0, 0, 1, 1], [], []>} : vector<6x6xf32>, vector<6x2560xf32>, vector<6x2560xf32> -> vector<6x2560xf32>
    %60 = arith.addf %55, %59 : vector<6x2560xf32>
    %c11 = arith.constant 11 : index
    %c0_39 = arith.constant 0 : index
    %c0_40 = arith.constant 0 : index
    %61 = vector.load %arg3[%c11, %c0_39, %c0_40] : memref<25x6x6xf32, #tpu.memory_space<vmem>>, vector<1x6x6xf32>
    %62 = vector.shape_cast %61 : vector<1x6x6xf32> to vector<6x6xf32>
    %63 = vector.extract_strided_slice %4 {offsets = [0, 5121], sizes = [6, 2560], strides = [1, 1]} : vector<6x12928xf32> to vector<6x2560xf32>
    %cst_41 = arith.constant dense<0.000000e+00> : vector<6x2560xf32>
    %64 = tpu.matmul %62, %63, %cst_41 {dimension_numbers = #tpu.dot_dimension_numbers<[1], [0], [0], [1], [0, 0, 1, 1], [], []>} : vector<6x6xf32>, vector<6x2560xf32>, vector<6x2560xf32> -> vector<6x2560xf32>
    %65 = arith.addf %60, %64 : vector<6x2560xf32>
    %c12 = arith.constant 12 : index
    %c0_42 = arith.constant 0 : index
    %c0_43 = arith.constant 0 : index
    %66 = vector.load %arg3[%c12, %c0_42, %c0_43] : memref<25x6x6xf32, #tpu.memory_space<vmem>>, vector<1x6x6xf32>
    %67 = vector.shape_cast %66 : vector<1x6x6xf32> to vector<6x6xf32>
    %68 = vector.extract_strided_slice %4 {offsets = [0, 5122], sizes = [6, 2560], strides = [1, 1]} : vector<6x12928xf32> to vector<6x2560xf32>
    %cst_44 = arith.constant dense<0.000000e+00> : vector<6x2560xf32>
    %69 = tpu.matmul %67, %68, %cst_44 {dimension_numbers = #tpu.dot_dimension_numbers<[1], [0], [0], [1], [0, 0, 1, 1], [], []>} : vector<6x6xf32>, vector<6x2560xf32>, vector<6x2560xf32> -> vector<6x2560xf32>
    %70 = arith.addf %65, %69 : vector<6x2560xf32>
    %c13 = arith.constant 13 : index
    %c0_45 = arith.constant 0 : index
    %c0_46 = arith.constant 0 : index
    %71 = vector.load %arg3[%c13, %c0_45, %c0_46] : memref<25x6x6xf32, #tpu.memory_space<vmem>>, vector<1x6x6xf32>
    %72 = vector.shape_cast %71 : vector<1x6x6xf32> to vector<6x6xf32>
    %73 = vector.extract_strided_slice %4 {offsets = [0, 5123], sizes = [6, 2560], strides = [1, 1]} : vector<6x12928xf32> to vector<6x2560xf32>
    %cst_47 = arith.constant dense<0.000000e+00> : vector<6x2560xf32>
    %74 = tpu.matmul %72, %73, %cst_47 {dimension_numbers = #tpu.dot_dimension_numbers<[1], [0], [0], [1], [0, 0, 1, 1], [], []>} : vector<6x6xf32>, vector<6x2560xf32>, vector<6x2560xf32> -> vector<6x2560xf32>
    %75 = arith.addf %70, %74 : vector<6x2560xf32>
    %c14 = arith.constant 14 : index
    %c0_48 = arith.constant 0 : index
    %c0_49 = arith.constant 0 : index
    %76 = vector.load %arg3[%c14, %c0_48, %c0_49] : memref<25x6x6xf32, #tpu.memory_space<vmem>>, vector<1x6x6xf32>
    %77 = vector.shape_cast %76 : vector<1x6x6xf32> to vector<6x6xf32>
    %78 = vector.extract_strided_slice %4 {offsets = [0, 5124], sizes = [6, 2560], strides = [1, 1]} : vector<6x12928xf32> to vector<6x2560xf32>
    %cst_50 = arith.constant dense<0.000000e+00> : vector<6x2560xf32>
    %79 = tpu.matmul %77, %78, %cst_50 {dimension_numbers = #tpu.dot_dimension_numbers<[1], [0], [0], [1], [0, 0, 1, 1], [], []>} : vector<6x6xf32>, vector<6x2560xf32>, vector<6x2560xf32> -> vector<6x2560xf32>
    %80 = arith.addf %75, %79 : vector<6x2560xf32>
    %c15 = arith.constant 15 : index
    %c0_51 = arith.constant 0 : index
    %c0_52 = arith.constant 0 : index
    %81 = vector.load %arg3[%c15, %c0_51, %c0_52] : memref<25x6x6xf32, #tpu.memory_space<vmem>>, vector<1x6x6xf32>
    %82 = vector.shape_cast %81 : vector<1x6x6xf32> to vector<6x6xf32>
    %83 = vector.extract_strided_slice %4 {offsets = [0, 7680], sizes = [6, 2560], strides = [1, 1]} : vector<6x12928xf32> to vector<6x2560xf32>
    %cst_53 = arith.constant dense<0.000000e+00> : vector<6x2560xf32>
    %84 = tpu.matmul %82, %83, %cst_53 {dimension_numbers = #tpu.dot_dimension_numbers<[1], [0], [0], [1], [0, 0, 1, 1], [], []>} : vector<6x6xf32>, vector<6x2560xf32>, vector<6x2560xf32> -> vector<6x2560xf32>
    %85 = arith.addf %80, %84 : vector<6x2560xf32>
    %c16 = arith.constant 16 : index
    %c0_54 = arith.constant 0 : index
    %c0_55 = arith.constant 0 : index
    %86 = vector.load %arg3[%c16, %c0_54, %c0_55] : memref<25x6x6xf32, #tpu.memory_space<vmem>>, vector<1x6x6xf32>
    %87 = vector.shape_cast %86 : vector<1x6x6xf32> to vector<6x6xf32>
    %88 = vector.extract_strided_slice %4 {offsets = [0, 7681], sizes = [6, 2560], strides = [1, 1]} : vector<6x12928xf32> to vector<6x2560xf32>
    %cst_56 = arith.constant dense<0.000000e+00> : vector<6x2560xf32>
    %89 = tpu.matmul %87, %88, %cst_56 {dimension_numbers = #tpu.dot_dimension_numbers<[1], [0], [0], [1], [0, 0, 1, 1], [], []>} : vector<6x6xf32>, vector<6x2560xf32>, vector<6x2560xf32> -> vector<6x2560xf32>
    %90 = arith.addf %85, %89 : vector<6x2560xf32>
    %c17 = arith.constant 17 : index
    %c0_57 = arith.constant 0 : index
    %c0_58 = arith.constant 0 : index
    %91 = vector.load %arg3[%c17, %c0_57, %c0_58] : memref<25x6x6xf32, #tpu.memory_space<vmem>>, vector<1x6x6xf32>
    %92 = vector.shape_cast %91 : vector<1x6x6xf32> to vector<6x6xf32>
    %93 = vector.extract_strided_slice %4 {offsets = [0, 7682], sizes = [6, 2560], strides = [1, 1]} : vector<6x12928xf32> to vector<6x2560xf32>
    %cst_59 = arith.constant dense<0.000000e+00> : vector<6x2560xf32>
    %94 = tpu.matmul %92, %93, %cst_59 {dimension_numbers = #tpu.dot_dimension_numbers<[1], [0], [0], [1], [0, 0, 1, 1], [], []>} : vector<6x6xf32>, vector<6x2560xf32>, vector<6x2560xf32> -> vector<6x2560xf32>
    %95 = arith.addf %90, %94 : vector<6x2560xf32>
    %c18 = arith.constant 18 : index
    %c0_60 = arith.constant 0 : index
    %c0_61 = arith.constant 0 : index
    %96 = vector.load %arg3[%c18, %c0_60, %c0_61] : memref<25x6x6xf32, #tpu.memory_space<vmem>>, vector<1x6x6xf32>
    %97 = vector.shape_cast %96 : vector<1x6x6xf32> to vector<6x6xf32>
    %98 = vector.extract_strided_slice %4 {offsets = [0, 7683], sizes = [6, 2560], strides = [1, 1]} : vector<6x12928xf32> to vector<6x2560xf32>
    %cst_62 = arith.constant dense<0.000000e+00> : vector<6x2560xf32>
    %99 = tpu.matmul %97, %98, %cst_62 {dimension_numbers = #tpu.dot_dimension_numbers<[1], [0], [0], [1], [0, 0, 1, 1], [], []>} : vector<6x6xf32>, vector<6x2560xf32>, vector<6x2560xf32> -> vector<6x2560xf32>
    %100 = arith.addf %95, %99 : vector<6x2560xf32>
    %c19 = arith.constant 19 : index
    %c0_63 = arith.constant 0 : index
    %c0_64 = arith.constant 0 : index
    %101 = vector.load %arg3[%c19, %c0_63, %c0_64] : memref<25x6x6xf32, #tpu.memory_space<vmem>>, vector<1x6x6xf32>
    %102 = vector.shape_cast %101 : vector<1x6x6xf32> to vector<6x6xf32>
    %103 = vector.extract_strided_slice %4 {offsets = [0, 7684], sizes = [6, 2560], strides = [1, 1]} : vector<6x12928xf32> to vector<6x2560xf32>
    %cst_65 = arith.constant dense<0.000000e+00> : vector<6x2560xf32>
    %104 = tpu.matmul %102, %103, %cst_65 {dimension_numbers = #tpu.dot_dimension_numbers<[1], [0], [0], [1], [0, 0, 1, 1], [], []>} : vector<6x6xf32>, vector<6x2560xf32>, vector<6x2560xf32> -> vector<6x2560xf32>
    %105 = arith.addf %100, %104 : vector<6x2560xf32>
    %c20 = arith.constant 20 : index
    %c0_66 = arith.constant 0 : index
    %c0_67 = arith.constant 0 : index
    %106 = vector.load %arg3[%c20, %c0_66, %c0_67] : memref<25x6x6xf32, #tpu.memory_space<vmem>>, vector<1x6x6xf32>
    %107 = vector.shape_cast %106 : vector<1x6x6xf32> to vector<6x6xf32>
    %108 = vector.extract_strided_slice %4 {offsets = [0, 10240], sizes = [6, 2560], strides = [1, 1]} : vector<6x12928xf32> to vector<6x2560xf32>
    %cst_68 = arith.constant dense<0.000000e+00> : vector<6x2560xf32>
    %109 = tpu.matmul %107, %108, %cst_68 {dimension_numbers = #tpu.dot_dimension_numbers<[1], [0], [0], [1], [0, 0, 1, 1], [], []>} : vector<6x6xf32>, vector<6x2560xf32>, vector<6x2560xf32> -> vector<6x2560xf32>
    %110 = arith.addf %105, %109 : vector<6x2560xf32>
    %c21 = arith.constant 21 : index
    %c0_69 = arith.constant 0 : index
    %c0_70 = arith.constant 0 : index
    %111 = vector.load %arg3[%c21, %c0_69, %c0_70] : memref<25x6x6xf32, #tpu.memory_space<vmem>>, vector<1x6x6xf32>
    %112 = vector.shape_cast %111 : vector<1x6x6xf32> to vector<6x6xf32>
    %113 = vector.extract_strided_slice %4 {offsets = [0, 10241], sizes = [6, 2560], strides = [1, 1]} : vector<6x12928xf32> to vector<6x2560xf32>
    %cst_71 = arith.constant dense<0.000000e+00> : vector<6x2560xf32>
    %114 = tpu.matmul %112, %113, %cst_71 {dimension_numbers = #tpu.dot_dimension_numbers<[1], [0], [0], [1], [0, 0, 1, 1], [], []>} : vector<6x6xf32>, vector<6x2560xf32>, vector<6x2560xf32> -> vector<6x2560xf32>
    %115 = arith.addf %110, %114 : vector<6x2560xf32>
    %c22 = arith.constant 22 : index
    %c0_72 = arith.constant 0 : index
    %c0_73 = arith.constant 0 : index
    %116 = vector.load %arg3[%c22, %c0_72, %c0_73] : memref<25x6x6xf32, #tpu.memory_space<vmem>>, vector<1x6x6xf32>
    %117 = vector.shape_cast %116 : vector<1x6x6xf32> to vector<6x6xf32>
    %118 = vector.extract_strided_slice %4 {offsets = [0, 10242], sizes = [6, 2560], strides = [1, 1]} : vector<6x12928xf32> to vector<6x2560xf32>
    %cst_74 = arith.constant dense<0.000000e+00> : vector<6x2560xf32>
    %119 = tpu.matmul %117, %118, %cst_74 {dimension_numbers = #tpu.dot_dimension_numbers<[1], [0], [0], [1], [0, 0, 1, 1], [], []>} : vector<6x6xf32>, vector<6x2560xf32>, vector<6x2560xf32> -> vector<6x2560xf32>
    %120 = arith.addf %115, %119 : vector<6x2560xf32>
    %c23 = arith.constant 23 : index
    %c0_75 = arith.constant 0 : index
    %c0_76 = arith.constant 0 : index
    %121 = vector.load %arg3[%c23, %c0_75, %c0_76] : memref<25x6x6xf32, #tpu.memory_space<vmem>>, vector<1x6x6xf32>
    %122 = vector.shape_cast %121 : vector<1x6x6xf32> to vector<6x6xf32>
    %123 = vector.extract_strided_slice %4 {offsets = [0, 10243], sizes = [6, 2560], strides = [1, 1]} : vector<6x12928xf32> to vector<6x2560xf32>
    %cst_77 = arith.constant dense<0.000000e+00> : vector<6x2560xf32>
    %124 = tpu.matmul %122, %123, %cst_77 {dimension_numbers = #tpu.dot_dimension_numbers<[1], [0], [0], [1], [0, 0, 1, 1], [], []>} : vector<6x6xf32>, vector<6x2560xf32>, vector<6x2560xf32> -> vector<6x2560xf32>
    %125 = arith.addf %120, %124 : vector<6x2560xf32>
    %c24 = arith.constant 24 : index
    %c0_78 = arith.constant 0 : index
    %c0_79 = arith.constant 0 : index
    %126 = vector.load %arg3[%c24, %c0_78, %c0_79] : memref<25x6x6xf32, #tpu.memory_space<vmem>>, vector<1x6x6xf32>
    %127 = vector.shape_cast %126 : vector<1x6x6xf32> to vector<6x6xf32>
    %128 = vector.extract_strided_slice %4 {offsets = [0, 10244], sizes = [6, 2560], strides = [1, 1]} : vector<6x12928xf32> to vector<6x2560xf32>
    %cst_80 = arith.constant dense<0.000000e+00> : vector<6x2560xf32>
    %129 = tpu.matmul %127, %128, %cst_80 {dimension_numbers = #tpu.dot_dimension_numbers<[1], [0], [0], [1], [0, 0, 1, 1], [], []>} : vector<6x6xf32>, vector<6x2560xf32>, vector<6x2560xf32> -> vector<6x2560xf32>
    %130 = arith.addf %125, %129 : vector<6x2560xf32>
    %c0_81 = arith.constant 0 : index
    %c0_82 = arith.constant 0 : index
    %131 = vector.load %arg4[%c0_81, %c0_82] : memref<6x1xf32, #tpu.memory_space<vmem>>, vector<6x1xf32>
    %132 = vector.broadcast %131 : vector<6x1xf32> to vector<6x2560xf32>
    %133 = arith.addf %130, %132 : vector<6x2560xf32>
    %cst_83 = arith.constant 0.000000e+00 : f32
    %134 = vector.broadcast %cst_83 : f32 to vector<6x2560xf32>
    %135 = arith.maximumf %133, %134 : vector<6x2560xf32>
    %136 = vector.shape_cast %135 : vector<6x2560xf32> to vector<6x10x256xf32>
    %cst_84 = arith.constant 0.000000e+00 : f32
    %137 = vector.broadcast %cst_84 : f32 to vector<10x128xf32>
    %138 = vector.extract_strided_slice %136 {offsets = [0, 0, 0], sizes = [1, 10, 256], strides = [1, 1, 1]} : vector<6x10x256xf32> to vector<1x10x256xf32>
    %139 = vector.shape_cast %138 : vector<1x10x256xf32> to vector<10x256xf32>
    %c0_85 = arith.constant 0 : index
    %c0_86 = arith.constant 0 : index
    %140 = vector.load %arg5[%c0_85, %c0_86] : memref<3072x128xf32, #tpu.memory_space<vmem>>, vector<256x128xf32>
    %cst_87 = arith.constant dense<0.000000e+00> : vector<10x128xf32>
    %141 = tpu.matmul %139, %140, %cst_87 {dimension_numbers = #tpu.dot_dimension_numbers<[1], [0], [0], [1], [0, 0, 1, 1], [], []>} : vector<10x256xf32>, vector<256x128xf32>, vector<10x128xf32> -> vector<10x128xf32>
    %142 = arith.addf %137, %141 : vector<10x128xf32>
    %143 = vector.extract_strided_slice %136 {offsets = [1, 0, 0], sizes = [1, 10, 256], strides = [1, 1, 1]} : vector<6x10x256xf32> to vector<1x10x256xf32>
    %144 = vector.shape_cast %143 : vector<1x10x256xf32> to vector<10x256xf32>
    %c256 = arith.constant 256 : index
    %c0_88 = arith.constant 0 : index
    %145 = vector.load %arg5[%c256, %c0_88] : memref<3072x128xf32, #tpu.memory_space<vmem>>, vector<256x128xf32>
    %cst_89 = arith.constant dense<0.000000e+00> : vector<10x128xf32>
    %146 = tpu.matmul %144, %145, %cst_89 {dimension_numbers = #tpu.dot_dimension_numbers<[1], [0], [0], [1], [0, 0, 1, 1], [], []>} : vector<10x256xf32>, vector<256x128xf32>, vector<10x128xf32> -> vector<10x128xf32>
    %147 = arith.addf %142, %146 : vector<10x128xf32>
    %148 = vector.extract_strided_slice %136 {offsets = [2, 0, 0], sizes = [1, 10, 256], strides = [1, 1, 1]} : vector<6x10x256xf32> to vector<1x10x256xf32>
    %149 = vector.shape_cast %148 : vector<1x10x256xf32> to vector<10x256xf32>
    %c512 = arith.constant 512 : index
    %c0_90 = arith.constant 0 : index
    %150 = vector.load %arg5[%c512, %c0_90] : memref<3072x128xf32, #tpu.memory_space<vmem>>, vector<256x128xf32>
    %cst_91 = arith.constant dense<0.000000e+00> : vector<10x128xf32>
    %151 = tpu.matmul %149, %150, %cst_91 {dimension_numbers = #tpu.dot_dimension_numbers<[1], [0], [0], [1], [0, 0, 1, 1], [], []>} : vector<10x256xf32>, vector<256x128xf32>, vector<10x128xf32> -> vector<10x128xf32>
    %152 = arith.addf %147, %151 : vector<10x128xf32>
    %153 = vector.extract_strided_slice %136 {offsets = [3, 0, 0], sizes = [1, 10, 256], strides = [1, 1, 1]} : vector<6x10x256xf32> to vector<1x10x256xf32>
    %154 = vector.shape_cast %153 : vector<1x10x256xf32> to vector<10x256xf32>
    %c768 = arith.constant 768 : index
    %c0_92 = arith.constant 0 : index
    %155 = vector.load %arg5[%c768, %c0_92] : memref<3072x128xf32, #tpu.memory_space<vmem>>, vector<256x128xf32>
    %cst_93 = arith.constant dense<0.000000e+00> : vector<10x128xf32>
    %156 = tpu.matmul %154, %155, %cst_93 {dimension_numbers = #tpu.dot_dimension_numbers<[1], [0], [0], [1], [0, 0, 1, 1], [], []>} : vector<10x256xf32>, vector<256x128xf32>, vector<10x128xf32> -> vector<10x128xf32>
    %157 = arith.addf %152, %156 : vector<10x128xf32>
    %158 = vector.extract_strided_slice %136 {offsets = [4, 0, 0], sizes = [1, 10, 256], strides = [1, 1, 1]} : vector<6x10x256xf32> to vector<1x10x256xf32>
    %159 = vector.shape_cast %158 : vector<1x10x256xf32> to vector<10x256xf32>
    %c1024 = arith.constant 1024 : index
    %c0_94 = arith.constant 0 : index
    %160 = vector.load %arg5[%c1024, %c0_94] : memref<3072x128xf32, #tpu.memory_space<vmem>>, vector<256x128xf32>
    %cst_95 = arith.constant dense<0.000000e+00> : vector<10x128xf32>
    %161 = tpu.matmul %159, %160, %cst_95 {dimension_numbers = #tpu.dot_dimension_numbers<[1], [0], [0], [1], [0, 0, 1, 1], [], []>} : vector<10x256xf32>, vector<256x128xf32>, vector<10x128xf32> -> vector<10x128xf32>
    %162 = arith.addf %157, %161 : vector<10x128xf32>
    %163 = vector.extract_strided_slice %136 {offsets = [5, 0, 0], sizes = [1, 10, 256], strides = [1, 1, 1]} : vector<6x10x256xf32> to vector<1x10x256xf32>
    %164 = vector.shape_cast %163 : vector<1x10x256xf32> to vector<10x256xf32>
    %c1280 = arith.constant 1280 : index
    %c0_96 = arith.constant 0 : index
    %165 = vector.load %arg5[%c1280, %c0_96] : memref<3072x128xf32, #tpu.memory_space<vmem>>, vector<256x128xf32>
    %cst_97 = arith.constant dense<0.000000e+00> : vector<10x128xf32>
    %166 = tpu.matmul %164, %165, %cst_97 {dimension_numbers = #tpu.dot_dimension_numbers<[1], [0], [0], [1], [0, 0, 1, 1], [], []>} : vector<10x256xf32>, vector<256x128xf32>, vector<10x128xf32> -> vector<10x128xf32>
    %167 = arith.addf %162, %166 : vector<10x128xf32>
    %c0_98 = arith.constant 0 : index
    %c0_99 = arith.constant 0 : index
    %168 = vector.load %arg6[%c0_98, %c0_99] : memref<8x128xf32, #tpu.memory_space<vmem>>, vector<1x128xf32>
    %169 = vector.broadcast %168 : vector<1x128xf32> to vector<10x128xf32>
    %170 = arith.addf %167, %169 : vector<10x128xf32>
    %cst_100 = arith.constant 0.000000e+00 : f32
    %171 = vector.broadcast %cst_100 : f32 to vector<10x128xf32>
    %172 = arith.maximumf %170, %171 : vector<10x128xf32>
    %c0_101 = arith.constant 0 : index
    %c0_102 = arith.constant 0 : index
    %173 = vector.load %arg1[%c0_101, %c0_102] : memref<2x128xf32, #tpu.memory_space<vmem>>, vector<2x128xf32>
    %c2304 = arith.constant 2304 : index
    %c0_103 = arith.constant 0 : index
    %174 = vector.load %arg5[%c2304, %c0_103] : memref<3072x128xf32, #tpu.memory_space<vmem>>, vector<128x128xf32>
    %cst_104 = arith.constant dense<0.000000e+00> : vector<2x128xf32>
    %175 = tpu.matmul %173, %174, %cst_104 {dimension_numbers = #tpu.dot_dimension_numbers<[1], [0], [0], [1], [0, 0, 1, 1], [], []>} : vector<2x128xf32>, vector<128x128xf32>, vector<2x128xf32> -> vector<2x128xf32>
    %c2_105 = arith.constant 2 : index
    %c0_106 = arith.constant 0 : index
    %176 = vector.load %arg6[%c2_105, %c0_106] : memref<8x128xf32, #tpu.memory_space<vmem>>, vector<1x128xf32>
    %177 = vector.broadcast %176 : vector<1x128xf32> to vector<2x128xf32>
    %178 = arith.addf %175, %177 : vector<2x128xf32>
    %cst_107 = arith.constant 0.000000e+00 : f32
    %179 = vector.broadcast %cst_107 : f32 to vector<2x128xf32>
    %180 = arith.maximumf %178, %179 : vector<2x128xf32>
    %c2432 = arith.constant 2432 : index
    %c0_108 = arith.constant 0 : index
    %181 = vector.load %arg5[%c2432, %c0_108] : memref<3072x128xf32, #tpu.memory_space<vmem>>, vector<128x128xf32>
    %cst_109 = arith.constant dense<0.000000e+00> : vector<2x128xf32>
    %182 = tpu.matmul %180, %181, %cst_109 {dimension_numbers = #tpu.dot_dimension_numbers<[1], [0], [0], [1], [0, 0, 1, 1], [], []>} : vector<2x128xf32>, vector<128x128xf32>, vector<2x128xf32> -> vector<2x128xf32>
    %c3_110 = arith.constant 3 : index
    %c0_111 = arith.constant 0 : index
    %183 = vector.load %arg6[%c3_110, %c0_111] : memref<8x128xf32, #tpu.memory_space<vmem>>, vector<1x128xf32>
    %184 = vector.broadcast %183 : vector<1x128xf32> to vector<2x128xf32>
    %185 = arith.addf %182, %184 : vector<2x128xf32>
    %cst_112 = arith.constant 0.000000e+00 : f32
    %186 = vector.broadcast %cst_112 : f32 to vector<2x128xf32>
    %187 = arith.maximumf %185, %186 : vector<2x128xf32>
    %c2560 = arith.constant 2560 : index
    %c0_113 = arith.constant 0 : index
    %188 = vector.load %arg5[%c2560, %c0_113] : memref<3072x128xf32, #tpu.memory_space<vmem>>, vector<128x128xf32>
    %cst_114 = arith.constant dense<0.000000e+00> : vector<2x128xf32>
    %189 = tpu.matmul %187, %188, %cst_114 {dimension_numbers = #tpu.dot_dimension_numbers<[1], [0], [0], [1], [0, 0, 1, 1], [], []>} : vector<2x128xf32>, vector<128x128xf32>, vector<2x128xf32> -> vector<2x128xf32>
    %c4_115 = arith.constant 4 : index
    %c0_116 = arith.constant 0 : index
    %190 = vector.load %arg6[%c4_115, %c0_116] : memref<8x128xf32, #tpu.memory_space<vmem>>, vector<1x128xf32>
    %191 = vector.broadcast %190 : vector<1x128xf32> to vector<2x128xf32>
    %192 = arith.addf %189, %191 : vector<2x128xf32>
    %193 = vector.extract_strided_slice %172 {offsets = [0, 0], sizes = [2, 128], strides = [1, 1]} : vector<10x128xf32> to vector<2x128xf32>
    %194 = vector.extract_strided_slice %172 {offsets = [2, 0], sizes = [2, 128], strides = [1, 1]} : vector<10x128xf32> to vector<2x128xf32>
    %195 = vector.extract_strided_slice %172 {offsets = [4, 0], sizes = [2, 128], strides = [1, 1]} : vector<10x128xf32> to vector<2x128xf32>
    %196 = vector.extract_strided_slice %172 {offsets = [6, 0], sizes = [2, 128], strides = [1, 1]} : vector<10x128xf32> to vector<2x128xf32>
    %197 = vector.extract_strided_slice %172 {offsets = [8, 0], sizes = [2, 128], strides = [1, 1]} : vector<10x128xf32> to vector<2x128xf32>
    %198 = tpu.concatenate %193, %194, %195, %196, %197 in 1 : vector<2x128xf32>, vector<2x128xf32>, vector<2x128xf32>, vector<2x128xf32>, vector<2x128xf32> -> vector<2x640xf32>
    %c1536 = arith.constant 1536 : index
    %c0_117 = arith.constant 0 : index
    %199 = vector.load %arg5[%c1536, %c0_117] : memref<3072x128xf32, #tpu.memory_space<vmem>>, vector<640x128xf32>
    %cst_118 = arith.constant dense<0.000000e+00> : vector<2x128xf32>
    %200 = tpu.matmul %198, %199, %cst_118 {dimension_numbers = #tpu.dot_dimension_numbers<[1], [0], [0], [1], [0, 0, 1, 1], [], []>} : vector<2x640xf32>, vector<640x128xf32>, vector<2x128xf32> -> vector<2x128xf32>
    %c2176 = arith.constant 2176 : index
    %c0_119 = arith.constant 0 : index
    %201 = vector.load %arg5[%c2176, %c0_119] : memref<3072x128xf32, #tpu.memory_space<vmem>>, vector<128x128xf32>
    %cst_120 = arith.constant dense<0.000000e+00> : vector<2x128xf32>
    %202 = tpu.matmul %192, %201, %cst_120 {dimension_numbers = #tpu.dot_dimension_numbers<[1], [0], [0], [1], [0, 0, 1, 1], [], []>} : vector<2x128xf32>, vector<128x128xf32>, vector<2x128xf32> -> vector<2x128xf32>
    %203 = arith.addf %200, %202 : vector<2x128xf32>
    %c1_121 = arith.constant 1 : index
    %c0_122 = arith.constant 0 : index
    %204 = vector.load %arg6[%c1_121, %c0_122] : memref<8x128xf32, #tpu.memory_space<vmem>>, vector<1x128xf32>
    %205 = vector.broadcast %204 : vector<1x128xf32> to vector<2x128xf32>
    %206 = arith.addf %203, %205 : vector<2x128xf32>
    %cst_123 = arith.constant 0.000000e+00 : f32
    %207 = vector.broadcast %cst_123 : f32 to vector<2x128xf32>
    %208 = arith.maximumf %206, %207 : vector<2x128xf32>
    %c2688 = arith.constant 2688 : index
    %c0_124 = arith.constant 0 : index
    %209 = vector.load %arg5[%c2688, %c0_124] : memref<3072x128xf32, #tpu.memory_space<vmem>>, vector<128x128xf32>
    %cst_125 = arith.constant dense<0.000000e+00> : vector<2x128xf32>
    %210 = tpu.matmul %208, %209, %cst_125 {dimension_numbers = #tpu.dot_dimension_numbers<[1], [0], [0], [1], [0, 0, 1, 1], [], []>} : vector<2x128xf32>, vector<128x128xf32>, vector<2x128xf32> -> vector<2x128xf32>
    %c5_126 = arith.constant 5 : index
    %c0_127 = arith.constant 0 : index
    %211 = vector.load %arg6[%c5_126, %c0_127] : memref<8x128xf32, #tpu.memory_space<vmem>>, vector<1x128xf32>
    %212 = vector.broadcast %211 : vector<1x128xf32> to vector<2x128xf32>
    %213 = arith.addf %210, %212 : vector<2x128xf32>
    %cst_128 = arith.constant 0.000000e+00 : f32
    %214 = vector.broadcast %cst_128 : f32 to vector<2x128xf32>
    %215 = arith.maximumf %213, %214 : vector<2x128xf32>
    %c2816 = arith.constant 2816 : index
    %c0_129 = arith.constant 0 : index
    %216 = vector.load %arg5[%c2816, %c0_129] : memref<3072x128xf32, #tpu.memory_space<vmem>>, vector<128x128xf32>
    %cst_130 = arith.constant dense<0.000000e+00> : vector<2x128xf32>
    %217 = tpu.matmul %215, %216, %cst_130 {dimension_numbers = #tpu.dot_dimension_numbers<[1], [0], [0], [1], [0, 0, 1, 1], [], []>} : vector<2x128xf32>, vector<128x128xf32>, vector<2x128xf32> -> vector<2x128xf32>
    %c6_131 = arith.constant 6 : index
    %c0_132 = arith.constant 0 : index
    %218 = vector.load %arg6[%c6_131, %c0_132] : memref<8x128xf32, #tpu.memory_space<vmem>>, vector<1x128xf32>
    %219 = vector.broadcast %218 : vector<1x128xf32> to vector<2x128xf32>
    %220 = arith.addf %217, %219 : vector<2x128xf32>
    %cst_133 = arith.constant 0.000000e+00 : f32
    %221 = vector.broadcast %cst_133 : f32 to vector<2x128xf32>
    %222 = arith.maximumf %220, %221 : vector<2x128xf32>
    %c2944 = arith.constant 2944 : index
    %c0_134 = arith.constant 0 : index
    %223 = vector.load %arg5[%c2944, %c0_134] : memref<3072x128xf32, #tpu.memory_space<vmem>>, vector<128x128xf32>
    %cst_135 = arith.constant dense<0.000000e+00> : vector<2x128xf32>
    %224 = tpu.matmul %222, %223, %cst_135 {dimension_numbers = #tpu.dot_dimension_numbers<[1], [0], [0], [1], [0, 0, 1, 1], [], []>} : vector<2x128xf32>, vector<128x128xf32>, vector<2x128xf32> -> vector<2x128xf32>
    %c7_136 = arith.constant 7 : index
    %c0_137 = arith.constant 0 : index
    %225 = vector.load %arg6[%c7_136, %c0_137] : memref<8x128xf32, #tpu.memory_space<vmem>>, vector<1x128xf32>
    %226 = vector.broadcast %225 : vector<1x128xf32> to vector<2x128xf32>
    %227 = arith.addf %224, %226 : vector<2x128xf32>
    %228 = vector.extract_strided_slice %227 {offsets = [0, 0], sizes = [2, 5], strides = [1, 1]} : vector<2x128xf32> to vector<2x5xf32>
    %c0_138 = arith.constant 0 : index
    %c0_139 = arith.constant 0 : index
    %229 = vector.load %arg7[%c0_138, %c0_139] : memref<2x5xf32, #tpu.memory_space<vmem>>, vector<2x5xf32>
    tpu.vector_store %arg7[%c0_138, %c0_139], %228 {strides = array<i32>} : memref<2x5xf32, #tpu.memory_space<vmem>>, vector<2x5xf32>,
    return
  }
}

</mosaic_0001>

<bundles_post_ra>
// kernel: forward.1
= control target key start
LH: loop header
LB: loop body
LE: loop exit
PB: predicated region body
PF: predicated region fallthrough
CT: control target
= control target key end

     0   :  { %v39945_v2 = vmov 0   ;;  %vm2972_vm0 = vcmask 1045504   ;;  %vm2968_vm1 = vcmask 621568   ;;  %s31946_s25 = smov 127   ;;  %s31947_s11 = smov 126   ;;  %s39937_s0 = inlined_call_operand.vmem [shape: bf16[76,12928], index: 0, kind: input, shape index: {}]   ;;  %s39938_s1 = inlined_call_operand.vmem [shape: f32[2,128], index: 1, kind: input, shape index: {}]   ;;  %s39939_s2 = inlined_call_operand.vmem [shape: bf16[6,76], index: 2, kind: input, shape index: {}]   ;;  %s39940_s3 = inlined_call_operand.vmem [shape: f32[25,6,6], index: 3, kind: input, shape index: {}]   ;;  %s39941_s4 = inlined_call_operand.vmem [shape: f32[6,1], index: 4, kind: input, shape index: {}]   ;;  %s39942_s5 = inlined_call_operand.vmem [shape: f32[3072,128], index: 5, kind: input, shape index: {}]   ;;  %s39943_s6 = inlined_call_operand.vmem [shape: f32[8,128], index: 6, kind: input, shape index: {}]   ;;  %s39944_s7 = inlined_call_operand.hbm [shape: f32[2,5], index: 7, kind: output, shape index: {}]  }
   0x1   :  { %v31163_v0 = vld [vmem:[%s39937_s0 + $0x4] ss:$404 sps:$4 sm:$0xff]   ;;  %v31165_v1 = vld [vmem:[%s39937_s0 + $0xc] ss:$404 sps:$4 sm:$0xff]   ;;  %3308 = vmatprep.mubr.bf16.mxu0 %v39945_v2  ;;  %3349 = vmatprep.mubr.bf16.mxu1 %v39945_v2  ;;  %v31168_v4 = vld [vmem:[%s39937_s0 + $0x8] ss:$404 sps:$4 sm:$0xff]  }
   0x2   :  { %3276 = vmatprep.subr.bf16.mxu0 %v31163_v0  ;;  %v31167_v3 = vld [vmem:[%s39937_s0] ss:$404 sps:$4 sm:$0xff]   ;;  %31162 = vset.pattern.permute.xlu0 %v39945_v2  ;;  %v31173_v7 = vld [vmem:[%s39937_s0 + $0x328] ss:$404 sps:$4 sm:$0xff]   ;;  %v31174_v8 = vld [vmem:[%s39937_s0 + $0x330] ss:$404 sps:$4 sm:$0xff]  }
   0x3   :  { %3317 = vmatprep.subr.bf16.mxu1 %v31165_v1  ;;  %v31169_v5 = vld [vmem:[%s39937_s0 + $0x32c] ss:$404 sps:$4 sm:$0xff]   ;;  %3277 = vmatpush1.bf16.msra.mxu0 %v31167_v3  ;;  %v31171_v6 = vld [vmem:[%s39937_s0 + $0x334] ss:$404 sps:$4 sm:$0xff]   ;;  %v31177_v10 = vld [vmem:[%s39937_s0 + $0x65c] ss:$404 sps:$4 sm:$0xff]  }
   0x4   :  { %3318 = vmatpush1.bf16.msra.mxu1 %v31168_v4  ;;  %3278 = vmatprep.subr.bf16.mxu0 %v31169_v5  ;;  %v31175_v9 = vld [vmem:[%s39937_s0 + $0x654] ss:$404 sps:$4 sm:$0xff]   ;;  %v31179_v11 = vld [vmem:[%s39937_s0 + $0x650] ss:$404 sps:$4 sm:$0xff]   ;;  %v31180_v12 = vld [vmem:[%s39937_s0 + $0x658] ss:$404 sps:$4 sm:$0xff]  }
   0x5   :  { %3319 = vmatprep.subr.bf16.mxu1 %v31171_v6  ;;  %v31181_v13 = vld [vmem:[%s39937_s0 + $0x97c] ss:$404 sps:$4 sm:$0xff]   ;;  %v31183_v14 = vld [vmem:[%s39937_s0 + $0x984] ss:$404 sps:$4 sm:$0xff]   ;;  %v31186_v16 = vld [vmem:[%s39937_s0 + $0x980] ss:$404 sps:$4 sm:$0xff]  }
   0x6   :  { %v31185_v15 = vld [vmem:[%s39937_s0 + $0x978] ss:$404 sps:$4 sm:$0xff]   ;;  %v31191_v19 = vld [vmem:[%s39937_s0 + $0xca0] ss:$404 sps:$4 sm:$0x3f]   ;;  %s31948_s20 = smov 125  }
   0x7   :  { %3279 = vmatpush1.bf16.msra.mxu0 %v31173_v7  ;;  %v31187_v17 = vld [vmem:[%s39937_s0 + $0xca4] ss:$404 sps:$4 sm:$0x3f]   ;;  %v31189_v18 = vld [vmem:[%s39937_s0 + $0xcac] ss:$404 sps:$4 sm:$0x3f]  }
   0x8   :  { %3320 = vmatpush1.bf16.msra.mxu1 %v31174_v8  ;;  %3280 = vmatprep.subr.bf16.mxu0 %v31175_v9  ;;  %v31192_v20 = vld [vmem:[%s39937_s0 + $0xca8] ss:$404 sps:$4 sm:$0x3f]   ;;  %v2974_v21 = vsel %vm2972_vm0, %v31191_v19, 0  ;;  %v32072_v25 = vld [vmem:[%s39939_s2] sm:$0x7] }
   0x9   :  { %3321 = vmatprep.subr.bf16.mxu1 %v31177_v10  ;;  %v2980_v22 = vsel %vm2972_vm0, %v31192_v20, 0  ;;  %v31195_v23 = vld [vmem:[%s39937_s0 + $0x14] ss:$404 sps:$4 sm:$0xff]   ;;  %v31198_v24 = vld [vmem:[%s39937_s0 + $0x1c] ss:$404 sps:$4 sm:$0xff]   ;;  %s31949_s30 = smov 124  }
   0xa   :  { %v31193_v26 = vld [vmem:[%s39937_s0 + $0x10] ss:$404 sps:$4 sm:$0xff]   ;;  %v31196_v27 = vld [vmem:[%s39937_s0 + $0x18] ss:$404 sps:$4 sm:$0xff]   ;;  %v31202_v31 = vld [vmem:[%s39937_s0 + $0x340] ss:$404 sps:$4 sm:$0xff]  }
   0xb   :  { %3281 = vmatpush1.bf16.msra.mxu0 %v31179_v11  ;;  %v31201_v28 = vld [vmem:[%s39937_s0 + $0x33c] ss:$404 sps:$4 sm:$0xff]   ;;  %v31204_v29 = vld [vmem:[%s39937_s0 + $0x344] ss:$404 sps:$4 sm:$0xff]   ;;  %v31210_v33 = vld [vmem:[%s39937_s0 + $0x66c] ss:$404 sps:$4 sm:$0xff]  }
   0xc   :  { %3322 = vmatpush1.bf16.msra.mxu1 %v31180_v12  ;;  %3282 = vmatprep.subr.bf16.mxu0 %v31181_v13  ;;  %v31199_v30 = vld [vmem:[%s39937_s0 + $0x338] ss:$404 sps:$4 sm:$0xff]   ;;  %v31205_v34 = vld [vmem:[%s39937_s0 + $0x660] ss:$404 sps:$4 sm:$0xff]   ;;  %v31208_v35 = vld [vmem:[%s39937_s0 + $0x668] ss:$404 sps:$4 sm:$0xff]  }
   0xd   :  { %3323 = vmatprep.subr.bf16.mxu1 %v31183_v14  ;;  %v31207_v32 = vld [vmem:[%s39937_s0 + $0x664] ss:$404 sps:$4 sm:$0xff]   ;;  %v31213_v36 = vld [vmem:[%s39937_s0 + $0x98c] ss:$404 sps:$4 sm:$0xff]   ;;  %v31216_v37 = vld [vmem:[%s39937_s0 + $0x994] ss:$404 sps:$4 sm:$0xff]  }
   0xe   :  { %v31211_v38 = vld [vmem:[%s39937_s0 + $0x988] ss:$404 sps:$4 sm:$0xff]   ;;  %v31214_v41 = vld [vmem:[%s39937_s0 + $0x990] ss:$404 sps:$4 sm:$0xff]   ;;  %v31228_v47 = vld [vmem:[%s39937_s0 + $0x2c] ss:$404 sps:$4 sm:$0xff]  }
   0xf   :  { %3283 = vmatpush1.bf16.msra.mxu0 %v31185_v15  ;;  %v31217_v39 = vld [vmem:[%s39937_s0 + $0xcb4] ss:$404 sps:$4 sm:$0x3f]   ;;  %v31219_v40 = vld [vmem:[%s39937_s0 + $0xcbc] ss:$404 sps:$4 sm:$0x3f]  }
  0x10   :  { %3324 = vmatpush1.bf16.msra.mxu1 %v31186_v16  ;;  %28604 = vmatprep.subr.msk.bf16.mxu0 %vm2972_vm0, %v31187_v17  ;;  %v31221_v42 = vld [vmem:[%s39937_s0 + $0xcb0] ss:$404 sps:$4 sm:$0x3f]   ;;  %v31222_v43 = vld [vmem:[%s39937_s0 + $0xcb8] ss:$404 sps:$4 sm:$0x3f]  }
  0x11   :  { %28606 = vmatprep.subr.msk.bf16.mxu1 %vm2972_vm0, %v31189_v18  ;;  %v31225_v44 = vld [vmem:[%s39937_s0 + $0x24] ss:$404 sps:$4 sm:$0xff]   ;;  %v2986_v45 = vsel %vm2972_vm0, %v31221_v42, 0  ;;  %v2992_v46 = vsel %vm2972_vm0, %v31222_v43, 0  ;;  %v31223_v48 = vld [vmem:[%s39937_s0 + $0x20] ss:$404 sps:$4 sm:$0xff]  }
  0x12   :  { %v31226_v49 = vld [vmem:[%s39937_s0 + $0x28] ss:$404 sps:$4 sm:$0xff]   ;;  %v31231_v50 = vld [vmem:[%s39937_s0 + $0x34c] ss:$404 sps:$4 sm:$0xff]   ;;  %v31232_v53 = vld [vmem:[%s39937_s0 + $0x350] ss:$404 sps:$4 sm:$0xff]  }
  0x13   :  { %3285 = vmatpush1.bf16.msra.mxu0 %v2974_v21  ;;  %v31234_v51 = vld [vmem:[%s39937_s0 + $0x354] ss:$404 sps:$4 sm:$0xff]   ;;  %v31240_v55 = vld [vmem:[%s39937_s0 + $0x67c] ss:$404 sps:$4 sm:$0xff]   ;;  %v31238_v57 = vld [vmem:[%s39937_s0 + $0x678] ss:$404 sps:$4 sm:$0xff]  }
  0x14   :  { %3326 = vmatpush1.bf16.msra.mxu1 %v2980_v22  ;;  %3358 = vmatprep.subr.bf16.mxu0 %v31195_v23  ;;  %v31229_v52 = vld [vmem:[%s39937_s0 + $0x348] ss:$404 sps:$4 sm:$0xff]   ;;  %v31235_v56 = vld [vmem:[%s39937_s0 + $0x670] ss:$404 sps:$4 sm:$0xff]   ;;  %v31241_v60 = vld [vmem:[%s39937_s0 + $0x998] ss:$404 sps:$4 sm:$0xff]  }
  0x15   :  { %3399 = vmatprep.subr.bf16.mxu1 %v31198_v24  ;;  %v31237_v54 = vld [vmem:[%s39937_s0 + $0x674] ss:$404 sps:$4 sm:$0xff]   ;;  %v31243_v58 = vld [vmem:[%s39937_s0 + $0x99c] ss:$404 sps:$4 sm:$0xff]   ;;  %v31246_v59 = vld [vmem:[%s39937_s0 + $0x9a4] ss:$404 sps:$4 sm:$0xff]  }
  0x16   :  { %28605 = vmatmul.mubr.msk.bf16.vlgmr.msra.gmra.mrb[0].mxu0 %vm2968_vm1, %v32072_v25  ;;  %v31244_v61 = vld [vmem:[%s39937_s0 + $0x9a0] ss:$404 sps:$4 sm:$0xff]   ;;  %v31247_v62 = vld [vmem:[%s39937_s0 + $0xcc4] ss:$404 sps:$4 sm:$0x3f]  }
  0x17   :  { %28607 = vmatmul.mubr.msk.bf16.vlgmr.msra.gmra.mrb[0].mxu1 %vm2968_vm1, %v32072_v25  ;;  %3359 = vmatpush1.bf16.msra.mxu0 %v31193_v26  ;;  %v31249_v63 = vld [vmem:[%s39937_s0 + $0xccc] ss:$404 sps:$4 sm:$0x3f]   ;;  %v31252_v1 = vld [vmem:[%s39937_s0 + $0xcc8] ss:$404 sps:$4 sm:$0x3f]  }
  0x18   :  { %3400 = vmatpush1.bf16.msra.mxu1 %v31196_v27  ;;  %3360 = vmatprep.subr.bf16.mxu0 %v31201_v28  ;;  %v31251_v0 = vld [vmem:[%s39937_s0 + $0xcc0] ss:$404 sps:$4 sm:$0x3f]   ;;  %v3004_v4 = vsel %vm2972_vm0, %v31252_v1, 0  ;;  %v31258_v6 = vld [vmem:[%s39937_s0 + $0x3c] ss:$404 sps:$4 sm:$0xff]  }
  0x19   :  { %3401 = vmatprep.subr.bf16.mxu1 %v31204_v29  ;;  %3431 = vmatprep.mubr.bf16.mxu1 %v39945_v2  ;;  %v2998_v3 = vsel %vm2972_vm0, %v31251_v0, 0  ;;  %v31255_v5 = vld [vmem:[%s39937_s0 + $0x34] ss:$404 sps:$4 sm:$0xff]   ;;  %v31253_v7 = vld [vmem:[%s39937_s0 + $0x30] ss:$404 sps:$4 sm:$0xff]  }
  0x1a   :  { %3390 = vmatprep.mubr.bf16.mxu0 %v39945_v2  ;;  %v31256_v8 = vld [vmem:[%s39937_s0 + $0x38] ss:$404 sps:$4 sm:$0xff]   ;;  %v31261_v9 = vld [vmem:[%s39937_s0 + $0x35c] ss:$404 sps:$4 sm:$0xff]   ;;  %v31262_v12 = vld [vmem:[%s39937_s0 + $0x360] ss:$404 sps:$4 sm:$0xff]  }
  0x1b   :  { %3361 = vmatpush1.bf16.msra.mxu0 %v31199_v30  ;;  %v31264_v10 = vld [vmem:[%s39937_s0 + $0x364] ss:$404 sps:$4 sm:$0xff]   ;;  %v31270_v14 = vld [vmem:[%s39937_s0 + $0x68c] ss:$404 sps:$4 sm:$0xff]   ;;  %v31268_v16 = vld [vmem:[%s39937_s0 + $0x688] ss:$404 sps:$4 sm:$0xff]  }
  0x1c   :  { %3402 = vmatpush1.bf16.msra.mxu1 %v31202_v31  ;;  %3362 = vmatprep.subr.bf16.mxu0 %v31207_v32  ;;  %v31259_v11 = vld [vmem:[%s39937_s0 + $0x358] ss:$404 sps:$4 sm:$0xff]   ;;  %v31265_v15 = vld [vmem:[%s39937_s0 + $0x680] ss:$404 sps:$4 sm:$0xff]   ;;  %v31271_v19 = vld [vmem:[%s39937_s0 + $0x9a8] ss:$404 sps:$4 sm:$0xff]  }
  0x1d   :  { %3403 = vmatprep.subr.bf16.mxu1 %v31210_v33  ;;  %v31267_v13 = vld [vmem:[%s39937_s0 + $0x684] ss:$404 sps:$4 sm:$0xff]   ;;  %v31273_v17 = vld [vmem:[%s39937_s0 + $0x9ac] ss:$404 sps:$4 sm:$0xff]   ;;  %v31276_v18 = vld [vmem:[%s39937_s0 + $0x9b4] ss:$404 sps:$4 sm:$0xff]  }
  0x1e   :  { %v31277_v20 = vld [vmem:[%s39937_s0 + $0xcd4] ss:$404 sps:$4 sm:$0x3f]   ;;  %v31279_v21 = vld [vmem:[%s39937_s0 + $0xcdc] ss:$404 sps:$4 sm:$0x3f]  }
  0x1f   :  { %3363 = vmatpush1.bf16.msra.mxu0 %v31205_v34  ;;  %v31274_v22 = vld [vmem:[%s39937_s0 + $0x9b0] ss:$404 sps:$4 sm:$0xff]   ;;  %v31282_v24 = vld [vmem:[%s39937_s0 + $0xcd8] ss:$404 sps:$4 sm:$0x3f]  }
  0x20   :  { %3404 = vmatpush1.bf16.msra.mxu1 %v31208_v35  ;;  %3364 = vmatprep.subr.bf16.mxu0 %v31213_v36  ;;  %v31281_v23 = vld [vmem:[%s39937_s0 + $0xcd0] ss:$404 sps:$4 sm:$0x3f]   ;;  %v3016_v27 = vsel %vm2972_vm0, %v31282_v24, 0  ;;  %v31288_v29 = vld [vmem:[%s39937_s0 + $0x4c] ss:$404 sps:$4 sm:$0xff]  }
  0x21   :  { %3405 = vmatprep.subr.bf16.mxu1 %v31216_v37  ;;  %v3010_v26 = vsel %vm2972_vm0, %v31281_v23, 0  ;;  %v31285_v28 = vld [vmem:[%s39937_s0 + $0x44] ss:$404 sps:$4 sm:$0xff]   ;;  %v31283_v30 = vld [vmem:[%s39937_s0 + $0x40] ss:$404 sps:$4 sm:$0xff]  }
  0x22   :  { %v31286_v31 = vld [vmem:[%s39937_s0 + $0x48] ss:$404 sps:$4 sm:$0xff]   ;;  %v31291_v32 = vld [vmem:[%s39937_s0 + $0x36c] ss:$404 sps:$4 sm:$0xff]   ;;  %v31292_v35 = vld [vmem:[%s39937_s0 + $0x370] ss:$404 sps:$4 sm:$0xff]  }
  0x23   :  { %3365 = vmatpush1.bf16.msra.mxu0 %v31211_v38  ;;  %v31294_v33 = vld [vmem:[%s39937_s0 + $0x374] ss:$404 sps:$4 sm:$0xff]   ;;  %v31300_v37 = vld [vmem:[%s39937_s0 + $0x69c] ss:$404 sps:$4 sm:$0xff]   ;;  %v31301_v42 = vld [vmem:[%s39937_s0 + $0x9b8] ss:$404 sps:$4 sm:$0xff]  }
  0x24   :  { %3406 = vmatpush1.bf16.msra.mxu1 %v31214_v41  ;;  %28608 = vmatprep.subr.msk.bf16.mxu0 %vm2972_vm0, %v31217_v39  ;;  %v31289_v34 = vld [vmem:[%s39937_s0 + $0x368] ss:$404 sps:$4 sm:$0xff]   ;;  %v31295_v38 = vld [vmem:[%s39937_s0 + $0x690] ss:$404 sps:$4 sm:$0xff]   ;;  %v31298_v39 = vld [vmem:[%s39937_s0 + $0x698] ss:$404 sps:$4 sm:$0xff]  }
  0x25   :  { %28610 = vmatprep.subr.msk.bf16.mxu1 %vm2972_vm0, %v31219_v40  ;;  %v31297_v36 = vld [vmem:[%s39937_s0 + $0x694] ss:$404 sps:$4 sm:$0xff]   ;;  %v31303_v40 = vld [vmem:[%s39937_s0 + $0x9bc] ss:$404 sps:$4 sm:$0xff]   ;;  %v31306_v41 = vld [vmem:[%s39937_s0 + $0x9c4] ss:$404 sps:$4 sm:$0xff]  }
  0x26   :  { %v31307_v43 = vld [vmem:[%s39937_s0 + $0xce4] ss:$404 sps:$4 sm:$0x3f]   ;;  %v31331_v0 = vld [vmem:[%s39937_s0 + $0x9c8] ss:$404 sps:$4 sm:$0xff]  }
  0x27   :  { %3367 = vmatpush1.bf16.msra.mxu0 %v2986_v45  ;;  %v31304_v45 = vld [vmem:[%s39937_s0 + $0x9c0] ss:$404 sps:$4 sm:$0xff]   ;;  %v31334_v1 = vld [vmem:[%s39937_s0 + $0x9d0] ss:$404 sps:$4 sm:$0xff]   ;;  %v31361_v23 = vld [vmem:[%s39937_s0 + $0x9d8] ss:$404 sps:$4 sm:$0xff]  }
  0x28   :  { %3408 = vmatpush1.bf16.msra.mxu1 %v2992_v46  ;;  %3440 = vmatprep.subr.bf16.mxu0 %v31225_v44  ;;  %v31309_v44 = vld [vmem:[%s39937_s0 + $0xcec] ss:$404 sps:$4 sm:$0x3f]   ;;  %v31367_v24 = vld [vmem:[%s39937_s0 + $0xd04] ss:$404 sps:$4 sm:$0x3f]  }
  0x29   :  { %3481 = vmatprep.subr.bf16.mxu1 %v31228_v47  ;;  %v31311_v46 = vld [vmem:[%s39937_s0 + $0xce0] ss:$404 sps:$4 sm:$0x3f]   ;;  %v31312_v47 = vld [vmem:[%s39937_s0 + $0xce8] ss:$404 sps:$4 sm:$0x3f]  }
  0x2a   :  { %28609 = vmatmul.mubr.msk.bf16.vlgmr.msra.gmra.mrb[4].mxu0 %vm2968_vm1, %v32072_v25 }
  0x2b   :  { %28611 = vmatmul.mubr.msk.bf16.vlgmr.msra.gmra.mrb[4].mxu1 %vm2968_vm1, %v32072_v25  ;;  %3441 = vmatpush1.bf16.msra.mxu0 %v31223_v48  ;;  %v31315_v48 = vld [vmem:[%s39937_s0 + $0x54] ss:$404 sps:$4 sm:$0xff]  }
  0x2c   :  { %3482 = vmatpush1.bf16.msra.mxu1 %v31226_v49  ;;  %3442 = vmatprep.subr.bf16.mxu0 %v31231_v50  ;;  %v3022_v49 = vsel %vm2972_vm0, %v31311_v46, 0  ;;  %v3028_v50 = vsel %vm2972_vm0, %v31312_v47, 0  ;;  %v31394_v46 = vld [vmem:[%s39937_s0 + $0x9f0] ss:$404 sps:$4 sm:$0xff]  }
  0x2d   :  { %3483 = vmatprep.subr.bf16.mxu1 %v31234_v51  ;;  %3513 = vmatprep.mubr.bf16.mxu1 %v39945_v2  ;;  %v31318_v51 = vld [vmem:[%s39937_s0 + $0x5c] ss:$404 sps:$4 sm:$0xff]   ;;  %v31397_v47 = vld [vmem:[%s39937_s0 + $0xd14] ss:$404 sps:$4 sm:$0x3f]  }
  0x2e   :  { %3472 = vmatprep.mubr.bf16.mxu0 %v39945_v2 }
  0x2f   :  { %3443 = vmatpush1.bf16.msra.mxu0 %v31229_v52  ;;  %v31313_v52 = vld [vmem:[%s39937_s0 + $0x50] ss:$404 sps:$4 sm:$0xff]  }
  0x30   :  { %3484 = vmatpush1.bf16.msra.mxu1 %v31232_v53  ;;  %3444 = vmatprep.subr.bf16.mxu0 %v31237_v54  ;;  %v31316_v53 = vld [vmem:[%s39937_s0 + $0x58] ss:$404 sps:$4 sm:$0xff]   ;;  %v31321_v54 = vld [vmem:[%s39937_s0 + $0x37c] ss:$404 sps:$4 sm:$0xff]  }
  0x31   :  { %3485 = vmatprep.subr.bf16.mxu1 %v31240_v55  ;;  %v31324_v55 = vld [vmem:[%s39937_s0 + $0x384] ss:$404 sps:$4 sm:$0xff]  }
  0x33   :  { %3445 = vmatpush1.bf16.msra.mxu0 %v31235_v56  ;;  %v31319_v56 = vld [vmem:[%s39937_s0 + $0x378] ss:$404 sps:$4 sm:$0xff]  }
  0x34   :  { %3486 = vmatpush1.bf16.msra.mxu1 %v31238_v57  ;;  %3446 = vmatprep.subr.bf16.mxu0 %v31243_v58  ;;  %v31322_v57 = vld [vmem:[%s39937_s0 + $0x380] ss:$404 sps:$4 sm:$0xff]   ;;  %v31327_v58 = vld [vmem:[%s39937_s0 + $0x6a4] ss:$404 sps:$4 sm:$0xff]  }
  0x35   :  { %3487 = vmatprep.subr.bf16.mxu1 %v31246_v59  ;;  %v31330_v59 = vld [vmem:[%s39937_s0 + $0x6ac] ss:$404 sps:$4 sm:$0xff]  }
  0x37   :  { %3447 = vmatpush1.bf16.msra.mxu0 %v31241_v60  ;;  %v31325_v60 = vld [vmem:[%s39937_s0 + $0x6a0] ss:$404 sps:$4 sm:$0xff]  }
  0x38   :  { %3488 = vmatpush1.bf16.msra.mxu1 %v31244_v61  ;;  %28612 = vmatprep.subr.msk.bf16.mxu0 %vm2972_vm0, %v31247_v62  ;;  %v31328_v61 = vld [vmem:[%s39937_s0 + $0x6a8] ss:$404 sps:$4 sm:$0xff]   ;;  %v31333_v62 = vld [vmem:[%s39937_s0 + $0x9cc] ss:$404 sps:$4 sm:$0xff]  }
  0x39   :  { %28614 = vmatprep.subr.msk.bf16.mxu1 %vm2972_vm0, %v31249_v63  ;;  %v31336_v63 = vld [vmem:[%s39937_s0 + $0x9d4] ss:$404 sps:$4 sm:$0xff]  }
  0x3b   :  { %3449 = vmatpush1.bf16.msra.mxu0 %v2998_v3  ;;  %v31337_v3 = vld [vmem:[%s39937_s0 + $0xcf4] ss:$404 sps:$4 sm:$0x3f]  }
  0x3c   :  { %3490 = vmatpush1.bf16.msra.mxu1 %v3004_v4  ;;  %3522 = vmatprep.subr.bf16.mxu0 %v31255_v5  ;;  %v31339_v4 = vld [vmem:[%s39937_s0 + $0xcfc] ss:$404 sps:$4 sm:$0x3f]  }
  0x3d   :  { %3563 = vmatprep.subr.bf16.mxu1 %v31258_v6  ;;  %v31341_v5 = vld [vmem:[%s39937_s0 + $0xcf0] ss:$404 sps:$4 sm:$0x3f]   ;;  %v31342_v6 = vld [vmem:[%s39937_s0 + $0xcf8] ss:$404 sps:$4 sm:$0x3f]  }
  0x3e   :  { %28613 = vmatmul.mubr.msk.bf16.vlgmr.msra.gmra.mrb[8].mxu0 %vm2968_vm1, %v32072_v25 }
  0x3f   :  { %28615 = vmatmul.mubr.msk.bf16.vlgmr.msra.gmra.mrb[8].mxu1 %vm2968_vm1, %v32072_v25  ;;  %3523 = vmatpush1.bf16.msra.mxu0 %v31253_v7  ;;  %v3034_v7 = vsel %vm2972_vm0, %v31341_v5, 0  ;;  %v31421_v5 = vld [vmem:[%s39937_s0 + $0x9f8] ss:$404 sps:$4 sm:$0xff]  }
  0x40   :  { %3564 = vmatpush1.bf16.msra.mxu1 %v31256_v8  ;;  %3524 = vmatprep.subr.bf16.mxu0 %v31261_v9  ;;  %v3040_v8 = vsel %vm2972_vm0, %v31342_v6, 0  ;;  %v31345_v9 = vld [vmem:[%s39937_s0 + $0x64] ss:$404 sps:$4 sm:$0xff]   ;;  %v31424_v6 = vld [vmem:[%s39937_s0 + $0xa00] ss:$404 sps:$4 sm:$0xff]  }
  0x41   :  { %3565 = vmatprep.subr.bf16.mxu1 %v31264_v10  ;;  %3595 = vmatprep.mubr.bf16.mxu1 %v39945_v2  ;;  %v31348_v10 = vld [vmem:[%s39937_s0 + $0x6c] ss:$404 sps:$4 sm:$0xff]  }
  0x42   :  { %3554 = vmatprep.mubr.bf16.mxu0 %v39945_v2 }
  0x43   :  { %3525 = vmatpush1.bf16.msra.mxu0 %v31259_v11  ;;  %v31343_v11 = vld [vmem:[%s39937_s0 + $0x60] ss:$404 sps:$4 sm:$0xff]  }
  0x44   :  { %3566 = vmatpush1.bf16.msra.mxu1 %v31262_v12  ;;  %3526 = vmatprep.subr.bf16.mxu0 %v31267_v13  ;;  %v31346_v12 = vld [vmem:[%s39937_s0 + $0x68] ss:$404 sps:$4 sm:$0xff]   ;;  %v31351_v13 = vld [vmem:[%s39937_s0 + $0x38c] ss:$404 sps:$4 sm:$0xff]  }
  0x45   :  { %3567 = vmatprep.subr.bf16.mxu1 %v31270_v14  ;;  %v31354_v14 = vld [vmem:[%s39937_s0 + $0x394] ss:$404 sps:$4 sm:$0xff]  }
  0x47   :  { %3527 = vmatpush1.bf16.msra.mxu0 %v31265_v15  ;;  %v31349_v15 = vld [vmem:[%s39937_s0 + $0x388] ss:$404 sps:$4 sm:$0xff]  }
  0x48   :  { %3568 = vmatpush1.bf16.msra.mxu1 %v31268_v16  ;;  %3528 = vmatprep.subr.bf16.mxu0 %v31273_v17  ;;  %v31352_v16 = vld [vmem:[%s39937_s0 + $0x390] ss:$404 sps:$4 sm:$0xff]   ;;  %v31357_v17 = vld [vmem:[%s39937_s0 + $0x6b4] ss:$404 sps:$4 sm:$0xff]  }
  0x49   :  { %3569 = vmatprep.subr.bf16.mxu1 %v31276_v18  ;;  %v31360_v18 = vld [vmem:[%s39937_s0 + $0x6bc] ss:$404 sps:$4 sm:$0xff]  }
  0x4b   :  { %3529 = vmatpush1.bf16.msra.mxu0 %v31271_v19  ;;  %v31355_v19 = vld [vmem:[%s39937_s0 + $0x6b0] ss:$404 sps:$4 sm:$0xff]  }
  0x4c   :  { %3570 = vmatpush1.bf16.msra.mxu1 %v31274_v22  ;;  %28616 = vmatprep.subr.msk.bf16.mxu0 %vm2972_vm0, %v31277_v20  ;;  %v31358_v20 = vld [vmem:[%s39937_s0 + $0x6b8] ss:$404 sps:$4 sm:$0xff]  }
  0x4d   :  { %28618 = vmatprep.subr.msk.bf16.mxu1 %vm2972_vm0, %v31279_v21  ;;  %v31363_v21 = vld [vmem:[%s39937_s0 + $0x9dc] ss:$404 sps:$4 sm:$0xff]   ;;  %v31366_v22 = vld [vmem:[%s39937_s0 + $0x9e4] ss:$404 sps:$4 sm:$0xff]  }
  0x4f   :  { %3531 = vmatpush1.bf16.msra.mxu0 %v3010_v26  ;;  %v31369_v26 = vld [vmem:[%s39937_s0 + $0xd0c] ss:$404 sps:$4 sm:$0x3f]  }
  0x50   :  { %3572 = vmatpush1.bf16.msra.mxu1 %v3016_v27  ;;  %3604 = vmatprep.subr.bf16.mxu0 %v31285_v28  ;;  %v31364_v27 = vld [vmem:[%s39937_s0 + $0x9e0] ss:$404 sps:$4 sm:$0xff]  }
  0x51   :  { %3645 = vmatprep.subr.bf16.mxu1 %v31288_v29  ;;  %v31371_v28 = vld [vmem:[%s39937_s0 + $0xd00] ss:$404 sps:$4 sm:$0x3f]   ;;  %v31372_v29 = vld [vmem:[%s39937_s0 + $0xd08] ss:$404 sps:$4 sm:$0x3f]  }
  0x52   :  { %28617 = vmatmul.mubr.msk.bf16.vlgmr.msra.gmra.mrb[12].mxu0 %vm2968_vm1, %v32072_v25 }
  0x53   :  { %28619 = vmatmul.mubr.msk.bf16.vlgmr.msra.gmra.mrb[12].mxu1 %vm2968_vm1, %v32072_v25  ;;  %3605 = vmatpush1.bf16.msra.mxu0 %v31283_v30  ;;  %v31375_v30 = vld [vmem:[%s39937_s0 + $0x74] ss:$404 sps:$4 sm:$0xff]  }
  0x54   :  { %3646 = vmatpush1.bf16.msra.mxu1 %v31286_v31  ;;  %3606 = vmatprep.subr.bf16.mxu0 %v31291_v32  ;;  %v3046_v31 = vsel %vm2972_vm0, %v31371_v28, 0  ;;  %v3052_v32 = vsel %vm2972_vm0, %v31372_v29, 0  ;;  %v31451_v28 = vld [vmem:[%s39937_s0 + $0xa08] ss:$404 sps:$4 sm:$0xff]  }
  0x55   :  { %3647 = vmatprep.subr.bf16.mxu1 %v31294_v33  ;;  %3677 = vmatprep.mubr.bf16.mxu1 %v39945_v2  ;;  %v31378_v33 = vld [vmem:[%s39937_s0 + $0x7c] ss:$404 sps:$4 sm:$0xff]   ;;  %v31457_v29 = vld [vmem:[%s39937_s0 + $0xd34] ss:$404 sps:$4 sm:$0x3f]  }
  0x56   :  { %3636 = vmatprep.mubr.bf16.mxu0 %v39945_v2 }
  0x57   :  { %3607 = vmatpush1.bf16.msra.mxu0 %v31289_v34  ;;  %v31373_v34 = vld [vmem:[%s39937_s0 + $0x70] ss:$404 sps:$4 sm:$0xff]  }
  0x58   :  { %3648 = vmatpush1.bf16.msra.mxu1 %v31292_v35  ;;  %3608 = vmatprep.subr.bf16.mxu0 %v31297_v36  ;;  %v31376_v35 = vld [vmem:[%s39937_s0 + $0x78] ss:$404 sps:$4 sm:$0xff]   ;;  %v31381_v36 = vld [vmem:[%s39937_s0 + $0x39c] ss:$404 sps:$4 sm:$0xff]  }
  0x59   :  { %3649 = vmatprep.subr.bf16.mxu1 %v31300_v37  ;;  %v31384_v37 = vld [vmem:[%s39937_s0 + $0x3a4] ss:$404 sps:$4 sm:$0xff]  }
  0x5b   :  { %3609 = vmatpush1.bf16.msra.mxu0 %v31295_v38  ;;  %v31379_v38 = vld [vmem:[%s39937_s0 + $0x398] ss:$404 sps:$4 sm:$0xff]  }
  0x5c   :  { %3650 = vmatpush1.bf16.msra.mxu1 %v31298_v39  ;;  %3610 = vmatprep.subr.bf16.mxu0 %v31303_v40  ;;  %v31382_v39 = vld [vmem:[%s39937_s0 + $0x3a0] ss:$404 sps:$4 sm:$0xff]   ;;  %v31387_v40 = vld [vmem:[%s39937_s0 + $0x6c4] ss:$404 sps:$4 sm:$0xff]  }
  0x5d   :  { %3651 = vmatprep.subr.bf16.mxu1 %v31306_v41  ;;  %v31385_v41 = vld [vmem:[%s39937_s0 + $0x6c0] ss:$404 sps:$4 sm:$0xff]  }
  0x5f   :  { %3611 = vmatpush1.bf16.msra.mxu0 %v31301_v42  ;;  %v31388_v42 = vld [vmem:[%s39937_s0 + $0x6c8] ss:$404 sps:$4 sm:$0xff]  }
  0x60   :  { %3652 = vmatpush1.bf16.msra.mxu1 %v31304_v45  ;;  %28620 = vmatprep.subr.msk.bf16.mxu0 %vm2972_vm0, %v31307_v43  ;;  %v31393_v43 = vld [vmem:[%s39937_s0 + $0x9ec] ss:$404 sps:$4 sm:$0xff]   ;;  %v31391_v45 = vld [vmem:[%s39937_s0 + $0x9e8] ss:$404 sps:$4 sm:$0xff]  }
  0x61   :  { %28622 = vmatprep.subr.msk.bf16.mxu1 %vm2972_vm0, %v31309_v44  ;;  %v31396_v44 = vld [vmem:[%s39937_s0 + $0x9f4] ss:$404 sps:$4 sm:$0xff]  }
  0x63   :  { %3613 = vmatpush1.bf16.msra.mxu0 %v3022_v49  ;;  %v31401_v49 = vld [vmem:[%s39937_s0 + $0xd10] ss:$404 sps:$4 sm:$0x3f]  }
  0x64   :  { %3654 = vmatpush1.bf16.msra.mxu1 %v3028_v50  ;;  %3686 = vmatprep.subr.bf16.mxu0 %v31315_v48  ;;  %v31399_v48 = vld [vmem:[%s39937_s0 + $0xd1c] ss:$404 sps:$4 sm:$0x3f]   ;;  %v31402_v50 = vld [vmem:[%s39937_s0 + $0xd18] ss:$404 sps:$4 sm:$0x3f]  }
  0x65   :  { %3727 = vmatprep.subr.bf16.mxu1 %v31318_v51  ;;  %v31405_v51 = vld [vmem:[%s39937_s0 + $0x84] ss:$404 sps:$4 sm:$0xff]  }
  0x66   :  { %28621 = vmatmul.mubr.msk.bf16.vlgmr.msra.gmra.mrb[16].mxu0 %vm2968_vm1, %v32072_v25 }
  0x67   :  { %28623 = vmatmul.mubr.msk.bf16.vlgmr.msra.gmra.mrb[16].mxu1 %vm2968_vm1, %v32072_v25  ;;  %3687 = vmatpush1.bf16.msra.mxu0 %v31313_v52  ;;  %v3058_v52 = vsel %vm2972_vm0, %v31401_v49, 0  ;;  %v31481_v49 = vld [vmem:[%s39937_s0 + $0xa18] ss:$404 sps:$4 sm:$0xff]  }
  0x68   :  { %3728 = vmatpush1.bf16.msra.mxu1 %v31316_v53  ;;  %3688 = vmatprep.subr.bf16.mxu0 %v31321_v54  ;;  %v3064_v53 = vsel %vm2972_vm0, %v31402_v50, 0  ;;  %v31408_v54 = vld [vmem:[%s39937_s0 + $0x8c] ss:$404 sps:$4 sm:$0xff]  }
  0x69   :  { %3729 = vmatprep.subr.bf16.mxu1 %v31324_v55  ;;  %3759 = vmatprep.mubr.bf16.mxu1 %v39945_v2  ;;  %v31403_v55 = vld [vmem:[%s39937_s0 + $0x80] ss:$404 sps:$4 sm:$0xff]  }
  0x6a   :  { %3718 = vmatprep.mubr.bf16.mxu0 %v39945_v2  ;;  %v31484_v50 = vld [vmem:[%s39937_s0 + $0xa20] ss:$404 sps:$4 sm:$0xff]  }
  0x6b   :  { %3689 = vmatpush1.bf16.msra.mxu0 %v31319_v56  ;;  %v31406_v56 = vld [vmem:[%s39937_s0 + $0x88] ss:$404 sps:$4 sm:$0xff]  }
  0x6c   :  { %3730 = vmatpush1.bf16.msra.mxu1 %v31322_v57  ;;  %3690 = vmatprep.subr.bf16.mxu0 %v31327_v58  ;;  %v31411_v57 = vld [vmem:[%s39937_s0 + $0x3ac] ss:$404 sps:$4 sm:$0xff]   ;;  %v31414_v58 = vld [vmem:[%s39937_s0 + $0x3b4] ss:$404 sps:$4 sm:$0xff]  }
  0x6d   :  { %3731 = vmatprep.subr.bf16.mxu1 %v31330_v59  ;;  %v32579_v59 = vld [vmem:[%s39939_s2] sm:$0x7] }
  0x6f   :  { %3691 = vmatpush1.bf16.msra.mxu0 %v31325_v60  ;;  %v31409_v60 = vld [vmem:[%s39937_s0 + $0x3a8] ss:$404 sps:$4 sm:$0xff]  }
  0x70   :  { %3732 = vmatpush1.bf16.msra.mxu1 %v31328_v61  ;;  %3692 = vmatprep.subr.bf16.mxu0 %v31333_v62  ;;  %v31412_v61 = vld [vmem:[%s39937_s0 + $0x3b0] ss:$404 sps:$4 sm:$0xff]   ;;  %v31417_v62 = vld [vmem:[%s39937_s0 + $0x6d4] ss:$404 sps:$4 sm:$0xff]  }
  0x71   :  { %3733 = vmatprep.subr.bf16.mxu1 %v31336_v63  ;;  %v31420_v63 = vld [vmem:[%s39937_s0 + $0x6dc] ss:$404 sps:$4 sm:$0xff]  }
  0x73   :  { %3693 = vmatpush1.bf16.msra.mxu0 %v31331_v0  ;;  %v31415_v0 = vld [vmem:[%s39937_s0 + $0x6d0] ss:$404 sps:$4 sm:$0xff]  }
  0x74   :  { %3734 = vmatpush1.bf16.msra.mxu1 %v31334_v1  ;;  %28624 = vmatprep.subr.msk.bf16.mxu0 %vm2972_vm0, %v31337_v3  ;;  %v31418_v1 = vld [vmem:[%s39937_s0 + $0x6d8] ss:$404 sps:$4 sm:$0xff]   ;;  %v31423_v3 = vld [vmem:[%s39937_s0 + $0x9fc] ss:$404 sps:$4 sm:$0xff]  }
  0x75   :  { %28626 = vmatprep.subr.msk.bf16.mxu1 %vm2972_vm0, %v31339_v4  ;;  %v31426_v4 = vld [vmem:[%s39937_s0 + $0xa04] ss:$404 sps:$4 sm:$0xff]  }
  0x77   :  { %3695 = vmatpush1.bf16.msra.mxu0 %v3034_v7  ;;  %v31427_v7 = vld [vmem:[%s39937_s0 + $0xd24] ss:$404 sps:$4 sm:$0x3f]  }
  0x78   :  { %3736 = vmatpush1.bf16.msra.mxu1 %v3040_v8  ;;  %3768 = vmatprep.subr.bf16.mxu0 %v31345_v9  ;;  %v31429_v8 = vld [vmem:[%s39937_s0 + $0xd2c] ss:$404 sps:$4 sm:$0x3f]  }
  0x79   :  { %3809 = vmatprep.subr.bf16.mxu1 %v31348_v10  ;;  %v31431_v9 = vld [vmem:[%s39937_s0 + $0xd20] ss:$404 sps:$4 sm:$0x3f]   ;;  %v31432_v10 = vld [vmem:[%s39937_s0 + $0xd28] ss:$404 sps:$4 sm:$0x3f]  }
  0x7a   :  { %28625 = vmatmul.mubr.msk.bf16.vlgmr.msra.gmra.mrb[20].mxu0 %vm2968_vm1, %v32072_v25 }
  0x7b   :  { %28627 = vmatmul.mubr.msk.bf16.vlgmr.msra.gmra.mrb[20].mxu1 %vm2968_vm1, %v32072_v25  ;;  %3769 = vmatpush1.bf16.msra.mxu0 %v31343_v11  ;;  %v3070_v11 = vsel %vm2972_vm0, %v31431_v9, 0  ;;  %v31511_v9 = vld [vmem:[%s39937_s0 + $0xa28] ss:$404 sps:$4 sm:$0xff]  }
  0x7c   :  { %3810 = vmatpush1.bf16.msra.mxu1 %v31346_v12  ;;  %3770 = vmatprep.subr.bf16.mxu0 %v31351_v13  ;;  %v3076_v12 = vsel %vm2972_vm0, %v31432_v10, 0  ;;  %v31435_v13 = vld [vmem:[%s39937_s0 + $0x94] ss:$404 sps:$4 sm:$0xff]   ;;  %v31514_v10 = vld [vmem:[%s39937_s0 + $0xa30] ss:$404 sps:$4 sm:$0xff]  }
  0x7d   :  { %3811 = vmatprep.subr.bf16.mxu1 %v31354_v14  ;;  %3841 = vmatprep.mubr.bf16.mxu1 %v39945_v2  ;;  %v31438_v14 = vld [vmem:[%s39937_s0 + $0x9c] ss:$404 sps:$4 sm:$0xff]  }
  0x7e   :  { %3800 = vmatprep.mubr.bf16.mxu0 %v39945_v2 }
  0x7f   :  { %3771 = vmatpush1.bf16.msra.mxu0 %v31349_v15  ;;  %v31433_v15 = vld [vmem:[%s39937_s0 + $0x90] ss:$404 sps:$4 sm:$0xff]  }
  0x80   :  { %3812 = vmatpush1.bf16.msra.mxu1 %v31352_v16  ;;  %3772 = vmatprep.subr.bf16.mxu0 %v31357_v17  ;;  %v31436_v16 = vld [vmem:[%s39937_s0 + $0x98] ss:$404 sps:$4 sm:$0xff]   ;;  %v31441_v17 = vld [vmem:[%s39937_s0 + $0x3bc] ss:$404 sps:$4 sm:$0xff]  }
  0x81   :  { %3813 = vmatprep.subr.bf16.mxu1 %v31360_v18  ;;  %v31444_v18 = vld [vmem:[%s39937_s0 + $0x3c4] ss:$404 sps:$4 sm:$0xff]  }
  0x83   :  { %3773 = vmatpush1.bf16.msra.mxu0 %v31355_v19  ;;  %v31439_v19 = vld [vmem:[%s39937_s0 + $0x3b8] ss:$404 sps:$4 sm:$0xff]  }
  0x84   :  { %3814 = vmatpush1.bf16.msra.mxu1 %v31358_v20  ;;  %3774 = vmatprep.subr.bf16.mxu0 %v31363_v21  ;;  %v31442_v20 = vld [vmem:[%s39937_s0 + $0x3c0] ss:$404 sps:$4 sm:$0xff]   ;;  %v31447_v21 = vld [vmem:[%s39937_s0 + $0x6e4] ss:$404 sps:$4 sm:$0xff]  }
  0x85   :  { %3815 = vmatprep.subr.bf16.mxu1 %v31366_v22  ;;  %v31450_v22 = vld [vmem:[%s39937_s0 + $0x6ec] ss:$404 sps:$4 sm:$0xff]  }
  0x87   :  { %3775 = vmatpush1.bf16.msra.mxu0 %v31361_v23  ;;  %v31445_v23 = vld [vmem:[%s39937_s0 + $0x6e0] ss:$404 sps:$4 sm:$0xff]  }
  0x88   :  { %3816 = vmatpush1.bf16.msra.mxu1 %v31364_v27  ;;  %28628 = vmatprep.subr.msk.bf16.mxu0 %vm2972_vm0, %v31367_v24  ;;  %v31448_v24 = vld [vmem:[%s39937_s0 + $0x6e8] ss:$404 sps:$4 sm:$0xff]  }
  0x89   :  { %28630 = vmatprep.subr.msk.bf16.mxu1 %vm2972_vm0, %v31369_v26  ;;  %v31453_v26 = vld [vmem:[%s39937_s0 + $0xa0c] ss:$404 sps:$4 sm:$0xff]   ;;  %v31456_v27 = vld [vmem:[%s39937_s0 + $0xa14] ss:$404 sps:$4 sm:$0xff]  }
  0x8b   :  { %3777 = vmatpush1.bf16.msra.mxu0 %v3046_v31  ;;  %v31454_v31 = vld [vmem:[%s39937_s0 + $0xa10] ss:$404 sps:$4 sm:$0xff]  }
  0x8c   :  { %3818 = vmatpush1.bf16.msra.mxu1 %v3052_v32  ;;  %3850 = vmatprep.subr.bf16.mxu0 %v31375_v30  ;;  %v31459_v30 = vld [vmem:[%s39937_s0 + $0xd3c] ss:$404 sps:$4 sm:$0x3f]  }
  0x8d   :  { %3891 = vmatprep.subr.bf16.mxu1 %v31378_v33  ;;  %v31461_v32 = vld [vmem:[%s39937_s0 + $0xd30] ss:$404 sps:$4 sm:$0x3f]   ;;  %v31462_v33 = vld [vmem:[%s39937_s0 + $0xd38] ss:$404 sps:$4 sm:$0x3f]  }
  0x8e   :  { %28629 = vmatmul.mubr.msk.bf16.vlgmr.msra.gmra.mrb[24].mxu0 %vm2968_vm1, %v32072_v25 }
  0x8f   :  { %28631 = vmatmul.mubr.msk.bf16.vlgmr.msra.gmra.mrb[24].mxu1 %vm2968_vm1, %v32072_v25  ;;  %3851 = vmatpush1.bf16.msra.mxu0 %v31373_v34  ;;  %v31390_v25 = vld [vmem:[%s39937_s0 + $0x6cc] ss:$404 sps:$4 sm:$0xff]   ;;  %v31465_v34 = vld [vmem:[%s39937_s0 + $0xa4] ss:$404 sps:$4 sm:$0xff]  }
  0x90   :  { %3892 = vmatpush1.bf16.msra.mxu1 %v31376_v35  ;;  %3852 = vmatprep.subr.bf16.mxu0 %v31381_v36  ;;  %v3082_v35 = vsel %vm2972_vm0, %v31461_v32, 0  ;;  %v3088_v36 = vsel %vm2972_vm0, %v31462_v33, 0  ;;  %v31531_v32 = vld [vmem:[%s39937_s0 + $0x3ec] ss:$404 sps:$4 sm:$0xff]   ;;  %v31534_v33 = vld [vmem:[%s39937_s0 + $0x3f4] ss:$404 sps:$4 sm:$0xff]  }
  0x91   :  { %3893 = vmatprep.subr.bf16.mxu1 %v31384_v37  ;;  %3923 = vmatprep.mubr.bf16.mxu1 %v39945_v2  ;;  %v31468_v37 = vld [vmem:[%s39937_s0 + $0xac] ss:$404 sps:$4 sm:$0xff]  }
  0x92   :  { %3882 = vmatprep.mubr.bf16.mxu0 %v39945_v2 }
  0x93   :  { %3853 = vmatpush1.bf16.msra.mxu0 %v31379_v38  ;;  %v31463_v38 = vld [vmem:[%s39937_s0 + $0xa0] ss:$404 sps:$4 sm:$0xff]  }
  0x94   :  { %3894 = vmatpush1.bf16.msra.mxu1 %v31382_v39  ;;  %3854 = vmatprep.subr.bf16.mxu0 %v31387_v40  ;;  %v31466_v39 = vld [vmem:[%s39937_s0 + $0xa8] ss:$404 sps:$4 sm:$0xff]   ;;  %v31471_v40 = vld [vmem:[%s39937_s0 + $0x3cc] ss:$404 sps:$4 sm:$0xff]  }
  0x95   :  { %3895 = vmatprep.subr.bf16.mxu1 %v31390_v25  ;;  %v31474_v25 = vld [vmem:[%s39937_s0 + $0x3d4] ss:$404 sps:$4 sm:$0xff]  }
  0x97   :  { %3855 = vmatpush1.bf16.msra.mxu0 %v31385_v41  ;;  %v31469_v41 = vld [vmem:[%s39937_s0 + $0x3c8] ss:$404 sps:$4 sm:$0xff]  }
  0x98   :  { %3896 = vmatpush1.bf16.msra.mxu1 %v31388_v42  ;;  %3856 = vmatprep.subr.bf16.mxu0 %v31393_v43  ;;  %v31472_v42 = vld [vmem:[%s39937_s0 + $0x3d0] ss:$404 sps:$4 sm:$0xff]   ;;  %v31477_v43 = vld [vmem:[%s39937_s0 + $0x6f4] ss:$404 sps:$4 sm:$0xff]  }
  0x99   :  { %3897 = vmatprep.subr.bf16.mxu1 %v31396_v44  ;;  %v31480_v44 = vld [vmem:[%s39937_s0 + $0x6fc] ss:$404 sps:$4 sm:$0xff]  }
  0x9b   :  { %3857 = vmatpush1.bf16.msra.mxu0 %v31391_v45  ;;  %v31475_v45 = vld [vmem:[%s39937_s0 + $0x6f0] ss:$404 sps:$4 sm:$0xff]  }
  0x9c   :  { %3898 = vmatpush1.bf16.msra.mxu1 %v31394_v46  ;;  %28632 = vmatprep.subr.msk.bf16.mxu0 %vm2972_vm0, %v31397_v47  ;;  %v31478_v46 = vld [vmem:[%s39937_s0 + $0x6f8] ss:$404 sps:$4 sm:$0xff]   ;;  %v31483_v47 = vld [vmem:[%s39937_s0 + $0xa1c] ss:$404 sps:$4 sm:$0xff]  }
  0x9d   :  { %28634 = vmatprep.subr.msk.bf16.mxu1 %vm2972_vm0, %v31399_v48  ;;  %v31486_v48 = vld [vmem:[%s39937_s0 + $0xa24] ss:$404 sps:$4 sm:$0xff]  }
  0x9f   :  { %3859 = vmatpush1.bf16.msra.mxu0 %v3058_v52  ;;  %v31489_v52 = vld [vmem:[%s39937_s0 + $0xd4c] ss:$404 sps:$4 sm:$0x3f]  }
  0xa0   :  { %3900 = vmatpush1.bf16.msra.mxu1 %v3064_v53  ;;  %3932 = vmatprep.subr.bf16.mxu0 %v31405_v51  ;;  %v31487_v51 = vld [vmem:[%s39937_s0 + $0xd44] ss:$404 sps:$4 sm:$0x3f]   ;;  %v31491_v53 = vld [vmem:[%s39937_s0 + $0xd40] ss:$404 sps:$4 sm:$0x3f]  }
  0xa1   :  { %3973 = vmatprep.subr.bf16.mxu1 %v31408_v54  ;;  %v31492_v54 = vld [vmem:[%s39937_s0 + $0xd48] ss:$404 sps:$4 sm:$0x3f]  }
  0xa2   :  { %28633 = vmatmul.mubr.msk.bf16.vlgmr.msra.gmra.mrb[28].mxu0 %vm2968_vm1, %v32579_v59 }
  0xa3   :  { %28635 = vmatmul.mubr.msk.bf16.vlgmr.msra.gmra.mrb[28].mxu1 %vm2968_vm1, %v32579_v59  ;;  %3933 = vmatpush1.bf16.msra.mxu0 %v31403_v55  ;;  %v3094_v55 = vsel %vm2972_vm0, %v31491_v53, 0 }
  0xa4   :  { %3974 = vmatpush1.bf16.msra.mxu1 %v31406_v56  ;;  %3934 = vmatprep.subr.bf16.mxu0 %v31411_v57  ;;  %v31495_v56 = vld [vmem:[%s39937_s0 + $0xb4] ss:$404 sps:$4 sm:$0xff]   ;;  %v3100_v57 = vsel %vm2972_vm0, %v31492_v54, 0 }
  0xa5   :  { %3975 = vmatprep.subr.bf16.mxu1 %v31414_v58  ;;  %4005 = vmatprep.mubr.bf16.mxu1 %v39945_v2  ;;  %v31498_v58 = vld [vmem:[%s39937_s0 + $0xbc] ss:$404 sps:$4 sm:$0xff]  }
  0xa6   :  { %3964 = vmatprep.mubr.bf16.mxu0 %v39945_v2 }
  0xa7   :  { %3935 = vmatpush1.bf16.msra.mxu0 %v31409_v60  ;;  %v31493_v60 = vld [vmem:[%s39937_s0 + $0xb0] ss:$404 sps:$4 sm:$0xff]  }
  0xa8   :  { %3976 = vmatpush1.bf16.msra.mxu1 %v31412_v61  ;;  %3936 = vmatprep.subr.bf16.mxu0 %v31417_v62  ;;  %v31496_v61 = vld [vmem:[%s39937_s0 + $0xb8] ss:$404 sps:$4 sm:$0xff]   ;;  %v31501_v62 = vld [vmem:[%s39937_s0 + $0x3dc] ss:$404 sps:$4 sm:$0xff]  }
  0xa9   :  { %3977 = vmatprep.subr.bf16.mxu1 %v31420_v63  ;;  %v31504_v63 = vld [vmem:[%s39937_s0 + $0x3e4] ss:$404 sps:$4 sm:$0xff]  }
  0xab   :  { %3937 = vmatpush1.bf16.msra.mxu0 %v31415_v0  ;;  %v31499_v0 = vld [vmem:[%s39937_s0 + $0x3d8] ss:$404 sps:$4 sm:$0xff]  }
  0xac   :  { %3978 = vmatpush1.bf16.msra.mxu1 %v31418_v1  ;;  %3938 = vmatprep.subr.bf16.mxu0 %v31423_v3  ;;  %v31502_v1 = vld [vmem:[%s39937_s0 + $0x3e0] ss:$404 sps:$4 sm:$0xff]   ;;  %v31507_v3 = vld [vmem:[%s39937_s0 + $0x704] ss:$404 sps:$4 sm:$0xff]  }
  0xad   :  { %3979 = vmatprep.subr.bf16.mxu1 %v31426_v4  ;;  %v31510_v4 = vld [vmem:[%s39937_s0 + $0x70c] ss:$404 sps:$4 sm:$0xff]  }
  0xaf   :  { %3939 = vmatpush1.bf16.msra.mxu0 %v31421_v5  ;;  %v31505_v5 = vld [vmem:[%s39937_s0 + $0x700] ss:$404 sps:$4 sm:$0xff]  }
  0xb0   :  { %3980 = vmatpush1.bf16.msra.mxu1 %v31424_v6  ;;  %28636 = vmatprep.subr.msk.bf16.mxu0 %vm2972_vm0, %v31427_v7  ;;  %v31508_v6 = vld [vmem:[%s39937_s0 + $0x708] ss:$404 sps:$4 sm:$0xff]   ;;  %v31513_v7 = vld [vmem:[%s39937_s0 + $0xa2c] ss:$404 sps:$4 sm:$0xff]  }
  0xb1   :  { %28638 = vmatprep.subr.msk.bf16.mxu1 %vm2972_vm0, %v31429_v8  ;;  %v31516_v8 = vld [vmem:[%s39937_s0 + $0xa34] ss:$404 sps:$4 sm:$0xff]  }
  0xb3   :  { %3941 = vmatpush1.bf16.msra.mxu0 %v3070_v11  ;;  %v31517_v11 = vld [vmem:[%s39937_s0 + $0xd54] ss:$404 sps:$4 sm:$0x3f]  }
  0xb4   :  { %3982 = vmatpush1.bf16.msra.mxu1 %v3076_v12  ;;  %4014 = vmatprep.subr.bf16.mxu0 %v31435_v13  ;;  %v31519_v12 = vld [vmem:[%s39937_s0 + $0xd5c] ss:$404 sps:$4 sm:$0x3f]  }
  0xb5   :  { %4055 = vmatprep.subr.bf16.mxu1 %v31438_v14  ;;  %v31521_v13 = vld [vmem:[%s39937_s0 + $0xd50] ss:$404 sps:$4 sm:$0x3f]   ;;  %v31522_v14 = vld [vmem:[%s39937_s0 + $0xd58] ss:$404 sps:$4 sm:$0x3f]  }
  0xb6   :  { %28637 = vmatmul.mubr.msk.bf16.vlgmr.msra.gmra.mrb[32].mxu0 %vm2968_vm1, %v32579_v59 }
  0xb7   :  { %28639 = vmatmul.mubr.msk.bf16.vlgmr.msra.gmra.mrb[32].mxu1 %vm2968_vm1, %v32579_v59  ;;  %4015 = vmatpush1.bf16.msra.mxu0 %v31433_v15 }
  0xb8   :  { %4056 = vmatpush1.bf16.msra.mxu1 %v31436_v16  ;;  %4016 = vmatprep.subr.bf16.mxu0 %v31441_v17 }
  0xb9   :  { %4057 = vmatprep.subr.bf16.mxu1 %v31444_v18  ;;  %4087 = vmatprep.mubr.bf16.mxu1 %v39945_v2 }
  0xba   :  { %4046 = vmatprep.mubr.bf16.mxu0 %v39945_v2 }
  0xbb   :  { %4017 = vmatpush1.bf16.msra.mxu0 %v31439_v19 }
  0xbc   :  { %4058 = vmatpush1.bf16.msra.mxu1 %v31442_v20  ;;  %4018 = vmatprep.subr.bf16.mxu0 %v31447_v21 }
  0xbd   :  { %4059 = vmatprep.subr.bf16.mxu1 %v31450_v22 }
  0xbf   :  { %4019 = vmatpush1.bf16.msra.mxu0 %v31445_v23 }
  0xc0   :  { %4060 = vmatpush1.bf16.msra.mxu1 %v31448_v24  ;;  %4020 = vmatprep.subr.bf16.mxu0 %v31453_v26  ;;  %v3106_v24 = vsel %vm2972_vm0, %v31521_v13, 0  ;;  %v3112_v26 = vsel %vm2972_vm0, %v31522_v14, 0  ;;  %v31571_v13 = vld [vmem:[%s39937_s0 + $0xa48] ss:$404 sps:$4 sm:$0xff]   ;;  %v31574_v14 = vld [vmem:[%s39937_s0 + $0xa50] ss:$404 sps:$4 sm:$0xff]  }
  0xc1   :  { %4061 = vmatprep.subr.bf16.mxu1 %v31456_v27 }
  0xc3   :  { %4021 = vmatpush1.bf16.msra.mxu0 %v31451_v28  ;;  %v31525_v28 = vld [vmem:[%s39937_s0 + $0xc4] ss:$404 sps:$4 sm:$0xff]  }
  0xc4   :  { %4062 = vmatpush1.bf16.msra.mxu1 %v31454_v31  ;;  %28640 = vmatprep.subr.msk.bf16.mxu0 %vm2972_vm0, %v31457_v29  ;;  %v31528_v29 = vld [vmem:[%s39937_s0 + $0xcc] ss:$404 sps:$4 sm:$0xff]   ;;  %v31526_v31 = vld [vmem:[%s39937_s0 + $0xc8] ss:$404 sps:$4 sm:$0xff]  }
  0xc5   :  { %28642 = vmatprep.subr.msk.bf16.mxu1 %vm2972_vm0, %v31459_v30  ;;  %v31523_v30 = vld [vmem:[%s39937_s0 + $0xc0] ss:$404 sps:$4 sm:$0xff]  }
  0xc7   :  { %4023 = vmatpush1.bf16.msra.mxu0 %v3082_v35  ;;  %v31532_v35 = vld [vmem:[%s39937_s0 + $0x3f0] ss:$404 sps:$4 sm:$0xff]  }
  0xc8   :  { %4064 = vmatpush1.bf16.msra.mxu1 %v3088_v36  ;;  %4096 = vmatprep.subr.bf16.mxu0 %v31465_v34  ;;  %v31529_v34 = vld [vmem:[%s39937_s0 + $0x3e8] ss:$404 sps:$4 sm:$0xff]  }
  0xc9   :  { %4137 = vmatprep.subr.bf16.mxu1 %v31468_v37  ;;  %v31537_v36 = vld [vmem:[%s39937_s0 + $0x714] ss:$404 sps:$4 sm:$0xff]   ;;  %v31540_v37 = vld [vmem:[%s39937_s0 + $0x71c] ss:$404 sps:$4 sm:$0xff]  }
  0xca   :  { %28641 = vmatmul.mubr.msk.bf16.vlgmr.msra.gmra.mrb[36].mxu0 %vm2968_vm1, %v32579_v59 }
  0xcb   :  { %28643 = vmatmul.mubr.msk.bf16.vlgmr.msra.gmra.mrb[36].mxu1 %vm2968_vm1, %v32579_v59  ;;  %4097 = vmatpush1.bf16.msra.mxu0 %v31463_v38  ;;  %v31535_v38 = vld [vmem:[%s39937_s0 + $0x710] ss:$404 sps:$4 sm:$0xff]  }
  0xcc   :  { %4138 = vmatpush1.bf16.msra.mxu1 %v31466_v39  ;;  %4098 = vmatprep.subr.bf16.mxu0 %v31471_v40  ;;  %v31538_v39 = vld [vmem:[%s39937_s0 + $0x718] ss:$404 sps:$4 sm:$0xff]  }
  0xcd   :  { %4139 = vmatprep.subr.bf16.mxu1 %v31474_v25  ;;  %4169 = vmatprep.mubr.bf16.mxu1 %v39945_v2  ;;  %v31541_v25 = vld [vmem:[%s39937_s0 + $0xa38] ss:$404 sps:$4 sm:$0xff]  }
  0xce   :  { %4128 = vmatprep.mubr.bf16.mxu0 %v39945_v2 }
  0xcf   :  { %4099 = vmatpush1.bf16.msra.mxu0 %v31469_v41  ;;  %v31543_v41 = vld [vmem:[%s39937_s0 + $0xa3c] ss:$404 sps:$4 sm:$0xff]  }
  0xd0   :  { %4140 = vmatpush1.bf16.msra.mxu1 %v31472_v42  ;;  %4100 = vmatprep.subr.bf16.mxu0 %v31477_v43  ;;  %v31546_v42 = vld [vmem:[%s39937_s0 + $0xa44] ss:$404 sps:$4 sm:$0xff]  }
  0xd1   :  { %4141 = vmatprep.subr.bf16.mxu1 %v31480_v44  ;;  %v31544_v44 = vld [vmem:[%s39937_s0 + $0xa40] ss:$404 sps:$4 sm:$0xff]  }
  0xd3   :  { %4101 = vmatpush1.bf16.msra.mxu0 %v31475_v45  ;;  %v31547_v45 = vld [vmem:[%s39937_s0 + $0xd64] ss:$404 sps:$4 sm:$0x3f]  }
  0xd4   :  { %4142 = vmatpush1.bf16.msra.mxu1 %v31478_v46  ;;  %4102 = vmatprep.subr.bf16.mxu0 %v31483_v47  ;;  %v31549_v46 = vld [vmem:[%s39937_s0 + $0xd6c] ss:$404 sps:$4 sm:$0x3f]  }
  0xd5   :  { %4143 = vmatprep.subr.bf16.mxu1 %v31486_v48  ;;  %v31551_v47 = vld [vmem:[%s39937_s0 + $0xd60] ss:$404 sps:$4 sm:$0x3f]   ;;  %v31552_v48 = vld [vmem:[%s39937_s0 + $0xd68] ss:$404 sps:$4 sm:$0x3f]  }
  0xd7   :  { %4103 = vmatpush1.bf16.msra.mxu0 %v31481_v49 }
  0xd8   :  { %4144 = vmatpush1.bf16.msra.mxu1 %v31484_v50  ;;  %28644 = vmatprep.subr.msk.bf16.mxu0 %vm2972_vm0, %v31487_v51 }
  0xd9   :  { %28646 = vmatprep.subr.msk.bf16.mxu1 %vm2972_vm0, %v31489_v52 }
  0xdb   :  { %4105 = vmatpush1.bf16.msra.mxu0 %v3094_v55 }
  0xdc   :  { %4146 = vmatpush1.bf16.msra.mxu1 %v3100_v57  ;;  %4178 = vmatprep.subr.bf16.mxu0 %v31495_v56  ;;  %v3118_v56 = vsel %vm2972_vm0, %v31551_v47, 0  ;;  %v3124_v57 = vsel %vm2972_vm0, %v31552_v48, 0  ;;  %v31606_v47 = vld [vmem:[%s39937_s0 + $0xa64] ss:$404 sps:$4 sm:$0xff]  }
  0xdd   :  { %4219 = vmatprep.subr.bf16.mxu1 %v31498_v58  ;;  %v31555_v58 = vld [vmem:[%s39937_s0 + $0xd4] ss:$404 sps:$4 sm:$0xff]   ;;  %v31601_v48 = vld [vmem:[%s39937_s0 + $0xa58] ss:$404 sps:$4 sm:$0xff]  }
  0xde   :  { %28645 = vmatmul.mubr.msk.bf16.vlgmr.msra.gmra.mrb[40].mxu0 %vm2968_vm1, %v32579_v59 }
  0xdf   :  { %28647 = vmatmul.mubr.msk.bf16.vlgmr.msra.gmra.mrb[40].mxu1 %vm2968_vm1, %v32579_v59  ;;  %4179 = vmatpush1.bf16.msra.mxu0 %v31493_v60 }
  0xe0   :  { %4220 = vmatpush1.bf16.msra.mxu1 %v31496_v61  ;;  %4180 = vmatprep.subr.bf16.mxu0 %v31501_v62  ;;  %v31558_v61 = vld [vmem:[%s39937_s0 + $0xdc] ss:$404 sps:$4 sm:$0xff]  }
  0xe1   :  { %4221 = vmatprep.subr.bf16.mxu1 %v31504_v63  ;;  %4251 = vmatprep.mubr.bf16.mxu1 %v39945_v2  ;;  %v31553_v62 = vld [vmem:[%s39937_s0 + $0xd0] ss:$404 sps:$4 sm:$0xff]   ;;  %v31556_v63 = vld [vmem:[%s39937_s0 + $0xd8] ss:$404 sps:$4 sm:$0xff]  }
  0xe2   :  { %4210 = vmatprep.mubr.bf16.mxu0 %v39945_v2 }
  0xe3   :  { %4181 = vmatpush1.bf16.msra.mxu0 %v31499_v0  ;;  %v31561_v0 = vld [vmem:[%s39937_s0 + $0x3fc] ss:$404 sps:$4 sm:$0xff]  }
  0xe4   :  { %4222 = vmatpush1.bf16.msra.mxu1 %v31502_v1  ;;  %4182 = vmatprep.subr.bf16.mxu0 %v31507_v3  ;;  %v31564_v1 = vld [vmem:[%s39937_s0 + $0x404] ss:$404 sps:$4 sm:$0xff]  }
  0xe5   :  { %4223 = vmatprep.subr.bf16.mxu1 %v31510_v4  ;;  %v31559_v3 = vld [vmem:[%s39937_s0 + $0x3f8] ss:$404 sps:$4 sm:$0xff]   ;;  %v31562_v4 = vld [vmem:[%s39937_s0 + $0x400] ss:$404 sps:$4 sm:$0xff]  }
  0xe7   :  { %4183 = vmatpush1.bf16.msra.mxu0 %v31505_v5 }
  0xe8   :  { %4224 = vmatpush1.bf16.msra.mxu1 %v31508_v6  ;;  %4184 = vmatprep.subr.bf16.mxu0 %v31513_v7  ;;  %v31567_v6 = vld [vmem:[%s39937_s0 + $0x724] ss:$404 sps:$4 sm:$0xff]   ;;  %v31570_v7 = vld [vmem:[%s39937_s0 + $0x72c] ss:$404 sps:$4 sm:$0xff]  }
  0xe9   :  { %4225 = vmatprep.subr.bf16.mxu1 %v31516_v8  ;;  %v3310_v15 = vpop.f32.mrb[0].mxu0  ;;  %v31565_v8 = vld [vmem:[%s39937_s0 + $0x720] ss:$404 sps:$4 sm:$0xff]  }
  0xea   :  { %v3351_v16 = vpop.f32.mrb[0].mxu1  ;;  %v32839_v17 = vmax.f32 %v3310_v15, 0.0  ;;  %v3312_v20 = vpop.f32.mrb[1].mxu0  ;;  %v31577_v15 = vld [vmem:[%s39937_s0 + $0xd74] ss:$404 sps:$4 sm:$0x3f]  }
  0xeb   :  { %v32841_v18 = vmax.f32 %v3351_v16, 0.0  ;;  %v3353_v19 = vpop.f32.mrb[1].mxu1  ;;  %4185 = vmatpush1.bf16.msra.mxu0 %v31511_v9  ;;  %v3314_v22 = vpop.f32.mrb[2].mxu0  ;;  %v32905_v40 = vmax.f32 %v3312_v20, 0.0  ;;  %v31568_v9 = vld [vmem:[%s39937_s0 + $0x728] ss:$404 sps:$4 sm:$0xff]  }
  0xec   :  { %v3355_v21 = vpop.f32.mrb[2].mxu1  ;;  %4226 = vmatpush1.bf16.msra.mxu1 %v31514_v10  ;;  %5491 = vrot.lane.b32.xlu1 %v32839_v17, %s31946_s25  ;;  %v3315_v27 = vpop.f32.mrb[3].mxu0  ;;  %v32916_v43 = vmax.f32 %v3353_v19, 0.0  ;;  %v31573_v10 = vld [vmem:[%s39937_s0 + $0xa4c] ss:$404 sps:$4 sm:$0xff]  }
  0xed   :  { %5495 = vrot.lane.b32.xlu0 %v32841_v18, %s31946_s25  ;;  %v3356_v23 = vpop.f32.mrb[3].mxu1  ;;  %28648 = vmatprep.subr.msk.bf16.mxu0 %vm2972_vm0, %v31517_v11  ;;  %v31576_v11 = vld [vmem:[%s39937_s0 + $0xa54] ss:$404 sps:$4 sm:$0xff]   ;;  %v31579_v16 = vld [vmem:[%s39937_s0 + $0xd7c] ss:$404 sps:$4 sm:$0x3f]  }
  0xee   :  { %28650 = vmatprep.subr.msk.bf16.mxu1 %vm2972_vm0, %v31519_v12  ;;  %v31581_v19 = vld [vmem:[%s39937_s0 + $0xd70] ss:$404 sps:$4 sm:$0x3f]   ;;  %v31582_v20 = vld [vmem:[%s39937_s0 + $0xd78] ss:$404 sps:$4 sm:$0x3f]  }
  0xef   :  { %4187 = vmatpush1.bf16.msra.mxu0 %v3106_v24 }
  0xf0   :  { %4228 = vmatpush1.bf16.msra.mxu1 %v3112_v26  ;;  %7063 = vrot.lane.b32.xlu1 %v32839_v17, %s31947_s11 }
  0xf1   :  { %7067 = vrot.lane.b32.xlu0 %v32841_v18, %s31947_s11  ;;  %4260 = vmatprep.subr.bf16.mxu0 %v31525_v28 }
  0xf2   :  { %4301 = vmatprep.subr.bf16.mxu1 %v31528_v29  ;;  %28649 = vmatmul.mubr.msk.bf16.vlgmr.msra.gmra.mrb[44].mxu0 %vm2968_vm1, %v32579_v59  ;;  %v3130_v29 = vsel %vm2972_vm0, %v31581_v19, 0  ;;  %v31625_v19 = vld [vmem:[%s39937_s0 + $0x740] ss:$404 sps:$4 sm:$0xff]  }
  0xf3   :  { %28651 = vmatmul.mubr.msk.bf16.vlgmr.msra.gmra.mrb[44].mxu1 %vm2968_vm1, %v32579_v59  ;;  %4261 = vmatpush1.bf16.msra.mxu0 %v31523_v30  ;;  %v3136_v30 = vsel %vm2972_vm0, %v31582_v20, 0  ;;  %v31628_v20 = vld [vmem:[%s39937_s0 + $0x748] ss:$404 sps:$4 sm:$0xff]  }
  0xf4   :  { %4302 = vmatpush1.bf16.msra.mxu1 %v31526_v31  ;;  %7905 = vrot.lane.b32.xlu1 %v32841_v18, %s31948_s20 }
  0xf5   :  { %7901 = vrot.lane.b32.xlu0 %v32839_v17, %s31948_s20  ;;  %4262 = vmatprep.subr.bf16.mxu0 %v31531_v32  ;;  %v31585_v32 = vld [vmem:[%s39937_s0 + $0xe4] ss:$404 sps:$4 sm:$0xff]  }
  0xf6   :  { %4303 = vmatprep.subr.bf16.mxu1 %v31534_v33  ;;  %4333 = vmatprep.mubr.bf16.mxu1 %v39945_v2  ;;  %v31588_v33 = vld [vmem:[%s39937_s0 + $0xec] ss:$404 sps:$4 sm:$0xff]  }
  0xf7   :  { %4292 = vmatprep.mubr.bf16.mxu0 %v39945_v2  ;;  %4263 = vmatpush1.bf16.msra.mxu0 %v31529_v34  ;;  %v31583_v34 = vld [vmem:[%s39937_s0 + $0xe0] ss:$404 sps:$4 sm:$0xff]  }
  0xf8   :  { %4304 = vmatpush1.bf16.msra.mxu1 %v31532_v35  ;;  %8739 = vrot.lane.b32.xlu1 %v32839_v17, %s31949_s30  ;;  %v31586_v35 = vld [vmem:[%s39937_s0 + $0xe8] ss:$404 sps:$4 sm:$0xff]  }
  0xf9   :  { %8743 = vrot.lane.b32.xlu0 %v32841_v18, %s31949_s30  ;;  %4264 = vmatprep.subr.bf16.mxu0 %v31537_v36 }
  0xfa   :  { %4305 = vmatprep.subr.bf16.mxu1 %v31540_v37  ;;  %v31591_v37 = vld [vmem:[%s39937_s0 + $0x40c] ss:$404 sps:$4 sm:$0xff]  }
  0xfb   :  { %4265 = vmatpush1.bf16.msra.mxu0 %v31535_v38  ;;  %v31594_v38 = vld [vmem:[%s39937_s0 + $0x414] ss:$404 sps:$4 sm:$0xff]  }
  0xfc   :  { %4306 = vmatpush1.bf16.msra.mxu1 %v31538_v39  ;;  %5497 = vrot.lane.b32.xlu1 %v32916_v43, %s31946_s25  ;;  %v31589_v39 = vld [vmem:[%s39937_s0 + $0x408] ss:$404 sps:$4 sm:$0xff]  }
  0xfd   :  { %5493 = vrot.lane.b32.xlu0 %v32905_v40, %s31946_s25  ;;  %4266 = vmatprep.subr.bf16.mxu0 %v31543_v41  ;;  %v3392_v50 = vpop.f32.mrb[4].mxu0  ;;  %v31600_v41 = vld [vmem:[%s39937_s0 + $0x73c] ss:$404 sps:$4 sm:$0xff]  }
  0xfe   :  { %v3433_v49 = vpop.f32.mrb[4].mxu1  ;;  %4307 = vmatprep.subr.bf16.mxu1 %v31546_v42  ;;  %v32939_v52 = vpop.f32.mrb[5].mxu0  ;;  %v32985_v5 = vmax.f32 %v3392_v50, 0.0  ;;  %v31604_v50 = vld [vmem:[%s39937_s0 + $0xa60] ss:$404 sps:$4 sm:$0xff]  }
  0xff   :  { %v32937_v51 = vpop.f32.mrb[5].mxu1  ;;  %4267 = vmatpush1.bf16.msra.mxu0 %v31541_v25  ;;  %v3396_v54 = vpop.f32.mrb[6].mxu0  ;;  %v33011_v12 = vmax.f32 %v3433_v49, 0.0  ;;  %v33068_v36 = vmax.f32 %v32939_v52, 0.0  ;;  %v31592_v25 = vld [vmem:[%s39937_s0 + $0x410] ss:$404 sps:$4 sm:$0xff]  }
 0x100   :  { %v3437_v53 = vpop.f32.mrb[6].mxu1  ;;  %4308 = vmatpush1.bf16.msra.mxu1 %v31544_v44  ;;  %7065 = vrot.lane.b32.xlu1 %v32905_v40, %s31947_s11  ;;  %v3397_v60 = vpop.f32.mrb[7].mxu0  ;;  %v33097_v42 = vmax.f32 %v32937_v51, 0.0  ;;  %v31595_v44 = vld [vmem:[%s39937_s0 + $0x730] ss:$404 sps:$4 sm:$0xff]  }
 0x101   :  { %v3438_v55 = vpop.f32.mrb[7].mxu1  ;;  %7069 = vrot.lane.b32.xlu0 %v32916_v43, %s31947_s11  ;;  %28652 = vmatprep.subr.msk.bf16.mxu0 %vm2972_vm0, %v31547_v45  ;;  %v31598_v45 = vld [vmem:[%s39937_s0 + $0x738] ss:$404 sps:$4 sm:$0xff]   ;;  %v31611_v49 = vld [vmem:[%s39937_s0 + $0xd80] ss:$404 sps:$4 sm:$0x3f]  }
 0x102   :  { %28654 = vmatprep.subr.msk.bf16.mxu1 %vm2972_vm0, %v31549_v46  ;;  %v31603_v46 = vld [vmem:[%s39937_s0 + $0xa5c] ss:$404 sps:$4 sm:$0xff]   ;;  %v31607_v51 = vld [vmem:[%s39937_s0 + $0xd84] ss:$404 sps:$4 sm:$0x3f]  }
 0x103   :  { %4269 = vmatpush1.bf16.msra.mxu0 %v3118_v56  ;;  %v31612_v52 = vld [vmem:[%s39937_s0 + $0xd88] ss:$404 sps:$4 sm:$0x3f]   ;;  %v31609_v54 = vld [vmem:[%s39937_s0 + $0xd8c] ss:$404 sps:$4 sm:$0x3f]  }
 0x104   :  { %4310 = vmatpush1.bf16.msra.mxu1 %v3124_v57  ;;  %7907 = vrot.lane.b32.xlu1 %v32916_v43, %s31948_s20 }
 0x105   :  { %7903 = vrot.lane.b32.xlu0 %v32905_v40, %s31948_s20  ;;  %4342 = vmatprep.subr.bf16.mxu0 %v31555_v58 }
 0x106   :  { %4383 = vmatprep.subr.bf16.mxu1 %v31558_v61  ;;  %28653 = vmatmul.mubr.msk.bf16.vlgmr.msra.gmra.mrb[48].mxu0 %vm2968_vm1, %v32579_v59 }
 0x107   :  { %28655 = vmatmul.mubr.msk.bf16.vlgmr.msra.gmra.mrb[48].mxu1 %vm2968_vm1, %v32579_v59  ;;  %4343 = vmatpush1.bf16.msra.mxu0 %v31553_v62 }
 0x108   :  { %4384 = vmatpush1.bf16.msra.mxu1 %v31556_v63  ;;  %8741 = vrot.lane.b32.xlu1 %v32905_v40, %s31949_s30  ;;  %v3142_v63 = vsel %vm2972_vm0, %v31611_v49, 0  ;;  %v31651_v49 = vld [vmem:[%s39937_s0 + $0x42c] ss:$404 sps:$4 sm:$0xff]  }
 0x109   :  { %8745 = vrot.lane.b32.xlu0 %v32916_v43, %s31949_s30  ;;  %4344 = vmatprep.subr.bf16.mxu0 %v31561_v0  ;;  %v3148_v0 = vsel %vm2972_vm0, %v31612_v52, 0  ;;  %v31649_v52 = vld [vmem:[%s39937_s0 + $0x428] ss:$404 sps:$4 sm:$0xff]  }
 0x10a   :  { %4385 = vmatprep.subr.bf16.mxu1 %v31564_v1  ;;  %4415 = vmatprep.mubr.bf16.mxu1 %v39945_v2 }
 0x10b   :  { %4374 = vmatprep.mubr.bf16.mxu0 %v39945_v2  ;;  %4345 = vmatpush1.bf16.msra.mxu0 %v31559_v3  ;;  %v31615_v3 = vld [vmem:[%s39937_s0 + $0xf4] ss:$404 sps:$4 sm:$0xff]  }
 0x10c   :  { %4386 = vmatpush1.bf16.msra.mxu1 %v31562_v4  ;;  %7071 = vrot.lane.b32.xlu1 %v32985_v5, %s31947_s11  ;;  %v31618_v4 = vld [vmem:[%s39937_s0 + $0xfc] ss:$404 sps:$4 sm:$0xff]  }
 0x10d   :  { %5499 = vrot.lane.b32.xlu0 %v32985_v5, %s31946_s25  ;;  %4346 = vmatprep.subr.bf16.mxu0 %v31567_v6  ;;  %v31613_v6 = vld [vmem:[%s39937_s0 + $0xf0] ss:$404 sps:$4 sm:$0xff]  }
 0x10e   :  { %4387 = vmatprep.subr.bf16.mxu1 %v31570_v7  ;;  %v31616_v7 = vld [vmem:[%s39937_s0 + $0xf8] ss:$404 sps:$4 sm:$0xff]  }
 0x10f   :  { %4347 = vmatpush1.bf16.msra.mxu0 %v31565_v8  ;;  %v31621_v8 = vld [vmem:[%s39937_s0 + $0x41c] ss:$404 sps:$4 sm:$0xff]  }
 0x110   :  { %4388 = vmatpush1.bf16.msra.mxu1 %v31568_v9  ;;  %7075 = vrot.lane.b32.xlu1 %v33011_v12, %s31947_s11  ;;  %v31624_v9 = vld [vmem:[%s39937_s0 + $0x424] ss:$404 sps:$4 sm:$0xff]  }
 0x111   :  { %5503 = vrot.lane.b32.xlu0 %v33011_v12, %s31946_s25  ;;  %4348 = vmatprep.subr.bf16.mxu0 %v31573_v10  ;;  %v33037_v22 = vpop.f32.mrb[8].mxu0 }
 0x112   :  { %v33035_v21 = vpop.f32.mrb[8].mxu1  ;;  %4389 = vmatprep.subr.bf16.mxu1 %v31576_v11  ;;  %v33041_v24 = vpop.f32.mrb[9].mxu0  ;;  %v33152_v62 = vmax.f32 %v33037_v22, 0.0  ;;  %v33186_v11 = vld [vmem:[%s39939_s2] sm:$0x7] }
 0x113   :  { %v33039_v23 = vpop.f32.mrb[9].mxu1  ;;  %4349 = vmatpush1.bf16.msra.mxu0 %v31571_v13  ;;  %v3478_v27 = vpop.f32.mrb[10].mxu0  ;;  %v33181_v10 = vmax.f32 %v33035_v21, 0.0  ;;  %v31619_v13 = vld [vmem:[%s39937_s0 + $0x418] ss:$404 sps:$4 sm:$0xff]  }
 0x114   :  { %v3519_v26 = vpop.f32.mrb[10].mxu1  ;;  %4390 = vmatpush1.bf16.msra.mxu1 %v31574_v14  ;;  %8747 = vrot.lane.b32.xlu1 %v32985_v5, %s31949_s30  ;;  %v3479_v31 = vpop.f32.mrb[11].mxu0  ;;  %v31622_v14 = vld [vmem:[%s39937_s0 + $0x420] ss:$404 sps:$4 sm:$0xff]   ;;  %v31631_v22 = vld [vmem:[%s39937_s0 + $0xa68] ss:$404 sps:$4 sm:$0xff]  }
 0x115   :  { %v3520_v28 = vpop.f32.mrb[11].mxu1  ;;  %7909 = vrot.lane.b32.xlu0 %v32985_v5, %s31948_s20  ;;  %28656 = vmatprep.subr.msk.bf16.mxu0 %vm2972_vm0, %v31577_v15  ;;  %v31627_v15 = vld [vmem:[%s39937_s0 + $0x744] ss:$404 sps:$4 sm:$0xff]   ;;  %v31633_v21 = vld [vmem:[%s39937_s0 + $0xa6c] ss:$404 sps:$4 sm:$0xff]   ;;  %v33246_v31 = vmax.f32 %v33041_v24, 0.0 }
 0x116   :  { %28658 = vmatprep.subr.msk.bf16.mxu1 %vm2972_vm0, %v31579_v16  ;;  %v31630_v16 = vld [vmem:[%s39937_s0 + $0x74c] ss:$404 sps:$4 sm:$0xff]   ;;  %v31636_v26 = vld [vmem:[%s39937_s0 + $0xa74] ss:$404 sps:$4 sm:$0xff]   ;;  %v31634_v27 = vld [vmem:[%s39937_s0 + $0xa70] ss:$404 sps:$4 sm:$0xff]  }
 0x117   :  { %4351 = vmatpush1.bf16.msra.mxu0 %v3130_v29  ;;  %v31637_v28 = vld [vmem:[%s39937_s0 + $0xd94] ss:$404 sps:$4 sm:$0x3f]   ;;  %v31641_v29 = vld [vmem:[%s39937_s0 + $0xd90] ss:$404 sps:$4 sm:$0x3f]  }
 0x118   :  { %4392 = vmatpush1.bf16.msra.mxu1 %v3136_v30  ;;  %8751 = vrot.lane.b32.xlu1 %v33011_v12, %s31949_s30  ;;  %v31642_v30 = vld [vmem:[%s39937_s0 + $0xd98] ss:$404 sps:$4 sm:$0x3f]  }
 0x119   :  { %7913 = vrot.lane.b32.xlu0 %v33011_v12, %s31948_s20  ;;  %4424 = vmatprep.subr.bf16.mxu0 %v31585_v32 }
 0x11a   :  { %4465 = vmatprep.subr.bf16.mxu1 %v31588_v33  ;;  %28657 = vmatmul.mubr.msk.bf16.vlgmr.msra.gmra.mrb[52].mxu0 %vm2968_vm1, %v32579_v59  ;;  %v31639_v33 = vld [vmem:[%s39937_s0 + $0xd9c] ss:$404 sps:$4 sm:$0x3f]  }
 0x11b   :  { %28659 = vmatmul.mubr.msk.bf16.vlgmr.msra.gmra.mrb[52].mxu1 %vm2968_vm1, %v32579_v59  ;;  %4425 = vmatpush1.bf16.msra.mxu0 %v31583_v34  ;;  %v31597_v59 = vld [vmem:[%s39937_s0 + $0x734] ss:$404 sps:$4 sm:$0xff]  }
 0x11c   :  { %4466 = vmatpush1.bf16.msra.mxu1 %v31586_v35  ;;  %5501 = vrot.lane.b32.xlu1 %v33068_v36, %s31946_s25 }
 0x11d   :  { %7073 = vrot.lane.b32.xlu0 %v33068_v36, %s31947_s11  ;;  %4426 = vmatprep.subr.bf16.mxu0 %v31591_v37 }
 0x11e   :  { %4467 = vmatprep.subr.bf16.mxu1 %v31594_v38  ;;  %4497 = vmatprep.mubr.bf16.mxu1 %v39945_v2 }
 0x11f   :  { %4456 = vmatprep.mubr.bf16.mxu0 %v39945_v2  ;;  %4427 = vmatpush1.bf16.msra.mxu0 %v31589_v39 }
 0x120   :  { %4468 = vmatpush1.bf16.msra.mxu1 %v31592_v25  ;;  %5505 = vrot.lane.b32.xlu1 %v33097_v42, %s31946_s25  ;;  %v3154_v25 = vsel %vm2972_vm0, %v31641_v29, 0  ;;  %v31676_v29 = vld [vmem:[%s39937_s0 + $0x118] ss:$404 sps:$4 sm:$0xff]  }
 0x121   :  { %7077 = vrot.lane.b32.xlu0 %v33097_v42, %s31947_s11  ;;  %4428 = vmatprep.subr.bf16.mxu0 %v31597_v59  ;;  %v3160_v59 = vsel %vm2972_vm0, %v31642_v30, 0  ;;  %v31681_v30 = vld [vmem:[%s39937_s0 + $0x43c] ss:$404 sps:$4 sm:$0xff]  }
 0x122   :  { %4469 = vmatprep.subr.bf16.mxu1 %v31600_v41  ;;  %v31645_v41 = vld [vmem:[%s39937_s0 + $0x104] ss:$404 sps:$4 sm:$0xff]  }
 0x123   :  { %4429 = vmatpush1.bf16.msra.mxu0 %v31595_v44 }
 0x124   :  { %4470 = vmatpush1.bf16.msra.mxu1 %v31598_v45  ;;  %7911 = vrot.lane.b32.xlu1 %v33068_v36, %s31948_s20  ;;  %v31648_v45 = vld [vmem:[%s39937_s0 + $0x10c] ss:$404 sps:$4 sm:$0xff]  }
 0x125   :  { %8749 = vrot.lane.b32.xlu0 %v33068_v36, %s31949_s30  ;;  %4430 = vmatprep.subr.bf16.mxu0 %v31603_v46  ;;  %v33141_v55 = vpop.f32.mrb[12].mxu0  ;;  %v31643_v46 = vld [vmem:[%s39937_s0 + $0x100] ss:$404 sps:$4 sm:$0xff]  }
 0x126   :  { %v33136_v53 = vpop.f32.mrb[12].mxu1  ;;  %4471 = vmatprep.subr.bf16.mxu1 %v31606_v47  ;;  %v33145_v57 = vpop.f32.mrb[13].mxu0  ;;  %v31646_v47 = vld [vmem:[%s39937_s0 + $0x108] ss:$404 sps:$4 sm:$0xff]  }
 0x127   :  { %v33143_v56 = vpop.f32.mrb[13].mxu1  ;;  %4431 = vmatpush1.bf16.msra.mxu0 %v31601_v48  ;;  %v3560_v60 = vpop.f32.mrb[14].mxu0  ;;  %v33284_v48 = vmax.f32 %v33141_v55, 0.0  ;;  %v31660_v55 = vld [vmem:[%s39937_s0 + $0x75c] ss:$404 sps:$4 sm:$0xff]  }
 0x128   :  { %v3601_v58 = vpop.f32.mrb[14].mxu1  ;;  %4472 = vmatpush1.bf16.msra.mxu1 %v31604_v50  ;;  %7915 = vrot.lane.b32.xlu1 %v33097_v42, %s31948_s20  ;;  %v3561_v1 = vpop.f32.mrb[15].mxu0  ;;  %v31654_v50 = vld [vmem:[%s39937_s0 + $0x434] ss:$404 sps:$4 sm:$0xff]   ;;  %v31658_v60 = vld [vmem:[%s39937_s0 + $0x758] ss:$404 sps:$4 sm:$0xff]  }
 0x129   :  { %v3602_v61 = vpop.f32.mrb[15].mxu1  ;;  %8753 = vrot.lane.b32.xlu0 %v33097_v42, %s31949_s30  ;;  %28660 = vmatprep.subr.msk.bf16.mxu0 %vm2972_vm0, %v31607_v51  ;;  %40160 = vst [vmem:[#allocation5_spill] sm:$0xff] %v33284_v48  ;;  %v33293_v51 = vmax.f32 %v33136_v53, 0.0  ;;  %v31657_v53 = vld [vmem:[%s39937_s0 + $0x754] ss:$404 sps:$4 sm:$0xff]  }
 0x12a   :  { %28662 = vmatprep.subr.msk.bf16.mxu1 %vm2972_vm0, %v31609_v54  ;;  %v31652_v54 = vld [vmem:[%s39937_s0 + $0x430] ss:$404 sps:$4 sm:$0xff]   ;;  %v31661_v61 = vld [vmem:[%s39937_s0 + $0xa78] ss:$404 sps:$4 sm:$0xff]  }
 0x12b   :  { %4433 = vmatpush1.bf16.msra.mxu0 %v3142_v63  ;;  %v31655_v58 = vld [vmem:[%s39937_s0 + $0x750] ss:$404 sps:$4 sm:$0xff]  }
 0x12c   :  { %4474 = vmatpush1.bf16.msra.mxu1 %v3148_v0  ;;  %7079 = vrot.lane.b32.xlu1 %v33152_v62, %s31947_s11  ;;  %v31663_v63 = vld [vmem:[%s39937_s0 + $0xa7c] ss:$404 sps:$4 sm:$0xff]   ;;  %v31664_v0 = vld [vmem:[%s39937_s0 + $0xa80] ss:$404 sps:$4 sm:$0xff]   ;;  %v31666_v1 = vld [vmem:[%s39937_s0 + $0xa84] ss:$404 sps:$4 sm:$0xff]  }
 0x12d   :  { %5507 = vrot.lane.b32.xlu0 %v33152_v62, %s31946_s25  ;;  %4506 = vmatprep.subr.bf16.mxu0 %v31615_v3  ;;  %v31671_v3 = vld [vmem:[%s39937_s0 + $0xda0] ss:$404 sps:$4 sm:$0x3f]  }
 0x12e   :  { %4547 = vmatprep.subr.bf16.mxu1 %v31618_v4  ;;  %28661 = vmatmul.mubr.msk.bf16.vlgmr.msra.gmra.mrb[56].mxu0 %vm2968_vm1, %v33186_v11  ;;  %v31672_v4 = vld [vmem:[%s39937_s0 + $0xda8] ss:$404 sps:$4 sm:$0x3f]  }
 0x12f   :  { %28663 = vmatmul.mubr.msk.bf16.vlgmr.msra.gmra.mrb[56].mxu1 %vm2968_vm1, %v33186_v11  ;;  %4507 = vmatpush1.bf16.msra.mxu0 %v31613_v6  ;;  %v31667_v6 = vld [vmem:[%s39937_s0 + $0xda4] ss:$404 sps:$4 sm:$0x3f]  }
 0x130   :  { %4548 = vmatpush1.bf16.msra.mxu1 %v31616_v7  ;;  %7083 = vrot.lane.b32.xlu1 %v33181_v10, %s31947_s11 }
 0x131   :  { %5511 = vrot.lane.b32.xlu0 %v33181_v10, %s31946_s25  ;;  %4508 = vmatprep.subr.bf16.mxu0 %v31621_v8  ;;  %v31669_v8 = vld [vmem:[%s39937_s0 + $0xdac] ss:$404 sps:$4 sm:$0x3f]  }
 0x132   :  { %4549 = vmatprep.subr.bf16.mxu1 %v31624_v9  ;;  %4579 = vmatprep.mubr.bf16.mxu1 %v39945_v2 }
 0x133   :  { %4538 = vmatprep.mubr.bf16.mxu0 %v39945_v2  ;;  %4509 = vmatpush1.bf16.msra.mxu0 %v31619_v13 }
 0x134   :  { %4550 = vmatpush1.bf16.msra.mxu1 %v31622_v14  ;;  %8755 = vrot.lane.b32.xlu1 %v33152_v62, %s31949_s30 }
 0x135   :  { %7917 = vrot.lane.b32.xlu0 %v33152_v62, %s31948_s20  ;;  %4510 = vmatprep.subr.bf16.mxu0 %v31627_v15 }
 0x136   :  { %4551 = vmatprep.subr.bf16.mxu1 %v31630_v16  ;;  %v31675_v16 = vld [vmem:[%s39937_s0 + $0x114] ss:$404 sps:$4 sm:$0xff]  }
 0x137   :  { %4511 = vmatpush1.bf16.msra.mxu0 %v31625_v19 }
 0x138   :  { %4552 = vmatpush1.bf16.msra.mxu1 %v31628_v20  ;;  %8759 = vrot.lane.b32.xlu1 %v33181_v10, %s31949_s30 }
 0x139   :  { %7921 = vrot.lane.b32.xlu0 %v33181_v10, %s31948_s20  ;;  %4512 = vmatprep.subr.bf16.mxu0 %v31633_v21  ;;  %v33253_v34 = vpop.f32.mrb[16].mxu0  ;;  %v33371_v21 = vmax.f32 %v33145_v57, 0.0  ;;  %v31678_v57 = vld [vmem:[%s39937_s0 + $0x11c] ss:$404 sps:$4 sm:$0xff]  }
 0x13a   :  { %v33248_v32 = vpop.f32.mrb[16].mxu1  ;;  %4553 = vmatprep.subr.bf16.mxu1 %v31636_v26  ;;  %v33257_v37 = vpop.f32.mrb[17].mxu0  ;;  %v3172_v26 = vsel %vm2972_vm0, %v31672_v4, 0 }
 0x13b   :  { %v33255_v35 = vpop.f32.mrb[17].mxu1  ;;  %4513 = vmatpush1.bf16.msra.mxu0 %v31631_v22  ;;  %v3642_v39 = vpop.f32.mrb[18].mxu0  ;;  %v3166_v22 = vsel %vm2972_vm0, %v31671_v3, 0 }
 0x13c   :  { %v3683_v38 = vpop.f32.mrb[18].mxu1  ;;  %4554 = vmatpush1.bf16.msra.mxu1 %v31634_v27  ;;  %5509 = vrot.lane.b32.xlu1 %v33246_v31, %s31946_s25  ;;  %v3643_v44 = vpop.f32.mrb[19].mxu0  ;;  %v31684_v39 = vld [vmem:[%s39937_s0 + $0x444] ss:$404 sps:$4 sm:$0xff]  }
 0x13d   :  { %v3684_v24 = vpop.f32.mrb[19].mxu1  ;;  %7081 = vrot.lane.b32.xlu0 %v33246_v31, %s31947_s11  ;;  %28664 = vmatprep.subr.msk.bf16.mxu0 %vm2972_vm0, %v31637_v28  ;;  %v31673_v28 = vld [vmem:[%s39937_s0 + $0x110] ss:$404 sps:$4 sm:$0xff]   ;;  %v31682_v38 = vld [vmem:[%s39937_s0 + $0x440] ss:$404 sps:$4 sm:$0xff]  }
 0x13e   :  { %28666 = vmatprep.subr.msk.bf16.mxu1 %vm2972_vm0, %v31639_v33  ;;  %v31679_v33 = vld [vmem:[%s39937_s0 + $0x438] ss:$404 sps:$4 sm:$0xff]   ;;  %v33411_v24 = vmax.f32 %v33253_v34, 0.0  ;;  %v31685_v44 = vld [vmem:[%s39937_s0 + $0x768] ss:$404 sps:$4 sm:$0xff]  }
 0x13f   :  { %4515 = vmatpush1.bf16.msra.mxu0 %v3154_v25  ;;  %v31687_v25 = vld [vmem:[%s39937_s0 + $0x76c] ss:$404 sps:$4 sm:$0xff]  }
 0x140   :  { %4556 = vmatpush1.bf16.msra.mxu1 %v3160_v59  ;;  %7919 = vrot.lane.b32.xlu1 %v33246_v31, %s31948_s20  ;;  %40161 = vst [vmem:[#allocation6_spill] sm:$0xff] %v33411_v24  ;;  %v31690_v59 = vld [vmem:[%s39937_s0 + $0x764] ss:$404 sps:$4 sm:$0xff]   ;;  %v31688_v34 = vld [vmem:[%s39937_s0 + $0x760] ss:$404 sps:$4 sm:$0xff]  }
 0x141   :  { %8757 = vrot.lane.b32.xlu0 %v33246_v31, %s31949_s30  ;;  %4588 = vmatprep.subr.bf16.mxu0 %v31645_v41  ;;  %v33420_v41 = vmax.f32 %v33248_v32, 0.0  ;;  %v31691_v32 = vld [vmem:[%s39937_s0 + $0xa90] ss:$404 sps:$4 sm:$0xff]  }
 0x142   :  { %4629 = vmatprep.subr.bf16.mxu1 %v31648_v45  ;;  %28665 = vmatmul.mubr.msk.bf16.vlgmr.msra.gmra.mrb[60].mxu0 %vm2968_vm1, %v33186_v11  ;;  %v31693_v45 = vld [vmem:[%s39937_s0 + $0xa94] ss:$404 sps:$4 sm:$0xff]  }
 0x143   :  { %28667 = vmatmul.mubr.msk.bf16.vlgmr.msra.gmra.mrb[60].mxu1 %vm2968_vm1, %v33186_v11  ;;  %4589 = vmatpush1.bf16.msra.mxu0 %v31643_v46  ;;  %v31694_v46 = vld [vmem:[%s39937_s0 + $0xa88] ss:$404 sps:$4 sm:$0xff]  }
 0x144   :  { %4630 = vmatpush1.bf16.msra.mxu1 %v31646_v47  ;;  %5515 = vrot.lane.b32.xlu1 %v33284_v48, %s31946_s25  ;;  %v31696_v47 = vld [vmem:[%s39937_s0 + $0xa8c] ss:$404 sps:$4 sm:$0xff]  }
 0x145   :  { %5519 = vrot.lane.b32.xlu0 %v33293_v51, %s31946_s25  ;;  %4590 = vmatprep.subr.bf16.mxu0 %v31651_v49 }
 0x146   :  { %4631 = vmatprep.subr.bf16.mxu1 %v31654_v50  ;;  %4661 = vmatprep.mubr.bf16.mxu1 %v39945_v2 }
 0x147   :  { %4620 = vmatprep.mubr.bf16.mxu0 %v39945_v2  ;;  %4591 = vmatpush1.bf16.msra.mxu0 %v31649_v52  ;;  %v31701_v52 = vld [vmem:[%s39937_s0 + $0xdb0] ss:$404 sps:$4 sm:$0x3f]  }
 0x148   :  { %4632 = vmatpush1.bf16.msra.mxu1 %v31652_v54  ;;  %7091 = vrot.lane.b32.xlu1 %v33293_v51, %s31947_s11  ;;  %v31702_v54 = vld [vmem:[%s39937_s0 + $0xdb8] ss:$404 sps:$4 sm:$0x3f]   ;;  %v3178_v4 = vsel %vm2972_vm0, %v31701_v52, 0 }
 0x149   :  { %7087 = vrot.lane.b32.xlu0 %v33284_v48, %s31947_s11  ;;  %4592 = vmatprep.subr.bf16.mxu0 %v31657_v53  ;;  %v31697_v53 = vld [vmem:[%s39937_s0 + $0xdb4] ss:$404 sps:$4 sm:$0x3f]  }
 0x14a   :  { %4633 = vmatprep.subr.bf16.mxu1 %v31660_v55 }
 0x14b   :  { %4593 = vmatpush1.bf16.msra.mxu0 %v31655_v58  ;;  %v31699_v58 = vld [vmem:[%s39937_s0 + $0xdbc] ss:$404 sps:$4 sm:$0x3f]  }
 0x14c   :  { %4634 = vmatpush1.bf16.msra.mxu1 %v31658_v60  ;;  %7925 = vrot.lane.b32.xlu1 %v33284_v48, %s31948_s20 }
 0x14d   :  { %7929 = vrot.lane.b32.xlu0 %v33293_v51, %s31948_s20  ;;  %4594 = vmatprep.subr.bf16.mxu0 %v31663_v63  ;;  %v33357_v9 = vpop.f32.mrb[20].mxu0 }
 0x14e   :  { %v33352_v7 = vpop.f32.mrb[20].mxu1  ;;  %4635 = vmatprep.subr.bf16.mxu1 %v31666_v1  ;;  %v33361_v14 = vpop.f32.mrb[21].mxu0 }
 0x14f   :  { %v33359_v13 = vpop.f32.mrb[21].mxu1  ;;  %4595 = vmatpush1.bf16.msra.mxu0 %v31661_v61  ;;  %v3724_v19 = vpop.f32.mrb[22].mxu0 }
 0x150   :  { %v3765_v15 = vpop.f32.mrb[22].mxu1  ;;  %4636 = vmatpush1.bf16.msra.mxu1 %v31664_v0  ;;  %8767 = vrot.lane.b32.xlu1 %v33293_v51, %s31949_s30  ;;  %v3725_v27 = vpop.f32.mrb[23].mxu0  ;;  %v31706_v19 = vld [vmem:[%s39937_s0 + $0x128] ss:$404 sps:$4 sm:$0xff]  }
 0x151   :  { %v3766_v20 = vpop.f32.mrb[23].mxu1  ;;  %8763 = vrot.lane.b32.xlu0 %v33284_v48, %s31949_s30  ;;  %28668 = vmatprep.subr.msk.bf16.mxu0 %vm2972_vm0, %v31667_v6  ;;  %v3184_v6 = vsel %vm2972_vm0, %v31702_v54, 0 }
 0x152   :  { %28670 = vmatprep.subr.msk.bf16.mxu1 %vm2972_vm0, %v31669_v8  ;;  %v31705_v8 = vld [vmem:[%s39937_s0 + $0x124] ss:$404 sps:$4 sm:$0xff]   ;;  %v31708_v20 = vld [vmem:[%s39937_s0 + $0x12c] ss:$404 sps:$4 sm:$0xff]  }
 0x153   :  { %4597 = vmatpush1.bf16.msra.mxu0 %v3166_v22 }
 0x154   :  { %4638 = vmatpush1.bf16.msra.mxu1 %v3172_v26  ;;  %5517 = vrot.lane.b32.xlu1 %v33371_v21, %s31946_s25 }
 0x155   :  { %7089 = vrot.lane.b32.xlu0 %v33371_v21, %s31947_s11  ;;  %4670 = vmatprep.subr.bf16.mxu0 %v31675_v16  ;;  %v31703_v16 = vld [vmem:[%s39937_s0 + $0x120] ss:$404 sps:$4 sm:$0xff]  }
 0x156   :  { %4711 = vmatprep.subr.bf16.mxu1 %v31678_v57  ;;  %28669 = vmatmul.mubr.msk.bf16.vlgmr.msra.gmra.mrb[64].mxu0 %vm2968_vm1, %v33186_v11  ;;  %v31711_v57 = vld [vmem:[%s39937_s0 + $0x44c] ss:$404 sps:$4 sm:$0xff]  }
 0x157   :  { %28671 = vmatmul.mubr.msk.bf16.vlgmr.msra.gmra.mrb[64].mxu1 %vm2968_vm1, %v33186_v11  ;;  %4671 = vmatpush1.bf16.msra.mxu0 %v31673_v28 }
 0x158   :  { %4712 = vmatpush1.bf16.msra.mxu1 %v31676_v29  ;;  %7927 = vrot.lane.b32.xlu1 %v33371_v21, %s31948_s20  ;;  %v33507_v29 = vmax.f32 %v33257_v37, 0.0 }
 0x159   :  { %8765 = vrot.lane.b32.xlu0 %v33371_v21, %s31949_s30  ;;  %4672 = vmatprep.subr.bf16.mxu0 %v31681_v30  ;;  %v33513_v30 = vmax.f32 %v33143_v56, 0.0  ;;  %v31709_v56 = vld [vmem:[%s39937_s0 + $0x448] ss:$404 sps:$4 sm:$0xff]  }
 0x15a   :  { %4713 = vmatprep.subr.bf16.mxu1 %v31684_v39  ;;  %4743 = vmatprep.mubr.bf16.mxu1 %v39945_v2  ;;  %40166 = vst [vmem:[#allocation11_spill] sm:$0xff] %v33507_v29  ;;  %v31712_v39 = vld [vmem:[%s39937_s0 + $0x450] ss:$404 sps:$4 sm:$0xff]  }
 0x15b   :  { %4702 = vmatprep.mubr.bf16.mxu0 %v39945_v2  ;;  %4673 = vmatpush1.bf16.msra.mxu0 %v31679_v33  ;;  %v31714_v33 = vld [vmem:[%s39937_s0 + $0x454] ss:$404 sps:$4 sm:$0xff]  }
 0x15c   :  { %4714 = vmatpush1.bf16.msra.mxu1 %v31682_v38  ;;  %5527 = vrot.lane.b32.xlu1 %v33420_v41, %s31946_s25 }
 0x15d   :  { %5523 = vrot.lane.b32.xlu0 %v33411_v24, %s31946_s25  ;;  %4715 = vmatprep.subr.bf16.mxu1 %v31687_v25 }
 0x15e   :  { %4674 = vmatprep.subr.bf16.mxu0 %v31690_v59  ;;  %v33448_v50 = vpop.permute.xlu1 %5491 }
 0x15f   :  { %v33446_v49 = vpop.permute.xlu0 %5495  ;;  %4675 = vmatpush1.bf16.msra.mxu0 %v31688_v34 }
 0x160   :  { %4716 = vmatpush1.bf16.msra.mxu1 %v31685_v44  ;;  %7095 = vrot.lane.b32.xlu1 %v33411_v24, %s31947_s11 }
 0x161   :  { %7099 = vrot.lane.b32.xlu0 %v33420_v41, %s31947_s11  ;;  %4717 = vmatprep.subr.bf16.mxu1 %v31693_v45  ;;  %v33468_v60 = vpop.f32.mrb[24].mxu0 }
 0x162   :  { %v33463_v55 = vpop.f32.mrb[24].mxu1  ;;  %4676 = vmatprep.subr.bf16.mxu0 %v31696_v47  ;;  %v33474_v0 = vpop.permute.xlu1 %7063 }
 0x163   :  { %v33470_v61 = vpop.permute.xlu0 %7067  ;;  %v33472_v63 = vpop.f32.mrb[25].mxu1  ;;  %40163 = vst [vmem:[#allocation8_spill] sm:$0xff] %v33474_v0  ;;  %4677 = vmatpush1.bf16.msra.mxu0 %v31694_v46 }
 0x164   :  { %40162 = vst [vmem:[#allocation7_spill] sm:$0xff] %v33470_v61  ;;  %v3847_v1 = vpop.f32.mrb[26].mxu1  ;;  %4718 = vmatpush1.bf16.msra.mxu1 %v31691_v32  ;;  %7937 = vrot.lane.b32.xlu1 %v33420_v41, %s31948_s20  ;;  %v33485_v15 = vpop.f32.mrb[25].mxu0 }
 0x165   :  { %v3848_v3 = vpop.f32.mrb[27].mxu1  ;;  %7933 = vrot.lane.b32.xlu0 %v33411_v24, %s31948_s20  ;;  %28672 = vmatprep.subr.msk.bf16.mxu0 %vm2972_vm0, %v31697_v53  ;;  %v3806_v22 = vpop.f32.mrb[26].mxu0 }
 0x166   :  { %28674 = vmatprep.subr.msk.bf16.mxu1 %vm2972_vm0, %v31699_v58  ;;  %v3807_v27 = vpop.f32.mrb[27].mxu0  ;;  %v33500_v28 = vpop.permute.xlu1 %7905 }
 0x167   :  { %v33498_v26 = vpop.permute.xlu0 %7901  ;;  %40165 = vst [vmem:[#allocation10_spill] sm:$0xff] %v33500_v28  ;;  %4679 = vmatpush1.bf16.msra.mxu0 %v3178_v4 }
 0x168   :  { %40164 = vst [vmem:[#allocation9_spill] sm:$0xff] %v33498_v26  ;;  %4720 = vmatpush1.bf16.msra.mxu1 %v3184_v6  ;;  %8771 = vrot.lane.b32.xlu1 %v33411_v24, %s31949_s30 }
 0x169   :  { %8775 = vrot.lane.b32.xlu0 %v33420_v41, %s31949_s30  ;;  %4752 = vmatprep.subr.bf16.mxu0 %v31705_v8 }
 0x16a   :  { %4793 = vmatprep.subr.bf16.mxu1 %v31708_v20  ;;  %28673 = vmatmul.mubr.msk.bf16.vlgmr.msra.gmra.mrb[68].mxu0 %vm2968_vm1, %v33186_v11  ;;  %v33524_v37 = vpop.permute.xlu1 %8739 }
 0x16b   :  { %28675 = vmatmul.mubr.msk.bf16.vlgmr.msra.gmra.mrb[68].mxu1 %vm2968_vm1, %v33186_v11  ;;  %v33520_v38 = vpop.permute.xlu0 %8743  ;;  %40168 = vst [vmem:[#allocation13_spill] sm:$0xff] %v33524_v37  ;;  %4753 = vmatpush1.bf16.msra.mxu0 %v31703_v16 }
 0x16c   :  { %40167 = vst [vmem:[#allocation12_spill] sm:$0xff] %v33520_v38  ;;  %4794 = vmatpush1.bf16.msra.mxu1 %v31706_v19 }
 0x16d   :  { %12 = vsyncpa [#allocation3], 0  ;;  %5521 = vrot.lane.b32.xlu1 %v33513_v30, %s31946_s25  ;;  %5525 = vrot.lane.b32.xlu0 %v33507_v29, %s31946_s25  ;;  %v31717_v25 = vld [vmem:[%s39937_s0 + $0x774] ss:$404 sps:$4 sm:$0xff]   ;;  %v31720_v59 = vld [vmem:[%s39937_s0 + $0x77c] ss:$404 sps:$4 sm:$0xff]  }
 0x16e   :  { %4754 = vmatprep.subr.bf16.mxu0 %v31711_v57  ;;  %4795 = vmatprep.subr.bf16.mxu1 %v31714_v33  ;;  %v33543_v44 = vmax.f32 %v33039_v23, 0.0  ;;  %v33549_v32 = vpop.permute.xlu1 %5497  ;;  %v31715_v45 = vld [vmem:[%s39937_s0 + $0x770] ss:$404 sps:$4 sm:$0xff]   ;;  %v31718_v46 = vld [vmem:[%s39937_s0 + $0x778] ss:$404 sps:$4 sm:$0xff]   ;;  %v33722_v37 = vmax.f32 %v33352_v7, 0.0 }
 0x16f   :  { %v33545_v34 = vpop.permute.xlu0 %5493  ;;  %4825 = vmatprep.mubr.bf16.mxu1 %v39945_v2  ;;  %4784 = vmatprep.mubr.bf16.mxu0 %v39945_v2  ;;  %v31723_v23 = vld [vmem:[%s39937_s0 + $0xa9c] ss:$404 sps:$4 sm:$0xff]   ;;  %v31726_v47 = vld [vmem:[%s39937_s0 + $0xaa4] ss:$404 sps:$4 sm:$0xff]   ;;  %v31724_v58 = vld [vmem:[%s39937_s0 + $0xaa0] ss:$404 sps:$4 sm:$0xff]  }
 0x170   :  { %4755 = vmatpush1.bf16.msra.mxu0 %v31709_v56  ;;  %4796 = vmatpush1.bf16.msra.mxu1 %v31712_v39  ;;  %v31721_v54 = vld [vmem:[%s39937_s0 + $0xa98] ss:$404 sps:$4 sm:$0xff]   ;;  %v31731_v3 = vld [vmem:[%s39937_s0 + $0xdc0] ss:$404 sps:$4 sm:$0x3f]   ;;  %40180 = vst [vmem:[#allocation25_spill] sm:$0xff] %v33722_v37 }
 0x171   :  { %7085 = vrot.lane.b32.xlu1 %v33543_v44, %s31947_s11  ;;  %5513 = vrot.lane.b32.xlu0 %v33543_v44, %s31946_s25  ;;  %v31727_v1 = vld [vmem:[%s39937_s0 + $0xdc4] ss:$404 sps:$4 sm:$0x3f]   ;;  %v31732_v4 = vld [vmem:[%s39937_s0 + $0xdc8] ss:$404 sps:$4 sm:$0x3f]  }
 0x172   :  { %4756 = vmatprep.subr.bf16.mxu0 %v31717_v25  ;;  %4797 = vmatprep.subr.bf16.mxu1 %v31720_v59  ;;  %v33572_v53 = vpop.permute.xlu1 %7065  ;;  %v31729_v8 = vld [vmem:[%s39937_s0 + $0xdcc] ss:$404 sps:$4 sm:$0x3f]   ;;  %v3190_v33 = vsel %vm2972_vm0, %v31731_v3, 0  ;;  %v3196_v56 = vsel %vm2972_vm0, %v31732_v4, 0  ;;  %v33640_v4 = vmax.f32 %v33255_v35, 0.0 }
 0x173   :  { %v33567_v52 = vpop.permute.xlu0 %7069  ;;  %40170 = vst [vmem:[#allocation15_spill] sm:$0xff] %v33572_v53  ;;  %v31735_v25 = vld [vmem:[%s39937_s0 + $0x134] ss:$404 sps:$4 sm:$0xff]   ;;  %v31738_v59 = vld [vmem:[%s39937_s0 + $0x13c] ss:$404 sps:$4 sm:$0xff]   ;;  %vm5533_vm2 = vcmask 1039360  }
 0x174   :  { %40169 = vst [vmem:[#allocation14_spill] sm:$0xff] %v33567_v52  ;;  %4757 = vmatpush1.bf16.msra.mxu0 %v31715_v45  ;;  %4798 = vmatpush1.bf16.msra.mxu1 %v31718_v46  ;;  %v31744_v3 = vld [vmem:[%s39937_s0 + $0x464] ss:$404 sps:$4 sm:$0xff]   ;;  %v31742_v35 = vld [vmem:[%s39937_s0 + $0x460] ss:$404 sps:$4 sm:$0xff]   ;;  %vm31951_vm3 = vmmov 0  }
 0x175   :  { %7931 = vrot.lane.b32.xlu1 %v33513_v30, %s31948_s20  ;;  %7093 = vrot.lane.b32.xlu0 %v33513_v30, %s31947_s11  ;;  %v33595_v16 = vpop.f32.mrb[28].mxu0  ;;  %vm5554_vm4 = vcmask 48128   ;;  %vm7105_vm5 = vcmask 1031168   ;;  %vm7943_vm6 = vcmask 1022976   ;;  %vm8781_vm7 = vcmask 1014784  }
 0x176   :  { %v33590_v6 = vpop.f32.mrb[28].mxu1  ;;  %4758 = vmatprep.subr.bf16.mxu0 %v31723_v23  ;;  %4799 = vmatprep.subr.bf16.mxu1 %v31726_v47  ;;  %v33601_v22 = vpop.permute.xlu1 %7907  ;;  %vm28083_vm8 = vcmask 33792  }
 0x177   :  { %v33597_v19 = vpop.f32.mrb[29].mxu1  ;;  %v33599_v20 = vpop.permute.xlu0 %7903  ;;  %40172 = vst [vmem:[#allocation17_spill] sm:$0xff] %v33601_v22 }
 0x178   :  { %40171 = vst [vmem:[#allocation16_spill] sm:$0xff] %v33599_v20  ;;  %v3929_v27 = vpop.f32.mrb[30].mxu1  ;;  %4759 = vmatpush1.bf16.msra.mxu0 %v31721_v54  ;;  %4800 = vmatpush1.bf16.msra.mxu1 %v31724_v58  ;;  %v33609_v39 = vpop.f32.mrb[29].mxu0  ;;  %v31733_v54 = vld [vmem:[%s39937_s0 + $0x130] ss:$404 sps:$4 sm:$0xff]  }
 0x179   :  { %v3930_v57 = vpop.f32.mrb[31].mxu1  ;;  %8761 = vrot.lane.b32.xlu1 %v33543_v44, %s31949_s30  ;;  %7923 = vrot.lane.b32.xlu0 %v33543_v44, %s31948_s20  ;;  %v3888_v45 = vpop.f32.mrb[30].mxu0  ;;  %v31736_v58 = vld [vmem:[%s39937_s0 + $0x138] ss:$404 sps:$4 sm:$0xff]  }
 0x17a   :  { %28676 = vmatprep.subr.msk.bf16.mxu0 %vm2972_vm0, %v31727_v1  ;;  %28678 = vmatprep.subr.msk.bf16.mxu1 %vm2972_vm0, %v31729_v8  ;;  %v3889_v23 = vpop.f32.mrb[31].mxu0  ;;  %v33621_v47 = vpop.permute.xlu1 %8741  ;;  %v31741_v1 = vld [vmem:[%s39937_s0 + $0x45c] ss:$404 sps:$4 sm:$0xff]   ;;  %v31739_v57 = vld [vmem:[%s39937_s0 + $0x458] ss:$404 sps:$4 sm:$0xff]  }
 0x17b   :  { %v33619_v46 = vpop.permute.xlu0 %8745  ;;  %40174 = vst [vmem:[#allocation19_spill] sm:$0xff] %v33621_v47  ;;  %v31745_v45 = vld [vmem:[%s39937_s0 + $0x780] ss:$404 sps:$4 sm:$0xff]   ;;  %v31748_v23 = vld [vmem:[%s39937_s0 + $0x788] ss:$404 sps:$4 sm:$0xff]  }
 0x17c   :  { %40173 = vst [vmem:[#allocation18_spill] sm:$0xff] %v33619_v46  ;;  %4761 = vmatpush1.bf16.msra.mxu0 %v3190_v33  ;;  %4802 = vmatpush1.bf16.msra.mxu1 %v3196_v56  ;;  %v31747_v33 = vld [vmem:[%s39937_s0 + $0x784] ss:$404 sps:$4 sm:$0xff]   ;;  %v31750_v56 = vld [vmem:[%s39937_s0 + $0x78c] ss:$404 sps:$4 sm:$0xff]  }
 0x17d   :  { %8769 = vrot.lane.b32.xlu1 %v33513_v30, %s31949_s30  ;;  %7935 = vrot.lane.b32.xlu0 %v33507_v29, %s31948_s20  ;;  %v31759_v46 = vld [vmem:[%s39937_s0 + $0xddc] ss:$404 sps:$4 sm:$0x3f]  }
 0x17e   :  { %4834 = vmatprep.subr.bf16.mxu0 %v31735_v25  ;;  %4875 = vmatprep.subr.bf16.mxu1 %v31738_v59  ;;  %v33648_v27 = vpop.permute.xlu1 %7071 }
 0x17f   :  { %28679 = vmatmul.mubr.msk.bf16.vlgmr.msra.gmra.mrb[72].mxu1 %vm2968_vm1, %v33186_v11  ;;  %v33644_v8 = vpop.permute.xlu0 %5499  ;;  %28677 = vmatmul.mubr.msk.bf16.vlgmr.msra.gmra.mrb[72].mxu0 %vm2968_vm1, %v33186_v11  ;;  %40175 = vst [vmem:[#allocation20_spill] sm:$0xff] %v33648_v27 }
 0x180   :  { %4835 = vmatpush1.bf16.msra.mxu0 %v31733_v54  ;;  %4876 = vmatpush1.bf16.msra.mxu1 %v31736_v58  ;;  %v31753_v54 = vld [vmem:[%s39937_s0 + $0xaac] ss:$404 sps:$4 sm:$0xff]   ;;  %v31756_v58 = vld [vmem:[%s39937_s0 + $0xab4] ss:$404 sps:$4 sm:$0xff]  }
 0x181   :  { %7097 = vrot.lane.b32.xlu1 %v33507_v29, %s31947_s11  ;;  %5529 = vrot.lane.b32.xlu0 %v33640_v4, %s31946_s25 }
 0x182   :  { %4836 = vmatprep.subr.bf16.mxu0 %v31741_v1  ;;  %4877 = vmatprep.subr.bf16.mxu1 %v31744_v3  ;;  %v33670_v59 = vpop.permute.xlu1 %7075  ;;  %v31751_v3 = vld [vmem:[%s39937_s0 + $0xaa8] ss:$404 sps:$4 sm:$0xff]  }
 0x183   :  { %v33666_v25 = vpop.permute.xlu0 %5503  ;;  %4907 = vmatprep.mubr.bf16.mxu1 %v39945_v2  ;;  %4866 = vmatprep.mubr.bf16.mxu0 %v39945_v2  ;;  %40176 = vst [vmem:[#allocation21_spill] sm:$0xff] %v33670_v59  ;;  %v33709_v2 = vmax.f32 %v33357_v9, 0.0 }
 0x184   :  { %4837 = vmatpush1.bf16.msra.mxu0 %v31739_v57  ;;  %4878 = vmatpush1.bf16.msra.mxu1 %v31742_v35  ;;  %v31754_v57 = vld [vmem:[%s39937_s0 + $0xab0] ss:$404 sps:$4 sm:$0xff]  }
 0x185   :  { %8773 = vrot.lane.b32.xlu1 %v33507_v29, %s31949_s30  ;;  %7939 = vrot.lane.b32.xlu0 %v33640_v4, %s31948_s20  ;;  %40179 = vst [vmem:[#allocation24_spill] sm:$0xff] %v33709_v2 }
 0x186   :  { %4838 = vmatprep.subr.bf16.mxu0 %v31747_v33  ;;  %4879 = vmatprep.subr.bf16.mxu1 %v31750_v56  ;;  %v33696_v35 = vpop.permute.xlu1 %8747  ;;  %v31757_v33 = vld [vmem:[%s39937_s0 + $0xdd4] ss:$404 sps:$4 sm:$0x3f]   ;;  %v31761_v56 = vld [vmem:[%s39937_s0 + $0xdd0] ss:$404 sps:$4 sm:$0x3f]  }
 0x187   :  { %v33688_v1 = vpop.permute.xlu0 %7909  ;;  %40178 = vst [vmem:[#allocation23_spill] sm:$0xff] %v33696_v35 }
 0x188   :  { %40177 = vst [vmem:[#allocation22_spill] sm:$0xff] %v33688_v1  ;;  %4839 = vmatpush1.bf16.msra.mxu0 %v31745_v45  ;;  %4880 = vmatpush1.bf16.msra.mxu1 %v31748_v23  ;;  %v31762_v45 = vld [vmem:[%s39937_s0 + $0xdd8] ss:$404 sps:$4 sm:$0x3f]  }
 0x189   :  { %7101 = vrot.lane.b32.xlu1 %v33640_v4, %s31947_s11  ;;  %8777 = vrot.lane.b32.xlu0 %v33640_v4, %s31949_s30  ;;  %v33719_v35 = vpop.f32.mrb[32].mxu0  ;;  %v3208_v7 = vsel %vm2972_vm0, %v31762_v45, 0  ;;  %v31771_v45 = vld [vmem:[%s39937_s0 + $0x46c] ss:$404 sps:$4 sm:$0xff]  }
 0x18a   :  { %v33714_v23 = vpop.f32.mrb[32].mxu1  ;;  %4840 = vmatprep.subr.bf16.mxu0 %v31753_v54  ;;  %4881 = vmatprep.subr.bf16.mxu1 %v31756_v58  ;;  %v33728_v38 = vpop.permute.xlu1 %8751  ;;  %v3202_v58 = vsel %vm2972_vm0, %v31761_v56, 0 }
 0x18b   :  { %v33724_v47 = vpop.f32.mrb[33].mxu1  ;;  %v33726_v9 = vpop.permute.xlu0 %7913  ;;  %40182 = vst [vmem:[#allocation27_spill] sm:$0xff] %v33728_v38 }
 0x18c   :  { %40181 = vst [vmem:[#allocation26_spill] sm:$0xff] %v33726_v9  ;;  %v4011_v22 = vpop.f32.mrb[34].mxu1  ;;  %4841 = vmatpush1.bf16.msra.mxu0 %v31751_v3  ;;  %4882 = vmatpush1.bf16.msra.mxu1 %v31754_v57  ;;  %v33736_v1 = vpop.f32.mrb[33].mxu0  ;;  %v31768_v3 = vld [vmem:[%s39937_s0 + $0x14c] ss:$404 sps:$4 sm:$0xff]  }
 0x18d   :  { %v4012_v54 = vpop.f32.mrb[35].mxu1  ;;  %10374 = vrot.lane.b32.xlu1 %v33722_v37, %s31946_s25  ;;  %5531 = vrot.lane.b32.xlu0 %v33709_v2, %s31946_s25  ;;  %v31765_v22 = vld [vmem:[%s39937_s0 + $0x144] ss:$404 sps:$4 sm:$0xff]   ;;  %v3970_v57 = vpop.f32.mrb[34].mxu0 }
 0x18e   :  { %28680 = vmatprep.subr.msk.bf16.mxu0 %vm2972_vm0, %v31757_v33  ;;  %28682 = vmatprep.subr.msk.bf16.mxu1 %vm2972_vm0, %v31759_v46  ;;  %v3971_v56 = vpop.f32.mrb[35].mxu0  ;;  %v33748_v38 = vpop.permute.xlu1 %5501  ;;  %v31763_v46 = vld [vmem:[%s39937_s0 + $0x140] ss:$404 sps:$4 sm:$0xff]   ;;  %v31766_v33 = vld [vmem:[%s39937_s0 + $0x148] ss:$404 sps:$4 sm:$0xff]  }
 0x18f   :  { %v33746_v54 = vpop.permute.xlu0 %7073  ;;  %v31780_v56 = vld [vmem:[%s39937_s0 + $0x79c] ss:$404 sps:$4 sm:$0xff]  }
 0x190   :  { %40183 = vst [vmem:[#allocation28_spill] sm:$0xff] %v33746_v54  ;;  %4843 = vmatpush1.bf16.msra.mxu0 %v3202_v58  ;;  %4884 = vmatpush1.bf16.msra.mxu1 %v3208_v7  ;;  %v31774_v58 = vld [vmem:[%s39937_s0 + $0x474] ss:$404 sps:$4 sm:$0xff]  }
 0x191   :  { %7103 = vrot.lane.b32.xlu1 %v33709_v2, %s31947_s11  ;;  %11209 = vrot.lane.b32.xlu0 %v33722_v37, %s31947_s11 }
 0x192   :  { %4916 = vmatprep.subr.bf16.mxu0 %v31765_v22  ;;  %4957 = vmatprep.subr.bf16.mxu1 %v31768_v3  ;;  %v33772_v57 = vpop.permute.xlu1 %5505  ;;  %v31769_v22 = vld [vmem:[%s39937_s0 + $0x468] ss:$404 sps:$4 sm:$0xff]   ;;  %v31772_v3 = vld [vmem:[%s39937_s0 + $0x470] ss:$404 sps:$4 sm:$0xff]  }
 0x193   :  { %28683 = vmatmul.mubr.msk.bf16.vlgmr.msra.gmra.mrb[76].mxu1 %vm2968_vm1, %v33186_v11  ;;  %v33768_v7 = vpop.permute.xlu0 %7077  ;;  %28681 = vmatmul.mubr.msk.bf16.vlgmr.msra.gmra.mrb[76].mxu0 %vm2968_vm1, %v33186_v11  ;;  %v31777_v11 = vld [vmem:[%s39937_s0 + $0x794] ss:$404 sps:$4 sm:$0xff]  }
 0x194   :  { %40184 = vst [vmem:[#allocation29_spill] sm:$0xff] %v33768_v7  ;;  %4917 = vmatpush1.bf16.msra.mxu0 %v31763_v46  ;;  %4958 = vmatpush1.bf16.msra.mxu1 %v31766_v33  ;;  %v40186_v33 = vmov 0  }
 0x195   :  { %12044 = vrot.lane.b32.xlu1 %v33722_v37, %s31948_s20  ;;  %7941 = vrot.lane.b32.xlu0 %v33709_v2, %s31948_s20 }
 0x196   :  { %4918 = vmatprep.subr.bf16.mxu0 %v31771_v45  ;;  %4959 = vmatprep.subr.bf16.mxu1 %v31774_v58  ;;  %v33794_v9 = vpop.permute.xlu1 %7911  ;;  %v31775_v45 = vld [vmem:[%s39937_s0 + $0x790] ss:$404 sps:$4 sm:$0xff]   ;;  %v31778_v58 = vld [vmem:[%s39937_s0 + $0x798] ss:$404 sps:$4 sm:$0xff]  }
 0x197   :  { %v33790_v46 = vpop.permute.xlu0 %8749  ;;  %4989 = vmatprep.mubr.bf16.mxu1 %v40186_v33  ;;  %4948 = vmatprep.mubr.bf16.mxu0 %v40186_v33  ;;  %40187 = vst [vmem:[#allocation31_spill] sm:$0xff] %v33794_v9  ;;  %v33816_v9 = vmax.f32 %v33359_v13, 0.0  ;;  %v31791_v13 = vld [vmem:[%s39937_s0 + $0xde0] ss:$404 sps:$4 sm:$0x3f]  }
 0x198   :  { %40185 = vst [vmem:[#allocation30_spill] sm:$0xff] %v33790_v46  ;;  %4919 = vmatpush1.bf16.msra.mxu0 %v31769_v22  ;;  %4960 = vmatpush1.bf16.msra.mxu1 %v31772_v3  ;;  %v33807_v46 = vmax.f32 %v33361_v14, 0.0  ;;  %v31783_v22 = vld [vmem:[%s39937_s0 + $0xabc] ss:$404 sps:$4 sm:$0xff]   ;;  %v31786_v3 = vld [vmem:[%s39937_s0 + $0xac4] ss:$404 sps:$4 sm:$0xff]  }
 0x199   :  { %8779 = vrot.lane.b32.xlu1 %v33709_v2, %s31949_s30  ;;  %12879 = vrot.lane.b32.xlu0 %v33722_v37, %s31949_s30  ;;  %40189 = vst [vmem:[#allocation33_spill] sm:$0xff] %v33816_v9  ;;  %v31781_v14 = vld [vmem:[%s39937_s0 + $0xab8] ss:$404 sps:$4 sm:$0xff]  }
 0x19a   :  { %40188 = vst [vmem:[#allocation32_spill] sm:$0xff] %v33807_v46  ;;  %4920 = vmatprep.subr.bf16.mxu0 %v31777_v11  ;;  %4961 = vmatprep.subr.bf16.mxu1 %v31780_v56  ;;  %v33823_v37 = vpop.permute.xlu1 %7915  ;;  %v31784_v11 = vld [vmem:[%s39937_s0 + $0xac0] ss:$404 sps:$4 sm:$0xff]   ;;  %v31787_v56 = vld [vmem:[%s39937_s0 + $0xde4] ss:$404 sps:$4 sm:$0x3f]  }
 0x19b   :  { %v33818_v2 = vpop.permute.xlu0 %8753  ;;  %40191 = vst [vmem:[#allocation35_spill] sm:$0xff] %v33823_v37 }
 0x19c   :  { %40190 = vst [vmem:[#allocation34_spill] sm:$0xff] %v33818_v2  ;;  %4921 = vmatpush1.bf16.msra.mxu0 %v31775_v45  ;;  %4962 = vmatpush1.bf16.msra.mxu1 %v31778_v58  ;;  %v31792_v45 = vld [vmem:[%s39937_s0 + $0xde8] ss:$404 sps:$4 sm:$0x3f]  }
 0x19d   :  { %10376 = vrot.lane.b32.xlu1 %v33816_v9, %s31946_s25  ;;  %10372 = vrot.lane.b32.xlu0 %v33807_v46, %s31946_s25  ;;  %v31789_v2 = vld [vmem:[%s39937_s0 + $0xdec] ss:$404 sps:$4 sm:$0x3f]   ;;  %v33846_v37 = vpop.f32.mrb[36].mxu0 }
 0x19e   :  { %v33841_v58 = vpop.f32.mrb[36].mxu1  ;;  %4922 = vmatprep.subr.bf16.mxu0 %v31783_v22  ;;  %4963 = vmatprep.subr.bf16.mxu1 %v31786_v3  ;;  %v33852_v28 = vpop.permute.xlu1 %7079  ;;  %v3214_v22 = vsel %vm2972_vm0, %v31791_v13, 0  ;;  %v3220_v3 = vsel %vm2972_vm0, %v31792_v45, 0  ;;  %v31801_v45 = vld [vmem:[%s39937_s0 + $0x47c] ss:$404 sps:$4 sm:$0xff]  }
 0x19f   :  { %v33848_v26 = vpop.f32.mrb[37].mxu1  ;;  %v33850_v20 = vpop.permute.xlu0 %5507  ;;  %40192 = vst [vmem:[#allocation36_spill] sm:$0xff] %v33852_v28 }
 0x1a0   :  { %v4093_v7 = vpop.f32.mrb[38].mxu1  ;;  %4923 = vmatpush1.bf16.msra.mxu0 %v31781_v14  ;;  %4964 = vmatpush1.bf16.msra.mxu1 %v31784_v11  ;;  %v33860_v59 = vpop.f32.mrb[37].mxu0 }
 0x1a1   :  { %v4094_v54 = vpop.f32.mrb[39].mxu1  ;;  %11207 = vrot.lane.b32.xlu1 %v33807_v46, %s31947_s11  ;;  %11211 = vrot.lane.b32.xlu0 %v33816_v9, %s31947_s11  ;;  %v31798_v7 = vld [vmem:[%s39937_s0 + $0x15c] ss:$404 sps:$4 sm:$0xff]   ;;  %v4052_v14 = vpop.f32.mrb[38].mxu0 }
 0x1a2   :  { %28684 = vmatprep.subr.msk.bf16.mxu0 %vm2972_vm0, %v31787_v56  ;;  %28686 = vmatprep.subr.msk.bf16.mxu1 %vm2972_vm0, %v31789_v2  ;;  %v31795_v54 = vld [vmem:[%s39937_s0 + $0x154] ss:$404 sps:$4 sm:$0xff]   ;;  %v4053_v13 = vpop.f32.mrb[39].mxu0  ;;  %v33872_v28 = vpop.permute.xlu1 %7083  ;;  %v31793_v2 = vld [vmem:[%s39937_s0 + $0x150] ss:$404 sps:$4 sm:$0xff]  }
 0x1a3   :  { %v33870_v11 = vpop.permute.xlu0 %5511  ;;  %v31796_v56 = vld [vmem:[%s39937_s0 + $0x158] ss:$404 sps:$4 sm:$0xff]   ;;  %v31802_v13 = vld [vmem:[%s39937_s0 + $0x480] ss:$404 sps:$4 sm:$0xff]  }
 0x1a4   :  { %4925 = vmatpush1.bf16.msra.mxu0 %v3214_v22  ;;  %4966 = vmatpush1.bf16.msra.mxu1 %v3220_v3  ;;  %v31804_v22 = vld [vmem:[%s39937_s0 + $0x484] ss:$404 sps:$4 sm:$0xff]   ;;  %v33893_v3 = vld [vmem:[%s39939_s2] sm:$0x7] }
 0x1a5   :  { %12046 = vrot.lane.b32.xlu1 %v33816_v9, %s31948_s20  ;;  %12042 = vrot.lane.b32.xlu0 %v33807_v46, %s31948_s20 }
 0x1a6   :  { %4998 = vmatprep.subr.bf16.mxu0 %v31795_v54  ;;  %5039 = vmatprep.subr.bf16.mxu1 %v31798_v7  ;;  %v33901_v54 = vpop.permute.xlu1 %8755  ;;  %v31799_v7 = vld [vmem:[%s39937_s0 + $0x478] ss:$404 sps:$4 sm:$0xff]  }
 0x1a7   :  { %28687 = vmatmul.mubr.msk.bf16.vlgmr.msra.gmra.mrb[80].mxu1 %vm2968_vm1, %v33893_v3  ;;  %v33897_v14 = vpop.permute.xlu0 %7917  ;;  %28685 = vmatmul.mubr.msk.bf16.vlgmr.msra.gmra.mrb[80].mxu0 %vm2968_vm1, %v33893_v3  ;;  %40194 = vst [vmem:[#allocation38_spill] sm:$0xff] %v33901_v54 }
 0x1a8   :  { %40193 = vst [vmem:[#allocation37_spill] sm:$0xff] %v33897_v14  ;;  %4999 = vmatpush1.bf16.msra.mxu0 %v31793_v2  ;;  %5040 = vmatpush1.bf16.msra.mxu1 %v31796_v56  ;;  %v33914_v14 = vmax.f32 %v33468_v60, 0.0  ;;  %v31807_v2 = vld [vmem:[%s39937_s0 + $0x7a4] ss:$404 sps:$4 sm:$0xff]   ;;  %v31810_v56 = vld [vmem:[%s39937_s0 + $0x7ac] ss:$404 sps:$4 sm:$0xff]  }
 0x1a9   :  { %12877 = vrot.lane.b32.xlu1 %v33807_v46, %s31949_s30  ;;  %12881 = vrot.lane.b32.xlu0 %v33816_v9, %s31949_s30  ;;  %v31805_v60 = vld [vmem:[%s39937_s0 + $0x7a0] ss:$404 sps:$4 sm:$0xff]  }
 0x1aa   :  { %40195 = vst [vmem:[#allocation39_spill] sm:$0xff] %v33914_v14  ;;  %5000 = vmatprep.subr.bf16.mxu0 %v31801_v45  ;;  %5041 = vmatprep.subr.bf16.mxu1 %v31804_v22  ;;  %v33926_v9 = vpop.permute.xlu1 %8759  ;;  %v31808_v45 = vld [vmem:[%s39937_s0 + $0x7a8] ss:$404 sps:$4 sm:$0xff]   ;;  %v31813_v22 = vld [vmem:[%s39937_s0 + $0xacc] ss:$404 sps:$4 sm:$0xff]  }
 0x1ab   :  { %v33922_v54 = vpop.permute.xlu0 %7921  ;;  %5071 = vmatprep.mubr.bf16.mxu1 %v40186_v33  ;;  %5030 = vmatprep.mubr.bf16.mxu0 %v40186_v33  ;;  %40197 = vst [vmem:[#allocation41_spill] sm:$0xff] %v33926_v9  ;;  %v31811_v9 = vld [vmem:[%s39937_s0 + $0xac8] ss:$404 sps:$4 sm:$0xff]  }
 0x1ac   :  { %40196 = vst [vmem:[#allocation40_spill] sm:$0xff] %v33922_v54  ;;  %5001 = vmatpush1.bf16.msra.mxu0 %v31799_v7  ;;  %5042 = vmatpush1.bf16.msra.mxu1 %v31802_v13  ;;  %v31816_v7 = vld [vmem:[%s39937_s0 + $0xad4] ss:$404 sps:$4 sm:$0xff]   ;;  %v33945_v13 = vmax.f32 %v33463_v55, 0.0 }
 0x1ad   :  { %11213 = vrot.lane.b32.xlu1 %v33914_v14, %s31947_s11  ;;  %10378 = vrot.lane.b32.xlu0 %v33914_v14, %s31946_s25  ;;  %v31821_v55 = vld [vmem:[%s39937_s0 + $0xdf0] ss:$404 sps:$4 sm:$0x3f]  }
 0x1ae   :  { %5002 = vmatprep.subr.bf16.mxu0 %v31807_v2  ;;  %5043 = vmatprep.subr.bf16.mxu1 %v31810_v56  ;;  %40198 = vst [vmem:[#allocation42_spill] sm:$0xff] %v33945_v13  ;;  %v33952_v52 = vpop.permute.xlu1 %5509  ;;  %v31814_v2 = vld [vmem:[%s39937_s0 + $0xad0] ss:$404 sps:$4 sm:$0xff]   ;;  %v31817_v56 = vld [vmem:[%s39937_s0 + $0xdf4] ss:$404 sps:$4 sm:$0x3f]  }
 0x1af   :  { %v33947_v46 = vpop.permute.xlu0 %7081 }
 0x1b0   :  { %40199 = vst [vmem:[#allocation43_spill] sm:$0xff] %v33947_v46  ;;  %5003 = vmatpush1.bf16.msra.mxu0 %v31805_v60  ;;  %5044 = vmatpush1.bf16.msra.mxu1 %v31808_v45  ;;  %v31822_v60 = vld [vmem:[%s39937_s0 + $0xdf8] ss:$404 sps:$4 sm:$0x3f]  }
 0x1b1   :  { %11217 = vrot.lane.b32.xlu1 %v33945_v13, %s31947_s11  ;;  %10382 = vrot.lane.b32.xlu0 %v33945_v13, %s31946_s25  ;;  %v31819_v46 = vld [vmem:[%s39937_s0 + $0xdfc] ss:$404 sps:$4 sm:$0x3f]   ;;  %v33975_v27 = vpop.f32.mrb[40].mxu0 }
 0x1b2   :  { %v33970_v45 = vpop.f32.mrb[40].mxu1  ;;  %5004 = vmatprep.subr.bf16.mxu0 %v31813_v22  ;;  %5045 = vmatprep.subr.bf16.mxu1 %v31816_v7  ;;  %v33981_v53 = vpop.permute.xlu1 %7919  ;;  %v3226_v22 = vsel %vm2972_vm0, %v31821_v55, 0  ;;  %v3232_v7 = vsel %vm2972_vm0, %v31822_v60, 0  ;;  %v34014_v60 = vmax.f32 %v33485_v15, 0.0 }
 0x1b3   :  { %v33977_v54 = vpop.f32.mrb[41].mxu1  ;;  %v33979_v0 = vpop.permute.xlu0 %8757  ;;  %40202 = vst [vmem:[#allocation46_spill] sm:$0xff] %v33981_v53  ;;  %v31841_v53 = vld [vmem:[%s39937_s0 + $0xad8] ss:$404 sps:$4 sm:$0xff]  }
 0x1b4   :  { %40200 = vst [vmem:[#allocation44_spill] sm:$0xff] %v33977_v54  ;;  %40201 = vst [vmem:[#allocation45_spill] sm:$0xff] %v33979_v0  ;;  %v4175_v61 = vpop.f32.mrb[42].mxu1  ;;  %5005 = vmatpush1.bf16.msra.mxu0 %v31811_v9  ;;  %5046 = vmatpush1.bf16.msra.mxu1 %v31814_v2  ;;  %v33989_v29 = vpop.f32.mrb[41].mxu0 }
 0x1b5   :  { %v4176_v24 = vpop.f32.mrb[43].mxu1  ;;  %12883 = vrot.lane.b32.xlu1 %v33914_v14, %s31949_s30  ;;  %12048 = vrot.lane.b32.xlu0 %v33914_v14, %s31948_s20  ;;  %40203 = vst [vmem:[#allocation47_spill] sm:$0xff] %v33989_v29  ;;  %v31828_v61 = vld [vmem:[%s39937_s0 + $0x16c] ss:$404 sps:$4 sm:$0xff]   ;;  %v4134_v9 = vpop.f32.mrb[42].mxu0  ;;  %40204 = vst [vmem:[#allocation48_spill] sm:$0xff] %v34014_v60 }
 0x1b6   :  { %28688 = vmatprep.subr.msk.bf16.mxu0 %vm2972_vm0, %v31817_v56  ;;  %28690 = vmatprep.subr.msk.bf16.mxu1 %vm2972_vm0, %v31819_v46  ;;  %v31825_v24 = vld [vmem:[%s39937_s0 + $0x164] ss:$404 sps:$4 sm:$0xff]   ;;  %v4135_v55 = vpop.f32.mrb[43].mxu0  ;;  %v34001_v14 = vpop.permute.xlu1 %5515  ;;  %v31823_v46 = vld [vmem:[%s39937_s0 + $0x160] ss:$404 sps:$4 sm:$0xff]  }
 0x1b7   :  { %v33999_v2 = vpop.permute.xlu0 %5519  ;;  %v31826_v56 = vld [vmem:[%s39937_s0 + $0x168] ss:$404 sps:$4 sm:$0xff]  }
 0x1b8   :  { %5007 = vmatpush1.bf16.msra.mxu0 %v3226_v22  ;;  %5048 = vmatpush1.bf16.msra.mxu1 %v3232_v7  ;;  %v31831_v22 = vld [vmem:[%s39937_s0 + $0x48c] ss:$404 sps:$4 sm:$0xff]   ;;  %v31834_v7 = vld [vmem:[%s39937_s0 + $0x494] ss:$404 sps:$4 sm:$0xff]  }
 0x1b9   :  { %12887 = vrot.lane.b32.xlu1 %v33945_v13, %s31949_s30  ;;  %12052 = vrot.lane.b32.xlu0 %v33945_v13, %s31948_s20  ;;  %v31837_v55 = vld [vmem:[%s39937_s0 + $0x7b4] ss:$404 sps:$4 sm:$0xff]  }
 0x1ba   :  { %5080 = vmatprep.subr.bf16.mxu0 %v31825_v24  ;;  %5121 = vmatprep.subr.bf16.mxu1 %v31828_v61  ;;  %v34028_v15 = vpop.permute.xlu1 %7091  ;;  %v31829_v24 = vld [vmem:[%s39937_s0 + $0x488] ss:$404 sps:$4 sm:$0xff]   ;;  %v31832_v61 = vld [vmem:[%s39937_s0 + $0x490] ss:$404 sps:$4 sm:$0xff]  }
 0x1bb   :  { %28691 = vmatmul.mubr.msk.bf16.vlgmr.msra.gmra.mrb[84].mxu1 %vm2968_vm1, %v33893_v3  ;;  %v34024_v9 = vpop.permute.xlu0 %7087  ;;  %28689 = vmatmul.mubr.msk.bf16.vlgmr.msra.gmra.mrb[84].mxu0 %vm2968_vm1, %v33893_v3  ;;  %40205 = vst [vmem:[#allocation49_spill] sm:$0xff] %v34028_v15 }
 0x1bc   :  { %5081 = vmatpush1.bf16.msra.mxu0 %v31823_v46  ;;  %5122 = vmatpush1.bf16.msra.mxu1 %v31826_v56  ;;  %v31840_v46 = vld [vmem:[%s39937_s0 + $0x7bc] ss:$404 sps:$4 sm:$0xff]   ;;  %v34047_v56 = vmax.f32 %v33472_v63, 0.0 }
 0x1bd   :  { %11215 = vrot.lane.b32.xlu0 %v34014_v60, %s31947_s11  ;;  %10380 = vrot.lane.b32.xlu1 %v34014_v60, %s31946_s25  ;;  %v31843_v63 = vld [vmem:[%s39937_s0 + $0xadc] ss:$404 sps:$4 sm:$0xff]  }
 0x1be   :  { %5082 = vmatprep.subr.bf16.mxu0 %v31831_v22  ;;  %5123 = vmatprep.subr.bf16.mxu1 %v31834_v7  ;;  %40206 = vst [vmem:[#allocation50_spill] sm:$0xff] %v34047_v56  ;;  %v34053_v0 = vpop.permute.xlu1 %7925  ;;  %v31835_v22 = vld [vmem:[%s39937_s0 + $0x7b0] ss:$404 sps:$4 sm:$0xff]   ;;  %v31838_v7 = vld [vmem:[%s39937_s0 + $0x7b8] ss:$404 sps:$4 sm:$0xff]  }
 0x1bf   :  { %v34049_v13 = vpop.permute.xlu0 %7929  ;;  %5153 = vmatprep.mubr.bf16.mxu1 %v40186_v33  ;;  %5112 = vmatprep.mubr.bf16.mxu0 %v40186_v33  ;;  %40208 = vst [vmem:[#allocation52_spill] sm:$0xff] %v34053_v0 }
 0x1c0   :  { %40207 = vst [vmem:[#allocation51_spill] sm:$0xff] %v34049_v13  ;;  %5083 = vmatpush1.bf16.msra.mxu0 %v31829_v24  ;;  %5124 = vmatpush1.bf16.msra.mxu1 %v31832_v61  ;;  %v31846_v24 = vld [vmem:[%s39937_s0 + $0xae4] ss:$404 sps:$4 sm:$0xff]  }
 0x1c1   :  { %11219 = vrot.lane.b32.xlu0 %v34047_v56, %s31947_s11  ;;  %10384 = vrot.lane.b32.xlu1 %v34047_v56, %s31946_s25 }
 0x1c2   :  { %5084 = vmatprep.subr.bf16.mxu0 %v31837_v55  ;;  %5125 = vmatprep.subr.bf16.mxu1 %v31840_v46  ;;  %v34076_v13 = vpop.permute.xlu1 %8767  ;;  %v31844_v55 = vld [vmem:[%s39937_s0 + $0xae0] ss:$404 sps:$4 sm:$0xff]   ;;  %v31847_v46 = vld [vmem:[%s39937_s0 + $0xe04] ss:$404 sps:$4 sm:$0x3f]  }
 0x1c3   :  { %v34071_v61 = vpop.permute.xlu0 %8763  ;;  %40210 = vst [vmem:[#allocation54_spill] sm:$0xff] %v34076_v13  ;;  %v31851_v13 = vld [vmem:[%s39937_s0 + $0xe00] ss:$404 sps:$4 sm:$0x3f]  }
 0x1c4   :  { %40209 = vst [vmem:[#allocation53_spill] sm:$0xff] %v34071_v61  ;;  %5085 = vmatpush1.bf16.msra.mxu0 %v31835_v22  ;;  %5126 = vmatpush1.bf16.msra.mxu1 %v31838_v7  ;;  %v31852_v22 = vld [vmem:[%s39937_s0 + $0xe08] ss:$404 sps:$4 sm:$0x3f]  }
 0x1c5   :  { %12885 = vrot.lane.b32.xlu0 %v34014_v60, %s31949_s30  ;;  %12050 = vrot.lane.b32.xlu1 %v34014_v60, %s31948_s20  ;;  %v31849_v61 = vld [vmem:[%s39937_s0 + $0xe0c] ss:$404 sps:$4 sm:$0x3f]   ;;  %v34099_v0 = vpop.f32.mrb[44].mxu0 }
 0x1c6   :  { %v34094_v7 = vpop.f32.mrb[44].mxu1  ;;  %5086 = vmatprep.subr.bf16.mxu0 %v31843_v63  ;;  %5127 = vmatprep.subr.bf16.mxu1 %v31846_v24  ;;  %40212 = vst [vmem:[#allocation56_spill] sm:$0xff] %v34099_v0  ;;  %v34105_v48 = vpop.permute.xlu1 %5517  ;;  %v34112_v63 = vmax.f32 %v33595_v16, 0.0  ;;  %v3238_v24 = vsel %vm2972_vm0, %v31851_v13, 0  ;;  %v31853_v13 = vld [vmem:[%s39937_s0 + $0x170] ss:$404 sps:$4 sm:$0xff]  }
 0x1c7   :  { %40211 = vst [vmem:[#allocation55_spill] sm:$0xff] %v34094_v7  ;;  %v34101_v29 = vpop.f32.mrb[45].mxu1  ;;  %v34103_v60 = vpop.permute.xlu0 %7089  ;;  %v34216_v7 = vmax.f32 %v33609_v39, 0.0 }
 0x1c8   :  { %40213 = vst [vmem:[#allocation57_spill] sm:$0xff] %v34101_v29  ;;  %40214 = vst [vmem:[#allocation58_spill] sm:$0xff] %v34103_v60  ;;  %v4257_v15 = vpop.f32.mrb[46].mxu1  ;;  %5087 = vmatpush1.bf16.msra.mxu0 %v31841_v53  ;;  %5128 = vmatpush1.bf16.msra.mxu1 %v31844_v55  ;;  %v3244_v29 = vsel %vm2972_vm0, %v31852_v22, 0  ;;  %v31855_v53 = vld [vmem:[%s39937_s0 + $0x174] ss:$404 sps:$4 sm:$0xff]  }
 0x1c9   :  { %v4258_v54 = vpop.f32.mrb[47].mxu1  ;;  %12889 = vrot.lane.b32.xlu0 %v34047_v56, %s31949_s30  ;;  %12054 = vrot.lane.b32.xlu1 %v34047_v56, %s31948_s20  ;;  %40215 = vst [vmem:[#allocation59_spill] sm:$0xff] %v34112_v63  ;;  %v31864_v55 = vld [vmem:[%s39937_s0 + $0x4a4] ss:$404 sps:$4 sm:$0xff]   ;;  %v34175_v56 = vpop.f32.mrb[45].mxu0  ;;  %40224 = vst [vmem:[#allocation68_spill] sm:$0xff] %v34216_v7 }
 0x1ca   :  { %28692 = vmatprep.subr.msk.bf16.mxu0 %vm2972_vm0, %v31847_v46  ;;  %28694 = vmatprep.subr.msk.bf16.mxu1 %vm2972_vm0, %v31849_v61  ;;  %v31858_v54 = vld [vmem:[%s39937_s0 + $0x17c] ss:$404 sps:$4 sm:$0xff]   ;;  %v34126_v16 = vpop.permute.xlu1 %7927  ;;  %v31856_v61 = vld [vmem:[%s39937_s0 + $0x178] ss:$404 sps:$4 sm:$0xff]   ;;  %v34145_v46 = vmax.f32 %v33590_v6, 0.0  ;;  %40220 = vst [vmem:[#allocation64_spill] sm:$0xff] %v34175_v56 }
 0x1cb   :  { %v34124_v15 = vpop.permute.xlu0 %8765  ;;  %40217 = vst [vmem:[#allocation61_spill] sm:$0xff] %v34126_v16  ;;  %v31862_v6 = vld [vmem:[%s39937_s0 + $0x4a0] ss:$404 sps:$4 sm:$0xff]   ;;  %v4216_v16 = vpop.f32.mrb[46].mxu0 }
 0x1cc   :  { %40216 = vst [vmem:[#allocation60_spill] sm:$0xff] %v34124_v15  ;;  %5089 = vmatpush1.bf16.msra.mxu0 %v3238_v24  ;;  %5130 = vmatpush1.bf16.msra.mxu1 %v3244_v29  ;;  %v31861_v29 = vld [vmem:[%s39937_s0 + $0x49c] ss:$404 sps:$4 sm:$0xff]   ;;  %40218 = vst [vmem:[#allocation62_spill] sm:$0xff] %v34145_v46  ;;  %v4217_v56 = vpop.f32.mrb[47].mxu0 }
 0x1cd   :  { %11221 = vrot.lane.b32.xlu1 %v34112_v63, %s31947_s11  ;;  %10386 = vrot.lane.b32.xlu0 %v34112_v63, %s31946_s25  ;;  %v31871_v16 = vld [vmem:[%s39937_s0 + $0xae8] ss:$404 sps:$4 sm:$0xff]   ;;  %v31874_v56 = vld [vmem:[%s39937_s0 + $0xaf0] ss:$404 sps:$4 sm:$0xff]  }
 0x1ce   :  { %5162 = vmatprep.subr.bf16.mxu0 %v31855_v53  ;;  %5203 = vmatprep.subr.bf16.mxu1 %v31858_v54  ;;  %v34153_v24 = vpop.permute.xlu1 %5527  ;;  %v31859_v53 = vld [vmem:[%s39937_s0 + $0x498] ss:$404 sps:$4 sm:$0xff]  }
 0x1cf   :  { %28695 = vmatmul.mubr.msk.bf16.vlgmr.msra.gmra.mrb[88].mxu1 %vm2968_vm1, %v33893_v3  ;;  %v34149_v22 = vpop.permute.xlu0 %5523  ;;  %28693 = vmatmul.mubr.msk.bf16.vlgmr.msra.gmra.mrb[88].mxu0 %vm2968_vm1, %v33893_v3  ;;  %v31867_v54 = vld [vmem:[%s39937_s0 + $0x7c4] ss:$404 sps:$4 sm:$0xff]  }
 0x1d0   :  { %5163 = vmatpush1.bf16.msra.mxu0 %v31853_v13  ;;  %5204 = vmatpush1.bf16.msra.mxu1 %v31856_v61  ;;  %v31870_v13 = vld [vmem:[%s39937_s0 + $0x7cc] ss:$404 sps:$4 sm:$0xff]  }
 0x1d1   :  { %11225 = vrot.lane.b32.xlu1 %v34145_v46, %s31947_s11  ;;  %10390 = vrot.lane.b32.xlu0 %v34145_v46, %s31946_s25 }
 0x1d2   :  { %5164 = vmatprep.subr.bf16.mxu0 %v31861_v29  ;;  %5205 = vmatprep.subr.bf16.mxu1 %v31864_v55  ;;  %v34177_v15 = vpop.permute.xlu1 %7095  ;;  %v31865_v29 = vld [vmem:[%s39937_s0 + $0x7c0] ss:$404 sps:$4 sm:$0xff]   ;;  %v31868_v55 = vld [vmem:[%s39937_s0 + $0x7c8] ss:$404 sps:$4 sm:$0xff]  }
 0x1d3   :  { %v34171_v61 = vpop.permute.xlu0 %7099  ;;  %5235 = vmatprep.mubr.bf16.mxu1 %v40186_v33  ;;  %5194 = vmatprep.mubr.bf16.mxu0 %v40186_v33  ;;  %40221 = vst [vmem:[#allocation65_spill] sm:$0xff] %v34177_v15 }
 0x1d4   :  { %40219 = vst [vmem:[#allocation63_spill] sm:$0xff] %v34171_v61  ;;  %5165 = vmatpush1.bf16.msra.mxu0 %v31859_v53  ;;  %5206 = vmatpush1.bf16.msra.mxu1 %v31862_v6  ;;  %v31873_v53 = vld [vmem:[%s39937_s0 + $0xaec] ss:$404 sps:$4 sm:$0xff]   ;;  %v31876_v6 = vld [vmem:[%s39937_s0 + $0xaf4] ss:$404 sps:$4 sm:$0xff]  }
 0x1d5   :  { %12891 = vrot.lane.b32.xlu1 %v34112_v63, %s31949_s30  ;;  %12056 = vrot.lane.b32.xlu0 %v34112_v63, %s31948_s20  ;;  %v31881_v63 = vld [vmem:[%s39937_s0 + $0xe10] ss:$404 sps:$4 sm:$0x3f]  }
 0x1d6   :  { %5166 = vmatprep.subr.bf16.mxu0 %v31867_v54  ;;  %5207 = vmatprep.subr.bf16.mxu1 %v31870_v13  ;;  %v34203_v54 = vpop.permute.xlu1 %7937  ;;  %v31877_v13 = vld [vmem:[%s39937_s0 + $0xe14] ss:$404 sps:$4 sm:$0x3f]  }
 0x1d7   :  { %v34195_v60 = vpop.permute.xlu0 %7933  ;;  %40223 = vst [vmem:[#allocation67_spill] sm:$0xff] %v34203_v54  ;;  %v31879_v54 = vld [vmem:[%s39937_s0 + $0xe1c] ss:$404 sps:$4 sm:$0x3f]  }
 0x1d8   :  { %40222 = vst [vmem:[#allocation66_spill] sm:$0xff] %v34195_v60  ;;  %5167 = vmatpush1.bf16.msra.mxu0 %v31865_v29  ;;  %5208 = vmatpush1.bf16.msra.mxu1 %v31868_v55  ;;  %v31882_v29 = vld [vmem:[%s39937_s0 + $0xe18] ss:$404 sps:$4 sm:$0x3f]  }
 0x1d9   :  { %12895 = vrot.lane.b32.xlu1 %v34145_v46, %s31949_s30  ;;  %12060 = vrot.lane.b32.xlu0 %v34145_v46, %s31948_s20 }
 0x1da   :  { %v34221_v55 = vpop.f32.mrb[48].mxu1  ;;  %5168 = vmatprep.subr.bf16.mxu0 %v31873_v53  ;;  %5209 = vmatprep.subr.bf16.mxu1 %v31876_v6  ;;  %v34230_v46 = vpop.permute.xlu1 %8771  ;;  %v3250_v53 = vsel %vm2972_vm0, %v31881_v63, 0  ;;  %v3256_v6 = vsel %vm2972_vm0, %v31882_v29, 0  ;;  %v31883_v63 = vld [vmem:[%s39937_s0 + $0x180] ss:$404 sps:$4 sm:$0xff]  }
 0x1db   :  { %40225 = vst [vmem:[#allocation69_spill] sm:$0xff] %v34221_v55  ;;  %v34226_v0 = vpop.f32.mrb[49].mxu1  ;;  %v34228_v60 = vpop.permute.xlu0 %8775  ;;  %40228 = vst [vmem:[#allocation72_spill] sm:$0xff] %v34230_v46  ;;  %v31894_v29 = vld [vmem:[%s39937_s0 + $0x4b4] ss:$404 sps:$4 sm:$0xff]  }
 0x1dc   :  { %40226 = vst [vmem:[#allocation70_spill] sm:$0xff] %v34226_v0  ;;  %40227 = vst [vmem:[#allocation71_spill] sm:$0xff] %v34228_v60  ;;  %v4339_v39 = vpop.f32.mrb[50].mxu1  ;;  %5169 = vmatpush1.bf16.msra.mxu0 %v31871_v16  ;;  %5210 = vmatpush1.bf16.msra.mxu1 %v31874_v56  ;;  %v31885_v16 = vld [vmem:[%s39937_s0 + $0x184] ss:$404 sps:$4 sm:$0xff]   ;;  %v34288_v0 = vmax.f32 %v33719_v35, 0.0 }
 0x1dd   :  { %v4340_v61 = vpop.f32.mrb[51].mxu1  ;;  %11223 = vrot.lane.b32.xlu0 %v34216_v7, %s31947_s11  ;;  %10388 = vrot.lane.b32.xlu1 %v34216_v7, %s31946_s25  ;;  %v31909_v46 = vld [vmem:[%s39937_s0 + $0xe2c] ss:$404 sps:$4 sm:$0x3f]  }
 0x1de   :  { %28696 = vmatprep.subr.msk.bf16.mxu0 %vm2972_vm0, %v31877_v13  ;;  %28698 = vmatprep.subr.msk.bf16.mxu1 %vm2972_vm0, %v31879_v54  ;;  %v31888_v61 = vld [vmem:[%s39937_s0 + $0x18c] ss:$404 sps:$4 sm:$0xff]   ;;  %v31886_v54 = vld [vmem:[%s39937_s0 + $0x188] ss:$404 sps:$4 sm:$0xff]   ;;  %40230 = vst [vmem:[#allocation74_spill] sm:$0xff] %v34288_v0 }
 0x1df   :  { %v34246_v56 = vpop.permute.xlu0 %5525  ;;  %v34248_v39 = vpop.permute.xlu1 %5521  ;;  %v31891_v13 = vld [vmem:[%s39937_s0 + $0x4ac] ss:$404 sps:$4 sm:$0xff]  }
 0x1e0   :  { %5171 = vmatpush1.bf16.msra.mxu0 %v3250_v53  ;;  %5212 = vmatpush1.bf16.msra.mxu1 %v3256_v6  ;;  %v34267_v53 = vmax.f32 %v33597_v19, 0.0  ;;  %v31892_v19 = vld [vmem:[%s39937_s0 + $0x4b0] ss:$404 sps:$4 sm:$0xff]  }
 0x1e1   :  { %12893 = vrot.lane.b32.xlu0 %v34216_v7, %s31949_s30  ;;  %12058 = vrot.lane.b32.xlu1 %v34216_v7, %s31948_s20  ;;  %v34297_v7 = vmax.f32 %v33714_v23, 0.0  ;;  %v31903_v23 = vld [vmem:[%s39937_s0 + $0xafc] ss:$404 sps:$4 sm:$0xff]  }
 0x1e2   :  { %5244 = vmatprep.subr.bf16.mxu0 %v31885_v16  ;;  %5285 = vmatprep.subr.bf16.mxu1 %v31888_v61  ;;  %40229 = vst [vmem:[#allocation73_spill] sm:$0xff] %v34267_v53  ;;  %v31889_v61 = vld [vmem:[%s39937_s0 + $0x4a8] ss:$404 sps:$4 sm:$0xff]  }
 0x1e3   :  { %28699 = vmatmul.mubr.msk.bf16.vlgmr.msra.gmra.mrb[92].mxu1 %vm2968_vm1, %v33893_v3  ;;  %v34271_v6 = vpop.permute.xlu0 %5513  ;;  %28697 = vmatmul.mubr.msk.bf16.vlgmr.msra.gmra.mrb[92].mxu0 %vm2968_vm1, %v33893_v3  ;;  %v34275_v16 = vpop.permute.xlu1 %7085 }
 0x1e4   :  { %5245 = vmatpush1.bf16.msra.mxu0 %v31883_v63  ;;  %5286 = vmatpush1.bf16.msra.mxu1 %v31886_v54  ;;  %v31897_v63 = vld [vmem:[%s39937_s0 + $0x7d4] ss:$404 sps:$4 sm:$0xff]   ;;  %v31900_v54 = vld [vmem:[%s39937_s0 + $0x7dc] ss:$404 sps:$4 sm:$0xff]  }
 0x1e5   :  { %10392 = vrot.lane.b32.xlu0 %v34267_v53, %s31946_s25  ;;  %11227 = vrot.lane.b32.xlu1 %v34267_v53, %s31947_s11  ;;  %v34326_v53 = vpop.f32.mrb[48].mxu0 }
 0x1e6   :  { %5246 = vmatprep.subr.bf16.mxu0 %v31891_v13  ;;  %5287 = vmatprep.subr.bf16.mxu1 %v31894_v29  ;;  %v31895_v13 = vld [vmem:[%s39937_s0 + $0x7d0] ss:$404 sps:$4 sm:$0xff]   ;;  %v31898_v29 = vld [vmem:[%s39937_s0 + $0x7d8] ss:$404 sps:$4 sm:$0xff]   ;;  %40234 = vst [vmem:[#allocation78_spill] sm:$0xff] %v34326_v53 }
 0x1e7   :  { %v34299_v55 = vpop.permute.xlu0 %7093  ;;  %5317 = vmatprep.mubr.bf16.mxu1 %v40186_v33  ;;  %5276 = vmatprep.mubr.bf16.mxu0 %v40186_v33  ;;  %v34303_v35 = vpop.permute.xlu1 %7931  ;;  %v31906_v33 = vld [vmem:[%s39937_s0 + $0xb04] ss:$404 sps:$4 sm:$0xff]   ;;  %v31911_v53 = vld [vmem:[%s39937_s0 + $0xe20] ss:$404 sps:$4 sm:$0x3f]  }
 0x1e8   :  { %40231 = vst [vmem:[#allocation75_spill] sm:$0xff] %v34299_v55  ;;  %40232 = vst [vmem:[#allocation76_spill] sm:$0xff] %v34303_v35  ;;  %5247 = vmatpush1.bf16.msra.mxu0 %v31889_v61  ;;  %5288 = vmatpush1.bf16.msra.mxu1 %v31892_v19  ;;  %v31901_v19 = vld [vmem:[%s39937_s0 + $0xaf8] ss:$404 sps:$4 sm:$0xff]  }
 0x1e9   :  { %10398 = vrot.lane.b32.xlu0 %v34297_v7, %s31946_s25  ;;  %10394 = vrot.lane.b32.xlu1 %v34288_v0, %s31946_s25 }
 0x1ea   :  { %5248 = vmatprep.subr.bf16.mxu0 %v31897_v63  ;;  %5289 = vmatprep.subr.bf16.mxu1 %v31900_v54  ;;  %v31904_v63 = vld [vmem:[%s39937_s0 + $0xb00] ss:$404 sps:$4 sm:$0xff]   ;;  %v31907_v54 = vld [vmem:[%s39937_s0 + $0xe24] ss:$404 sps:$4 sm:$0x3f]  }
 0x1eb   :  { %v34321_v61 = vpop.permute.xlu0 %7923  ;;  %v34328_v60 = vpop.permute.xlu1 %8761 }
 0x1ec   :  { %40233 = vst [vmem:[#allocation77_spill] sm:$0xff] %v34321_v61  ;;  %40235 = vst [vmem:[#allocation79_spill] sm:$0xff] %v34328_v60  ;;  %5249 = vmatpush1.bf16.msra.mxu0 %v31895_v13  ;;  %5290 = vmatpush1.bf16.msra.mxu1 %v31898_v29  ;;  %v31912_v13 = vld [vmem:[%s39937_s0 + $0xe28] ss:$404 sps:$4 sm:$0x3f]  }
 0x1ed   :  { %11229 = vrot.lane.b32.xlu0 %v34288_v0, %s31947_s11  ;;  %11233 = vrot.lane.b32.xlu1 %v34297_v7, %s31947_s11 }
 0x1ee   :  { %v34346_v29 = vpop.f32.mrb[52].mxu1  ;;  %5250 = vmatprep.subr.bf16.mxu0 %v31903_v23  ;;  %5291 = vmatprep.subr.bf16.mxu1 %v31906_v33  ;;  %v3262_v23 = vsel %vm2972_vm0, %v31911_v53, 0  ;;  %v3268_v33 = vsel %vm2972_vm0, %v31912_v13, 0  ;;  %v31913_v53 = vld [vmem:[%s39937_s0 + $0x190] ss:$404 sps:$4 sm:$0xff]  }
 0x1ef   :  { %v34351_v60 = vpop.f32.mrb[53].mxu1  ;;  %v34353_v35 = vpop.permute.xlu0 %7935 }
 0x1f0   :  { %40236 = vst [vmem:[#allocation80_spill] sm:$0xff] %v34351_v60  ;;  %v34355_v61 = vpop.permute.xlu1 %8769  ;;  %v4421_v55 = vpop.f32.mrb[54].mxu1  ;;  %5251 = vmatpush1.bf16.msra.mxu0 %v31901_v19  ;;  %5292 = vmatpush1.bf16.msra.mxu1 %v31904_v63  ;;  %v40011_v19 = vmov 0.0   ;;  %v5534_v63 = vsel %vm5533_vm2, %v33448_v50, %v33545_v34  ;;  %v31914_v50 = vld [vmem:[%s39937_s0 + $0x4b8] ss:$404 sps:$4 sm:$0xff]  }
 0x1f1   :  { %v4422_v15 = vpop.f32.mrb[55].mxu1  ;;  %12068 = vrot.lane.b32.xlu0 %v34297_v7, %s31948_s20  ;;  %12064 = vrot.lane.b32.xlu1 %v34288_v0, %s31948_s20 }
 0x1f2   :  { %28700 = vmatprep.subr.msk.bf16.mxu0 %vm2972_vm0, %v31907_v54  ;;  %28702 = vmatprep.subr.msk.bf16.mxu1 %vm2972_vm0, %v31909_v46  ;;  %v5535_v15 = vsel %vm5533_vm2, %v33545_v34, %v33446_v49  ;;  %v34379_v46 = vmax.f32 %v33736_v1, 0.0  ;;  %v34393_v1 = vpop.f32.mrb[49].mxu0 }
 0x1f3   :  { %v34365_v60 = vpop.permute.xlu0 %5529  ;;  %v4298_v34 = vpop.f32.mrb[50].mxu0 }
 0x1f4   :  { %v34367_v55 = vpop.permute.xlu1 %7097  ;;  %5253 = vmatpush1.bf16.msra.mxu0 %v3262_v23  ;;  %5294 = vmatpush1.bf16.msra.mxu1 %v3268_v33  ;;  %40237 = vst [vmem:[#allocation81_spill] sm:$0xff] %v34379_v46  ;;  %v5537_v23 = vsel %vm5533_vm2, %v33549_v32, %v33644_v8  ;;  %v4299_v33 = vpop.f32.mrb[51].mxu0  ;;  %v34434_v34 = vmax.f32 %v33724_v47, 0.0  ;;  %v34456_v47 = vmax.f32 %v33846_v37, 0.0 }
 0x1f5   :  { %28706 = vmatprep.subr.msk.mxu1 %vm2972_vm0, %v5535_v15  ;;  %12899 = vrot.lane.b32.xlu0 %v34288_v0, %s31949_s30  ;;  %v34441_v0 = vmax.f32 %v33841_v58, 0.0  ;;  %v31917_v58 = vld [vmem:[%s39937_s0 + $0xe30] ss:$404 sps:$4 sm:$0x3f]  }
 0x1f6   :  { %12903 = vrot.lane.b32.xlu1 %v34297_v7, %s31949_s30  ;;  %29929 = vmatprep.subr.bf16.mxu0 %v40011_v19 }
 0x1f7   :  { %28703 = vmatmul.mubr.msk.bf16.vlgmr.msra.gmra.mrb[96].mxu1 %vm2968_vm1, %v33893_v3  ;;  %v34389_v54 = vpop.permute.xlu0 %7939  ;;  %28701 = vmatmul.mubr.msk.bf16.vlgmr.msra.gmra.mrb[96].mxu0 %vm2968_vm1, %v33893_v3 }
 0x1f8   :  { %v34395_v13 = vpop.permute.xlu1 %8773  ;;  %29930 = vmatpush3.bf16.msra.mxu0 %v31913_v53  ;;  %28707 = vmatpush1.msk.msra.mxu1 %vm2972_vm0, %v5534_v63  ;;  %v34420_v63 = vld [vmem:[%s39940_s3 + $0x8] sm:$0x3f] }
 0x1f9   :  { %40238 = vst [vmem:[#allocation82_spill] sm:$0xff] %v34395_v13  ;;  %28709 = vmatprep.subr.msk.mxu1 %vm2972_vm0, %v5537_v23  ;;  %11231 = vrot.lane.b32.xlu0 %v34379_v46, %s31947_s11  ;;  %v31915_v23 = vld [vmem:[%s39937_s0 + $0x7e0] ss:$404 sps:$4 sm:$0xff]   ;;  %v5541_v13 = vsel %vm5533_vm2, %v33772_v57, %v33850_v20 }
 0x1fa   :  { %10396 = vrot.lane.b32.xlu1 %v34379_v46, %s31946_s25  ;;  %29931 = vmatprep.subr.bf16.mxu0 %v40011_v19 }
 0x1fb   :  { %v34410_v15 = vpop.permute.xlu0 %8777  ;;  %5662 = vmatprep.mubr.f32.mxu1 %v40011_v19  ;;  %29939 = vmatprep.mubr.msk.bf16.mxu0 %vm31951_vm3, %v40011_v19 }
 0x1fc   :  { %v34415_v53 = vpop.permute.xlu1 %7101  ;;  %29932 = vmatpush3.bf16.msra.mxu0 %v31914_v50  ;;  %v5536_v50 = vsel %vm5533_vm2, %v33446_v49, %v33549_v32  ;;  %v5539_v49 = vsel %vm5533_vm2, %v33748_v38, %v33666_v25  ;;  %v31916_v32 = vld [vmem:[%s39937_s0 + $0xb08] ss:$404 sps:$4 sm:$0xff]  }
 0x1fd   :  { %12901 = vrot.lane.b32.xlu0 %v34379_v46, %s31949_s30  ;;  %29933 = vmatprep.subr.bf16.mxu0 %v40011_v19 }
 0x1fe   :  { %12066 = vrot.lane.b32.xlu1 %v34379_v46, %s31948_s20 }
 0x1ff   :  { %28708 = vmatmul.mubr.msk.f32.vlgmr.msra.gmra.mrb[100].mxu1 %vm5554_vm4, %v34420_v63  ;;  %v34438_v33 = vpop.permute.xlu0 %5531 }
 0x200   :  { %28710 = vmatpush1.msk.msra.mxu1 %vm2972_vm0, %v5536_v50  ;;  %v34444_v19 = vpop.permute.xlu1 %10374  ;;  %29934 = vmatpush3.bf16.msra.mxu0 %v31915_v23  ;;  %v40241_v50 = vmov 0.0  }
 0x201   :  { %40239 = vst [vmem:[#allocation83_spill] sm:$0xff] %v34444_v19  ;;  %28712 = vmatprep.subr.msk.mxu1 %vm2972_vm0, %v5539_v49  ;;  %10400 = vrot.lane.b32.xlu0 %v34434_v34, %s31946_s25  ;;  %v5538_v49 = vsel %vm5533_vm2, %v33644_v8, %v33748_v38  ;;  %v3274_v8 = vsel %vm2972_vm0, %v31917_v58, 0 }
 0x202   :  { %10406 = vrot.lane.b32.xlu1 %v34441_v0, %s31946_s25  ;;  %v34463_v23 = vpop.f32.mrb[56].mxu1  ;;  %5733 = vmatprep.mubr.f32.mxu1 %v40241_v50 }
 0x203   :  { %40240 = vst [vmem:[#allocation84_spill] sm:$0xff] %v34463_v23  ;;  %v34469_v19 = vpop.f32.mrb[57].mxu1  ;;  %29935 = vmatprep.subr.bf16.mxu0 %v40241_v50  ;;  %28711 = vmatmul.mubr.msk.f32.vlgmr.msra.gmra.mrb[102].mxu1 %vm5554_vm4, %v34420_v63  ;;  %v34474_v37 = vpop.permute.xlu0 %11209 }
 0x204   :  { %40242 = vst [vmem:[#allocation85_spill] sm:$0xff] %v34469_v19  ;;  %28713 = vmatpush1.msk.msra.mxu1 %vm2972_vm0, %v5538_v49  ;;  %v34477_v46 = vpop.permute.xlu1 %7103  ;;  %v4503_v23 = vpop.f32.mrb[58].mxu1  ;;  %29936 = vmatpush3.bf16.msra.mxu0 %v31916_v32  ;;  %v5540_v32 = vsel %vm5533_vm2, %v33666_v25, %v33772_v57  ;;  %v5545_v25 = vsel %vm5533_vm2, %v34271_v6, %v34001_v14 }
 0x205   :  { %28715 = vmatprep.subr.msk.mxu1 %vm2972_vm0, %v5541_v13  ;;  %v4504_v38 = vpop.f32.mrb[59].mxu1  ;;  %10402 = vrot.lane.b32.xlu0 %v34456_v47, %s31946_s25  ;;  %v34486_v19 = vpop.f32.mrb[52].mxu0  ;;  %v5543_v23 = vsel %vm5533_vm2, %v33952_v52, %v33870_v11  ;;  %v5544_v57 = vsel %vm5533_vm2, %v33870_v11, %v34271_v6  ;;  %v5549_v11 = vsel %vm5533_vm2, %v34248_v39, %v34149_v22 }
 0x206   :  { %11237 = vrot.lane.b32.xlu1 %v34456_v47, %s31947_s11  ;;  %5804 = vmatprep.mubr.f32.mxu1 %v40241_v50  ;;  %v5542_v38 = vsel %vm5533_vm2, %v33850_v20, %v33952_v52  ;;  %v34542_v52 = vmax.f32 %v33860_v59, 0.0  ;;  %v5546_v6 = vsel %vm5533_vm2, %v34001_v14, %v34105_v48  ;;  %v5551_v59 = vsel %vm5533_vm2, %v34246_v56, %v34153_v24 }
 0x207   :  { %29937 = vmatprep.subr.bf16.mxu0 %v40241_v50  ;;  %28714 = vmatmul.mubr.msk.f32.vlgmr.msra.gmra.mrb[104].mxu1 %vm5554_vm4, %v34420_v63  ;;  %v34497_v13 = vpop.permute.xlu0 %7941 }
 0x208   :  { %40243 = vst [vmem:[#allocation86_spill] sm:$0xff] %v34497_v13  ;;  %28716 = vmatpush1.msk.msra.mxu1 %vm2972_vm0, %v5540_v32  ;;  %v34500_v58 = vpop.permute.xlu1 %12044  ;;  %29938 = vmatpush3.bf16.msra.mxu0 %v3274_v8 }
 0x209   :  { %40244 = vst [vmem:[#allocation87_spill] sm:$0xff] %v34500_v58  ;;  %28718 = vmatprep.subr.msk.mxu1 %vm2972_vm0, %v5543_v23  ;;  %28721 = vmatprep.subr.msk.mxu0 %vm2972_vm0, %v5545_v25  ;;  %v34574_v23 = vpop.f32.mrb[53].mxu0  ;;  %v5550_v25 = vsel %vm5533_vm2, %v34149_v22, %v34246_v56  ;;  %v40300_v58 = vld [vmem:[#allocation79_spill] sm:$0xff] }
 0x20a   :  { %12076 = vrot.lane.b32.xlu1 %v34441_v0, %s31948_s20  ;;  %11241 = vrot.lane.b32.xlu0 %v34441_v0, %s31947_s11 }
 0x20b   :  { %5875 = vmatprep.mubr.f32.mxu1 %v40241_v50  ;;  %29940 = vmatmul.mubr.msk.bf16.vlgmr.msra.gmra.mrb[100].mxu0 %vm2968_vm1, %v33893_v3  ;;  %v34520_v49 = vpop.permute.xlu0 %12879  ;;  %v5547_v3 = vsel %vm5533_vm2, %v34105_v48, %v33999_v2  ;;  %v5548_v48 = vsel %vm5533_vm2, %v33999_v2, %v34248_v39  ;;  %v5553_v39 = vsel %vm5533_vm2, %v34365_v60, %v34438_v33 }
 0x20c   :  { %40245 = vst [vmem:[#allocation88_spill] sm:$0xff] %v34520_v49  ;;  %28717 = vmatmul.mubr.msk.f32.vlgmr.msra.gmra.mrb[106].mxu1 %vm5554_vm4, %v34420_v63  ;;  %v34527_v8 = vpop.permute.xlu1 %8779  ;;  %28722 = vmatpush1.msk.msra.mxu0 %vm2972_vm0, %v5544_v57  ;;  %v4380_v57 = vpop.f32.mrb[54].mxu0 }
 0x20d   :  { %40246 = vst [vmem:[#allocation89_spill] sm:$0xff] %v34527_v8  ;;  %28719 = vmatpush1.msk.msra.mxu1 %vm2972_vm0, %v5542_v38  ;;  %28727 = vmatprep.subr.msk.mxu0 %vm2972_vm0, %v5549_v11  ;;  %v4381_v38 = vpop.f32.mrb[55].mxu0 }
 0x20e   :  { %28724 = vmatprep.subr.msk.mxu1 %vm2972_vm0, %v5547_v3  ;;  %12907 = vrot.lane.b32.xlu1 %v34456_v47, %s31949_s30  ;;  %v5552_v3 = vsel %vm5533_vm2, %v34153_v24, %v34365_v60  ;;  %v34652_v24 = vpop.f32.mrb[56].mxu0 }
 0x20f   :  { %12072 = vrot.lane.b32.xlu0 %v34456_v47, %s31948_s20  ;;  %5946 = vmatprep.mubr.f32.mxu1 %v40241_v50  ;;  %v34547_v20 = vpop.permute.xlu0 %10372  ;;  %v34746_v38 = vpop.f32.mrb[57].mxu0 }
 0x210   :  { %28720 = vmatmul.mubr.msk.f32.vlgmr.msra.gmra.mrb[108].mxu1 %vm5554_vm4, %v34420_v63  ;;  %v34554_v32 = vpop.permute.xlu1 %10376  ;;  %6017 = vmatprep.mubr.f32.mxu0 %v40241_v50 }
 0x211   :  { %28725 = vmatpush1.msk.msra.mxu1 %vm2972_vm0, %v5546_v6  ;;  %6088 = vmatprep.mubr.f32.mxu1 %v40241_v50 }
 0x212   :  { %28730 = vmatprep.subr.msk.mxu1 %vm2972_vm0, %v5551_v59  ;;  %11239 = vrot.lane.b32.xlu1 %v34542_v52, %s31947_s11  ;;  %v34611_v59 = vmax.f32 %v33848_v26, 0.0  ;;  %v34627_v26 = vld [vmem:[%s39940_s3] sm:$0x3f] }
 0x213   :  { %12911 = vrot.lane.b32.xlu0 %v34441_v0, %s31949_s30  ;;  %28723 = vmatmul.mubr.msk.f32.vlgmr.msra.gmra.mrb[104].mxu0 %vm5554_vm4, %v34420_v63  ;;  %v34572_v14 = vpop.permute.xlu0 %11211 }
 0x214   :  { %28726 = vmatmul.mubr.msk.f32.vlgmr.msra.gmra.mrb[110].mxu1 %vm5554_vm4, %v34420_v63  ;;  %28728 = vmatpush1.msk.msra.mxu0 %vm2972_vm0, %v5548_v48  ;;  %v34582_v2 = vpop.permute.xlu1 %11207 }
 0x215   :  { %28731 = vmatpush1.msk.msra.mxu1 %vm2972_vm0, %v5550_v25  ;;  %28733 = vmatprep.subr.msk.mxu0 %vm2972_vm0, %v5553_v39  ;;  %v40261_v25 = vld [vmem:[#allocation65_spill] sm:$0xff]  ;;  %v40262_v39 = vld [vmem:[#allocation75_spill] sm:$0xff] }
 0x216   :  { %28736 = vmatprep.subr.msk.mxu1 %vm2972_vm0, %v32905_v40  ;;  %12909 = vrot.lane.b32.xlu1 %v34542_v52, %s31949_s30  ;;  %v34593_v22 = vpop.f32.mrb[60].mxu1  ;;  %v7121_v57 = vsel %vm7105_vm5, %v40262_v39, %v40261_v25 }
 0x217   :  { %10404 = vrot.lane.b32.xlu0 %v34542_v52, %s31946_s25  ;;  %6159 = vmatprep.mubr.f32.mxu0 %v40241_v50  ;;  %v34598_v56 = vpop.f32.mrb[61].mxu1  ;;  %v34600_v11 = vpop.permute.xlu0 %12042 }
 0x218   :  { %40247 = vst [vmem:[#allocation90_spill] sm:$0xff] %v34598_v56  ;;  %40248 = vst [vmem:[#allocation91_spill] sm:$0xff] %v34600_v11  ;;  %6230 = vmatprep.mubr.f32.mxu1 %v40241_v50  ;;  %28729 = vmatmul.mubr.msk.f32.vlgmr.msra.gmra.mrb[106].mxu0 %vm5554_vm4, %v34420_v63  ;;  %v34608_v40 = vpop.permute.xlu1 %12046  ;;  %v4585_v6 = vpop.f32.mrb[62].mxu1  ;;  %v40297_v11 = vld [vmem:[#allocation36_spill] sm:$0xff] }
 0x219   :  { %40249 = vst [vmem:[#allocation92_spill] sm:$0xff] %v34608_v40  ;;  %28732 = vmatmul.mubr.msk.f32.vlgmr.msra.gmra.mrb[112].mxu1 %vm5554_vm4, %v34420_v63  ;;  %28734 = vmatpush1.msk.msra.mxu0 %vm2972_vm0, %v5552_v3  ;;  %v4586_v48 = vpop.f32.mrb[63].mxu1  ;;  %v4462_v3 = vpop.f32.mrb[58].mxu0 }
 0x21a   :  { %28737 = vmatpush1.msk.msra.mxu1 %vm2972_vm0, %v32839_v17  ;;  %28751 = vmatprep.subr.msk.mxu0 %vm2972_vm0, %v33543_v44  ;;  %v4463_v6 = vpop.f32.mrb[59].mxu0  ;;  %v40264_v48 = vld [vmem:[#allocation44_spill] sm:$0xff]  ;;  %v7125_v3 = vsel %vm7105_vm5, %v34415_v53, %v34477_v46 }
 0x21b   :  { %28739 = vmatprep.subr.msk.mxu1 %vm2972_vm0, %v32916_v43  ;;  %11243 = vrot.lane.b32.xlu1 %v34611_v59, %s31947_s11  ;;  %v34629_v60 = vpop.permute.xlu0 %12881  ;;  %v34640_v43 = vmax.f32 %v33970_v45, 0.0 }
 0x21c   :  { %40250 = vst [vmem:[#allocation93_spill] sm:$0xff] %v34629_v60  ;;  %11235 = vrot.lane.b32.xlu0 %v34434_v34, %s31947_s11  ;;  %6301 = vmatprep.mubr.f32.mxu0 %v40241_v50  ;;  %v34634_v17 = vpop.permute.xlu1 %12877 }
 0x21d   :  { %40251 = vst [vmem:[#allocation94_spill] sm:$0xff] %v34634_v17  ;;  %6415 = vmatprep.mubr.f32.mxu1 %v40241_v50  ;;  %28735 = vmatmul.mubr.msk.f32.vlgmr.msra.gmra.mrb[108].mxu0 %vm5554_vm4, %v34420_v63  ;;  %40252 = vst [vmem:[#allocation95_spill] sm:$0xff] %v34640_v43  ;;  %v40278_v17 = vld [vmem:[#allocation77_spill] sm:$0xff] }
 0x21e   :  { %28738 = vmatmul.mubr.msk.f32.vlgmr.msra.gmra.mrb[100].mxu1 %vm5554_vm4, %v34627_v26  ;;  %28752 = vmatpush1.msk.msra.mxu0 %vm2972_vm0, %v33181_v10 }
 0x21f   :  { %28740 = vmatpush1.msk.msra.mxu1 %vm2972_vm0, %v32841_v18  ;;  %28757 = vmatprep.subr.msk.mxu0 %vm2972_vm0, %v33513_v30  ;;  %v34650_v44 = vpop.permute.xlu0 %10378  ;;  %v34664_v18 = vmax.f32 %v33975_v27, 0.0  ;;  %v7116_v27 = vsel %vm7105_vm5, %v33872_v28, %v34275_v16 }
 0x220   :  { %28742 = vmatprep.subr.msk.mxu1 %vm2972_vm0, %v33068_v36  ;;  %14509 = vrot.lane.b32.xlu1 %v34640_v43, %s31946_s25  ;;  %v34658_v45 = vpop.permute.xlu1 %11213 }
 0x221   :  { %12074 = vrot.lane.b32.xlu0 %v34542_v52, %s31948_s20  ;;  %6486 = vmatprep.mubr.f32.mxu1 %v40241_v50  ;;  %40253 = vst [vmem:[#allocation96_spill] sm:$0xff] %v34664_v18 }
 0x222   :  { %6770 = vmatprep.mubr.f32.mxu0 %v40241_v50  ;;  %28741 = vmatmul.mubr.msk.f32.vlgmr.msra.gmra.mrb[102].mxu1 %vm5554_vm4, %v34627_v26 }
 0x223   :  { %28743 = vmatpush1.msk.msra.mxu1 %vm2972_vm0, %v32985_v5  ;;  %28753 = vmatmul.mubr.msk.f32.vlgmr.msra.gmra.mrb[104].mxu0 %vm5554_vm4, %v34627_v26  ;;  %v34673_v36 = vpop.permute.xlu0 %10382 }
 0x224   :  { %28758 = vmatpush1.msk.msra.mxu0 %vm2972_vm0, %v33293_v51  ;;  %28745 = vmatprep.subr.msk.mxu1 %vm2972_vm0, %v33097_v42  ;;  %v34679_v10 = vpop.permute.xlu1 %11217  ;;  %v7117_v51 = vsel %vm7105_vm5, %v34275_v16, %v34024_v9 }
 0x225   :  { %40254 = vst [vmem:[#allocation97_spill] sm:$0xff] %v34679_v10  ;;  %28763 = vmatprep.subr.msk.mxu0 %vm2972_vm0, %v33640_v4  ;;  %10408 = vrot.lane.b32.xlu0 %v34611_v59, %s31946_s25 }
 0x226   :  { %11245 = vrot.lane.b32.xlu1 %v34664_v18, %s31947_s11  ;;  %6557 = vmatprep.mubr.f32.mxu1 %v40241_v50 }
 0x227   :  { %6912 = vmatprep.mubr.f32.mxu0 %v40241_v50  ;;  %28744 = vmatmul.mubr.msk.f32.vlgmr.msra.gmra.mrb[104].mxu1 %vm5554_vm4, %v34627_v26  ;;  %v34691_v5 = vpop.permute.xlu0 %12048 }
 0x228   :  { %40255 = vst [vmem:[#allocation98_spill] sm:$0xff] %v34691_v5  ;;  %28746 = vmatpush1.msk.msra.mxu1 %vm2972_vm0, %v33011_v12  ;;  %28759 = vmatmul.mubr.msk.f32.vlgmr.msra.gmra.mrb[106].mxu0 %vm5554_vm4, %v34627_v26  ;;  %v34697_v42 = vpop.permute.xlu1 %12883  ;;  %v40293_v5 = vld [vmem:[#allocation28_spill] sm:$0xff] }
 0x229   :  { %40256 = vst [vmem:[#allocation99_spill] sm:$0xff] %v34697_v42  ;;  %28764 = vmatpush1.msk.msra.mxu0 %vm2972_vm0, %v33420_v41  ;;  %28748 = vmatprep.subr.msk.mxu1 %vm2972_vm0, %v33246_v31  ;;  %v40277_v42 = vld [vmem:[#allocation52_spill] sm:$0xff] }
 0x22a   :  { %28782 = vmatprep.subr.msk.mxu0 %vm2972_vm0, %v7117_v51  ;;  %16179 = vrot.lane.b32.xlu1 %v34640_v43, %s31948_s20  ;;  %v34709_v12 = vpop.f32.mrb[64].mxu1  ;;  %v34757_v51 = vmax.f32 %v40264_v48, 0.0  ;;  %v40270_v48 = vld [vmem:[#allocation47_spill] sm:$0xff] }
 0x22b   :  { %40257 = vst [vmem:[#allocation100_spill] sm:$0xff] %v34709_v12  ;;  %10410 = vrot.lane.b32.xlu0 %v34664_v18, %s31946_s25  ;;  %6628 = vmatprep.mubr.f32.mxu1 %v40241_v50  ;;  %v34714_v41 = vpop.f32.mrb[65].mxu1  ;;  %v34716_v30 = vpop.permute.xlu0 %12052 }
 0x22c   :  { %40258 = vst [vmem:[#allocation101_spill] sm:$0xff] %v34714_v41  ;;  %40259 = vst [vmem:[#allocation102_spill] sm:$0xff] %v34716_v30  ;;  %7054 = vmatprep.mubr.f32.mxu0 %v40241_v50  ;;  %28747 = vmatmul.mubr.msk.f32.vlgmr.msra.gmra.mrb[106].mxu1 %vm5554_vm4, %v34627_v26  ;;  %v34721_v31 = vpop.permute.xlu1 %12887  ;;  %v4667_v4 = vpop.f32.mrb[66].mxu1  ;;  %v40284_v41 = vld [vmem:[#allocation14_spill] sm:$0xff]  ;;  %v40291_v30 = vld [vmem:[#allocation51_spill] sm:$0xff] }
 0x22d   :  { %40260 = vst [vmem:[#allocation103_spill] sm:$0xff] %v34721_v31  ;;  %28749 = vmatpush1.msk.msra.mxu1 %vm2972_vm0, %v33152_v62  ;;  %28765 = vmatmul.mubr.msk.f32.vlgmr.msra.gmra.mrb[108].mxu0 %vm5554_vm4, %v34627_v26  ;;  %v4668_v63 = vpop.f32.mrb[67].mxu1  ;;  %v34742_v62 = vld [vmem:[%s39940_s3 + $0x10] sm:$0x3f]  ;;  %40265 = vst [vmem:[#allocation75_spill] sm:$0xff] %v34757_v51  ;;  %v40266_v4 = vld [vmem:[#allocation49_spill] sm:$0xff] }
 0x22e   :  { %28783 = vmatpush1.msk.msra.mxu0 %vm2972_vm0, %v7116_v27  ;;  %28754 = vmatprep.subr.msk.mxu1 %vm2972_vm0, %v33371_v21  ;;  %v7120_v27 = vsel %vm7105_vm5, %v40266_v4, %v40262_v39  ;;  %v40267_v63 = vld [vmem:[#allocation5_spill] sm:$0xff]  ;;  %v40275_v31 = vld [vmem:[#allocation15_spill] sm:$0xff] }
 0x22f   :  { %28788 = vmatprep.subr.msk.mxu0 %vm2972_vm0, %v7121_v57  ;;  %12915 = vrot.lane.b32.xlu1 %v34664_v18, %s31949_s30  ;;  %v34744_v16 = vpop.permute.xlu0 %11215  ;;  %v40268_v57 = vld [vmem:[#allocation11_spill] sm:$0xff] }
 0x230   :  { %40263 = vst [vmem:[#allocation65_spill] sm:$0xff] %v34744_v16  ;;  %15344 = vrot.lane.b32.xlu0 %v34640_v43, %s31947_s11  ;;  %6699 = vmatprep.mubr.f32.mxu1 %v40241_v50  ;;  %v34751_v21 = vpop.permute.xlu1 %10380 }
 0x231   :  { %7588 = vmatprep.mubr.f32.mxu0 %v40241_v50  ;;  %28750 = vmatmul.mubr.msk.f32.vlgmr.msra.gmra.mrb[108].mxu1 %vm5554_vm4, %v34627_v26 }
 0x232   :  { %28755 = vmatpush1.msk.msra.mxu1 %vm2972_vm0, %v40267_v63  ;;  %28784 = vmatmul.mubr.msk.f32.vlgmr.msra.gmra.mrb[104].mxu0 %vm5554_vm4, %v34742_v62  ;;  %v40272_v63 = vld [vmem:[#allocation63_spill] sm:$0xff] }
 0x233   :  { %28789 = vmatpush1.msk.msra.mxu0 %vm2972_vm0, %v7120_v27  ;;  %28760 = vmatprep.subr.msk.mxu1 %vm2972_vm0, %v40268_v57  ;;  %v34772_v6 = vpop.permute.xlu0 %11219  ;;  %v34783_v27 = vmax.f32 %v40270_v48, 0.0  ;;  %v7124_v57 = vsel %vm7105_vm5, %v40272_v63, %v34415_v53  ;;  %v7955_v53 = vsel %vm7943_vm6, %v40278_v17, %v40277_v42 }
 0x234   :  { %40269 = vst [vmem:[#allocation44_spill] sm:$0xff] %v34772_v6  ;;  %28794 = vmatprep.subr.msk.mxu0 %vm2972_vm0, %v7125_v3  ;;  %14511 = vrot.lane.b32.xlu1 %v34757_v51, %s31946_s25  ;;  %v34777_v39 = vpop.permute.xlu1 %10384  ;;  %v40273_v3 = vld [vmem:[#allocation6_spill] sm:$0xff] }
 0x235   :  { %12080 = vrot.lane.b32.xlu0 %v34664_v18, %s31948_s20  ;;  %6841 = vmatprep.mubr.f32.mxu1 %v40241_v50  ;;  %40271 = vst [vmem:[#allocation49_spill] sm:$0xff] %v34783_v27  ;;  %v40274_v18 = vld [vmem:[#allocation7_spill] sm:$0xff] }
 0x236   :  { %7730 = vmatprep.mubr.f32.mxu0 %v40241_v50  ;;  %28756 = vmatmul.mubr.msk.f32.vlgmr.msra.gmra.mrb[110].mxu1 %vm5554_vm4, %v34627_v26  ;;  %v7107_v48 = vsel %vm7105_vm5, %v40275_v31, %v40274_v18 }
 0x237   :  { %28761 = vmatpush1.msk.msra.mxu1 %vm2972_vm0, %v40273_v3  ;;  %28790 = vmatmul.mubr.msk.f32.vlgmr.msra.gmra.mrb[106].mxu0 %vm5554_vm4, %v34742_v62  ;;  %v34798_v60 = vpop.permute.xlu0 %12885 }
 0x238   :  { %40276 = vst [vmem:[#allocation5_spill] sm:$0xff] %v34798_v60  ;;  %28795 = vmatpush1.msk.msra.mxu0 %vm2972_vm0, %v7124_v57  ;;  %28767 = vmatprep.subr.msk.mxu1 %vm2972_vm0, %v7107_v48  ;;  %v34805_v49 = vpop.permute.xlu1 %12050  ;;  %v40280_v57 = vld [vmem:[#allocation8_spill] sm:$0xff] }
 0x239   :  { %40279 = vst [vmem:[#allocation11_spill] sm:$0xff] %v34805_v49  ;;  %28813 = vmatprep.subr.msk.mxu0 %vm2972_vm0, %v7955_v53  ;;  %17014 = vrot.lane.b32.xlu0 %v34640_v43, %s31949_s30  ;;  %v7106_v3 = vsel %vm7105_vm5, %v40280_v57, %v40275_v31  ;;  %v40282_v53 = vld [vmem:[#allocation40_spill] sm:$0xff] }
 0x23a   :  { %15342 = vrot.lane.b32.xlu1 %v34783_v27, %s31947_s11  ;;  %6983 = vmatprep.mubr.f32.mxu1 %v40241_v50  ;;  %v7954_v43 = vsel %vm7943_vm6, %v40282_v53, %v40278_v17  ;;  %v40283_v60 = vld [vmem:[#allocation20_spill] sm:$0xff] }
 0x23b   :  { %7872 = vmatprep.mubr.f32.mxu0 %v40241_v50  ;;  %28762 = vmatmul.mubr.msk.f32.vlgmr.msra.gmra.mrb[112].mxu1 %vm5554_vm4, %v34627_v26  ;;  %v34819_v48 = vpop.permute.xlu0 %12889  ;;  %v7109_v31 = vsel %vm7105_vm5, %v40284_v41, %v40283_v60  ;;  %v40286_v26 = vld [vmem:[#allocation66_spill] sm:$0xff]  ;;  %v34843_v17 = vld [vmem:[%s39940_s3 + $0x18] sm:$0x3f] }
 0x23c   :  { %40281 = vst [vmem:[#allocation47_spill] sm:$0xff] %v34819_v48  ;;  %28768 = vmatpush1.msk.msra.mxu1 %vm2972_vm0, %v7106_v3  ;;  %28796 = vmatmul.mubr.msk.f32.vlgmr.msra.gmra.mrb[108].mxu0 %vm5554_vm4, %v34742_v62  ;;  %v34830_v57 = vpop.permute.xlu1 %12054  ;;  %v40287_v48 = vld [vmem:[#allocation76_spill] sm:$0xff] }
 0x23d   :  { %40285 = vst [vmem:[#allocation63_spill] sm:$0xff] %v34830_v57  ;;  %28814 = vmatpush1.msk.msra.mxu0 %vm2972_vm0, %v7954_v43  ;;  %28770 = vmatprep.subr.msk.mxu1 %vm2972_vm0, %v7109_v31  ;;  %v7959_v49 = vsel %vm7943_vm6, %v40287_v48, %v40286_v26  ;;  %v7958_v40 = vsel %vm7943_vm6, %v40291_v30, %v40287_v48 }
 0x23e   :  { %28819 = vmatprep.subr.msk.mxu0 %vm2972_vm0, %v7959_v49  ;;  %16181 = vrot.lane.b32.xlu1 %v34757_v51, %s31948_s20  ;;  %v34845_v3 = vpop.f32.mrb[68].mxu1  ;;  %v7108_v49 = vsel %vm7105_vm5, %v40274_v18, %v40284_v41 }
 0x23f   :  { %40288 = vst [vmem:[#allocation6_spill] sm:$0xff] %v34845_v3  ;;  %14507 = vrot.lane.b32.xlu0 %v34783_v27, %s31946_s25  ;;  %7233 = vmatprep.mubr.f32.mxu1 %v40241_v50  ;;  %v34850_v43 = vpop.f32.mrb[69].mxu1  ;;  %v34852_v31 = vpop.permute.xlu0 %10386 }
 0x240   :  { %40289 = vst [vmem:[#allocation7_spill] sm:$0xff] %v34850_v43  ;;  %8426 = vmatprep.mubr.f32.mxu0 %v40241_v50  ;;  %28769 = vmatmul.mubr.msk.f32.vlgmr.msra.gmra.mrb[100].mxu1 %vm5554_vm4, %v34742_v62  ;;  %v34860_v57 = vpop.permute.xlu1 %11221  ;;  %v4749_v3 = vpop.f32.mrb[70].mxu1  ;;  %v40292_v43 = vld [vmem:[#allocation21_spill] sm:$0xff] }
 0x241   :  { %40290 = vst [vmem:[#allocation15_spill] sm:$0xff] %v34860_v57  ;;  %28771 = vmatpush1.msk.msra.mxu1 %vm2972_vm0, %v7108_v49  ;;  %28815 = vmatmul.mubr.msk.f32.vlgmr.msra.gmra.mrb[104].mxu0 %vm5554_vm4, %v34843_v17  ;;  %v7111_v18 = vsel %vm7105_vm5, %v40293_v5, %v40292_v43  ;;  %v4750_v41 = vpop.f32.mrb[71].mxu1  ;;  %v7963_v3 = vsel %vm7943_vm6, %v34389_v54, %v34497_v13  ;;  %v40308_v57 = vld [vmem:[#allocation72_spill] sm:$0xff] }
 0x242   :  { %28820 = vmatpush1.msk.msra.mxu0 %vm2972_vm0, %v7958_v40  ;;  %28773 = vmatprep.subr.msk.mxu1 %vm2972_vm0, %v7111_v18  ;;  %v7110_v40 = vsel %vm7105_vm5, %v40283_v60, %v40293_v5  ;;  %v40294_v18 = vld [vmem:[#allocation56_spill] sm:$0xff]  ;;  %v40298_v60 = vld [vmem:[#allocation29_spill] sm:$0xff] }
 0x243   :  { %28825 = vmatprep.subr.msk.mxu0 %vm2972_vm0, %v7963_v3  ;;  %17012 = vrot.lane.b32.xlu1 %v34783_v27, %s31949_s30  ;;  %v34879_v48 = vpop.permute.xlu0 %10390  ;;  %v34890_v41 = vmax.f32 %v40294_v18, 0.0  ;;  %v40296_v3 = vld [vmem:[#allocation67_spill] sm:$0xff]  ;;  %v7113_v5 = vsel %vm7105_vm5, %v40298_v60, %v40297_v11  ;;  %v40299_v18 = vld [vmem:[#allocation53_spill] sm:$0xff] }
 0x244   :  { %15346 = vrot.lane.b32.xlu0 %v34757_v51, %s31947_s11  ;;  %7304 = vmatprep.mubr.f32.mxu1 %v40241_v50  ;;  %v34884_v49 = vpop.permute.xlu1 %11225  ;;  %v7962_v13 = vsel %vm7943_vm6, %v40296_v3, %v34389_v54  ;;  %v8793_v12 = vsel %vm8781_vm7, %v40300_v58, %v40299_v18  ;;  %v34911_v54 = vpop.f32.mrb[60].mxu0 }
 0x245   :  { %40295 = vst [vmem:[#allocation52_spill] sm:$0xff] %v34890_v41  ;;  %8568 = vmatprep.mubr.f32.mxu0 %v40241_v50  ;;  %28772 = vmatmul.mubr.msk.f32.vlgmr.msra.gmra.mrb[102].mxu1 %vm5554_vm4, %v34742_v62 }
 0x246   :  { %28774 = vmatpush1.msk.msra.mxu1 %vm2972_vm0, %v7110_v40  ;;  %28821 = vmatmul.mubr.msk.f32.vlgmr.msra.gmra.mrb[106].mxu0 %vm5554_vm4, %v34843_v17 }
 0x247   :  { %28826 = vmatpush1.msk.msra.mxu0 %vm2972_vm0, %v7962_v13  ;;  %28776 = vmatprep.subr.msk.mxu1 %vm2972_vm0, %v7113_v5  ;;  %v34909_v6 = vpop.permute.xlu0 %12056  ;;  %v7112_v13 = vsel %vm7105_vm5, %v40292_v43, %v40298_v60  ;;  %v40306_v43 = vld [vmem:[#allocation55_spill] sm:$0xff] }
 0x248   :  { %40301 = vst [vmem:[#allocation77_spill] sm:$0xff] %v34909_v6  ;;  %28844 = vmatprep.subr.msk.mxu0 %vm2972_vm0, %v8793_v12  ;;  %16177 = vrot.lane.b32.xlu0 %v34783_v27, %s31948_s20  ;;  %v34916_v40 = vpop.permute.xlu1 %12891  ;;  %v40303_v12 = vld [vmem:[#allocation41_spill] sm:$0xff]  ;;  %v40304_v27 = vld [vmem:[#allocation43_spill] sm:$0xff]  ;;  %v34939_v60 = vmax.f32 %v40306_v43, 0.0  ;;  %v40311_v43 = vld [vmem:[#allocation54_spill] sm:$0xff] }
 0x249   :  { %40302 = vst [vmem:[#allocation8_spill] sm:$0xff] %v34916_v40  ;;  %15348 = vrot.lane.b32.xlu1 %v34890_v41, %s31947_s11  ;;  %7375 = vmatprep.mubr.f32.mxu1 %v40241_v50  ;;  %v8792_v5 = vsel %vm8781_vm7, %v40303_v12, %v40300_v58  ;;  %v7115_v40 = vsel %vm7105_vm5, %v40304_v27, %v33872_v28  ;;  %v34954_v28 = vld [vmem:[%s39940_s3 + $0x20] sm:$0x3f] }
 0x24a   :  { %8710 = vmatprep.mubr.f32.mxu0 %v40241_v50  ;;  %28775 = vmatmul.mubr.msk.f32.vlgmr.msra.gmra.mrb[104].mxu1 %vm5554_vm4, %v34742_v62  ;;  %40307 = vst [vmem:[#allocation20_spill] sm:$0xff] %v34939_v60  ;;  %v8797_v58 = vsel %vm8781_vm7, %v34355_v61, %v40308_v57 }
 0x24b   :  { %28777 = vmatpush1.msk.msra.mxu1 %vm2972_vm0, %v7112_v13  ;;  %28827 = vmatmul.mubr.msk.f32.vlgmr.msra.gmra.mrb[108].mxu0 %vm5554_vm4, %v34843_v17  ;;  %v34936_v6 = vpop.permute.xlu0 %12060 }
 0x24c   :  { %40305 = vst [vmem:[#allocation40_spill] sm:$0xff] %v34936_v6  ;;  %28845 = vmatpush1.msk.msra.mxu0 %vm2972_vm0, %v8792_v5  ;;  %28779 = vmatprep.subr.msk.mxu1 %vm2972_vm0, %v7115_v40  ;;  %v34946_v13 = vpop.permute.xlu1 %12895  ;;  %v7114_v40 = vsel %vm7105_vm5, %v40297_v11, %v40304_v27  ;;  %v40319_v6 = vld [vmem:[#allocation71_spill] sm:$0xff] }
 0x24d   :  { %40309 = vst [vmem:[#allocation14_spill] sm:$0xff] %v34946_v13  ;;  %28850 = vmatprep.subr.msk.mxu0 %vm2972_vm0, %v8797_v58  ;;  %17016 = vrot.lane.b32.xlu0 %v34757_v51, %s31949_s30  ;;  %v8796_v58 = vsel %vm8781_vm7, %v40311_v43, %v34355_v61  ;;  %v40312_v51 = vld [vmem:[#allocation58_spill] sm:$0xff]  ;;  %v8801_v13 = vsel %vm8781_vm7, %v34410_v15, %v34527_v8 }
 0x24e   :  { %15352 = vrot.lane.b32.xlu1 %v34939_v60, %s31947_s11  ;;  %7446 = vmatprep.mubr.f32.mxu1 %v40241_v50  ;;  %v7119_v11 = vsel %vm7105_vm5, %v40312_v51, %v40266_v4 }
 0x24f   :  { %9264 = vmatprep.mubr.f32.mxu0 %v40241_v50  ;;  %28778 = vmatmul.mubr.msk.f32.vlgmr.msra.gmra.mrb[106].mxu1 %vm5554_vm4, %v34742_v62  ;;  %v34965_v5 = vpop.permute.xlu0 %11223 }
 0x250   :  { %40310 = vst [vmem:[#allocation66_spill] sm:$0xff] %v34965_v5  ;;  %28780 = vmatpush1.msk.msra.mxu1 %vm2972_vm0, %v7114_v40  ;;  %28846 = vmatmul.mubr.msk.f32.vlgmr.msra.gmra.mrb[104].mxu0 %vm5554_vm4, %v34954_v28  ;;  %v34976_v27 = vpop.permute.xlu1 %10388  ;;  %v40326_v5 = vld [vmem:[#allocation62_spill] sm:$0xff] }
 0x251   :  { %28851 = vmatpush1.msk.msra.mxu0 %vm2972_vm0, %v8796_v58  ;;  %28785 = vmatprep.subr.msk.mxu1 %vm2972_vm0, %v7119_v11  ;;  %v7118_v58 = vsel %vm7105_vm5, %v34024_v9, %v40312_v51  ;;  %v40316_v11 = vld [vmem:[#allocation64_spill] sm:$0xff]  ;;  %v7123_v9 = vsel %vm7105_vm5, %v34367_v55, %v40272_v63 }
 0x252   :  { %28856 = vmatprep.subr.msk.mxu0 %vm2972_vm0, %v8801_v13  ;;  %17018 = vrot.lane.b32.xlu1 %v34890_v41, %s31949_s30  ;;  %v34986_v61 = vpop.f32.mrb[72].mxu1  ;;  %v34999_v13 = vmax.f32 %v40316_v11, 0.0  ;;  %v35015_v11 = vpop.f32.mrb[61].mxu0 }
 0x253   :  { %40313 = vst [vmem:[#allocation76_spill] sm:$0xff] %v34986_v61  ;;  %14513 = vrot.lane.b32.xlu0 %v34890_v41, %s31946_s25  ;;  %7517 = vmatprep.mubr.f32.mxu1 %v40241_v50  ;;  %v34991_v4 = vpop.f32.mrb[73].mxu1  ;;  %v34993_v40 = vpop.permute.xlu0 %12893  ;;  %40320 = vst [vmem:[#allocation67_spill] sm:$0xff] %v35015_v11 }
 0x254   :  { %40314 = vst [vmem:[#allocation51_spill] sm:$0xff] %v34991_v4  ;;  %40315 = vst [vmem:[#allocation21_spill] sm:$0xff] %v34993_v40  ;;  %9406 = vmatprep.mubr.f32.mxu0 %v40241_v50  ;;  %28781 = vmatmul.mubr.msk.f32.vlgmr.msra.gmra.mrb[108].mxu1 %vm5554_vm4, %v34742_v62  ;;  %v35004_v61 = vpop.permute.xlu1 %12058  ;;  %v4831_v8 = vpop.f32.mrb[74].mxu1  ;;  %v8800_v4 = vsel %vm8781_vm7, %v40319_v6, %v34410_v15  ;;  %v40321_v40 = vld [vmem:[#allocation73_spill] sm:$0xff] }
 0x255   :  { %40317 = vst [vmem:[#allocation28_spill] sm:$0xff] %v34999_v13  ;;  %40318 = vst [vmem:[#allocation56_spill] sm:$0xff] %v35004_v61  ;;  %28786 = vmatpush1.msk.msra.mxu1 %vm2972_vm0, %v7118_v58  ;;  %28852 = vmatmul.mubr.msk.f32.vlgmr.msra.gmra.mrb[106].mxu0 %vm5554_vm4, %v34954_v28  ;;  %v4832_v51 = vpop.f32.mrb[75].mxu1  ;;  %v4544_v8 = vpop.f32.mrb[62].mxu0 }
 0x256   :  { %28857 = vmatpush1.msk.msra.mxu0 %vm2972_vm0, %v8800_v4  ;;  %28791 = vmatprep.subr.msk.mxu1 %vm2972_vm0, %v7123_v9  ;;  %v4545_v58 = vpop.f32.mrb[63].mxu0  ;;  %v7122_v4 = vsel %vm7105_vm5, %v40261_v25, %v34367_v55  ;;  %v40322_v9 = vld [vmem:[#allocation10_spill] sm:$0xff]  ;;  %v40323_v51 = vld [vmem:[#allocation16_spill] sm:$0xff] }
 0x257   :  { %28875 = vmatprep.subr.msk.mxu0 %vm2972_vm0, %v40321_v40  ;;  %14517 = vrot.lane.b32.xlu0 %v34939_v60, %s31946_s25  ;;  %v35023_v15 = vpop.permute.xlu0 %10392  ;;  %v7945_v8 = vsel %vm7943_vm6, %v40323_v51, %v40322_v9  ;;  %v40324_v58 = vld [vmem:[#allocation57_spill] sm:$0xff] }
 0x258   :  { %14515 = vrot.lane.b32.xlu1 %v34999_v13, %s31946_s25  ;;  %7659 = vmatprep.mubr.f32.mxu1 %v40241_v50  ;;  %v35028_v63 = vpop.permute.xlu1 %11227  ;;  %v35043_v61 = vmax.f32 %v40324_v58, 0.0  ;;  %v35057_v25 = vld [vmem:[%s39940_s3 + $0x28] sm:$0x3f] }
 0x259   :  { %9548 = vmatprep.mubr.f32.mxu0 %v40241_v50  ;;  %28787 = vmatmul.mubr.msk.f32.vlgmr.msra.gmra.mrb[110].mxu1 %vm5554_vm4, %v34742_v62  ;;  %v40328_v58 = vld [vmem:[#allocation22_spill] sm:$0xff] }
 0x25a   :  { %28792 = vmatpush1.msk.msra.mxu1 %vm2972_vm0, %v7122_v4  ;;  %28858 = vmatmul.mubr.msk.f32.vlgmr.msra.gmra.mrb[108].mxu0 %vm5554_vm4, %v34954_v28  ;;  %40325 = vst [vmem:[#allocation36_spill] sm:$0xff] %v35043_v61 }
 0x25b   :  { %28876 = vmatpush1.msk.msra.mxu0 %vm2972_vm0, %v40326_v5  ;;  %28798 = vmatprep.subr.msk.mxu1 %vm2972_vm0, %v7945_v8  ;;  %v35048_v55 = vpop.permute.xlu0 %10398  ;;  %v40327_v5 = vld [vmem:[#allocation9_spill] sm:$0xff] }
 0x25c   :  { %28881 = vmatprep.subr.msk.mxu0 %vm2972_vm0, %v34434_v34  ;;  %16183 = vrot.lane.b32.xlu0 %v34890_v41, %s31948_s20  ;;  %v35059_v4 = vpop.permute.xlu1 %10394  ;;  %v7944_v8 = vsel %vm7943_vm6, %v40327_v5, %v40323_v51  ;;  %v40329_v41 = vld [vmem:[#allocation17_spill] sm:$0xff]  ;;  %v40331_v5 = vld [vmem:[#allocation26_spill] sm:$0xff] }
 0x25d   :  { %14519 = vrot.lane.b32.xlu1 %v35043_v61, %s31946_s25  ;;  %7801 = vmatprep.mubr.f32.mxu1 %v40241_v50  ;;  %v7947_v56 = vsel %vm7943_vm6, %v40329_v41, %v40328_v58 }
 0x25e   :  { %10058 = vmatprep.mubr.f32.mxu0 %v40241_v50  ;;  %28793 = vmatmul.mubr.msk.f32.vlgmr.msra.gmra.mrb[112].mxu1 %vm5554_vm4, %v34742_v62  ;;  %v7946_v62 = vsel %vm7943_vm6, %v40322_v9, %v40329_v41  ;;  %v10423_v41 = vsel %vm5533_vm2, %v35023_v15, %v35059_v4 }
 0x25f   :  { %28799 = vmatpush1.msk.msra.mxu1 %vm2972_vm0, %v7944_v8  ;;  %28877 = vmatmul.mubr.msk.f32.vlgmr.msra.gmra.mrb[104].mxu0 %vm5554_vm4, %v35057_v25  ;;  %v35076_v16 = vpop.permute.xlu0 %11229  ;;  %v40332_v8 = vld [vmem:[#allocation31_spill] sm:$0xff] }
 0x260   :  { %28882 = vmatpush1.msk.msra.mxu0 %vm2972_vm0, %v34297_v7  ;;  %28801 = vmatprep.subr.msk.mxu1 %vm2972_vm0, %v7947_v56  ;;  %v35081_v51 = vpop.permute.xlu1 %11233  ;;  %v35098_v56 = vpop.f32.mrb[64].mxu0  ;;  %v7949_v10 = vsel %vm7943_vm6, %v40332_v8, %v40331_v5 }
 0x261   :  { %28887 = vmatprep.subr.msk.mxu0 %vm2972_vm0, %v34611_v59  ;;  %16187 = vrot.lane.b32.xlu0 %v34939_v60, %s31948_s20 }
 0x262   :  { %16185 = vrot.lane.b32.xlu1 %v34999_v13, %s31948_s20  ;;  %8071 = vmatprep.mubr.f32.mxu1 %v40241_v50 }
 0x263   :  { %10200 = vmatprep.mubr.f32.mxu0 %v40241_v50  ;;  %28800 = vmatmul.mubr.msk.f32.vlgmr.msra.gmra.mrb[100].mxu1 %vm5554_vm4, %v34843_v17  ;;  %v35096_v7 = vpop.permute.xlu0 %12068 }
 0x264   :  { %40330 = vst [vmem:[#allocation29_spill] sm:$0xff] %v35096_v7  ;;  %28802 = vmatpush1.msk.msra.mxu1 %vm2972_vm0, %v7946_v62  ;;  %28883 = vmatmul.mubr.msk.f32.vlgmr.msra.gmra.mrb[106].mxu0 %vm5554_vm4, %v35057_v25  ;;  %v35106_v11 = vpop.permute.xlu1 %12064  ;;  %v40339_v7 = vld [vmem:[#allocation35_spill] sm:$0xff] }
 0x265   :  { %40333 = vst [vmem:[#allocation53_spill] sm:$0xff] %v35106_v11  ;;  %28888 = vmatpush1.msk.msra.mxu0 %vm2972_vm0, %v34441_v0  ;;  %28804 = vmatprep.subr.msk.mxu1 %vm2972_vm0, %v7949_v10  ;;  %v7948_v10 = vsel %vm7943_vm6, %v40328_v58, %v40332_v8  ;;  %v40338_v11 = vld [vmem:[#allocation37_spill] sm:$0xff]  ;;  %v10422_v58 = vsel %vm5533_vm2, %v34879_v48, %v35023_v15  ;;  %v40340_v8 = vld [vmem:[#allocation78_spill] sm:$0xff] }
 0x266   :  { %17022 = vrot.lane.b32.xlu0 %v34939_v60, %s31949_s30  ;;  %16189 = vrot.lane.b32.xlu1 %v35043_v61, %s31948_s20  ;;  %v35118_v9 = vpop.f32.mrb[76].mxu1 }
 0x267   :  { %40334 = vst [vmem:[#allocation79_spill] sm:$0xff] %v35118_v9  ;;  %8142 = vmatprep.mubr.f32.mxu1 %v40241_v50  ;;  %10342 = vmatprep.mubr.f32.mxu0 %v40241_v50  ;;  %v35122_v62 = vpop.f32.mrb[77].mxu1  ;;  %v35124_v0 = vpop.permute.xlu0 %12899 }
 0x268   :  { %40335 = vst [vmem:[#allocation41_spill] sm:$0xff] %v35122_v62  ;;  %40336 = vst [vmem:[#allocation43_spill] sm:$0xff] %v35124_v0  ;;  %28803 = vmatmul.mubr.msk.f32.vlgmr.msra.gmra.mrb[102].mxu1 %vm5554_vm4, %v34843_v17  ;;  %28906 = vmatprep.subr.msk.mxu0 %vm2972_vm0, %v10423_v41  ;;  %v35132_v60 = vpop.permute.xlu1 %12903  ;;  %v4913_v9 = vpop.f32.mrb[78].mxu1  ;;  %v7951_v62 = vsel %vm7943_vm6, %v40339_v7, %v40338_v11  ;;  %v35148_v41 = vmax.f32 %v40340_v8, 0.0  ;;  %v35170_v8 = vld [vmem:[%s39940_s3 + $0x30] sm:$0x3f] }
 0x269   :  { %40337 = vst [vmem:[#allocation55_spill] sm:$0xff] %v35132_v60  ;;  %28805 = vmatpush1.msk.msra.mxu1 %vm2972_vm0, %v7948_v10  ;;  %8213 = vmatprep.mubr.f32.mxu1 %v40241_v50  ;;  %v4914_v0 = vpop.f32.mrb[79].mxu1 }
 0x26a   :  { %28807 = vmatprep.subr.msk.mxu1 %vm2972_vm0, %v7951_v62  ;;  %15350 = vrot.lane.b32.xlu0 %v34999_v13, %s31947_s11  ;;  %40341 = vst [vmem:[#allocation72_spill] sm:$0xff] %v35148_v41  ;;  %v7950_v62 = vsel %vm7943_vm6, %v40331_v5, %v40339_v7  ;;  %v40342_v0 = vld [vmem:[#allocation46_spill] sm:$0xff] }
 0x26b   :  { %17020 = vrot.lane.b32.xlu1 %v34999_v13, %s31949_s30  ;;  %28889 = vmatmul.mubr.msk.f32.vlgmr.msra.gmra.mrb[108].mxu0 %vm5554_vm4, %v35057_v25  ;;  %v35152_v9 = vpop.permute.xlu0 %11231  ;;  %v7953_v10 = vsel %vm7943_vm6, %v40342_v0, %v40282_v53  ;;  %v7952_v53 = vsel %vm7943_vm6, %v40338_v11, %v40342_v0  ;;  %v35203_v0 = vpop.f32.mrb[65].mxu0 }
 0x26c   :  { %28806 = vmatmul.mubr.msk.f32.vlgmr.msra.gmra.mrb[104].mxu1 %vm5554_vm4, %v34843_v17  ;;  %28907 = vmatpush1.msk.msra.mxu0 %vm2972_vm0, %v10422_v58  ;;  %v35160_v15 = vpop.permute.xlu1 %10396  ;;  %v40345_v58 = vld [vmem:[#allocation69_spill] sm:$0xff] }
 0x26d   :  { %28808 = vmatpush1.msk.msra.mxu1 %vm2972_vm0, %v7950_v62  ;;  %8284 = vmatprep.mubr.f32.mxu1 %v40241_v50  ;;  %v35190_v62 = vmax.f32 %v40345_v58, 0.0  ;;  %v7961_v58 = vsel %vm7943_vm6, %v34353_v35, %v40296_v3  ;;  %v7960_v3 = vsel %vm7943_vm6, %v40286_v26, %v34353_v35 }
 0x26e   :  { %28810 = vmatprep.subr.msk.mxu1 %vm2972_vm0, %v7953_v10  ;;  %15354 = vrot.lane.b32.xlu0 %v35043_v61, %s31947_s11  ;;  %v40347_v10 = vld [vmem:[#allocation61_spill] sm:$0xff] }
 0x26f   :  { %15356 = vrot.lane.b32.xlu1 %v35148_v41, %s31947_s11  ;;  %v35177_v7 = vpop.permute.xlu0 %12901  ;;  %10894 = vmatprep.mubr.f32.mxu0 %v40241_v50  ;;  %40346 = vst [vmem:[#allocation64_spill] sm:$0xff] %v35190_v62  ;;  %v7957_v13 = vsel %vm7943_vm6, %v40347_v10, %v40291_v30 }
 0x270   :  { %40343 = vst [vmem:[#allocation54_spill] sm:$0xff] %v35177_v7  ;;  %28809 = vmatmul.mubr.msk.f32.vlgmr.msra.gmra.mrb[106].mxu1 %vm5554_vm4, %v34843_v17  ;;  %v35185_v5 = vpop.permute.xlu1 %12066  ;;  %28908 = vmatmul.mubr.msk.f32.vlgmr.msra.gmra.mrb[104].mxu0 %vm5554_vm4, %v35170_v8  ;;  %v40353_v7 = vld [vmem:[#allocation13_spill] sm:$0xff] }
 0x271   :  { %40344 = vst [vmem:[#allocation58_spill] sm:$0xff] %v35185_v5  ;;  %28811 = vmatpush1.msk.msra.mxu1 %vm2972_vm0, %v7952_v53  ;;  %8355 = vmatprep.mubr.f32.mxu1 %v40241_v50  ;;  %v7956_v53 = vsel %vm7943_vm6, %v40277_v42, %v40347_v10  ;;  %v35223_v42 = vmax.f32 %v34393_v1, 0.0  ;;  %v40355_v5 = vld [vmem:[#allocation18_spill] sm:$0xff] }
 0x272   :  { %28816 = vmatprep.subr.msk.mxu1 %vm2972_vm0, %v7957_v13  ;;  %17024 = vrot.lane.b32.xlu0 %v35043_v61, %s31949_s30  ;;  %v4626_v13 = vpop.f32.mrb[66].mxu0 }
 0x273   :  { %15360 = vrot.lane.b32.xlu1 %v35190_v62, %s31947_s11  ;;  %v10401_v11 = vpop.permute.xlu0 %10400  ;;  %11036 = vmatprep.mubr.f32.mxu0 %v40241_v50  ;;  %v4627_v61 = vpop.f32.mrb[67].mxu0  ;;  %40348 = vst [vmem:[#allocation71_spill] sm:$0xff] %v35223_v42  ;;  %v40349_v13 = vld [vmem:[#allocation12_spill] sm:$0xff] }
 0x274   :  { %28812 = vmatmul.mubr.msk.f32.vlgmr.msra.gmra.mrb[108].mxu1 %vm5554_vm4, %v34843_v17  ;;  %v35210_v30 = vpop.permute.xlu1 %10406  ;;  %v10426_v26 = vsel %vm5533_vm2, %v35048_v55, %v10401_v11 }
 0x275   :  { %28817 = vmatpush1.msk.msra.mxu1 %vm2972_vm0, %v7956_v53  ;;  %8497 = vmatprep.mubr.f32.mxu1 %v40241_v50 }
 0x276   :  { %28822 = vmatprep.subr.msk.mxu1 %vm2972_vm0, %v7961_v58  ;;  %14521 = vrot.lane.b32.xlu0 %v35148_v41, %s31946_s25  ;;  %v40350_v58 = vld [vmem:[#allocation19_spill] sm:$0xff] }
 0x277   :  { %17026 = vrot.lane.b32.xlu1 %v35148_v41, %s31949_s30  ;;  %v35225_v10 = vpop.permute.xlu0 %10402  ;;  %v8783_v1 = vsel %vm8781_vm7, %v40350_v58, %v40349_v13  ;;  %v8782_v60 = vsel %vm8781_vm7, %v40353_v7, %v40350_v58  ;;  %v40357_v58 = vld [vmem:[#allocation27_spill] sm:$0xff] }
 0x278   :  { %28818 = vmatmul.mubr.msk.f32.vlgmr.msra.gmra.mrb[110].mxu1 %vm5554_vm4, %v34843_v17  ;;  %v35232_v61 = vpop.permute.xlu1 %11237  ;;  %v10427_v53 = vsel %vm5533_vm2, %v10401_v11, %v35225_v10  ;;  %v40354_v11 = vld [vmem:[#allocation23_spill] sm:$0xff] }
 0x279   :  { %28823 = vmatpush1.msk.msra.mxu1 %vm2972_vm0, %v7960_v3  ;;  %8639 = vmatprep.mubr.f32.mxu1 %v40241_v50 }
 0x27a   :  { %28829 = vmatprep.subr.msk.mxu1 %vm2972_vm0, %v8783_v1  ;;  %14525 = vrot.lane.b32.xlu0 %v35190_v62, %s31946_s25  ;;  %v35244_v35 = vpop.f32.mrb[80].mxu1 }
 0x27b   :  { %40351 = vst [vmem:[#allocation73_spill] sm:$0xff] %v35244_v35  ;;  %14523 = vrot.lane.b32.xlu1 %v35223_v42, %s31946_s25  ;;  %28912 = vmatprep.subr.msk.mxu0 %vm2972_vm0, %v10427_v53  ;;  %v35251_v3 = vpop.f32.mrb[81].mxu1  ;;  %v8785_v53 = vsel %vm8781_vm7, %v40355_v5, %v40354_v11 }
 0x27c   :  { %40352 = vst [vmem:[#allocation10_spill] sm:$0xff] %v35251_v3  ;;  %28824 = vmatmul.mubr.msk.f32.vlgmr.msra.gmra.mrb[112].mxu1 %vm5554_vm4, %v34843_v17  ;;  %28913 = vmatpush1.msk.msra.mxu0 %vm2972_vm0, %v10426_v26  ;;  %v35259_v1 = vpop.permute.xlu1 %12076  ;;  %v35261_v35 = vpop.permute.xlu0 %11241  ;;  %v40358_v26 = vld [vmem:[#allocation30_spill] sm:$0xff] }
 0x27d   :  { %28830 = vmatpush1.msk.msra.mxu1 %vm2972_vm0, %v8782_v60  ;;  %8909 = vmatprep.mubr.f32.mxu1 %v40241_v50  ;;  %v4995_v3 = vpop.f32.mrb[82].mxu1  ;;  %v8784_v60 = vsel %vm8781_vm7, %v40349_v13, %v40355_v5  ;;  %v35296_v5 = vmax.f32 %v34486_v19, 0.0  ;;  %v8786_v13 = vsel %vm8781_vm7, %v40354_v11, %v40358_v26 }
 0x27e   :  { %28832 = vmatprep.subr.msk.mxu1 %vm2972_vm0, %v8785_v53  ;;  %16191 = vrot.lane.b32.xlu0 %v35148_v41, %s31948_s20  ;;  %v4996_v17 = vpop.f32.mrb[83].mxu1  ;;  %v8787_v3 = vsel %vm8781_vm7, %v40358_v26, %v40357_v58  ;;  %v35325_v26 = vmax.f32 %v34346_v29, 0.0  ;;  %v35339_v29 = vpop.f32.mrb[68].mxu0 }
 0x27f   :  { %16193 = vrot.lane.b32.xlu1 %v35223_v42, %s31948_s20  ;;  %28914 = vmatmul.mubr.msk.f32.vlgmr.msra.gmra.mrb[106].mxu0 %vm5554_vm4, %v35170_v8  ;;  %40359 = vst [vmem:[#allocation57_spill] sm:$0xff] %v35296_v5 }
 0x280   :  { %28831 = vmatmul.mubr.msk.f32.vlgmr.msra.gmra.mrb[100].mxu1 %vm5554_vm4, %v34954_v28  ;;  %v35280_v7 = vpop.permute.xlu1 %12907  ;;  %11178 = vmatprep.mubr.f32.mxu0 %v40241_v50  ;;  %40364 = vst [vmem:[#allocation22_spill] sm:$0xff] %v35325_v26 }
 0x281   :  { %40356 = vst [vmem:[#allocation16_spill] sm:$0xff] %v35280_v7  ;;  %28833 = vmatpush1.msk.msra.mxu1 %vm2972_vm0, %v8784_v60  ;;  %8980 = vmatprep.mubr.f32.mxu1 %v40241_v50  ;;  %v35288_v53 = vpop.permute.xlu0 %12072  ;;  %v40360_v60 = vld [vmem:[#allocation38_spill] sm:$0xff] }
 0x282   :  { %28835 = vmatprep.subr.msk.mxu1 %vm2972_vm0, %v8787_v3  ;;  %16195 = vrot.lane.b32.xlu0 %v35190_v62, %s31948_s20  ;;  %v40361_v3 = vld [vmem:[#allocation34_spill] sm:$0xff] }
 0x283   :  { %17028 = vrot.lane.b32.xlu1 %v35223_v42, %s31949_s30  ;;  %v8789_v41 = vsel %vm8781_vm7, %v40361_v3, %v40360_v60  ;;  %v8788_v19 = vsel %vm8781_vm7, %v40357_v58, %v40361_v3 }
 0x284   :  { %28834 = vmatmul.mubr.msk.f32.vlgmr.msra.gmra.mrb[102].mxu1 %vm5554_vm4, %v34954_v28  ;;  %v35303_v17 = vpop.permute.xlu1 %11239 }
 0x285   :  { %28836 = vmatpush1.msk.msra.mxu1 %vm2972_vm0, %v8786_v13  ;;  %9051 = vmatprep.mubr.f32.mxu1 %v40241_v50  ;;  %v35310_v7 = vpop.permute.xlu0 %12911 }
 0x286   :  { %40362 = vst [vmem:[#allocation62_spill] sm:$0xff] %v35310_v7  ;;  %28838 = vmatprep.subr.msk.mxu1 %vm2972_vm0, %v8789_v41  ;;  %17030 = vrot.lane.b32.xlu0 %v35190_v62, %s31949_s30  ;;  %v40365_v41 = vld [vmem:[#allocation45_spill] sm:$0xff] }
 0x287   :  { %14529 = vrot.lane.b32.xlu1 %v35296_v5, %s31946_s25  ;;  %v8791_v13 = vsel %vm8781_vm7, %v40365_v41, %v40303_v12  ;;  %v8790_v58 = vsel %vm8781_vm7, %v40360_v60, %v40365_v41  ;;  %v40366_v12 = vld [vmem:[#allocation60_spill] sm:$0xff] }
 0x288   :  { %28837 = vmatmul.mubr.msk.f32.vlgmr.msra.gmra.mrb[104].mxu1 %vm5554_vm4, %v34954_v28  ;;  %v35322_v11 = vpop.permute.xlu1 %12909  ;;  %v8795_v3 = vsel %vm8781_vm7, %v40366_v12, %v40311_v43  ;;  %v8794_v43 = vsel %vm8781_vm7, %v40299_v18, %v40366_v12 }
 0x289   :  { %40363 = vst [vmem:[#allocation9_spill] sm:$0xff] %v35322_v11  ;;  %28839 = vmatpush1.msk.msra.mxu1 %vm2972_vm0, %v8788_v19  ;;  %9122 = vmatprep.mubr.f32.mxu1 %v40241_v50  ;;  %v35332_v62 = vpop.permute.xlu0 %10404 }
 0x28a   :  { %28841 = vmatprep.subr.msk.mxu1 %vm2972_vm0, %v8791_v13  ;;  %15358 = vrot.lane.b32.xlu0 %v35223_v42, %s31947_s11 }
 0x28b   :  { %15368 = vrot.lane.b32.xlu1 %v35325_v26, %s31947_s11 }
 0x28c   :  { %28840 = vmatmul.mubr.msk.f32.vlgmr.msra.gmra.mrb[106].mxu1 %vm5554_vm4, %v34954_v28 }
 0x28d   :  { %28842 = vmatpush1.msk.msra.mxu1 %vm2972_vm0, %v8790_v58  ;;  %9193 = vmatprep.mubr.f32.mxu1 %v40241_v50  ;;  %v35351_v19 = vpop.permute.xlu1 %11243  ;;  %v35364_v58 = vpop.f32.mrb[69].mxu0 }
 0x28e   :  { %28847 = vmatprep.subr.msk.mxu1 %vm2972_vm0, %v8795_v3  ;;  %14533 = vrot.lane.b32.xlu0 %v35325_v26, %s31946_s25  ;;  %v35356_v13 = vpop.permute.xlu0 %11235  ;;  %v35358_v60 = vpop.f32.mrb[84].mxu1 }
 0x28f   :  { %40367 = vst [vmem:[#allocation17_spill] sm:$0xff] %v35358_v60  ;;  %16199 = vrot.lane.b32.xlu1 %v35296_v5, %s31948_s20  ;;  %v35362_v41 = vpop.f32.mrb[85].mxu1  ;;  %v4708_v42 = vpop.f32.mrb[70].mxu0  ;;  %v40369_v60 = vld [vmem:[#allocation82_spill] sm:$0xff] }
 0x290   :  { %40368 = vst [vmem:[#allocation26_spill] sm:$0xff] %v35362_v41  ;;  %28843 = vmatmul.mubr.msk.f32.vlgmr.msra.gmra.mrb[108].mxu1 %vm5554_vm4, %v34954_v28  ;;  %v5077_v3 = vpop.f32.mrb[86].mxu1  ;;  %v8799_v11 = vsel %vm8781_vm7, %v40369_v60, %v40319_v6  ;;  %v4709_v7 = vpop.f32.mrb[71].mxu0  ;;  %v35384_v42 = vmax.f32 %v34574_v23, 0.0  ;;  %v8798_v6 = vsel %vm8781_vm7, %v40308_v57, %v40369_v60  ;;  %v40372_v60 = vld [vmem:[#allocation24_spill] sm:$0xff] }
 0x291   :  { %28848 = vmatpush1.msk.msra.mxu1 %vm2972_vm0, %v8794_v43  ;;  %9335 = vmatprep.mubr.f32.mxu1 %v40241_v50  ;;  %v5078_v41 = vpop.f32.mrb[87].mxu1  ;;  %v40371_v7 = vld [vmem:[#allocation32_spill] sm:$0xff]  ;;  %v40375_v43 = vld [vmem:[#allocation25_spill] sm:$0xff] }
 0x292   :  { %28853 = vmatprep.subr.msk.mxu1 %vm2972_vm0, %v8799_v11  ;;  %15364 = vrot.lane.b32.xlu0 %v35296_v5, %s31947_s11  ;;  %v35379_v18 = vpop.permute.xlu1 %14509  ;;  %v35401_v11 = vpop.f32.mrb[72].mxu0  ;;  %v40373_v41 = vld [vmem:[#allocation33_spill] sm:$0xff] }
 0x293   :  { %40370 = vst [vmem:[#allocation31_spill] sm:$0xff] %v35379_v18  ;;  %17034 = vrot.lane.b32.xlu1 %v35296_v5, %s31949_s30  ;;  %v35386_v12 = vpop.permute.xlu0 %12074  ;;  %v40385_v5 = vld [vmem:[#allocation68_spill] sm:$0xff] }
 0x294   :  { %28849 = vmatmul.mubr.msk.f32.vlgmr.msra.gmra.mrb[110].mxu1 %vm5554_vm4, %v34954_v28 }
 0x295   :  { %28854 = vmatpush1.msk.msra.mxu1 %vm2972_vm0, %v8798_v6  ;;  %9477 = vmatprep.mubr.f32.mxu1 %v40241_v50  ;;  %v40377_v6 = vld [vmem:[#allocation48_spill] sm:$0xff] }
 0x296   :  { %28860 = vmatprep.subr.msk.mxu1 %vm2972_vm0, %v40371_v7  ;;  %16203 = vrot.lane.b32.xlu0 %v35325_v26, %s31948_s20  ;;  %v35430_v7 = vmax.f32 %v34652_v24, 0.0  ;;  %v40379_v24 = vld [vmem:[#allocation39_spill] sm:$0xff] }
 0x297   :  { %14531 = vrot.lane.b32.xlu1 %v35384_v42, %s31946_s25  ;;  %v10409_v23 = vpop.permute.xlu0 %10408 }
 0x298   :  { %28855 = vmatmul.mubr.msk.f32.vlgmr.msra.gmra.mrb[112].mxu1 %vm5554_vm4, %v34954_v28  ;;  %v35405_v57 = vpop.permute.xlu1 %11245 }
 0x299   :  { %28861 = vmatpush1.msk.msra.mxu1 %vm2972_vm0, %v40372_v60  ;;  %9703 = vmatprep.mubr.f32.mxu1 %v40241_v50 }
 0x29a   :  { %28863 = vmatprep.subr.msk.mxu1 %vm2972_vm0, %v40373_v41  ;;  %17038 = vrot.lane.b32.xlu0 %v35325_v26, %s31949_s30  ;;  %v10430_v41 = vsel %vm5533_vm2, %v35210_v30, %v10409_v23  ;;  %v40380_v26 = vld [vmem:[#allocation50_spill] sm:$0xff] }
 0x29b   :  { %16201 = vrot.lane.b32.xlu1 %v35384_v42, %s31948_s20 }
 0x29c   :  { %28862 = vmatmul.mubr.msk.f32.vlgmr.msra.gmra.mrb[100].mxu1 %vm5554_vm4, %v35057_v25  ;;  %v35418_v28 = vpop.permute.xlu1 %16179 }
 0x29d   :  { %40374 = vst [vmem:[#allocation37_spill] sm:$0xff] %v35418_v28  ;;  %28864 = vmatpush1.msk.msra.mxu1 %vm2972_vm0, %v40375_v43  ;;  %9774 = vmatprep.mubr.f32.mxu1 %v40241_v50  ;;  %v35423_v3 = vpop.permute.xlu0 %10410  ;;  %v40378_v43 = vld [vmem:[#allocation84_spill] sm:$0xff] }
 0x29e   :  { %40376 = vst [vmem:[#allocation35_spill] sm:$0xff] %v35423_v3  ;;  %28866 = vmatprep.subr.msk.mxu1 %vm2972_vm0, %v40377_v6  ;;  %15366 = vrot.lane.b32.xlu0 %v35384_v42, %s31947_s11  ;;  %v10431_v60 = vsel %vm5533_vm2, %v10409_v23, %v35423_v3  ;;  %v35443_v6 = vmax.f32 %v40378_v43, 0.0 }
 0x29f   :  { %17036 = vrot.lane.b32.xlu1 %v35384_v42, %s31949_s30  ;;  %28918 = vmatprep.subr.msk.mxu0 %vm2972_vm0, %v10431_v60 }
 0x2a0   :  { %28865 = vmatmul.mubr.msk.f32.vlgmr.msra.gmra.mrb[102].mxu1 %vm5554_vm4, %v35057_v25  ;;  %28919 = vmatpush1.msk.msra.mxu0 %vm2972_vm0, %v10430_v41  ;;  %v11258_v41 = vsel %vm7105_vm5, %v35028_v63, %v35076_v16 }
 0x2a1   :  { %28867 = vmatpush1.msk.msra.mxu1 %vm2972_vm0, %v40379_v24  ;;  %9845 = vmatprep.mubr.f32.mxu1 %v40241_v50  ;;  %v35448_v28 = vpop.permute.xlu1 %12915 }
 0x2a2   :  { %28869 = vmatprep.subr.msk.mxu1 %vm2972_vm0, %v40380_v26  ;;  %14537 = vrot.lane.b32.xlu0 %v35430_v7, %s31946_s25  ;;  %v35454_v23 = vpop.permute.xlu0 %15344  ;;  %v35456_v60 = vpop.f32.mrb[88].mxu1 }
 0x2a3   :  { %40381 = vst [vmem:[#allocation78_spill] sm:$0xff] %v35454_v23  ;;  %40382 = vst [vmem:[#allocation46_spill] sm:$0xff] %v35456_v60  ;;  %14541 = vrot.lane.b32.xlu1 %v35443_v6, %s31946_s25  ;;  %28920 = vmatmul.mubr.msk.f32.vlgmr.msra.gmra.mrb[108].mxu0 %vm5554_vm4, %v35170_v8  ;;  %v35465_v43 = vpop.f32.mrb[89].mxu1  ;;  %v35467_v26 = vpop.f32.mrb[73].mxu0  ;;  %v40384_v23 = vld [vmem:[#allocation42_spill] sm:$0xff] }
 0x2a4   :  { %40383 = vst [vmem:[#allocation69_spill] sm:$0xff] %v35465_v43  ;;  %28868 = vmatmul.mubr.msk.f32.vlgmr.msra.gmra.mrb[104].mxu1 %vm5554_vm4, %v35057_v25  ;;  %28937 = vmatprep.subr.msk.mxu0 %vm2972_vm0, %v11258_v41  ;;  %v5159_v24 = vpop.f32.mrb[90].mxu1  ;;  %v4790_v60 = vpop.f32.mrb[74].mxu0  ;;  %v11257_v43 = vsel %vm7105_vm5, %v34884_v49, %v35028_v63  ;;  %v40386_v63 = vld [vmem:[#allocation59_spill] sm:$0xff] }
 0x2a5   :  { %28870 = vmatpush1.msk.msra.mxu1 %vm2972_vm0, %v40384_v23  ;;  %9916 = vmatprep.mubr.f32.mxu1 %v40241_v50  ;;  %v5160_v3 = vpop.f32.mrb[91].mxu1  ;;  %v4791_v18 = vpop.f32.mrb[75].mxu0  ;;  %v40387_v23 = vld [vmem:[#allocation81_spill] sm:$0xff]  ;;  %v40389_v24 = vld [vmem:[#allocation74_spill] sm:$0xff] }
 0x2a6   :  { %28872 = vmatprep.subr.msk.mxu1 %vm2972_vm0, %v40385_v5  ;;  %15376 = vrot.lane.b32.xlu0 %v35443_v6, %s31947_s11  ;;  %v35482_v41 = vpop.permute.xlu1 %14511  ;;  %v11262_v18 = vsel %vm7105_vm5, %v35356_v13, %v35232_v61  ;;  %v35501_v5 = vld [vmem:[%s39940_s3 + $0x38] sm:$0x3f] }
 0x2a7   :  { %15372 = vrot.lane.b32.xlu1 %v35430_v7, %s31947_s11  ;;  %28938 = vmatpush1.msk.msra.mxu0 %vm2972_vm0, %v11257_v43  ;;  %v35490_v3 = vpop.permute.xlu0 %12080 }
 0x2a8   :  { %28871 = vmatmul.mubr.msk.f32.vlgmr.msra.gmra.mrb[106].mxu1 %vm5554_vm4, %v35057_v25  ;;  %28943 = vmatprep.subr.msk.mxu0 %vm2972_vm0, %v11262_v18  ;;  %v11261_v18 = vsel %vm7105_vm5, %v35081_v51, %v35356_v13 }
 0x2a9   :  { %28873 = vmatpush1.msk.msra.mxu1 %vm2972_vm0, %v40386_v63  ;;  %9987 = vmatprep.mubr.f32.mxu1 %v40241_v50  ;;  %v35529_v63 = vmax.f32 %v34746_v38, 0.0  ;;  %v40391_v38 = vld [vmem:[#allocation83_spill] sm:$0xff] }
 0x2aa   :  { %28878 = vmatprep.subr.msk.mxu1 %vm2972_vm0, %v40387_v23  ;;  %16207 = vrot.lane.b32.xlu0 %v35430_v7, %s31948_s20  ;;  %v11266_v23 = vsel %vm7105_vm5, %v35351_v19, %v35405_v57  ;;  %v10413_v13 = vsel %vm5533_vm2, %v34547_v20, %v40391_v38 }
 0x2ab   :  { %16211 = vrot.lane.b32.xlu1 %v35443_v6, %s31948_s20  ;;  %11729 = vmatprep.mubr.f32.mxu0 %v40241_v50  ;;  %v35510_v60 = vpop.permute.xlu0 %17014 }
 0x2ac   :  { %40388 = vst [vmem:[#allocation61_spill] sm:$0xff] %v35510_v60  ;;  %28874 = vmatmul.mubr.msk.f32.vlgmr.msra.gmra.mrb[108].mxu1 %vm5554_vm4, %v35057_v25  ;;  %28939 = vmatmul.mubr.msk.f32.vlgmr.msra.gmra.mrb[104].mxu0 %vm5554_vm4, %v35501_v5  ;;  %v35516_v43 = vpop.permute.xlu1 %15342 }
 0x2ad   :  { %28879 = vmatpush1.msk.msra.mxu1 %vm2972_vm0, %v40389_v24  ;;  %10129 = vmatprep.mubr.f32.mxu1 %v40241_v50  ;;  %v35537_v24 = vpop.f32.mrb[76].mxu0 }
 0x2ae   :  { %28884 = vmatprep.subr.msk.mxu1 %vm2972_vm0, %v34542_v52  ;;  %17042 = vrot.lane.b32.xlu0 %v35430_v7, %s31949_s30 }
 0x2af   :  { %17046 = vrot.lane.b32.xlu1 %v35443_v6, %s31949_s30  ;;  %28944 = vmatpush1.msk.msra.mxu0 %vm2972_vm0, %v11261_v18 }
 0x2b0   :  { %28880 = vmatmul.mubr.msk.f32.vlgmr.msra.gmra.mrb[110].mxu1 %vm5554_vm4, %v35057_v25  ;;  %28949 = vmatprep.subr.msk.mxu0 %vm2972_vm0, %v11266_v23  ;;  %v35542_v52 = vpop.permute.xlu1 %16181  ;;  %v11265_v23 = vsel %vm7105_vm5, %v35261_v35, %v35351_v19 }
 0x2b1   :  { %40390 = vst [vmem:[#allocation12_spill] sm:$0xff] %v35542_v52  ;;  %28885 = vmatpush1.msk.msra.mxu1 %vm2972_vm0, %v34456_v47  ;;  %10271 = vmatprep.mubr.f32.mxu1 %v40241_v50  ;;  %v35550_v18 = vpop.permute.xlu0 %14507  ;;  %v10412_v47 = vsel %vm5533_vm2, %v34438_v33, %v34547_v20  ;;  %v10415_v33 = vsel %vm5533_vm2, %v34554_v32, %v34650_v44  ;;  %v40466_v52 = vld [vmem:[#allocation5_spill] sm:$0xff] }
 0x2b2   :  { %28891 = vmatprep.subr.msk.mxu1 %vm2972_vm0, %v10413_v13  ;;  %14539 = vrot.lane.b32.xlu0 %v35529_v63, %s31946_s25  ;;  %v40392_v13 = vld [vmem:[#allocation70_spill] sm:$0xff] }
 0x2b3   :  { %12905 = vrot.lane.b32.xlu1 %v34434_v34, %s31949_s30  ;;  %11871 = vmatprep.mubr.f32.mxu0 %v40241_v50  ;;  %v35569_v60 = vmax.f32 %v40392_v13, 0.0 }
 0x2b4   :  { %28886 = vmatmul.mubr.msk.f32.vlgmr.msra.gmra.mrb[112].mxu1 %vm5554_vm4, %v35057_v25  ;;  %28945 = vmatmul.mubr.msk.f32.vlgmr.msra.gmra.mrb[106].mxu0 %vm5554_vm4, %v35501_v5 }
 0x2b5   :  { %28892 = vmatpush1.msk.msra.mxu1 %vm2972_vm0, %v10412_v47  ;;  %28950 = vmatpush1.msk.msra.mxu0 %vm2972_vm0, %v11265_v23  ;;  %v35576_v20 = vpop.permute.xlu1 %17012  ;;  %v10414_v23 = vsel %vm5533_vm2, %v40391_v38, %v34554_v32 }
 0x2b6   :  { %40393 = vst [vmem:[#allocation19_spill] sm:$0xff] %v35576_v20  ;;  %28894 = vmatprep.subr.msk.mxu1 %vm2972_vm0, %v10415_v33  ;;  %12062 = vrot.lane.b32.xlu0 %v40321_v40, %s31948_s20  ;;  %v35581_v25 = vpop.permute.xlu0 %15346  ;;  %v35583_v19 = vpop.f32.mrb[92].mxu1  ;;  %v40396_v33 = vld [vmem:[#allocation80_spill] sm:$0xff] }
 0x2b7   :  { %40394 = vst [vmem:[#allocation13_spill] sm:$0xff] %v35583_v19  ;;  %14527 = vrot.lane.b32.xlu1 %v35569_v60, %s31946_s25  ;;  %10539 = vmatprep.mubr.f32.mxu1 %v40241_v50  ;;  %v35588_v47 = vpop.f32.mrb[93].mxu1  ;;  %v35597_v20 = vmax.f32 %v40396_v33, 0.0  ;;  %v10417_v19 = vsel %vm5533_vm2, %v34751_v21, %v34673_v36  ;;  %v10421_v33 = vsel %vm5533_vm2, %v34976_v27, %v34879_v48  ;;  %v35660_v48 = vmax.f32 %v34593_v22, 0.0 }
 0x2b8   :  { %40395 = vst [vmem:[#allocation23_spill] sm:$0xff] %v35588_v47  ;;  %28893 = vmatmul.mubr.msk.f32.vlgmr.msra.gmra.mrb[100].mxu1 %vm5554_vm4, %v35170_v8  ;;  %v5241_v13 = vpop.f32.mrb[94].mxu1  ;;  %12013 = vmatprep.mubr.f32.mxu0 %v40241_v50  ;;  %v35675_v22 = vmax.f32 %v34911_v54, 0.0 }
 0x2b9   :  { %28895 = vmatpush1.msk.msra.mxu1 %vm2972_vm0, %v10414_v23  ;;  %10610 = vmatprep.mubr.f32.mxu1 %v40241_v50  ;;  %v5242_v47 = vpop.f32.mrb[95].mxu1  ;;  %v10416_v23 = vsel %vm5533_vm2, %v34650_v44, %v34751_v21  ;;  %v35633_v21 = vpop.f32.mrb[77].mxu0  ;;  %40400 = vst [vmem:[#allocation38_spill] sm:$0xff] %v35660_v48 }
 0x2ba   :  { %28897 = vmatprep.subr.msk.mxu1 %vm2972_vm0, %v10417_v19  ;;  %12070 = vrot.lane.b32.xlu0 %v34434_v34, %s31948_s20  ;;  %v35607_v32 = vpop.permute.xlu0 %16177  ;;  %v10419_v34 = vsel %vm5533_vm2, %v34777_v39, %v34852_v31  ;;  %v10418_v19 = vsel %vm5533_vm2, %v34673_v36, %v34777_v39  ;;  %v4872_v13 = vpop.f32.mrb[78].mxu0  ;;  %v10420_v36 = vsel %vm5533_vm2, %v34852_v31, %v34976_v27 }
 0x2bb   :  { %40397 = vst [vmem:[#allocation18_spill] sm:$0xff] %v35607_v32  ;;  %14535 = vrot.lane.b32.xlu1 %v35597_v20, %s31946_s25  ;;  %v35611_v38 = vpop.permute.xlu1 %15348  ;;  %28951 = vmatmul.mubr.msk.f32.vlgmr.msra.gmra.mrb[108].mxu0 %vm5554_vm4, %v35501_v5  ;;  %40401 = vst [vmem:[#allocation34_spill] sm:$0xff] %v35675_v22  ;;  %v10424_v31 = vsel %vm5533_vm2, %v35059_v4, %v35160_v15  ;;  %v10429_v27 = vsel %vm5533_vm2, %v35332_v62, %v35210_v30  ;;  %v40481_v32 = vld [vmem:[#allocation9_spill] sm:$0xff] }
 0x2bc   :  { %28896 = vmatmul.mubr.msk.f32.vlgmr.msra.gmra.mrb[102].mxu1 %vm5554_vm4, %v35170_v8  ;;  %12564 = vmatprep.mubr.f32.mxu0 %v40241_v50 }
 0x2bd   :  { %28898 = vmatpush1.msk.msra.mxu1 %vm2972_vm0, %v10416_v23  ;;  %10681 = vmatprep.mubr.f32.mxu1 %v40241_v50  ;;  %v4873_v23 = vpop.f32.mrb[79].mxu0 }
 0x2be   :  { %28900 = vmatprep.subr.msk.mxu1 %vm2972_vm0, %v10419_v34  ;;  %12078 = vrot.lane.b32.xlu0 %v34611_v59, %s31948_s20  ;;  %v11250_v23 = vsel %vm7105_vm5, %v34572_v14, %v34658_v45 }
 0x2bf   :  { %15362 = vrot.lane.b32.xlu1 %v35569_v60, %s31947_s11  ;;  %v35631_v44 = vpop.permute.xlu0 %17016 }
 0x2c0   :  { %40398 = vst [vmem:[#allocation27_spill] sm:$0xff] %v35631_v44  ;;  %28899 = vmatmul.mubr.msk.f32.vlgmr.msra.gmra.mrb[104].mxu1 %vm5554_vm4, %v35170_v8  ;;  %v35640_v47 = vpop.permute.xlu1 %15352 }
 0x2c1   :  { %28901 = vmatpush1.msk.msra.mxu1 %vm2972_vm0, %v10418_v19  ;;  %10752 = vmatprep.mubr.f32.mxu1 %v40241_v50  ;;  %v11248_v19 = vsel %vm7105_vm5, %v34582_v2, %v34474_v37 }
 0x2c2   :  { %28903 = vmatprep.subr.msk.mxu1 %vm2972_vm0, %v10421_v33  ;;  %12897 = vrot.lane.b32.xlu0 %v40321_v40, %s31949_s30  ;;  %v10425_v40 = vsel %vm5533_vm2, %v35160_v15, %v35048_v55  ;;  %v10428_v15 = vsel %vm5533_vm2, %v35225_v10, %v35332_v62  ;;  %v11247_v10 = vsel %vm7105_vm5, %v34477_v46, %v34582_v2  ;;  %v40405_v46 = vld [vmem:[#allocation67_spill] sm:$0xff] }
 0x2c3   :  { %15374 = vrot.lane.b32.xlu1 %v35529_v63, %s31947_s11  ;;  %v35735_v2 = vmax.f32 %v40405_v46, 0.0  ;;  %v40416_v46 = vld [vmem:[#allocation15_spill] sm:$0xff] }
 0x2c4   :  { %28902 = vmatmul.mubr.msk.f32.vlgmr.msra.gmra.mrb[106].mxu1 %vm5554_vm4, %v35170_v8  ;;  %v35657_v39 = vpop.permute.xlu1 %17018 }
 0x2c5   :  { %40399 = vst [vmem:[#allocation30_spill] sm:$0xff] %v35657_v39  ;;  %28904 = vmatpush1.msk.msra.mxu1 %vm2972_vm0, %v10420_v36  ;;  %10823 = vmatprep.mubr.f32.mxu1 %v40241_v50  ;;  %v35667_v34 = vpop.permute.xlu0 %14513  ;;  %40406 = vst [vmem:[#allocation32_spill] sm:$0xff] %v35735_v2  ;;  %v40408_v36 = vld [vmem:[#allocation85_spill] sm:$0xff]  ;;  %v12099_v39 = vsel %vm7943_vm6, %v35386_v12, %v35259_v1 }
 0x2c6   :  { %28909 = vmatprep.subr.msk.mxu1 %vm2972_vm0, %v10425_v40  ;;  %12913 = vrot.lane.b32.xlu0 %v34611_v59, %s31949_s30  ;;  %v35740_v40 = vmax.f32 %v40408_v36, 0.0  ;;  %v40417_v36 = vld [vmem:[#allocation44_spill] sm:$0xff] }
 0x2c7   :  { %18644 = vrot.lane.b32.xlu1 %v35660_v48, %s31946_s25 }
 0x2c8   :  { %28905 = vmatmul.mubr.msk.f32.vlgmr.msra.gmra.mrb[108].mxu1 %vm5554_vm4, %v35170_v8 }
 0x2c9   :  { %28910 = vmatpush1.msk.msra.mxu1 %vm2972_vm0, %v10424_v31  ;;  %10965 = vmatprep.mubr.f32.mxu1 %v40241_v50  ;;  %v35687_v59 = vpop.permute.xlu0 %14517  ;;  %v11249_v31 = vsel %vm7105_vm5, %v34474_v37, %v34572_v14 }
 0x2ca   :  { %28915 = vmatprep.subr.msk.mxu1 %vm2972_vm0, %v10429_v27  ;;  %15370 = vrot.lane.b32.xlu0 %v35597_v20, %s31947_s11  ;;  %v35692_v54 = vpop.permute.xlu1 %14515  ;;  %v35694_v55 = vpop.f32.mrb[96].mxu1 }
 0x2cb   :  { %40402 = vst [vmem:[#allocation45_spill] sm:$0xff] %v35694_v55  ;;  %15380 = vrot.lane.b32.xlu1 %v35675_v22, %s31947_s11  ;;  %v35698_v4 = vpop.f32.mrb[97].mxu1 }
 0x2cc   :  { %40403 = vst [vmem:[#allocation60_spill] sm:$0xff] %v35698_v4  ;;  %28911 = vmatmul.mubr.msk.f32.vlgmr.msra.gmra.mrb[110].mxu1 %vm5554_vm4, %v35170_v8  ;;  %v5323_v30 = vpop.f32.mrb[98].mxu1  ;;  %v40431_v4 = vld [vmem:[#allocation92_spill] sm:$0xff] }
 0x2cd   :  { %28916 = vmatpush1.msk.msra.mxu1 %vm2972_vm0, %v10428_v15  ;;  %11107 = vmatprep.mubr.f32.mxu1 %v40241_v50  ;;  %v5324_v13 = vpop.f32.mrb[99].mxu1  ;;  %v40410_v15 = vld [vmem:[#allocation97_spill] sm:$0xff] }
 0x2ce   :  { %28922 = vmatprep.subr.msk.mxu1 %vm2972_vm0, %v11248_v19  ;;  %16209 = vrot.lane.b32.xlu0 %v35529_v63, %s31948_s20  ;;  %v35713_v33 = vpop.permute.xlu0 %16183  ;;  %v40411_v30 = vld [vmem:[#allocation65_spill] sm:$0xff] }
 0x2cf   :  { %40404 = vst [vmem:[#allocation82_spill] sm:$0xff] %v35713_v33  ;;  %16215 = vrot.lane.b32.xlu1 %v35675_v22, %s31948_s20  ;;  %v35717_v62 = vpop.permute.xlu1 %14519  ;;  %v11252_v19 = vsel %vm7105_vm5, %v40411_v30, %v40410_v15  ;;  %v11251_v37 = vsel %vm7105_vm5, %v34658_v45, %v40411_v30  ;;  %v11253_v45 = vsel %vm7105_vm5, %v40410_v15, %v40417_v36 }
 0x2d0   :  { %28917 = vmatmul.mubr.msk.f32.vlgmr.msra.gmra.mrb[112].mxu1 %vm5554_vm4, %v35170_v8 }
 0x2d1   :  { %28923 = vmatpush1.msk.msra.mxu1 %vm2972_vm0, %v11247_v10  ;;  %11374 = vmatprep.mubr.f32.mxu1 %v40241_v50  ;;  %v40414_v10 = vld [vmem:[#allocation90_spill] sm:$0xff] }
 0x2d2   :  { %28925 = vmatprep.subr.msk.mxu1 %vm2972_vm0, %v11250_v23  ;;  %17044 = vrot.lane.b32.xlu0 %v35529_v63, %s31949_s30  ;;  %v35769_v23 = vmax.f32 %v40414_v10, 0.0 }
 0x2d3   :  { %21149 = vrot.lane.b32.xlu1 %v35660_v48, %s31949_s30  ;;  %v35737_v8 = vpop.permute.xlu0 %16187 }
 0x2d4   :  { %40407 = vst [vmem:[#allocation24_spill] sm:$0xff] %v35737_v8  ;;  %28924 = vmatmul.mubr.msk.f32.vlgmr.msra.gmra.mrb[100].mxu1 %vm5554_vm4, %v35501_v5  ;;  %v35747_v27 = vpop.permute.xlu1 %16185  ;;  %40415 = vst [vmem:[#allocation84_spill] sm:$0xff] %v35769_v23  ;;  %v40465_v8 = vld [vmem:[#allocation103_spill] sm:$0xff] }
 0x2d5   :  { %40409 = vst [vmem:[#allocation33_spill] sm:$0xff] %v35747_v27  ;;  %28926 = vmatpush1.msk.msra.mxu1 %vm2972_vm0, %v11249_v31  ;;  %11445 = vmatprep.mubr.f32.mxu1 %v40241_v50  ;;  %v11254_v31 = vsel %vm7105_vm5, %v40417_v36, %v40416_v46 }
 0x2d6   :  { %28928 = vmatprep.subr.msk.mxu1 %vm2972_vm0, %v11252_v19  ;;  %14543 = vrot.lane.b32.xlu0 %v35740_v40, %s31946_s25 }
 0x2d7   :  { %19477 = vrot.lane.b32.xlu1 %v35735_v2, %s31947_s11 }
 0x2d8   :  { %28927 = vmatmul.mubr.msk.f32.vlgmr.msra.gmra.mrb[102].mxu1 %vm5554_vm4, %v35501_v5  ;;  %v35764_v14 = vpop.permute.xlu0 %17022  ;;  %v35766_v13 = vpop.permute.xlu1 %16189 }
 0x2d9   :  { %40412 = vst [vmem:[#allocation25_spill] sm:$0xff] %v35764_v14  ;;  %40413 = vst [vmem:[#allocation48_spill] sm:$0xff] %v35766_v13  ;;  %28929 = vmatpush1.msk.msra.mxu1 %vm2972_vm0, %v11251_v37  ;;  %11516 = vmatprep.mubr.f32.mxu1 %v40241_v50  ;;  %v40419_v37 = vld [vmem:[#allocation66_spill] sm:$0xff] }
 0x2da   :  { %28931 = vmatprep.subr.msk.mxu1 %vm2972_vm0, %v11254_v31  ;;  %14545 = vrot.lane.b32.xlu0 %v35675_v22, %s31946_s25  ;;  %v11256_v10 = vsel %vm7105_vm5, %v40419_v37, %v34884_v49  ;;  %v11255_v15 = vsel %vm7105_vm5, %v40416_v46, %v40419_v37  ;;  %v11260_v31 = vsel %vm7105_vm5, %v35152_v9, %v35081_v51  ;;  %v35820_v46 = vmax.f32 %v35098_v56, 0.0 }
 0x2db   :  { %19481 = vrot.lane.b32.xlu1 %v35769_v23, %s31947_s11 }
 0x2dc   :  { %28930 = vmatmul.mubr.msk.f32.vlgmr.msra.gmra.mrb[104].mxu1 %vm5554_vm4, %v35501_v5  ;;  %v35786_v30 = vpop.permute.xlu0 %15350  ;;  %40422 = vst [vmem:[#allocation68_spill] sm:$0xff] %v35820_v46 }
 0x2dd   :  { %28932 = vmatpush1.msk.msra.mxu1 %vm2972_vm0, %v11253_v45  ;;  %v35789_v19 = vpop.permute.xlu1 %17020  ;;  %11587 = vmatprep.mubr.f32.mxu1 %v40241_v50  ;;  %v11259_v45 = vsel %vm7105_vm5, %v35076_v16, %v35152_v9  ;;  %v11263_v16 = vsel %vm7105_vm5, %v35232_v61, %v35303_v17  ;;  %v40424_v9 = vld [vmem:[#allocation100_spill] sm:$0xff]  ;;  %v40429_v61 = vld [vmem:[#allocation86_spill] sm:$0xff] }
 0x2de   :  { %40418 = vst [vmem:[#allocation39_spill] sm:$0xff] %v35789_v19  ;;  %28934 = vmatprep.subr.msk.mxu1 %vm2972_vm0, %v11256_v10  ;;  %19479 = vrot.lane.b32.xlu0 %v35660_v48, %s31947_s11  ;;  %v11264_v10 = vsel %vm7105_vm5, %v35303_v17, %v35261_v35  ;;  %v35849_v35 = vmax.f32 %v40424_v9, 0.0  ;;  %v40446_v19 = vld [vmem:[#allocation56_spill] sm:$0xff] }
 0x2df   :  { %20312 = vrot.lane.b32.xlu1 %v35735_v2, %s31948_s20 }
 0x2e0   :  { %28933 = vmatmul.mubr.msk.f32.vlgmr.msra.gmra.mrb[106].mxu1 %vm5554_vm4, %v35501_v5  ;;  %v35805_v36 = vpop.permute.xlu0 %15354  ;;  %40425 = vst [vmem:[#allocation81_spill] sm:$0xff] %v35849_v35 }
 0x2e1   :  { %40420 = vst [vmem:[#allocation50_spill] sm:$0xff] %v35805_v36  ;;  %28935 = vmatpush1.msk.msra.mxu1 %vm2972_vm0, %v11255_v15  ;;  %v35808_v49 = vpop.permute.xlu1 %15356  ;;  %11658 = vmatprep.mubr.f32.mxu1 %v40241_v50 }
 0x2e2   :  { %40421 = vst [vmem:[#allocation42_spill] sm:$0xff] %v35808_v49  ;;  %28940 = vmatprep.subr.msk.mxu1 %vm2972_vm0, %v11260_v31  ;;  %20314 = vrot.lane.b32.xlu0 %v35660_v48, %s31948_s20  ;;  %v40427_v31 = vld [vmem:[#allocation87_spill] sm:$0xff]  ;;  %v35880_v48 = vld [vmem:[%s39940_s3 + $0x40] sm:$0x3f] }
 0x2e3   :  { %20316 = vrot.lane.b32.xlu1 %v35769_v23, %s31948_s20  ;;  %v40493_v49 = vld [vmem:[#allocation36_spill] sm:$0xff] }
 0x2e4   :  { %28936 = vmatmul.mubr.msk.f32.vlgmr.msra.gmra.mrb[108].mxu1 %vm5554_vm4, %v35501_v5  ;;  %v35827_v51 = vpop.permute.xlu0 %17024 }
 0x2e5   :  { %40423 = vst [vmem:[#allocation59_spill] sm:$0xff] %v35827_v51  ;;  %28941 = vmatpush1.msk.msra.mxu1 %vm2972_vm0, %v11259_v45  ;;  %v35830_v37 = vpop.permute.xlu1 %15360  ;;  %11800 = vmatprep.mubr.f32.mxu1 %v40241_v50  ;;  %v40428_v45 = vld [vmem:[#allocation91_spill] sm:$0xff] }
 0x2e6   :  { %28946 = vmatprep.subr.msk.mxu1 %vm2972_vm0, %v11264_v10  ;;  %17050 = vrot.lane.b32.xlu0 %v35675_v22, %s31949_s30  ;;  %v12083_v10 = vsel %vm7943_vm6, %v40428_v45, %v40427_v31  ;;  %v12082_v17 = vsel %vm7943_vm6, %v40429_v61, %v40428_v45  ;;  %v40440_v51 = vld [vmem:[#allocation63_spill] sm:$0xff] }
 0x2e7   :  { %18648 = vrot.lane.b32.xlu1 %v35820_v46, %s31946_s25 }
 0x2e8   :  { %28942 = vmatmul.mubr.msk.f32.vlgmr.msra.gmra.mrb[110].mxu1 %vm5554_vm4, %v35501_v5  ;;  %v35846_v56 = vpop.permute.xlu0 %14521 }
 0x2e9   :  { %28947 = vmatpush1.msk.msra.mxu1 %vm2972_vm0, %v11263_v16  ;;  %v35852_v15 = vpop.permute.xlu1 %17026  ;;  %11942 = vmatprep.mubr.f32.mxu1 %v40241_v50 }
 0x2ea   :  { %40426 = vst [vmem:[#allocation74_spill] sm:$0xff] %v35852_v15  ;;  %28953 = vmatprep.subr.msk.mxu1 %vm2972_vm0, %v12083_v10  ;;  %18642 = vrot.lane.b32.xlu0 %v35735_v2, %s31946_s25  ;;  %v40430_v10 = vld [vmem:[#allocation98_spill] sm:$0xff] }
 0x2eb   :  { %19487 = vrot.lane.b32.xlu1 %v35849_v35, %s31947_s11  ;;  %v12085_v55 = vsel %vm7943_vm6, %v40431_v4, %v40430_v10 }
 0x2ec   :  { %28948 = vmatmul.mubr.msk.f32.vlgmr.msra.gmra.mrb[112].mxu1 %vm5554_vm4, %v35501_v5  ;;  %v35868_v16 = vpop.permute.xlu0 %14525  ;;  %v12084_v5 = vsel %vm7943_vm6, %v40427_v31, %v40431_v4  ;;  %v35907_v4 = vmax.f32 %v35203_v0, 0.0 }
 0x2ed   :  { %28954 = vmatpush1.msk.msra.mxu1 %vm2972_vm0, %v12082_v17  ;;  %v35871_v9 = vpop.permute.xlu1 %14523  ;;  %12209 = vmatprep.mubr.f32.mxu1 %v40241_v50  ;;  %v40435_v17 = vld [vmem:[#allocation11_spill] sm:$0xff] }
 0x2ee   :  { %28956 = vmatprep.subr.msk.mxu1 %vm2972_vm0, %v12085_v55  ;;  %18646 = vrot.lane.b32.xlu0 %v35769_v23, %s31946_s25  ;;  %v40434_v55 = vld [vmem:[#allocation102_spill] sm:$0xff]  ;;  %40436 = vst [vmem:[#allocation80_spill] sm:$0xff] %v35907_v4  ;;  %v12086_v31 = vsel %vm7943_vm6, %v40430_v10, %v40435_v17 }
 0x2ef   :  { %20322 = vrot.lane.b32.xlu1 %v35849_v35, %s31948_s20  ;;  %v12087_v22 = vsel %vm7943_vm6, %v40435_v17, %v40434_v55  ;;  %v12088_v0 = vsel %vm7943_vm6, %v40434_v55, %v40440_v51  ;;  %v35935_v17 = vpop.f32.mrb[80].mxu0 }
 0x2f0   :  { %28955 = vmatmul.mubr.msk.f32.vlgmr.msra.gmra.mrb[100].mxu1 %vm5554_vm4, %v35880_v48  ;;  %v35892_v45 = vpop.permute.xlu0 %16191  ;;  %40442 = vst [vmem:[#allocation65_spill] sm:$0xff] %v35935_v17  ;;  %v35978_v44 = vpop.f32.mrb[81].mxu0 }
 0x2f1   :  { %40432 = vst [vmem:[#allocation83_spill] sm:$0xff] %v35892_v45  ;;  %28957 = vmatpush1.msk.msra.mxu1 %vm2972_vm0, %v12084_v5  ;;  %v35895_v61 = vpop.permute.xlu1 %16193  ;;  %12280 = vmatprep.mubr.f32.mxu1 %v40241_v50  ;;  %40451 = vst [vmem:[#allocation44_spill] sm:$0xff] %v35978_v44  ;;  %v40460_v45 = vld [vmem:[#allocation93_spill] sm:$0xff] }
 0x2f2   :  { %40433 = vst [vmem:[#allocation70_spill] sm:$0xff] %v35895_v61  ;;  %28959 = vmatprep.subr.msk.mxu1 %vm2972_vm0, %v12087_v22  ;;  %21147 = vrot.lane.b32.xlu0 %v35735_v2, %s31949_s30  ;;  %v40439_v2 = vld [vmem:[#allocation77_spill] sm:$0xff]  ;;  %v4954_v61 = vpop.f32.mrb[82].mxu0 }
 0x2f3   :  { %21153 = vrot.lane.b32.xlu1 %v35820_v46, %s31949_s30  ;;  %v12089_v15 = vsel %vm7943_vm6, %v40440_v51, %v40439_v2  ;;  %v12090_v51 = vsel %vm7943_vm6, %v40439_v2, %v40446_v19  ;;  %v40450_v2 = vld [vmem:[#allocation53_spill] sm:$0xff] }
 0x2f4   :  { %28958 = vmatmul.mubr.msk.f32.vlgmr.msra.gmra.mrb[102].mxu1 %vm5554_vm4, %v35880_v48  ;;  %v35914_v5 = vpop.permute.xlu0 %16195 }
 0x2f5   :  { %40437 = vst [vmem:[#allocation67_spill] sm:$0xff] %v35914_v5  ;;  %28960 = vmatpush1.msk.msra.mxu1 %vm2972_vm0, %v12086_v31  ;;  %v35917_v22 = vpop.permute.xlu1 %17028  ;;  %12351 = vmatprep.mubr.f32.mxu1 %v40241_v50  ;;  %v40443_v31 = vld [vmem:[#allocation101_spill] sm:$0xff]  ;;  %v40455_v5 = vld [vmem:[#allocation94_spill] sm:$0xff] }
 0x2f6   :  { %40438 = vst [vmem:[#allocation85_spill] sm:$0xff] %v35917_v22  ;;  %28962 = vmatprep.subr.msk.mxu1 %vm2972_vm0, %v12089_v15  ;;  %21151 = vrot.lane.b32.xlu0 %v35769_v23, %s31949_s30  ;;  %v35938_v22 = vmax.f32 %v40443_v31, 0.0  ;;  %v40445_v23 = vld [vmem:[#allocation40_spill] sm:$0xff]  ;;  %v40449_v31 = vld [vmem:[#allocation58_spill] sm:$0xff] }
 0x2f7   :  { %18650 = vrot.lane.b32.xlu1 %v35907_v4, %s31946_s25  ;;  %v12091_v14 = vsel %vm7943_vm6, %v40446_v19, %v40445_v23  ;;  %v12094_v19 = vsel %vm7943_vm6, %v40450_v2, %v40449_v31 }
 0x2f8   :  { %28961 = vmatmul.mubr.msk.f32.vlgmr.msra.gmra.mrb[104].mxu1 %vm5554_vm4, %v35880_v48  ;;  %v35933_v10 = vpop.permute.xlu0 %17030  ;;  %40444 = vst [vmem:[#allocation90_spill] sm:$0xff] %v35938_v22 }
 0x2f9   :  { %40441 = vst [vmem:[#allocation97_spill] sm:$0xff] %v35933_v10  ;;  %28963 = vmatpush1.msk.msra.mxu1 %vm2972_vm0, %v12088_v0  ;;  %v35941_v15 = vpop.permute.xlu1 %14529  ;;  %12422 = vmatprep.mubr.f32.mxu1 %v40241_v50 }
 0x2fa   :  { %28965 = vmatprep.subr.msk.mxu1 %vm2972_vm0, %v12091_v14  ;;  %18652 = vrot.lane.b32.xlu0 %v35849_v35, %s31946_s25  ;;  %v40448_v14 = vld [vmem:[#allocation29_spill] sm:$0xff] }
 0x2fb   :  { %18654 = vrot.lane.b32.xlu1 %v35938_v22, %s31946_s25  ;;  %v12095_v10 = vsel %vm7943_vm6, %v40449_v31, %v40448_v14  ;;  %v4955_v31 = vpop.f32.mrb[83].mxu0 }
 0x2fc   :  { %28964 = vmatmul.mubr.msk.f32.vlgmr.msra.gmra.mrb[106].mxu1 %vm5554_vm4, %v35880_v48  ;;  %v35957_v55 = vpop.permute.xlu0 %15358 }
 0x2fd   :  { %40447 = vst [vmem:[#allocation15_spill] sm:$0xff] %v35957_v55  ;;  %28966 = vmatpush1.msk.msra.mxu1 %vm2972_vm0, %v12090_v51  ;;  %v35960_v0 = vpop.permute.xlu1 %15368  ;;  %12493 = vmatprep.mubr.f32.mxu1 %v40241_v50  ;;  %v40490_v55 = vld [vmem:[#allocation28_spill] sm:$0xff] }
 0x2fe   :  { %28971 = vmatprep.subr.msk.mxu1 %vm2972_vm0, %v12095_v10  ;;  %19483 = vrot.lane.b32.xlu0 %v35820_v46, %s31947_s11 }
 0x2ff   :  { %19489 = vrot.lane.b32.xlu1 %v35938_v22, %s31947_s11 }
 0x300   :  { %28967 = vmatmul.mubr.msk.f32.vlgmr.msra.gmra.mrb[108].mxu1 %vm5554_vm4, %v35880_v48  ;;  %v35976_v51 = vpop.permute.xlu0 %14533 }
 0x301   :  { %28972 = vmatpush1.msk.msra.mxu1 %vm2972_vm0, %v12094_v19  ;;  %v35981_v10 = vpop.permute.xlu1 %16199  ;;  %12635 = vmatprep.mubr.f32.mxu1 %v40241_v50  ;;  %v12098_v19 = vsel %vm7943_vm6, %v35288_v53, %v35386_v12  ;;  %v40456_v12 = vld [vmem:[#allocation89_spill] sm:$0xff] }
 0x302   :  { %40452 = vst [vmem:[#allocation66_spill] sm:$0xff] %v35981_v10  ;;  %28977 = vmatprep.subr.msk.mxu1 %vm2972_vm0, %v12099_v39  ;;  %20318 = vrot.lane.b32.xlu0 %v35820_v46, %s31948_s20  ;;  %v40454_v39 = vld [vmem:[#allocation88_spill] sm:$0xff] }
 0x303   :  { %20324 = vrot.lane.b32.xlu1 %v35938_v22, %s31948_s20  ;;  %v12918_v31 = vsel %vm8781_vm7, %v40455_v5, %v40454_v39 }
 0x304   :  { %28973 = vmatmul.mubr.msk.f32.vlgmr.msra.gmra.mrb[110].mxu1 %vm5554_vm4, %v35880_v48  ;;  %v35997_v10 = vpop.permute.xlu0 %15364 }
 0x305   :  { %28978 = vmatpush1.msk.msra.mxu1 %vm2972_vm0, %v12098_v19  ;;  %v36000_v61 = vpop.permute.xlu1 %17034  ;;  %12777 = vmatprep.mubr.f32.mxu1 %v40241_v50  ;;  %v12917_v19 = vsel %vm8781_vm7, %v40456_v12, %v40455_v5  ;;  %v36031_v5 = vld [vmem:[%s39940_s3 + $0x48] sm:$0x3f]  ;;  %v12919_v12 = vsel %vm8781_vm7, %v40454_v39, %v40460_v45 }
 0x306   :  { %40453 = vst [vmem:[#allocation100_spill] sm:$0xff] %v36000_v61  ;;  %28984 = vmatprep.subr.msk.mxu1 %vm2972_vm0, %v12918_v31  ;;  %21157 = vrot.lane.b32.xlu0 %v35849_v35, %s31949_s30  ;;  %v40458_v61 = vld [vmem:[#allocation6_spill] sm:$0xff]  ;;  %v40459_v35 = vld [vmem:[#allocation99_spill] sm:$0xff] }
 0x307   :  { %21155 = vrot.lane.b32.xlu1 %v35907_v4, %s31949_s30  ;;  %v36019_v13 = vmax.f32 %v40458_v61, 0.0  ;;  %v12920_v27 = vsel %vm8781_vm7, %v40460_v45, %v40459_v35  ;;  %v36039_v61 = vmax.f32 %v35339_v29, 0.0  ;;  %v12922_v29 = vsel %vm8781_vm7, %v40466_v52, %v40465_v8 }
 0x308   :  { %28979 = vmatmul.mubr.msk.f32.vlgmr.msra.gmra.mrb[112].mxu1 %vm5554_vm4, %v35880_v48  ;;  %v36016_v46 = vpop.permute.xlu0 %16203  ;;  %v36063_v45 = vmax.f32 %v35364_v58, 0.0  ;;  %v12921_v39 = vsel %vm8781_vm7, %v40459_v35, %v40466_v52 }
 0x309   :  { %40457 = vst [vmem:[#allocation87_spill] sm:$0xff] %v36016_v46  ;;  %28985 = vmatpush1.msk.msra.mxu1 %vm2972_vm0, %v12917_v19  ;;  %v36022_v31 = vpop.permute.xlu1 %14531  ;;  %13044 = vmatprep.mubr.f32.mxu1 %v40241_v50  ;;  %40461 = vst [vmem:[#allocation91_spill] sm:$0xff] %v36039_v61  ;;  %v36048_v46 = vpop.f32.mrb[84].mxu0 }
 0x30a   :  { %28987 = vmatprep.subr.msk.mxu1 %vm2972_vm0, %v12920_v27  ;;  %19485 = vrot.lane.b32.xlu0 %v35907_v4, %s31947_s11  ;;  %40463 = vst [vmem:[#allocation98_spill] sm:$0xff] %v36048_v46  ;;  %v36091_v35 = vpop.f32.mrb[85].mxu0 }
 0x30b   :  { %19495 = vrot.lane.b32.xlu1 %v36019_v13, %s31947_s11  ;;  %40471 = vst [vmem:[#allocation77_spill] sm:$0xff] %v36091_v35  ;;  %v5036_v46 = vpop.f32.mrb[86].mxu0  ;;  %v40476_v35 = vld [vmem:[#allocation54_spill] sm:$0xff] }
 0x30c   :  { %28986 = vmatmul.mubr.msk.f32.vlgmr.msra.gmra.mrb[100].mxu1 %vm5554_vm4, %v36031_v5  ;;  %v36046_v19 = vpop.permute.xlu0 %17038 }
 0x30d   :  { %40462 = vst [vmem:[#allocation86_spill] sm:$0xff] %v36046_v19  ;;  %28988 = vmatpush1.msk.msra.mxu1 %vm2972_vm0, %v12919_v12  ;;  %v36051_v27 = vpop.permute.xlu1 %16201  ;;  %13115 = vmatprep.mubr.f32.mxu1 %v40241_v50  ;;  %v40470_v19 = vld [vmem:[#allocation47_spill] sm:$0xff] }
 0x30e   :  { %40464 = vst [vmem:[#allocation92_spill] sm:$0xff] %v36051_v27  ;;  %28990 = vmatprep.subr.msk.mxu1 %vm2972_vm0, %v12922_v29  ;;  %20320 = vrot.lane.b32.xlu0 %v35907_v4, %s31948_s20  ;;  %v40469_v4 = vld [vmem:[#allocation8_spill] sm:$0xff]  ;;  %v12923_v58 = vsel %vm8781_vm7, %v40465_v8, %v40470_v19  ;;  %v5037_v8 = vpop.f32.mrb[87].mxu0 }
 0x30f   :  { %21161 = vrot.lane.b32.xlu1 %v36039_v61, %s31949_s30  ;;  %v12924_v27 = vsel %vm8781_vm7, %v40470_v19, %v40469_v4  ;;  %v36106_v19 = vmax.f32 %v35401_v11, 0.0  ;;  %v40475_v8 = vld [vmem:[#allocation55_spill] sm:$0xff] }
 0x310   :  { %28989 = vmatmul.mubr.msk.f32.vlgmr.msra.gmra.mrb[102].mxu1 %vm5554_vm4, %v36031_v5  ;;  %v36070_v12 = vpop.permute.xlu0 %15366  ;;  %v12930_v33 = vsel %vm8781_vm7, %v40476_v35, %v40475_v8  ;;  %v40477_v11 = vld [vmem:[#allocation43_spill] sm:$0xff] }
 0x311   :  { %40467 = vst [vmem:[#allocation102_spill] sm:$0xff] %v36070_v12  ;;  %28991 = vmatpush1.msk.msra.mxu1 %vm2972_vm0, %v12921_v39  ;;  %v36073_v29 = vpop.permute.xlu1 %17036  ;;  %13186 = vmatprep.mubr.f32.mxu1 %v40241_v50  ;;  %v40472_v39 = vld [vmem:[#allocation14_spill] sm:$0xff] }
 0x312   :  { %40468 = vst [vmem:[#allocation11_spill] sm:$0xff] %v36073_v29  ;;  %28993 = vmatprep.subr.msk.mxu1 %vm2972_vm0, %v12924_v27  ;;  %21159 = vrot.lane.b32.xlu0 %v35938_v22, %s31949_s30  ;;  %v40473_v22 = vld [vmem:[#allocation21_spill] sm:$0xff] }
 0x313   :  { %18658 = vrot.lane.b32.xlu1 %v36063_v45, %s31946_s25  ;;  %v12926_v29 = vsel %vm8781_vm7, %v40473_v22, %v40472_v39 }
 0x314   :  { %28992 = vmatmul.mubr.msk.f32.vlgmr.msra.gmra.mrb[104].mxu1 %vm5554_vm4, %v36031_v5  ;;  %v36089_v52 = vpop.permute.xlu0 %14537 }
 0x315   :  { %28994 = vmatpush1.msk.msra.mxu1 %vm2972_vm0, %v12923_v58  ;;  %v36094_v27 = vpop.permute.xlu1 %14541  ;;  %13257 = vmatprep.mubr.f32.mxu1 %v40241_v50  ;;  %v12925_v58 = vsel %vm8781_vm7, %v40469_v4, %v40473_v22  ;;  %v12929_v4 = vsel %vm8781_vm7, %v40477_v11, %v40476_v35  ;;  %v40482_v35 = vld [vmem:[#allocation16_spill] sm:$0xff] }
 0x316   :  { %28996 = vmatprep.subr.msk.mxu1 %vm2972_vm0, %v12926_v29  ;;  %18656 = vrot.lane.b32.xlu0 %v36039_v61, %s31946_s25 }
 0x317   :  { %20328 = vrot.lane.b32.xlu1 %v36063_v45, %s31948_s20 }
 0x318   :  { %28995 = vmatmul.mubr.msk.f32.vlgmr.msra.gmra.mrb[106].mxu1 %vm5554_vm4, %v36031_v5  ;;  %v36113_v46 = vpop.permute.xlu0 %15376 }
 0x319   :  { %40474 = vst [vmem:[#allocation63_spill] sm:$0xff] %v36113_v46  ;;  %28997 = vmatpush1.msk.msra.mxu1 %vm2972_vm0, %v12925_v58  ;;  %v36116_v29 = vpop.permute.xlu1 %15372  ;;  %13328 = vmatprep.mubr.f32.mxu1 %v40241_v50  ;;  %v40489_v46 = vld [vmem:[#allocation95_spill] sm:$0xff] }
 0x31a   :  { %29002 = vmatprep.subr.msk.mxu1 %vm2972_vm0, %v12930_v33  ;;  %18660 = vrot.lane.b32.xlu0 %v36019_v13, %s31946_s25  ;;  %v40480_v33 = vld [vmem:[#allocation62_spill] sm:$0xff] }
 0x31b   :  { %18664 = vrot.lane.b32.xlu1 %v36106_v19, %s31946_s25  ;;  %v12934_v44 = vsel %vm8781_vm7, %v40481_v32, %v40480_v33 }
 0x31c   :  { %28998 = vmatmul.mubr.msk.f32.vlgmr.msra.gmra.mrb[108].mxu1 %vm5554_vm4, %v36031_v5  ;;  %v36132_v22 = vpop.permute.xlu0 %16207 }
 0x31d   :  { %40478 = vst [vmem:[#allocation101_spill] sm:$0xff] %v36132_v22  ;;  %29003 = vmatpush1.msk.msra.mxu1 %vm2972_vm0, %v12929_v4  ;;  %v36135_v58 = vpop.permute.xlu1 %16211  ;;  %13470 = vmatprep.mubr.f32.mxu1 %v40241_v50  ;;  %v12933_v4 = vsel %vm8781_vm7, %v40482_v35, %v40481_v32  ;;  %v36164_v32 = vmax.f32 %v35467_v26, 0.0 }
 0x31e   :  { %40479 = vst [vmem:[#allocation40_spill] sm:$0xff] %v36135_v58  ;;  %29008 = vmatprep.subr.msk.mxu1 %vm2972_vm0, %v12934_v44  ;;  %19491 = vrot.lane.b32.xlu0 %v36039_v61, %s31947_s11  ;;  %v40485_v44 = vld [vmem:[#allocation49_spill] sm:$0xff] }
 0x31f   :  { %19499 = vrot.lane.b32.xlu1 %v36106_v19, %s31947_s11 }
 0x320   :  { %29004 = vmatmul.mubr.msk.f32.vlgmr.msra.gmra.mrb[110].mxu1 %vm5554_vm4, %v36031_v5  ;;  %v36151_v22 = vpop.permute.xlu0 %17042 }
 0x321   :  { %40483 = vst [vmem:[#allocation56_spill] sm:$0xff] %v36151_v22  ;;  %29009 = vmatpush1.msk.msra.mxu1 %vm2972_vm0, %v12933_v4  ;;  %v36154_v58 = vpop.permute.xlu1 %17046  ;;  %13612 = vmatprep.mubr.f32.mxu1 %v40241_v50  ;;  %v40486_v22 = vld [vmem:[#allocation96_spill] sm:$0xff] }
 0x322   :  { %40484 = vst [vmem:[#allocation29_spill] sm:$0xff] %v36154_v58  ;;  %29015 = vmatprep.subr.msk.mxu1 %vm2972_vm0, %v40485_v44  ;;  %20326 = vrot.lane.b32.xlu0 %v36039_v61, %s31948_s20  ;;  %v36178_v44 = vld [vmem:[%s39940_s3 + $0x50] sm:$0x3f] }
 0x323   :  { %20334 = vrot.lane.b32.xlu1 %v36106_v19, %s31948_s20  ;;  %v40487_v61 = vld [vmem:[#allocation75_spill] sm:$0xff] }
 0x324   :  { %29010 = vmatmul.mubr.msk.f32.vlgmr.msra.gmra.mrb[112].mxu1 %vm5554_vm4, %v36031_v5  ;;  %v36168_v4 = vpop.permute.xlu0 %14539 }
 0x325   :  { %29016 = vmatpush1.msk.msra.mxu1 %vm2972_vm0, %v40486_v22  ;;  %v36172_v58 = vpop.permute.xlu1 %12905  ;;  %13838 = vmatprep.mubr.f32.mxu1 %v40241_v50  ;;  %v36188_v22 = vpop.f32.mrb[88].mxu0 }
 0x326   :  { %29018 = vmatprep.subr.msk.mxu1 %vm2972_vm0, %v40487_v61  ;;  %20330 = vrot.lane.b32.xlu0 %v36019_v13, %s31948_s20  ;;  %40488 = vst [vmem:[#allocation58_spill] sm:$0xff] %v36188_v22 }
 0x327   :  { %18666 = vrot.lane.b32.xlu1 %v36164_v32, %s31946_s25 }
 0x328   :  { %29017 = vmatmul.mubr.msk.f32.vlgmr.msra.gmra.mrb[100].mxu1 %vm5554_vm4, %v36178_v44  ;;  %v12063_v26 = vpop.permute.xlu0 %12062 }
 0x329   :  { %29019 = vmatpush1.msk.msra.mxu1 %vm2972_vm0, %v40489_v46  ;;  %v36192_v12 = vpop.permute.xlu1 %14527  ;;  %v12092_v61 = vsel %vm7943_vm6, %v40445_v23, %v12063_v26  ;;  %v12093_v17 = vsel %vm7943_vm6, %v12063_v26, %v40450_v2  ;;  %13909 = vmatprep.mubr.f32.mxu1 %v40241_v50  ;;  %v36209_v2 = vpop.f32.mrb[89].mxu0  ;;  %v40491_v46 = vld [vmem:[#allocation76_spill] sm:$0xff] }
 0x32a   :  { %29021 = vmatprep.subr.msk.mxu1 %vm2972_vm0, %v40490_v55  ;;  %28968 = vmatprep.subr.msk.mxu0 %vm2972_vm0, %v12093_v17  ;;  %v36212_v26 = vmax.f32 %v40491_v46, 0.0  ;;  %v40492_v55 = vld [vmem:[#allocation52_spill] sm:$0xff]  ;;  %v5118_v36 = vpop.f32.mrb[90].mxu0 }
 0x32b   :  { %19493 = vrot.lane.b32.xlu0 %v36063_v45, %s31947_s11  ;;  %19501 = vrot.lane.b32.xlu1 %v36164_v32, %s31947_s11  ;;  %v5119_v46 = vpop.f32.mrb[91].mxu0 }
 0x32c   :  { %28969 = vmatpush1.msk.msra.mxu0 %vm2972_vm0, %v12092_v61  ;;  %29020 = vmatmul.mubr.msk.f32.vlgmr.msra.gmra.mrb[102].mxu1 %vm5554_vm4, %v36178_v44  ;;  %v12071_v23 = vpop.permute.xlu0 %12070 }
 0x32d   :  { %29022 = vmatpush1.msk.msra.mxu1 %vm2972_vm0, %v40492_v55  ;;  %v36216_v17 = vpop.permute.xlu1 %14535  ;;  %28970 = vmatmul.mubr.msk.f32.vlgmr.msra.gmra.mrb[104].mxu0 %vm5554_vm4, %v35880_v48  ;;  %v12096_v61 = vsel %vm7943_vm6, %v40448_v14, %v12071_v23  ;;  %v12097_v22 = vsel %vm7943_vm6, %v12071_v23, %v35288_v53  ;;  %v36232_v55 = vmax.f32 %v35537_v24, 0.0  ;;  %v40494_v14 = vld [vmem:[#allocation20_spill] sm:$0xff] }
 0x32e   :  { %29024 = vmatprep.subr.msk.mxu1 %vm2972_vm0, %v40493_v49  ;;  %28974 = vmatprep.subr.msk.mxu0 %vm2972_vm0, %v12097_v22  ;;  %v40495_v22 = vld [vmem:[#allocation71_spill] sm:$0xff] }
 0x32f   :  { %18668 = vrot.lane.b32.xlu0 %v36212_v26, %s31946_s25  ;;  %20336 = vrot.lane.b32.xlu1 %v36164_v32, %s31948_s20 }
 0x330   :  { %28975 = vmatpush1.msk.msra.mxu0 %vm2972_vm0, %v12096_v61  ;;  %12706 = vmatprep.mubr.f32.mxu0 %v40241_v50  ;;  %v12079_v53 = vpop.permute.xlu0 %12078 }
 0x331   :  { %13980 = vmatprep.mubr.f32.mxu1 %v40241_v50  ;;  %v36237_v36 = vpop.permute.xlu1 %15362  ;;  %28976 = vmatmul.mubr.msk.f32.vlgmr.msra.gmra.mrb[106].mxu0 %vm5554_vm4, %v35880_v48  ;;  %v12101_v49 = vsel %vm7943_vm6, %v12079_v53, %v35490_v3  ;;  %v12100_v24 = vsel %vm7943_vm6, %v35259_v1, %v12079_v53  ;;  %v40496_v53 = vld [vmem:[#allocation72_spill] sm:$0xff] }
 0x332   :  { %29023 = vmatmul.mubr.msk.f32.vlgmr.msra.gmra.mrb[104].mxu1 %vm5554_vm4, %v36178_v44  ;;  %28980 = vmatprep.subr.msk.mxu0 %vm2972_vm0, %v12101_v49  ;;  %v36274_v49 = vpop.f32.mrb[92].mxu0 }
 0x333   :  { %29025 = vmatpush1.msk.msra.mxu1 %vm2972_vm0, %v40494_v14  ;;  %19503 = vrot.lane.b32.xlu0 %v36212_v26, %s31947_s11 }
 0x334   :  { %29027 = vmatprep.subr.msk.mxu1 %vm2972_vm0, %v40495_v22  ;;  %18672 = vrot.lane.b32.xlu1 %v36232_v55, %s31946_s25  ;;  %v12898_v23 = vpop.permute.xlu0 %12897  ;;  %v36300_v22 = vpop.f32.mrb[93].mxu0 }
 0x335   :  { %28981 = vmatpush1.msk.msra.mxu0 %vm2972_vm0, %v12100_v24  ;;  %12848 = vmatprep.mubr.f32.mxu0 %v40241_v50  ;;  %v36258_v1 = vpop.permute.xlu1 %15374  ;;  %v12928_v61 = vsel %vm8781_vm7, %v12898_v23, %v40477_v11  ;;  %v12927_v46 = vsel %vm8781_vm7, %v40472_v39, %v12898_v23  ;;  %v12932_v39 = vsel %vm8781_vm7, %v36172_v58, %v40482_v35  ;;  %v40497_v23 = vld [vmem:[#allocation79_spill] sm:$0xff]  ;;  %v40499_v35 = vld [vmem:[#allocation57_spill] sm:$0xff] }
 0x336   :  { %14051 = vmatprep.mubr.f32.mxu1 %v40241_v50  ;;  %28982 = vmatmul.mubr.msk.f32.vlgmr.msra.gmra.mrb[108].mxu0 %vm5554_vm4, %v35880_v48  ;;  %v12931_v24 = vsel %vm8781_vm7, %v40475_v8, %v36172_v58  ;;  %v5200_v8 = vpop.f32.mrb[94].mxu0 }
 0x337   :  { %29026 = vmatmul.mubr.msk.f32.vlgmr.msra.gmra.mrb[106].mxu1 %vm5554_vm4, %v36178_v44  ;;  %28999 = vmatprep.subr.msk.mxu0 %vm2972_vm0, %v12928_v61  ;;  %v36303_v61 = vmax.f32 %v40497_v23, 0.0  ;;  %v5201_v58 = vpop.f32.mrb[95].mxu0  ;;  %v14550_v8 = vsel %vm5533_vm2, %v35482_v41, %v35667_v34 }
 0x338   :  { %29028 = vmatpush1.msk.msra.mxu1 %vm2972_vm0, %v40496_v53  ;;  %20338 = vrot.lane.b32.xlu0 %v36212_v26, %s31948_s20  ;;  %v12914_v11 = vpop.permute.xlu0 %12913  ;;  %v36318_v53 = vmax.f32 %v35633_v21, 0.0  ;;  %v40500_v21 = vld [vmem:[#allocation31_spill] sm:$0xff]  ;;  %v36374_v58 = vpop.f32.mrb[96].mxu0 }
 0x339   :  { %29033 = vmatprep.subr.msk.mxu1 %vm2972_vm0, %v35384_v42  ;;  %19507 = vrot.lane.b32.xlu1 %v36232_v55, %s31947_s11  ;;  %v36280_v48 = vpop.permute.xlu1 %18644  ;;  %v12936_v42 = vsel %vm8781_vm7, %v12914_v11, %v35448_v28  ;;  %40498 = vst [vmem:[#allocation53_spill] sm:$0xff] %v36303_v61 }
 0x33a   :  { %29000 = vmatpush1.msk.msra.mxu0 %vm2972_vm0, %v12927_v46  ;;  %13399 = vmatprep.mubr.f32.mxu0 %v40241_v50 }
 0x33b   :  { %14122 = vmatprep.mubr.f32.mxu1 %v40241_v50  ;;  %29001 = vmatmul.mubr.msk.f32.vlgmr.msra.gmra.mrb[104].mxu0 %vm5554_vm4, %v36031_v5 }
 0x33c   :  { %29029 = vmatmul.mubr.msk.f32.vlgmr.msra.gmra.mrb[108].mxu1 %vm5554_vm4, %v36178_v44  ;;  %29005 = vmatprep.subr.msk.mxu0 %vm2972_vm0, %v12932_v39  ;;  %v36298_v14 = vpop.permute.xlu0 %15370 }
 0x33d   :  { %29034 = vmatpush1.msk.msra.mxu1 %vm2972_vm0, %v40499_v35  ;;  %29006 = vmatpush1.msk.msra.mxu0 %vm2972_vm0, %v12931_v24  ;;  %v36308_v46 = vpop.permute.xlu1 %15380  ;;  %v14548_v24 = vsel %vm5533_vm2, %v35550_v18, %v40500_v21  ;;  %v40503_v35 = vld [vmem:[#allocation64_spill] sm:$0xff] }
 0x33e   :  { %29039 = vmatprep.subr.msk.mxu1 %vm2972_vm0, %v35529_v63  ;;  %29011 = vmatprep.subr.msk.mxu0 %vm2972_vm0, %v12936_v42  ;;  %v12935_v63 = vsel %vm8781_vm7, %v40480_v33, %v12914_v11  ;;  %v40502_v11 = vld [vmem:[#allocation35_spill] sm:$0xff] }
 0x33f   :  { %18676 = vrot.lane.b32.xlu0 %v36303_v61, %s31946_s25  ;;  %20346 = vrot.lane.b32.xlu1 %v36303_v61, %s31948_s20  ;;  %v14547_v23 = vsel %vm5533_vm2, %v40502_v11, %v35550_v18  ;;  %v36370_v18 = vld [vmem:[%s39940_s3 + $0x58] sm:$0x3f]  ;;  %v40505_v11 = vld [vmem:[#allocation22_spill] sm:$0xff] }
 0x340   :  { %13541 = vmatprep.mubr.f32.mxu0 %v40241_v50  ;;  %14264 = vmatprep.mubr.f32.mxu1 %v40241_v50  ;;  %v36322_v39 = vpop.permute.xlu0 %16209 }
 0x341   :  { %29007 = vmatmul.mubr.msk.f32.vlgmr.msra.gmra.mrb[106].mxu0 %vm5554_vm4, %v36031_v5  ;;  %29035 = vmatmul.mubr.msk.f32.vlgmr.msra.gmra.mrb[110].mxu1 %vm5554_vm4, %v36178_v44  ;;  %v36330_v42 = vpop.permute.xlu1 %16215 }
 0x342   :  { %29012 = vmatpush1.msk.msra.mxu0 %vm2972_vm0, %v12935_v63  ;;  %29040 = vmatpush1.msk.msra.mxu1 %vm2972_vm0, %v35430_v7 }
 0x343   :  { %29030 = vmatprep.subr.msk.mxu0 %vm2972_vm0, %v35569_v60  ;;  %29046 = vmatprep.subr.msk.mxu1 %vm2972_vm0, %v14548_v24  ;;  %v14549_v24 = vsel %vm5533_vm2, %v40500_v21, %v35482_v41  ;;  %v14551_v21 = vsel %vm5533_vm2, %v35667_v34, %v35692_v54  ;;  %v14558_v34 = vsel %vm5533_vm2, %v36192_v12, %v35941_v15 }
 0x344   :  { %19511 = vrot.lane.b32.xlu0 %v36303_v61, %s31947_s11  ;;  %18674 = vrot.lane.b32.xlu1 %v36318_v53, %s31946_s25  ;;  %v36345_v33 = vpop.permute.xlu0 %17044 }
 0x345   :  { %13683 = vmatprep.mubr.f32.mxu0 %v40241_v50  ;;  %14406 = vmatprep.mubr.f32.mxu1 %v40241_v50  ;;  %v36349_v7 = vpop.permute.xlu1 %21149 }
 0x346   :  { %40501 = vst [vmem:[#allocation88_spill] sm:$0xff] %v36349_v7  ;;  %29013 = vmatmul.mubr.msk.f32.vlgmr.msra.gmra.mrb[108].mxu0 %vm5554_vm4, %v36031_v5  ;;  %29041 = vmatmul.mubr.msk.f32.vlgmr.msra.gmra.mrb[112].mxu1 %vm5554_vm4, %v36178_v44 }
 0x347   :  { %29031 = vmatpush1.msk.msra.mxu0 %vm2972_vm0, %v40503_v35  ;;  %29047 = vmatpush1.msk.msra.mxu1 %vm2972_vm0, %v14547_v23  ;;  %v14552_v23 = vsel %vm5533_vm2, %v35692_v54, %v35687_v59 }
 0x348   :  { %29036 = vmatprep.subr.msk.mxu0 %vm2972_vm0, %v35597_v20  ;;  %29049 = vmatprep.subr.msk.mxu1 %vm2972_vm0, %v14550_v8  ;;  %v36372_v5 = vpop.permute.xlu0 %14543 }
 0x349   :  { %20342 = vrot.lane.b32.xlu0 %v36232_v55, %s31948_s20  ;;  %21163 = vrot.lane.b32.xlu1 %v36063_v45, %s31949_s30  ;;  %v36380_v63 = vpop.permute.xlu1 %19477 }
 0x34a   :  { %40504 = vst [vmem:[#allocation94_spill] sm:$0xff] %v36380_v63  ;;  %14193 = vmatprep.mubr.f32.mxu0 %v40241_v50  ;;  %14674 = vmatprep.mubr.f32.mxu1 %v40241_v50 }
 0x34b   :  { %29032 = vmatmul.mubr.msk.f32.vlgmr.msra.gmra.mrb[104].mxu0 %vm5554_vm4, %v36178_v44  ;;  %29048 = vmatmul.mubr.msk.f32.vlgmr.msra.gmra.mrb[100].mxu1 %vm5554_vm4, %v36370_v18 }
 0x34c   :  { %29037 = vmatpush1.msk.msra.mxu0 %vm2972_vm0, %v40505_v11  ;;  %29050 = vmatpush1.msk.msra.mxu1 %vm2972_vm0, %v14549_v24  ;;  %v36397_v35 = vpop.permute.xlu0 %14545  ;;  %v36419_v24 = vpop.f32.mrb[97].mxu0  ;;  %v14554_v11 = vsel %vm5533_vm2, %v35717_v62, %v35846_v56 }
 0x34d   :  { %29042 = vmatprep.subr.msk.mxu0 %vm2972_vm0, %v35740_v40  ;;  %29052 = vmatprep.subr.msk.mxu1 %vm2972_vm0, %v14552_v23  ;;  %v36402_v41 = vpop.permute.xlu1 %19481  ;;  %v5282_v23 = vpop.f32.mrb[98].mxu0 }
 0x34e   :  { %40506 = vst [vmem:[#allocation89_spill] sm:$0xff] %v36402_v41  ;;  %21165 = vrot.lane.b32.xlu0 %v36019_v13, %s31949_s30  ;;  %15378 = vrot.lane.b32.xlu1 %v35740_v40, %s31947_s11  ;;  %v5283_v7 = vpop.f32.mrb[99].mxu0  ;;  %v14560_v23 = vsel %vm5533_vm2, %v36022_v31, %v35976_v51  ;;  %v36902_v41 = vld [vmem:[%s39940_s3 + $0x70] sm:$0x3f] }
 0x34f   :  { %14335 = vmatprep.mubr.f32.mxu0 %v40241_v50  ;;  %14745 = vmatprep.mubr.f32.mxu1 %v40241_v50  ;;  %v14557_v7 = vsel %vm5533_vm2, %v35868_v16, %v36192_v12 }
 0x350   :  { %29038 = vmatmul.mubr.msk.f32.vlgmr.msra.gmra.mrb[106].mxu0 %vm5554_vm4, %v36178_v44  ;;  %29051 = vmatmul.mubr.msk.f32.vlgmr.msra.gmra.mrb[102].mxu1 %vm5554_vm4, %v36370_v18  ;;  %v36417_v8 = vpop.permute.xlu0 %19479 }
 0x351   :  { %40507 = vst [vmem:[#allocation6_spill] sm:$0xff] %v36417_v8  ;;  %29043 = vmatpush1.msk.msra.mxu0 %vm2972_vm0, %v35443_v6  ;;  %29053 = vmatpush1.msk.msra.mxu1 %vm2972_vm0, %v14551_v21  ;;  %v36430_v54 = vpop.permute.xlu1 %20312  ;;  %v14553_v21 = vsel %vm5533_vm2, %v35687_v59, %v35717_v62  ;;  %v14556_v59 = vsel %vm5533_vm2, %v35871_v9, %v35868_v16  ;;  %v40581_v8 = vld [vmem:[#allocation59_spill] sm:$0xff] }
 0x352   :  { %40508 = vst [vmem:[#allocation99_spill] sm:$0xff] %v36430_v54  ;;  %29055 = vmatprep.subr.msk.mxu1 %vm2972_vm0, %v14554_v11  ;;  %29061 = vmatprep.subr.msk.mxu0 %vm2972_vm0, %v14558_v34  ;;  %v14562_v62 = vsel %vm5533_vm2, %v36216_v17, %v36089_v52  ;;  %v14561_v34 = vsel %vm5533_vm2, %v35976_v51, %v36216_v17 }
 0x353   :  { %21171 = vrot.lane.b32.xlu0 %v36164_v32, %s31949_s30  ;;  %21173 = vrot.lane.b32.xlu1 %v36212_v26, %s31949_s30  ;;  %v14559_v51 = vsel %vm5533_vm2, %v35941_v15, %v36022_v31  ;;  %v15393_v15 = vsel %vm7105_vm5, %v36237_v36, %v35997_v10 }
 0x354   :  { %14477 = vmatprep.mubr.f32.mxu0 %v40241_v50  ;;  %14816 = vmatprep.mubr.f32.mxu1 %v40241_v50  ;;  %v36440_v6 = vpop.permute.xlu0 %20314 }
 0x355   :  { %40509 = vst [vmem:[#allocation93_spill] sm:$0xff] %v36440_v6  ;;  %29044 = vmatmul.mubr.msk.f32.vlgmr.msra.gmra.mrb[108].mxu0 %vm5554_vm4, %v36178_v44  ;;  %29054 = vmatmul.mubr.msk.f32.vlgmr.msra.gmra.mrb[104].mxu1 %vm5554_vm4, %v36370_v18  ;;  %v36452_v11 = vpop.permute.xlu1 %20316  ;;  %v14555_v44 = vsel %vm5533_vm2, %v35846_v56, %v35871_v9  ;;  %v14566_v56 = vsel %vm5533_vm2, %v36372_v5, %v36397_v35 }
 0x356   :  { %40510 = vst [vmem:[#allocation103_spill] sm:$0xff] %v36452_v11  ;;  %29056 = vmatpush1.msk.msra.mxu1 %vm2972_vm0, %v14553_v21  ;;  %29062 = vmatpush1.msk.msra.mxu0 %vm2972_vm0, %v14557_v7  ;;  %v14565_v21 = vsel %vm5533_vm2, %v36094_v27, %v36372_v5  ;;  %v14564_v7 = vsel %vm5533_vm2, %v36168_v4, %v36094_v27 }
 0x357   :  { %29058 = vmatprep.subr.msk.mxu1 %vm2972_vm0, %v14556_v59  ;;  %29067 = vmatprep.subr.msk.mxu0 %vm2972_vm0, %v14562_v62  ;;  %v14563_v27 = vsel %vm5533_vm2, %v36089_v52, %v36168_v4  ;;  %v15392_v59 = vsel %vm7105_vm5, %v35830_v37, %v36237_v36  ;;  %v15397_v4 = vsel %vm7105_vm5, %v36298_v14, %v36116_v29 }
 0x358   :  { %21169 = vrot.lane.b32.xlu0 %v36106_v19, %s31949_s30  ;;  %16197 = vrot.lane.b32.xlu1 %v35569_v60, %s31948_s20  ;;  %v36468_v12 = vpop.permute.xlu0 %17050 }
 0x359   :  { %14887 = vmatprep.mubr.f32.mxu1 %v40241_v50  ;;  %15029 = vmatprep.mubr.f32.mxu0 %v40241_v50  ;;  %v36472_v16 = vpop.permute.xlu1 %18648 }
 0x35a   :  { %29057 = vmatmul.mubr.msk.f32.vlgmr.msra.gmra.mrb[106].mxu1 %vm5554_vm4, %v36370_v18  ;;  %29063 = vmatmul.mubr.msk.f32.vlgmr.msra.gmra.mrb[104].mxu0 %vm5554_vm4, %v36370_v18 }
 0x35b   :  { %29059 = vmatpush1.msk.msra.mxu1 %vm2972_vm0, %v14555_v44  ;;  %29068 = vmatpush1.msk.msra.mxu0 %vm2972_vm0, %v14561_v34  ;;  %v40514_v44 = vld [vmem:[#allocation78_spill] sm:$0xff]  ;;  %v36561_v34 = vld [vmem:[%s39940_s3 + $0x60] sm:$0x3f] }
 0x35c   :  { %29064 = vmatprep.subr.msk.mxu1 %vm2972_vm0, %v14560_v23  ;;  %29073 = vmatprep.subr.msk.mxu0 %vm2972_vm0, %v14566_v56  ;;  %v36494_v9 = vpop.permute.xlu0 %18642  ;;  %v15383_v52 = vsel %vm7105_vm5, %v35516_v43, %v40514_v44  ;;  %v40517_v56 = vld [vmem:[#allocation51_spill] sm:$0xff] }
 0x35d   :  { %21177 = vrot.lane.b32.xlu0 %v36232_v55, %s31949_s30  ;;  %21181 = vrot.lane.b32.xlu1 %v36303_v61, %s31949_s30  ;;  %v36500_v17 = vpop.permute.xlu1 %19487 }
 0x35e   :  { %40511 = vst [vmem:[#allocation5_spill] sm:$0xff] %v36500_v17  ;;  %14958 = vmatprep.mubr.f32.mxu1 %v40241_v50  ;;  %15171 = vmatprep.mubr.f32.mxu0 %v40241_v50 }
 0x35f   :  { %29060 = vmatmul.mubr.msk.f32.vlgmr.msra.gmra.mrb[108].mxu1 %vm5554_vm4, %v36370_v18  ;;  %29069 = vmatmul.mubr.msk.f32.vlgmr.msra.gmra.mrb[106].mxu0 %vm5554_vm4, %v36370_v18 }
 0x360   :  { %29065 = vmatpush1.msk.msra.mxu1 %vm2972_vm0, %v14559_v51  ;;  %29074 = vmatpush1.msk.msra.mxu0 %vm2972_vm0, %v14565_v21  ;;  %v36522_v31 = vpop.permute.xlu0 %18646  ;;  %v36572_v51 = vmax.f32 %v40517_v56, 0.0  ;;  %v15382_v21 = vsel %vm7105_vm5, %v35405_v57, %v35516_v43  ;;  %v15385_v57 = vsel %vm7105_vm5, %v35581_v25, %v35611_v38  ;;  %v40520_v56 = vld [vmem:[#allocation7_spill] sm:$0xff] }
 0x361   :  { %29070 = vmatprep.subr.msk.mxu1 %vm2972_vm0, %v14564_v7  ;;  %29092 = vmatprep.subr.msk.mxu0 %vm2972_vm0, %v15393_v15  ;;  %v36526_v5 = vpop.permute.xlu1 %20322 }
 0x362   :  { %40512 = vst [vmem:[#allocation8_spill] sm:$0xff] %v36526_v5  ;;  %16213 = vrot.lane.b32.xlu0 %v35740_v40, %s31948_s20  ;;  %16205 = vrot.lane.b32.xlu1 %v35597_v20, %s31948_s20 }
 0x363   :  { %15100 = vmatprep.mubr.f32.mxu1 %v40241_v50  ;;  %15313 = vmatprep.mubr.f32.mxu0 %v40241_v50 }
 0x364   :  { %29066 = vmatmul.mubr.msk.f32.vlgmr.msra.gmra.mrb[110].mxu1 %vm5554_vm4, %v36370_v18  ;;  %29075 = vmatmul.mubr.msk.f32.vlgmr.msra.gmra.mrb[108].mxu0 %vm5554_vm4, %v36370_v18  ;;  %v36544_v62 = vpop.permute.xlu0 %21147 }
 0x365   :  { %40513 = vst [vmem:[#allocation47_spill] sm:$0xff] %v36544_v62  ;;  %29071 = vmatpush1.msk.msra.mxu1 %vm2972_vm0, %v14563_v27  ;;  %29093 = vmatpush1.msk.msra.mxu0 %vm2972_vm0, %v15392_v59  ;;  %v36554_v36 = vpop.permute.xlu1 %21153 }
 0x366   :  { %40515 = vst [vmem:[#allocation14_spill] sm:$0xff] %v36554_v36  ;;  %29077 = vmatprep.subr.msk.mxu1 %vm2972_vm0, %v15383_v52  ;;  %29098 = vmatprep.subr.msk.mxu0 %vm2972_vm0, %v15397_v4  ;;  %v15386_v52 = vsel %vm7105_vm5, %v35611_v38, %v35786_v30 }
 0x367   :  { %17040 = vrot.lane.b32.xlu0 %v35597_v20, %s31949_s30  ;;  %19509 = vrot.lane.b32.xlu1 %v36318_v53, %s31947_s11  ;;  %v15396_v20 = vsel %vm7105_vm5, %v35960_v0, %v36298_v14  ;;  %v36599_v14 = vpop.f32.mrb[100].mxu0 }
 0x368   :  { %15242 = vmatprep.mubr.f32.mxu1 %v40241_v50  ;;  %15864 = vmatprep.mubr.f32.mxu0 %v40241_v50  ;;  %v36569_v23 = vpop.permute.xlu0 %21151  ;;  %v29941_v27 = vpop.f32.mrb[101].mxu0 }
 0x369   :  { %40516 = vst [vmem:[#allocation21_spill] sm:$0xff] %v36569_v23  ;;  %29072 = vmatmul.mubr.msk.f32.vlgmr.msra.gmra.mrb[112].mxu1 %vm5554_vm4, %v36370_v18  ;;  %29094 = vmatmul.mubr.msk.f32.vlgmr.msra.gmra.mrb[104].mxu0 %vm5554_vm4, %v36561_v34  ;;  %v36584_v7 = vpop.permute.xlu1 %18650  ;;  %v15384_v18 = vsel %vm7105_vm5, %v40514_v44, %v35581_v25  ;;  %v5363_v59 = vpop.f32.mrb[102].mxu0  ;;  %v40525_v27 = vld [vmem:[#allocation41_spill] sm:$0xff]  ;;  %v40545_v23 = vld [vmem:[#allocation12_spill] sm:$0xff] }
 0x36a   :  { %29078 = vmatpush1.msk.msra.mxu1 %vm2972_vm0, %v15382_v21  ;;  %29099 = vmatpush1.msk.msra.mxu0 %vm2972_vm0, %v15396_v20  ;;  %v29942_v25 = vpop.f32.mrb[103].mxu0  ;;  %v36632_v21 = vmax.f32 %v40520_v56, 0.0  ;;  %v40522_v20 = vld [vmem:[#allocation50_spill] sm:$0xff]  ;;  %v40527_v59 = vld [vmem:[#allocation15_spill] sm:$0xff] }
 0x36b   :  { %29080 = vmatprep.subr.msk.mxu1 %vm2972_vm0, %v15385_v57  ;;  %18670 = vrot.lane.b32.xlu0 %v36572_v51, %s31946_s25  ;;  %v15391_v25 = vsel %vm7105_vm5, %v40527_v59, %v35830_v37 }
 0x36c   :  { %17032 = vrot.lane.b32.xlu1 %v35569_v60, %s31949_s30  ;;  %15509 = vmatprep.mubr.f32.mxu1 %v40241_v50  ;;  %v36597_v43 = vpop.permute.xlu0 %18652  ;;  %v15387_v60 = vsel %vm7105_vm5, %v35786_v30, %v35640_v47  ;;  %v15388_v30 = vsel %vm7105_vm5, %v35640_v47, %v40522_v20  ;;  %v40528_v47 = vld [vmem:[#allocation65_spill] sm:$0xff] }
 0x36d   :  { %29079 = vmatmul.mubr.msk.f32.vlgmr.msra.gmra.mrb[100].mxu1 %vm5554_vm4, %v36561_v34  ;;  %v36606_v15 = vpop.permute.xlu1 %18654  ;;  %16006 = vmatprep.mubr.f32.mxu0 %v40241_v50 }
 0x36e   :  { %29081 = vmatpush1.msk.msra.mxu1 %vm2972_vm0, %v15384_v18  ;;  %15580 = vmatprep.mubr.f32.mxu1 %v40241_v50 }
 0x36f   :  { %29083 = vmatprep.subr.msk.mxu1 %vm2972_vm0, %v15387_v60  ;;  %20344 = vrot.lane.b32.xlu0 %v36318_v53, %s31948_s20  ;;  %v36654_v60 = vmax.f32 %v40525_v27, 0.0 }
 0x370   :  { %17048 = vrot.lane.b32.xlu1 %v35740_v40, %s31949_s30  ;;  %v36619_v44 = vpop.permute.xlu0 %19483  ;;  %29100 = vmatmul.mubr.msk.f32.vlgmr.msra.gmra.mrb[106].mxu0 %vm5554_vm4, %v36561_v34  ;;  %v40521_v40 = vld [vmem:[#allocation42_spill] sm:$0xff] }
 0x371   :  { %40518 = vst [vmem:[#allocation55_spill] sm:$0xff] %v36619_v44  ;;  %29082 = vmatmul.mubr.msk.f32.vlgmr.msra.gmra.mrb[102].mxu1 %vm5554_vm4, %v36561_v34  ;;  %v36628_v4 = vpop.permute.xlu1 %19489  ;;  %16148 = vmatprep.mubr.f32.mxu0 %v40241_v50  ;;  %v15389_v57 = vsel %vm7105_vm5, %v40522_v20, %v40521_v40  ;;  %40526 = vst [vmem:[#allocation9_spill] sm:$0xff] %v36654_v60  ;;  %v15390_v20 = vsel %vm7105_vm5, %v40521_v40, %v40527_v59  ;;  %v40535_v59 = vld [vmem:[#allocation63_spill] sm:$0xff] }
 0x372   :  { %40519 = vst [vmem:[#allocation54_spill] sm:$0xff] %v36628_v4  ;;  %29084 = vmatpush1.msk.msra.mxu1 %vm2972_vm0, %v15386_v52  ;;  %15651 = vmatprep.mubr.f32.mxu1 %v40241_v50  ;;  %v36665_v52 = vmax.f32 %v40528_v47, 0.0  ;;  %v40536_v47 = vld [vmem:[#allocation44_spill] sm:$0xff] }
 0x373   :  { %29086 = vmatprep.subr.msk.mxu1 %vm2972_vm0, %v15389_v57  ;;  %21179 = vrot.lane.b32.xlu0 %v36318_v53, %s31949_s30  ;;  %v40532_v57 = vld [vmem:[#allocation102_spill] sm:$0xff]  ;;  %v40561_v4 = vld [vmem:[#allocation92_spill] sm:$0xff] }
 0x374   :  { %18662 = vrot.lane.b32.xlu1 %v36632_v21, %s31946_s25  ;;  %v36644_v38 = vpop.permute.xlu0 %20318  ;;  %40529 = vst [vmem:[#allocation16_spill] sm:$0xff] %v36665_v52  ;;  %v15394_v27 = vsel %vm7105_vm5, %v35997_v10, %v40532_v57  ;;  %v36706_v10 = vmax.f32 %v40536_v47, 0.0  ;;  %v40540_v47 = vld [vmem:[#allocation37_spill] sm:$0xff] }
 0x375   :  { %40523 = vst [vmem:[#allocation43_spill] sm:$0xff] %v36644_v38  ;;  %29085 = vmatmul.mubr.msk.f32.vlgmr.msra.gmra.mrb[104].mxu1 %vm5554_vm4, %v36561_v34  ;;  %v36651_v18 = vpop.permute.xlu1 %20324 }
 0x376   :  { %40524 = vst [vmem:[#allocation62_spill] sm:$0xff] %v36651_v18  ;;  %29087 = vmatpush1.msk.msra.mxu1 %vm2972_vm0, %v15388_v30  ;;  %15722 = vmatprep.mubr.f32.mxu1 %v40241_v50  ;;  %v15395_v30 = vsel %vm7105_vm5, %v40532_v57, %v35960_v0  ;;  %v15398_v57 = vsel %vm7105_vm5, %v36116_v29, %v36258_v1 }
 0x377   :  { %29089 = vmatprep.subr.msk.mxu1 %vm2972_vm0, %v15391_v25  ;;  %19497 = vrot.lane.b32.xlu0 %v36632_v21, %s31947_s11  ;;  %v15399_v25 = vsel %vm7105_vm5, %v36258_v1, %v40535_v59  ;;  %v40543_v1 = vld [vmem:[#allocation10_spill] sm:$0xff] }
 0x378   :  { %18678 = vrot.lane.b32.xlu1 %v36654_v60, %s31946_s25  ;;  %v36669_v56 = vpop.permute.xlu0 %21157 }
 0x379   :  { %40530 = vst [vmem:[#allocation49_spill] sm:$0xff] %v36669_v56  ;;  %29088 = vmatmul.mubr.msk.f32.vlgmr.msra.gmra.mrb[106].mxu1 %vm5554_vm4, %v36561_v34  ;;  %v36676_v37 = vpop.permute.xlu1 %21155 }
 0x37a   :  { %40531 = vst [vmem:[#allocation96_spill] sm:$0xff] %v36676_v37  ;;  %29090 = vmatpush1.msk.msra.mxu1 %vm2972_vm0, %v15390_v20  ;;  %15793 = vmatprep.mubr.f32.mxu1 %v40241_v50  ;;  %v40541_v37 = vld [vmem:[#allocation18_spill] sm:$0xff] }
 0x37b   :  { %29095 = vmatprep.subr.msk.mxu1 %vm2972_vm0, %v15395_v30  ;;  %18680 = vrot.lane.b32.xlu0 %v36665_v52, %s31946_s25  ;;  %v16218_v56 = vsel %vm7943_vm6, %v40541_v37, %v40540_v47 }
 0x37c   :  { %19505 = vrot.lane.b32.xlu1 %v36572_v51, %s31947_s11  ;;  %v36688_v40 = vpop.permute.xlu0 %19485 }
 0x37d   :  { %40533 = vst [vmem:[#allocation75_spill] sm:$0xff] %v36688_v40  ;;  %29091 = vmatmul.mubr.msk.f32.vlgmr.msra.gmra.mrb[108].mxu1 %vm5554_vm4, %v36561_v34  ;;  %v36695_v0 = vpop.permute.xlu1 %19495 }
 0x37e   :  { %40534 = vst [vmem:[#allocation95_spill] sm:$0xff] %v36695_v0  ;;  %29096 = vmatpush1.msk.msra.mxu1 %vm2972_vm0, %v15394_v27  ;;  %15935 = vmatprep.mubr.f32.mxu1 %v40241_v50  ;;  %v40539_v27 = vld [vmem:[#allocation73_spill] sm:$0xff]  ;;  %v40560_v0 = vld [vmem:[#allocation87_spill] sm:$0xff] }
 0x37f   :  { %29101 = vmatprep.subr.msk.mxu1 %vm2972_vm0, %v15399_v25  ;;  %19515 = vrot.lane.b32.xlu0 %v36665_v52, %s31947_s11  ;;  %v36720_v25 = vmax.f32 %v40539_v27, 0.0  ;;  %v36735_v27 = vmax.f32 %v40543_v1, 0.0  ;;  %v36752_v1 = vld [vmem:[%s39940_s3 + $0x68] sm:$0x3f] }
 0x380   :  { %19513 = vrot.lane.b32.xlu1 %v36654_v60, %s31947_s11  ;;  %v36710_v20 = vpop.permute.xlu0 %20320 }
 0x381   :  { %40537 = vst [vmem:[#allocation28_spill] sm:$0xff] %v36710_v20  ;;  %29097 = vmatmul.mubr.msk.f32.vlgmr.msra.gmra.mrb[110].mxu1 %vm5554_vm4, %v36561_v34  ;;  %v36717_v30 = vpop.permute.xlu1 %21161  ;;  %v40551_v20 = vld [vmem:[#allocation48_spill] sm:$0xff] }
 0x382   :  { %40538 = vst [vmem:[#allocation76_spill] sm:$0xff] %v36717_v30  ;;  %29102 = vmatpush1.msk.msra.mxu1 %vm2972_vm0, %v15398_v57  ;;  %16077 = vmatprep.mubr.f32.mxu1 %v40241_v50  ;;  %v16217_v57 = vsel %vm7943_vm6, %v35490_v3, %v40541_v37  ;;  %v16219_v37 = vsel %vm7943_vm6, %v40540_v47, %v40545_v23 }
 0x383   :  { %29108 = vmatprep.subr.msk.mxu1 %vm2972_vm0, %v16218_v56  ;;  %22777 = vrot.lane.b32.xlu0 %v36706_v10, %s31946_s25  ;;  %v40544_v56 = vld [vmem:[#allocation82_spill] sm:$0xff] }
 0x384   :  { %22779 = vrot.lane.b32.xlu1 %v36720_v25, %s31946_s25  ;;  %v36732_v29 = vpop.permute.xlu0 %21159  ;;  %v16220_v36 = vsel %vm7943_vm6, %v40545_v23, %v40544_v56  ;;  %v40549_v23 = vld [vmem:[#allocation98_spill] sm:$0xff] }
 0x385   :  { %40542 = vst [vmem:[#allocation52_spill] sm:$0xff] %v36732_v29  ;;  %29103 = vmatmul.mubr.msk.f32.vlgmr.msra.gmra.mrb[112].mxu1 %vm5554_vm4, %v36561_v34  ;;  %v36742_v30 = vpop.permute.xlu1 %18658  ;;  %v40548_v29 = vld [vmem:[#allocation33_spill] sm:$0xff]  ;;  %v36779_v47 = vmax.f32 %v40549_v23, 0.0 }
 0x386   :  { %29109 = vmatpush1.msk.msra.mxu1 %vm2972_vm0, %v16217_v57  ;;  %16344 = vmatprep.mubr.f32.mxu1 %v40241_v50 }
 0x387   :  { %29111 = vmatprep.subr.msk.mxu1 %vm2972_vm0, %v16220_v36  ;;  %22781 = vrot.lane.b32.xlu0 %v36735_v27, %s31946_s25  ;;  %v40547_v36 = vld [vmem:[#allocation24_spill] sm:$0xff] }
 0x388   :  { %23612 = vrot.lane.b32.xlu1 %v36706_v10, %s31947_s11  ;;  %v36759_v3 = vpop.permute.xlu0 %18656  ;;  %v16222_v62 = vsel %vm7943_vm6, %v40548_v29, %v40547_v36 }
 0x389   :  { %29110 = vmatmul.mubr.msk.f32.vlgmr.msra.gmra.mrb[100].mxu1 %vm5554_vm4, %v36752_v1  ;;  %v36766_v57 = vpop.permute.xlu1 %20328 }
 0x38a   :  { %40546 = vst [vmem:[#allocation36_spill] sm:$0xff] %v36766_v57  ;;  %29112 = vmatpush1.msk.msra.mxu1 %vm2972_vm0, %v16219_v37  ;;  %16415 = vmatprep.mubr.f32.mxu1 %v40241_v50  ;;  %v16221_v37 = vsel %vm7943_vm6, %v40544_v56, %v40548_v29  ;;  %v16223_v56 = vsel %vm7943_vm6, %v40547_v36, %v40551_v20 }
 0x38b   :  { %29114 = vmatprep.subr.msk.mxu1 %vm2972_vm0, %v16222_v62  ;;  %20332 = vrot.lane.b32.xlu0 %v36632_v21, %s31948_s20  ;;  %v40550_v62 = vld [vmem:[#allocation83_spill] sm:$0xff] }
 0x38c   :  { %20340 = vrot.lane.b32.xlu1 %v36572_v51, %s31948_s20  ;;  %v36781_v57 = vpop.permute.xlu0 %18660  ;;  %v16224_v5 = vsel %vm7943_vm6, %v40551_v20, %v40550_v62  ;;  %v40556_v20 = vld [vmem:[#allocation77_spill] sm:$0xff] }
 0x38d   :  { %29113 = vmatmul.mubr.msk.f32.vlgmr.msra.gmra.mrb[102].mxu1 %vm5554_vm4, %v36752_v1  ;;  %v36788_v18 = vpop.permute.xlu1 %18664  ;;  %v36820_v36 = vmax.f32 %v40556_v20, 0.0  ;;  %v16230_v20 = vsel %vm7943_vm6, %v40561_v4, %v40560_v0 }
 0x38e   :  { %29115 = vmatpush1.msk.msra.mxu1 %vm2972_vm0, %v16221_v37  ;;  %16486 = vmatprep.mubr.f32.mxu1 %v40241_v50  ;;  %v40555_v37 = vld [vmem:[#allocation70_spill] sm:$0xff] }
 0x38f   :  { %29117 = vmatprep.subr.msk.mxu1 %vm2972_vm0, %v16224_v5  ;;  %23614 = vrot.lane.b32.xlu0 %v36720_v25, %s31947_s11  ;;  %v40554_v5 = vld [vmem:[#allocation67_spill] sm:$0xff]  ;;  %v16225_v6 = vsel %vm7943_vm6, %v40550_v62, %v40555_v37 }
 0x390   :  { %22783 = vrot.lane.b32.xlu1 %v36779_v47, %s31946_s25  ;;  %v36800_v29 = vpop.permute.xlu0 %19491  ;;  %v16226_v11 = vsel %vm7943_vm6, %v40555_v37, %v40554_v5  ;;  %v40563_v37 = vld [vmem:[#allocation26_spill] sm:$0xff] }
 0x391   :  { %40552 = vst [vmem:[#allocation20_spill] sm:$0xff] %v36800_v29  ;;  %29116 = vmatmul.mubr.msk.f32.vlgmr.msra.gmra.mrb[104].mxu1 %vm5554_vm4, %v36752_v1  ;;  %v36807_v23 = vpop.permute.xlu1 %19499 }
 0x392   :  { %40553 = vst [vmem:[#allocation71_spill] sm:$0xff] %v36807_v23  ;;  %29118 = vmatpush1.msk.msra.mxu1 %vm2972_vm0, %v16223_v56  ;;  %16557 = vmatprep.mubr.f32.mxu1 %v40241_v50  ;;  %v40558_v56 = vld [vmem:[#allocation17_spill] sm:$0xff]  ;;  %v40570_v23 = vld [vmem:[#allocation19_spill] sm:$0xff] }
 0x393   :  { %29120 = vmatprep.subr.msk.mxu1 %vm2972_vm0, %v16226_v11  ;;  %23616 = vrot.lane.b32.xlu0 %v36735_v27, %s31947_s11  ;;  %v36825_v54 = vmax.f32 %v40558_v56, 0.0  ;;  %v36847_v56 = vmax.f32 %v40563_v37, 0.0 }
 0x394   :  { %23618 = vrot.lane.b32.xlu1 %v36779_v47, %s31947_s11  ;;  %v36822_v38 = vpop.permute.xlu0 %20326 }
 0x395   :  { %40557 = vst [vmem:[#allocation72_spill] sm:$0xff] %v36822_v38  ;;  %29119 = vmatmul.mubr.msk.f32.vlgmr.msra.gmra.mrb[106].mxu1 %vm5554_vm4, %v36752_v1  ;;  %v36832_v11 = vpop.permute.xlu1 %20334 }
 0x396   :  { %40559 = vst [vmem:[#allocation79_spill] sm:$0xff] %v36832_v11  ;;  %29121 = vmatpush1.msk.msra.mxu1 %vm2972_vm0, %v16225_v6  ;;  %16628 = vmatprep.mubr.f32.mxu1 %v40241_v50  ;;  %v40564_v6 = vld [vmem:[#allocation66_spill] sm:$0xff] }
 0x397   :  { %29126 = vmatprep.subr.msk.mxu1 %vm2972_vm0, %v16230_v20  ;;  %22787 = vrot.lane.b32.xlu0 %v36825_v54, %s31946_s25  ;;  %v16229_v38 = vsel %vm7943_vm6, %v40564_v6, %v40561_v4  ;;  %v40565_v20 = vld [vmem:[#allocation40_spill] sm:$0xff]  ;;  %v40566_v4 = vld [vmem:[#allocation101_spill] sm:$0xff] }
 0x398   :  { %22785 = vrot.lane.b32.xlu1 %v36820_v36, %s31946_s25  ;;  %v36844_v62 = vpop.permute.xlu0 %20330  ;;  %v16234_v29 = vsel %vm7943_vm6, %v36322_v39, %v40565_v20  ;;  %v16233_v37 = vsel %vm7943_vm6, %v40566_v4, %v36322_v39  ;;  %v17052_v39 = vsel %vm8781_vm7, %v35448_v28, %v40570_v23 }
 0x399   :  { %40562 = vst [vmem:[#allocation57_spill] sm:$0xff] %v36844_v62  ;;  %29122 = vmatmul.mubr.msk.f32.vlgmr.msra.gmra.mrb[108].mxu1 %vm5554_vm4, %v36752_v1  ;;  %v36854_v11 = vpop.permute.xlu1 %18666 }
 0x39a   :  { %29127 = vmatpush1.msk.msra.mxu1 %vm2972_vm0, %v16229_v38  ;;  %16770 = vmatprep.mubr.f32.mxu1 %v40241_v50 }
 0x39b   :  { %29132 = vmatprep.subr.msk.mxu1 %vm2972_vm0, %v16234_v29  ;;  %22789 = vrot.lane.b32.xlu0 %v36847_v56, %s31946_s25  ;;  %v40569_v29 = vld [vmem:[#allocation61_spill] sm:$0xff] }
 0x39c   :  { %20350 = vrot.lane.b32.xlu1 %v36665_v52, %s31948_s20  ;;  %v17053_v40 = vsel %vm8781_vm7, %v40570_v23, %v40569_v29 }
 0x39d   :  { %29128 = vmatmul.mubr.msk.f32.vlgmr.msra.gmra.mrb[110].mxu1 %vm5554_vm4, %v36752_v1  ;;  %v36871_v38 = vpop.permute.xlu0 %19493  ;;  %v36873_v62 = vpop.permute.xlu1 %19501 }
 0x39e   :  { %40567 = vst [vmem:[#allocation31_spill] sm:$0xff] %v36871_v38  ;;  %40568 = vst [vmem:[#allocation35_spill] sm:$0xff] %v36873_v62  ;;  %29133 = vmatpush1.msk.msra.mxu1 %vm2972_vm0, %v16233_v37  ;;  %16912 = vmatprep.mubr.f32.mxu1 %v40241_v50  ;;  %v40573_v38 = vld [vmem:[#allocation27_spill] sm:$0xff] }
 0x39f   :  { %29139 = vmatprep.subr.msk.mxu1 %vm2972_vm0, %v17053_v40  ;;  %20348 = vrot.lane.b32.xlu0 %v36654_v60, %s31948_s20  ;;  %v40572_v40 = vld [vmem:[#allocation30_spill] sm:$0xff]  ;;  %v17054_v28 = vsel %vm8781_vm7, %v40569_v29, %v40573_v38 }
 0x3a0   :  { %23622 = vrot.lane.b32.xlu1 %v36825_v54, %s31947_s11  ;;  %v17055_v17 = vsel %vm8781_vm7, %v40573_v38, %v40572_v40  ;;  %v40578_v38 = vld [vmem:[#allocation58_spill] sm:$0xff] }
 0x3a1   :  { %29134 = vmatmul.mubr.msk.f32.vlgmr.msra.gmra.mrb[112].mxu1 %vm5554_vm4, %v36752_v1  ;;  %v36890_v37 = vpop.permute.xlu0 %18668  ;;  %v36892_v62 = vpop.permute.xlu1 %20336  ;;  %v36929_v29 = vmax.f32 %v40578_v38, 0.0 }
 0x3a2   :  { %40571 = vst [vmem:[#allocation64_spill] sm:$0xff] %v36892_v62  ;;  %29140 = vmatpush1.msk.msra.mxu1 %vm2972_vm0, %v17052_v39  ;;  %17179 = vmatprep.mubr.f32.mxu1 %v40241_v50  ;;  %v40575_v39 = vld [vmem:[#allocation25_spill] sm:$0xff]  ;;  %v40576_v62 = vld [vmem:[#allocation39_spill] sm:$0xff] }
 0x3a3   :  { %29142 = vmatprep.subr.msk.mxu1 %vm2972_vm0, %v17055_v17  ;;  %23620 = vrot.lane.b32.xlu0 %v36820_v36, %s31947_s11  ;;  %v17057_v17 = vsel %vm8781_vm7, %v40576_v62, %v40575_v39  ;;  %v17056_v63 = vsel %vm8781_vm7, %v40572_v40, %v40576_v62  ;;  %v17058_v62 = vsel %vm8781_vm7, %v40575_v39, %v40581_v8  ;;  %v40585_v40 = vld [vmem:[#allocation85_spill] sm:$0xff] }
 0x3a4   :  { %23624 = vrot.lane.b32.xlu1 %v36847_v56, %s31947_s11 }
 0x3a5   :  { %29141 = vmatmul.mubr.msk.f32.vlgmr.msra.gmra.mrb[100].mxu1 %vm5554_vm4, %v36902_v41  ;;  %v36914_v23 = vpop.permute.xlu0 %19503 }
 0x3a6   :  { %40574 = vst [vmem:[#allocation22_spill] sm:$0xff] %v36914_v23  ;;  %29143 = vmatpush1.msk.msra.mxu1 %vm2972_vm0, %v17054_v28  ;;  %17250 = vmatprep.mubr.f32.mxu1 %v40241_v50  ;;  %v36921_v44 = vpop.permute.xlu1 %18672  ;;  %v40579_v28 = vld [vmem:[#allocation46_spill] sm:$0xff] }
 0x3a7   :  { %40577 = vst [vmem:[#allocation78_spill] sm:$0xff] %v36921_v44  ;;  %29145 = vmatprep.subr.msk.mxu1 %vm2972_vm0, %v17057_v17  ;;  %21167 = vrot.lane.b32.xlu0 %v36632_v21, %s31949_s30  ;;  %v36932_v23 = vmax.f32 %v40579_v28, 0.0  ;;  %v40580_v17 = vld [vmem:[#allocation74_spill] sm:$0xff] }
 0x3a8   :  { %21175 = vrot.lane.b32.xlu1 %v36572_v51, %s31949_s30  ;;  %v17059_v61 = vsel %vm8781_vm7, %v40581_v8, %v40580_v17 }
 0x3a9   :  { %29144 = vmatmul.mubr.msk.f32.vlgmr.msra.gmra.mrb[102].mxu1 %vm5554_vm4, %v36902_v41 }
 0x3aa   :  { %29146 = vmatpush1.msk.msra.mxu1 %vm2972_vm0, %v17056_v63  ;;  %17321 = vmatprep.mubr.f32.mxu1 %v40241_v50  ;;  %v36947_v38 = vpop.permute.xlu0 %20338  ;;  %v36954_v63 = vmax.f32 %v36209_v2, 0.0  ;;  %v17060_v2 = vsel %vm8781_vm7, %v40580_v17, %v40585_v40  ;;  %v40590_v17 = vld [vmem:[#allocation100_spill] sm:$0xff] }
 0x3ab   :  { %29148 = vmatprep.subr.msk.mxu1 %vm2972_vm0, %v17059_v61  ;;  %22795 = vrot.lane.b32.xlu0 %v36932_v23, %s31946_s25  ;;  %40582 = vst [vmem:[#allocation51_spill] sm:$0xff] %v36947_v38  ;;  %v36949_v28 = vpop.permute.xlu1 %19507  ;;  %v40584_v61 = vld [vmem:[#allocation97_spill] sm:$0xff] }
 0x3ac   :  { %40583 = vst [vmem:[#allocation7_spill] sm:$0xff] %v36949_v28  ;;  %22791 = vrot.lane.b32.xlu1 %v36929_v29, %s31946_s25  ;;  %v17061_v38 = vsel %vm8781_vm7, %v40585_v40, %v40584_v61 }
 0x3ad   :  { %29147 = vmatmul.mubr.msk.f32.vlgmr.msra.gmra.mrb[104].mxu1 %vm5554_vm4, %v36902_v41 }
 0x3ae   :  { %29149 = vmatpush1.msk.msra.mxu1 %vm2972_vm0, %v17058_v62  ;;  %17392 = vmatprep.mubr.f32.mxu1 %v40241_v50  ;;  %v40589_v62 = vld [vmem:[#allocation11_spill] sm:$0xff] }
 0x3af   :  { %29151 = vmatprep.subr.msk.mxu1 %vm2972_vm0, %v17061_v38  ;;  %23626 = vrot.lane.b32.xlu0 %v36929_v29, %s31947_s11  ;;  %v40588_v38 = vld [vmem:[#allocation86_spill] sm:$0xff]  ;;  %v17064_v40 = vsel %vm8781_vm7, %v40590_v17, %v40589_v62 }
 0x3b0   :  { %22793 = vrot.lane.b32.xlu1 %v36954_v63, %s31946_s25  ;;  %v17065_v28 = vsel %vm8781_vm7, %v40589_v62, %v40588_v38  ;;  %v37008_v62 = vmax.f32 %v36274_v49, 0.0  ;;  %v37027_v49 = vmax.f32 %v36300_v22, 0.0  ;;  %v37043_v22 = vld [vmem:[%s39940_s3 + $0x78] sm:$0x3f] }
 0x3b1   :  { %29150 = vmatmul.mubr.msk.f32.vlgmr.msra.gmra.mrb[106].mxu1 %vm5554_vm4, %v36902_v41  ;;  %v36976_v8 = vpop.permute.xlu0 %18676  ;;  %v36978_v39 = vpop.permute.xlu1 %20346 }
 0x3b2   :  { %40586 = vst [vmem:[#allocation42_spill] sm:$0xff] %v36976_v8  ;;  %40587 = vst [vmem:[#allocation50_spill] sm:$0xff] %v36978_v39  ;;  %29152 = vmatpush1.msk.msra.mxu1 %vm2972_vm0, %v17060_v2  ;;  %17463 = vmatprep.mubr.f32.mxu1 %v40241_v50  ;;  %v40591_v2 = vld [vmem:[#allocation29_spill] sm:$0xff] }
 0x3b3   :  { %29157 = vmatprep.subr.msk.mxu1 %vm2972_vm0, %v17065_v28  ;;  %23628 = vrot.lane.b32.xlu0 %v36954_v63, %s31947_s11  ;;  %v17069_v39 = vsel %vm8781_vm7, %v36345_v33, %v40591_v2 }
 0x3b4   :  { %23630 = vrot.lane.b32.xlu1 %v36932_v23, %s31947_s11 }
 0x3b5   :  { %29153 = vmatmul.mubr.msk.f32.vlgmr.msra.gmra.mrb[108].mxu1 %vm5554_vm4, %v36902_v41 }
 0x3b6   :  { %29158 = vmatpush1.msk.msra.mxu1 %vm2972_vm0, %v17064_v40  ;;  %17605 = vmatprep.mubr.f32.mxu1 %v40241_v50  ;;  %v37000_v28 = vpop.permute.xlu0 %19511  ;;  %v37002_v44 = vpop.permute.xlu1 %18674  ;;  %v40594_v40 = vld [vmem:[#allocation56_spill] sm:$0xff] }
 0x3b7   :  { %40592 = vst [vmem:[#allocation41_spill] sm:$0xff] %v37000_v28  ;;  %40593 = vst [vmem:[#allocation15_spill] sm:$0xff] %v37002_v44  ;;  %29163 = vmatprep.subr.msk.mxu1 %vm2972_vm0, %v17069_v39  ;;  %21183 = vrot.lane.b32.xlu0 %v36654_v60, %s31949_s30  ;;  %v17068_v8 = vsel %vm8781_vm7, %v40594_v40, %v36345_v33  ;;  %v40595_v28 = vld [vmem:[#allocation13_spill] sm:$0xff]  ;;  %v40596_v39 = vld [vmem:[#allocation32_spill] sm:$0xff] }
 0x3b8   :  { %21185 = vrot.lane.b32.xlu1 %v36665_v52, %s31949_s30  ;;  %v37018_v44 = vmax.f32 %v40595_v28, 0.0  ;;  %v40600_v28 = vld [vmem:[#allocation84_spill] sm:$0xff] }
 0x3b9   :  { %29159 = vmatmul.mubr.msk.f32.vlgmr.msra.gmra.mrb[110].mxu1 %vm5554_vm4, %v36902_v41  ;;  %v40603_v60 = vld [vmem:[#allocation80_spill] sm:$0xff] }
 0x3ba   :  { %29164 = vmatpush1.msk.msra.mxu1 %vm2972_vm0, %v17068_v8  ;;  %17747 = vmatprep.mubr.f32.mxu1 %v40241_v50  ;;  %v40599_v8 = vld [vmem:[#allocation34_spill] sm:$0xff] }
 0x3bb   :  { %29170 = vmatprep.subr.msk.mxu1 %vm2972_vm0, %v40596_v39  ;;  %22799 = vrot.lane.b32.xlu0 %v37008_v62, %s31946_s25  ;;  %v37029_v33 = vpop.permute.xlu0 %20342  ;;  %v37031_v52 = vpop.permute.xlu1 %21163 }
 0x3bc   :  { %40597 = vst [vmem:[#allocation65_spill] sm:$0xff] %v37029_v33  ;;  %40598 = vst [vmem:[#allocation102_spill] sm:$0xff] %v37031_v52  ;;  %22803 = vrot.lane.b32.xlu1 %v37018_v44, %s31946_s25  ;;  %v40602_v33 = vld [vmem:[#allocation38_spill] sm:$0xff] }
 0x3bd   :  { %29165 = vmatmul.mubr.msk.f32.vlgmr.msra.gmra.mrb[112].mxu1 %vm5554_vm4, %v36902_v41 }
 0x3be   :  { %29171 = vmatpush1.msk.msra.mxu1 %vm2972_vm0, %v40599_v8  ;;  %17973 = vmatprep.mubr.f32.mxu1 %v40241_v50 }
 0x3bf   :  { %29173 = vmatprep.subr.msk.mxu1 %vm2972_vm0, %v40600_v28  ;;  %22801 = vrot.lane.b32.xlu0 %v37027_v49, %s31946_s25 }
 0x3c0   :  { %23638 = vrot.lane.b32.xlu1 %v37018_v44, %s31947_s11  ;;  %v37051_v39 = vpop.permute.xlu0 %21165  ;;  %v15379_v52 = vpop.permute.xlu1 %15378 }
 0x3c1   :  { %40601 = vst [vmem:[#allocation63_spill] sm:$0xff] %v37051_v39  ;;  %29172 = vmatmul.mubr.msk.f32.vlgmr.msra.gmra.mrb[100].mxu1 %vm5554_vm4, %v37043_v22  ;;  %v15401_v8 = vsel %vm7105_vm5, %v15379_v52, %v36308_v46  ;;  %v15400_v28 = vsel %vm7105_vm5, %v40535_v59, %v15379_v52  ;;  %v40604_v52 = vld [vmem:[#allocation68_spill] sm:$0xff]  ;;  %v37086_v59 = vmax.f32 %v36374_v58, 0.0 }
 0x3c2   :  { %29174 = vmatpush1.msk.msra.mxu1 %vm2972_vm0, %v40602_v33  ;;  %18044 = vmatprep.mubr.f32.mxu1 %v40241_v50 }
 0x3c3   :  { %29176 = vmatprep.subr.msk.mxu1 %vm2972_vm0, %v40603_v60  ;;  %23636 = vrot.lane.b32.xlu0 %v37027_v49, %s31947_s11  ;;  %v40605_v60 = vld [vmem:[#allocation90_spill] sm:$0xff] }
 0x3c4   :  { %24449 = vrot.lane.b32.xlu1 %v36720_v25, %s31948_s20  ;;  %29104 = vmatprep.subr.msk.mxu0 %vm2972_vm0, %v15401_v8  ;;  %v40606_v8 = vld [vmem:[#allocation81_spill] sm:$0xff] }
 0x3c5   :  { %29175 = vmatmul.mubr.msk.f32.vlgmr.msra.gmra.mrb[102].mxu1 %vm5554_vm4, %v37043_v22  ;;  %29105 = vmatpush1.msk.msra.mxu0 %vm2972_vm0, %v15400_v28  ;;  %v37072_v33 = vpop.permute.xlu0 %21171  ;;  %v37074_v39 = vpop.permute.xlu1 %21173 }
 0x3c6   :  { %29177 = vmatpush1.msk.msra.mxu1 %vm2972_vm0, %v40604_v52  ;;  %18115 = vmatprep.mubr.f32.mxu1 %v40241_v50 }
 0x3c7   :  { %29179 = vmatprep.subr.msk.mxu1 %vm2972_vm0, %v40605_v60  ;;  %23634 = vrot.lane.b32.xlu0 %v37008_v62, %s31947_s11  ;;  %v37126_v60 = vmax.f32 %v36419_v24, 0.0 }
 0x3c8   :  { %24453 = vrot.lane.b32.xlu1 %v36779_v47, %s31948_s20  ;;  %29106 = vmatmul.mubr.msk.f32.vlgmr.msra.gmra.mrb[108].mxu0 %vm5554_vm4, %v36561_v34 }
 0x3c9   :  { %29178 = vmatmul.mubr.msk.f32.vlgmr.msra.gmra.mrb[104].mxu1 %vm5554_vm4, %v37043_v22  ;;  %16699 = vmatprep.mubr.f32.mxu0 %v40241_v50 }
 0x3ca   :  { %29180 = vmatpush1.msk.msra.mxu1 %vm2972_vm0, %v40606_v8  ;;  %18186 = vmatprep.mubr.f32.mxu1 %v40241_v50  ;;  %v37096_v28 = vpop.permute.xlu0 %21169  ;;  %v16198_v52 = vpop.permute.xlu1 %16197  ;;  %v40608_v8 = vld [vmem:[#allocation45_spill] sm:$0xff] }
 0x3cb   :  { %29182 = vmatprep.subr.msk.mxu1 %vm2972_vm0, %v36063_v45  ;;  %24447 = vrot.lane.b32.xlu0 %v36706_v10, %s31948_s20  ;;  %v16227_v58 = vsel %vm7943_vm6, %v40554_v5, %v16198_v52  ;;  %v16228_v34 = vsel %vm7943_vm6, %v16198_v52, %v40564_v6  ;;  %v40607_v45 = vld [vmem:[#allocation91_spill] sm:$0xff]  ;;  %v37131_v52 = vmax.f32 %v40608_v8, 0.0  ;;  %v18682_v8 = vsel %vm5533_vm2, %v36397_v35, %v36494_v9  ;;  %v37192_v35 = vld [vmem:[%s39940_s3 + $0x80] sm:$0x3f] }
 0x3cc   :  { %22807 = vrot.lane.b32.xlu1 %v37086_v59, %s31946_s25  ;;  %29123 = vmatprep.subr.msk.mxu0 %vm2972_vm0, %v16228_v34  ;;  %v40609_v34 = vld [vmem:[#allocation69_spill] sm:$0xff] }
 0x3cd   :  { %29181 = vmatmul.mubr.msk.f32.vlgmr.msra.gmra.mrb[106].mxu1 %vm5554_vm4, %v37043_v22  ;;  %29124 = vmatpush1.msk.msra.mxu0 %vm2972_vm0, %v16227_v58 }
 0x3ce   :  { %29183 = vmatpush1.msk.msra.mxu1 %vm2972_vm0, %v40607_v45  ;;  %18257 = vmatprep.mubr.f32.mxu1 %v40241_v50  ;;  %v37171_v45 = vmax.f32 %v40609_v34, 0.0 }
 0x3cf   :  { %29188 = vmatprep.subr.msk.mxu1 %vm2972_vm0, %v36164_v32  ;;  %24451 = vrot.lane.b32.xlu0 %v36735_v27, %s31948_s20  ;;  %v37119_v5 = vpop.permute.xlu0 %21177  ;;  %v37121_v6 = vpop.permute.xlu1 %21181 }
 0x3d0   :  { %23642 = vrot.lane.b32.xlu1 %v37086_v59, %s31947_s11  ;;  %29125 = vmatmul.mubr.msk.f32.vlgmr.msra.gmra.mrb[104].mxu0 %vm5554_vm4, %v36752_v1 }
 0x3d1   :  { %29184 = vmatmul.mubr.msk.f32.vlgmr.msra.gmra.mrb[108].mxu1 %vm5554_vm4, %v37043_v22  ;;  %16841 = vmatprep.mubr.f32.mxu0 %v40241_v50 }
 0x3d2   :  { %29189 = vmatpush1.msk.msra.mxu1 %vm2972_vm0, %v36106_v19  ;;  %18399 = vmatprep.mubr.f32.mxu1 %v40241_v50 }
 0x3d3   :  { %29194 = vmatprep.subr.msk.mxu1 %vm2972_vm0, %v36318_v53  ;;  %22811 = vrot.lane.b32.xlu0 %v37131_v52, %s31946_s25  ;;  %v18683_v53 = vsel %vm5533_vm2, %v36494_v9, %v36280_v48 }
 0x3d4   :  { %22809 = vrot.lane.b32.xlu1 %v37126_v60, %s31946_s25  ;;  %v16214_v32 = vpop.permute.xlu0 %16213  ;;  %v16206_v24 = vpop.permute.xlu1 %16205 }
 0x3d5   :  { %29190 = vmatmul.mubr.msk.f32.vlgmr.msra.gmra.mrb[110].mxu1 %vm5554_vm4, %v37043_v22  ;;  %v16231_v58 = vsel %vm7943_vm6, %v40560_v0, %v16206_v24  ;;  %v16232_v19 = vsel %vm7943_vm6, %v16206_v24, %v40566_v4  ;;  %v16235_v24 = vsel %vm7943_vm6, %v40565_v20, %v16214_v32 }
 0x3d6   :  { %29195 = vmatpush1.msk.msra.mxu1 %vm2972_vm0, %v36232_v55  ;;  %29129 = vmatprep.subr.msk.mxu0 %vm2972_vm0, %v16232_v19  ;;  %v16236_v55 = vsel %vm7943_vm6, %v16214_v32, %v36330_v42  ;;  %v18684_v32 = vsel %vm5533_vm2, %v36280_v48, %v36522_v31  ;;  %v18687_v48 = vsel %vm5533_vm2, %v36584_v7, %v36597_v43 }
 0x3d7   :  { %29201 = vmatprep.subr.msk.mxu1 %vm2972_vm0, %v18683_v53  ;;  %23646 = vrot.lane.b32.xlu0 %v37131_v52, %s31947_s11 }
 0x3d8   :  { %23644 = vrot.lane.b32.xlu1 %v37126_v60, %s31947_s11  ;;  %29130 = vmatpush1.msk.msra.mxu0 %vm2972_vm0, %v16231_v58  ;;  %v18685_v58 = vsel %vm5533_vm2, %v36522_v31, %v36472_v16 }
 0x3d9   :  { %18541 = vmatprep.mubr.f32.mxu1 %v40241_v50  ;;  %v17041_v0 = vpop.permute.xlu0 %17040  ;;  %29131 = vmatmul.mubr.msk.f32.vlgmr.msra.gmra.mrb[106].mxu0 %vm5554_vm4, %v36752_v1  ;;  %v37168_v4 = vpop.permute.xlu1 %19509 }
 0x3da   :  { %29135 = vmatprep.subr.msk.mxu0 %vm2972_vm0, %v16236_v55  ;;  %29196 = vmatmul.mubr.msk.f32.vlgmr.msra.gmra.mrb[112].mxu1 %vm5554_vm4, %v37043_v22  ;;  %v40610_v55 = vld [vmem:[#allocation23_spill] sm:$0xff] }
 0x3db   :  { %29202 = vmatpush1.msk.msra.mxu1 %vm2972_vm0, %v18682_v8  ;;  %29136 = vmatpush1.msk.msra.mxu0 %vm2972_vm0, %v16235_v24  ;;  %v37213_v34 = vmax.f32 %v40610_v55, 0.0  ;;  %v18686_v8 = vsel %vm5533_vm2, %v36472_v16, %v36584_v7  ;;  %v17066_v24 = vsel %vm8781_vm7, %v40588_v38, %v17041_v0  ;;  %v18688_v7 = vsel %vm5533_vm2, %v36597_v43, %v36606_v15 }
 0x3dc   :  { %29204 = vmatprep.subr.msk.mxu1 %vm2972_vm0, %v18685_v58  ;;  %22797 = vrot.lane.b32.xlu0 %v37171_v45, %s31946_s25  ;;  %v18691_v43 = vsel %vm5533_vm2, %v36742_v30, %v36781_v57 }
 0x3dd   :  { %24455 = vrot.lane.b32.xlu1 %v36820_v36, %s31948_s20  ;;  %16983 = vmatprep.mubr.f32.mxu0 %v40241_v50  ;;  %v37197_v9 = vpop.permute.xlu0 %18670 }
 0x3de   :  { %18809 = vmatprep.mubr.f32.mxu1 %v40241_v50  ;;  %29137 = vmatmul.mubr.msk.f32.vlgmr.msra.gmra.mrb[108].mxu0 %vm5554_vm4, %v36752_v1  ;;  %v17033_v20 = vpop.permute.xlu1 %17032 }
 0x3df   :  { %v17062_v19 = vsel %vm8781_vm7, %v40584_v61, %v17033_v20  ;;  %29203 = vmatmul.mubr.msk.f32.vlgmr.msra.gmra.mrb[100].mxu1 %vm5554_vm4, %v37192_v35  ;;  %v17063_v53 = vsel %vm8781_vm7, %v17033_v20, %v40590_v17  ;;  %17534 = vmatprep.mubr.f32.mxu0 %v40241_v50  ;;  %v17067_v61 = vsel %vm8781_vm7, %v17041_v0, %v40594_v40  ;;  %v40611_v20 = vld [vmem:[#allocation60_spill] sm:$0xff] }
 0x3e0   :  { %29205 = vmatpush1.msk.msra.mxu1 %vm2972_vm0, %v18684_v32  ;;  %29154 = vmatprep.subr.msk.mxu0 %vm2972_vm0, %v17063_v53  ;;  %v18689_v40 = vsel %vm5533_vm2, %v36606_v15, %v36759_v3  ;;  %v37272_v32 = vmax.f32 %v40611_v20, 0.0 }
 0x3e1   :  { %29207 = vmatprep.subr.msk.mxu1 %vm2972_vm0, %v18687_v48  ;;  %24457 = vrot.lane.b32.xlu0 %v36825_v54, %s31948_s20  ;;  %v37223_v31 = vpop.permute.xlu0 %20344  ;;  %v40614_v48 = vld [vmem:[#allocation9_spill] sm:$0xff] }
 0x3e2   :  { %22805 = vrot.lane.b32.xlu1 %v37213_v34, %s31946_s25  ;;  %29155 = vmatpush1.msk.msra.mxu0 %vm2972_vm0, %v17062_v19  ;;  %v17049_v1 = vpop.permute.xlu1 %17048 }
 0x3e3   :  { %18880 = vmatprep.mubr.f32.mxu1 %v40241_v50  ;;  %29156 = vmatmul.mubr.msk.f32.vlgmr.msra.gmra.mrb[104].mxu0 %vm5554_vm4, %v36902_v41  ;;  %v17071_v17 = vsel %vm8781_vm7, %v17049_v1, %v36468_v12  ;;  %v17070_v38 = vsel %vm8781_vm7, %v40591_v2, %v17049_v1  ;;  %v37289_v2 = vmax.f32 %v36599_v14, 0.0  ;;  %v18695_v14 = vsel %vm5533_vm2, %v36854_v11, %v36890_v37 }
 0x3e4   :  { %29160 = vmatprep.subr.msk.mxu0 %vm2972_vm0, %v17067_v61  ;;  %29206 = vmatmul.mubr.msk.f32.vlgmr.msra.gmra.mrb[102].mxu1 %vm5554_vm4, %v37192_v35 }
 0x3e5   :  { %29208 = vmatpush1.msk.msra.mxu1 %vm2972_vm0, %v18686_v8  ;;  %29161 = vmatpush1.msk.msra.mxu0 %vm2972_vm0, %v17066_v24  ;;  %v37248_v58 = vpop.permute.xlu0 %21179 }
 0x3e6   :  { %29210 = vmatprep.subr.msk.mxu1 %vm2972_vm0, %v18689_v40  ;;  %29166 = vmatprep.subr.msk.mxu0 %vm2972_vm0, %v17071_v17  ;;  %v37252_v16 = vpop.permute.xlu1 %18662  ;;  %v40615_v17 = vld [vmem:[#allocation78_spill] sm:$0xff]  ;;  %v40616_v40 = vld [vmem:[#allocation53_spill] sm:$0xff] }
 0x3e7   :  { %24459 = vrot.lane.b32.xlu0 %v36847_v56, %s31948_s20  ;;  %24461 = vrot.lane.b32.xlu1 %v36929_v29, %s31948_s20  ;;  %v18693_v24 = vsel %vm5533_vm2, %v37252_v16, %v36788_v18 }
 0x3e8   :  { %17676 = vmatprep.mubr.f32.mxu0 %v40241_v50  ;;  %18951 = vmatprep.mubr.f32.mxu1 %v40241_v50 }
 0x3e9   :  { %29162 = vmatmul.mubr.msk.f32.vlgmr.msra.gmra.mrb[106].mxu0 %vm5554_vm4, %v36902_v41  ;;  %29209 = vmatmul.mubr.msk.f32.vlgmr.msra.gmra.mrb[104].mxu1 %vm5554_vm4, %v37192_v35  ;;  %v37269_v0 = vpop.permute.xlu0 %19497 }
 0x3ea   :  { %29167 = vmatpush1.msk.msra.mxu0 %vm2972_vm0, %v17070_v38  ;;  %29211 = vmatpush1.msk.msra.mxu1 %vm2972_vm0, %v18688_v7  ;;  %v37279_v15 = vpop.permute.xlu1 %18678  ;;  %v40617_v7 = vld [vmem:[#allocation6_spill] sm:$0xff] }
 0x3eb   :  { %29185 = vmatprep.subr.msk.mxu0 %vm2972_vm0, %v36632_v21  ;;  %29213 = vmatprep.subr.msk.mxu1 %vm2972_vm0, %v18691_v43  ;;  %v18690_v21 = vsel %vm5533_vm2, %v36759_v3, %v36742_v30  ;;  %v40612_v30 = vld [vmem:[#allocation42_spill] sm:$0xff]  ;;  %v40613_v3 = vld [vmem:[#allocation15_spill] sm:$0xff] }
 0x3ec   :  { %22813 = vrot.lane.b32.xlu0 %v37272_v32, %s31946_s25  ;;  %24465 = vrot.lane.b32.xlu1 %v36932_v23, %s31948_s20  ;;  %v18699_v55 = vsel %vm5533_vm2, %v40613_v3, %v40612_v30  ;;  %v18698_v8 = vsel %vm5533_vm2, %v40615_v17, %v40613_v3  ;;  %v40618_v38 = vld [vmem:[#allocation94_spill] sm:$0xff]  ;;  %v18692_v3 = vsel %vm5533_vm2, %v36781_v57, %v37252_v16 }
 0x3ed   :  { %17818 = vmatprep.mubr.f32.mxu0 %v40241_v50  ;;  %19022 = vmatprep.mubr.f32.mxu1 %v40241_v50  ;;  %v37293_v19 = vpop.permute.xlu0 %18680  ;;  %v19518_v20 = vsel %vm7105_vm5, %v40618_v38, %v40617_v7 }
 0x3ee   :  { %29168 = vmatmul.mubr.msk.f32.vlgmr.msra.gmra.mrb[108].mxu0 %vm5554_vm4, %v36902_v41  ;;  %29212 = vmatmul.mubr.msk.f32.vlgmr.msra.gmra.mrb[106].mxu1 %vm5554_vm4, %v37192_v35  ;;  %v37302_v53 = vpop.permute.xlu1 %19505 }
 0x3ef   :  { %29186 = vmatpush1.msk.msra.mxu0 %vm2972_vm0, %v36019_v13  ;;  %29214 = vmatpush1.msk.msra.mxu1 %vm2972_vm0, %v18690_v21 }
 0x3f0   :  { %29191 = vmatprep.subr.msk.mxu0 %vm2972_vm0, %v36572_v51  ;;  %29219 = vmatprep.subr.msk.mxu1 %vm2972_vm0, %v18695_v14  ;;  %v18694_v51 = vsel %vm5533_vm2, %v36788_v18, %v36854_v11 }
 0x3f1   :  { %24463 = vrot.lane.b32.xlu0 %v36954_v63, %s31948_s20  ;;  %22815 = vrot.lane.b32.xlu1 %v37289_v2, %s31946_s25  ;;  %v37317_v41 = vpop.permute.xlu0 %19515 }
 0x3f2   :  { %18328 = vmatprep.mubr.f32.mxu0 %v40241_v50  ;;  %19093 = vmatprep.mubr.f32.mxu1 %v40241_v50  ;;  %v37321_v13 = vpop.permute.xlu1 %19513 }
 0x3f3   :  { %29187 = vmatmul.mubr.msk.f32.vlgmr.msra.gmra.mrb[104].mxu0 %vm5554_vm4, %v37043_v22  ;;  %29215 = vmatmul.mubr.msk.f32.vlgmr.msra.gmra.mrb[108].mxu1 %vm5554_vm4, %v37192_v35 }
 0x3f4   :  { %29192 = vmatpush1.msk.msra.mxu0 %vm2972_vm0, %v36212_v26  ;;  %29220 = vmatpush1.msk.msra.mxu1 %vm2972_vm0, %v18694_v51  ;;  %v19517_v51 = vsel %vm7105_vm5, %v36308_v46, %v40618_v38  ;;  %v18697_v46 = vsel %vm5533_vm2, %v37197_v9, %v40615_v17  ;;  %v18701_v38 = vsel %vm5533_vm2, %v37279_v15, %v37293_v19 }
 0x3f5   :  { %29197 = vmatprep.subr.msk.mxu0 %vm2972_vm0, %v40614_v48  ;;  %29225 = vmatprep.subr.msk.mxu1 %vm2972_vm0, %v18699_v55  ;;  %v22778_v11 = vpop.permute.xlu0 %22777  ;;  %v40619_v48 = vld [vmem:[#allocation55_spill] sm:$0xff] }
 0x3f6   :  { %23632 = vrot.lane.b32.xlu0 %v37171_v45, %s31947_s11  ;;  %24471 = vrot.lane.b32.xlu1 %v37027_v49, %s31948_s20  ;;  %v22780_v1 = vpop.permute.xlu1 %22779  ;;  %v37345_v26 = vsel %vm5533_vm2, %v37293_v19, %v22778_v11 }
 0x3f7   :  { %18470 = vmatprep.mubr.f32.mxu0 %v40241_v50  ;;  %19235 = vmatprep.mubr.f32.mxu1 %v40241_v50  ;;  %v37350_v61 = vsel %vm5533_vm2, %v22778_v11, %v22780_v1  ;;  %v40620_v11 = vld [vmem:[#allocation89_spill] sm:$0xff] }
 0x3f8   :  { %29193 = vmatmul.mubr.msk.f32.vlgmr.msra.gmra.mrb[106].mxu0 %vm5554_vm4, %v37043_v22  ;;  %29221 = vmatmul.mubr.msk.f32.vlgmr.msra.gmra.mrb[110].mxu1 %vm5554_vm4, %v37192_v35  ;;  %v19520_v57 = vsel %vm7105_vm5, %v40620_v11, %v40619_v48  ;;  %v19519_v17 = vsel %vm7105_vm5, %v40617_v7, %v40620_v11  ;;  %v40621_v7 = vld [vmem:[#allocation5_spill] sm:$0xff]  ;;  %v40625_v11 = vld [vmem:[#allocation71_spill] sm:$0xff] }
 0x3f9   :  { %29198 = vmatpush1.msk.msra.mxu0 %vm2972_vm0, %v40616_v40  ;;  %29226 = vmatpush1.msk.msra.mxu1 %vm2972_vm0, %v18698_v8  ;;  %v22782_v43 = vpop.permute.xlu0 %22781  ;;  %v18696_v8 = vsel %vm5533_vm2, %v36890_v37, %v37197_v9  ;;  %v40622_v37 = vld [vmem:[#allocation75_spill] sm:$0xff] }
 0x3fa   :  { %29216 = vmatprep.subr.msk.mxu0 %vm2972_vm0, %v18693_v24  ;;  %29232 = vmatprep.subr.msk.mxu1 %vm2972_vm0, %v19518_v20  ;;  %v23613_v21 = vpop.permute.xlu1 %23612  ;;  %v37371_v14 = vsel %vm5533_vm2, %v22780_v1, %v22782_v43  ;;  %v19522_v9 = vsel %vm7105_vm5, %v40622_v37, %v40621_v7 }
 0x3fb   :  { %24473 = vrot.lane.b32.xlu0 %v37018_v44, %s31948_s20  ;;  %24469 = vrot.lane.b32.xlu1 %v37008_v62, %s31948_s20  ;;  %v37379_v18 = vsel %vm7105_vm5, %v37317_v41, %v23613_v21 }
 0x3fc   :  { %18612 = vmatprep.mubr.f32.mxu0 %v40241_v50  ;;  %19377 = vmatprep.mubr.f32.mxu1 %v40241_v50 }
 0x3fd   :  { %29199 = vmatmul.mubr.msk.f32.vlgmr.msra.gmra.mrb[108].mxu0 %vm5554_vm4, %v37043_v22  ;;  %29227 = vmatmul.mubr.msk.f32.vlgmr.msra.gmra.mrb[112].mxu1 %vm5554_vm4, %v37192_v35  ;;  %v37393_v55 = vpop.permute.xlu0 %20332  ;;  %v37410_v22 = vld [vmem:[%s39940_s3 + $0x88] sm:$0x3f] }
 0x3fe   :  { %29217 = vmatpush1.msk.msra.mxu0 %vm2972_vm0, %v18692_v3  ;;  %29233 = vmatpush1.msk.msra.mxu1 %vm2972_vm0, %v19517_v51  ;;  %v37403_v16 = vpop.permute.xlu1 %20340  ;;  %v19521_v51 = vsel %vm7105_vm5, %v40619_v48, %v40622_v37  ;;  %v18700_v3 = vsel %vm5533_vm2, %v40612_v30, %v37279_v15  ;;  %v40626_v48 = vld [vmem:[#allocation20_spill] sm:$0xff] }
 0x3ff   :  { %29222 = vmatprep.subr.msk.mxu0 %vm2972_vm0, %v18697_v46  ;;  %29235 = vmatprep.subr.msk.mxu1 %vm2972_vm0, %v19520_v57  ;;  %v19528_v57 = vsel %vm7105_vm5, %v37269_v0, %v40625_v11 }
 0x400   :  { %23640 = vrot.lane.b32.xlu0 %v37213_v34, %s31947_s11  ;;  %24479 = vrot.lane.b32.xlu1 %v37126_v60, %s31948_s20 }
 0x401   :  { %19164 = vmatprep.mubr.f32.mxu0 %v40241_v50  ;;  %19644 = vmatprep.mubr.f32.mxu1 %v40241_v50  ;;  %v23615_v1 = vpop.permute.xlu0 %23614 }
 0x402   :  { %29218 = vmatmul.mubr.msk.f32.vlgmr.msra.gmra.mrb[104].mxu0 %vm5554_vm4, %v37192_v35  ;;  %29234 = vmatmul.mubr.msk.f32.vlgmr.msra.gmra.mrb[100].mxu1 %vm5554_vm4, %v37410_v22  ;;  %v37429_v24 = vsel %vm7105_vm5, %v23613_v21, %v23615_v1  ;;  %v22784_v40 = vpop.permute.xlu1 %22783 }
 0x403   :  { %29223 = vmatpush1.msk.msra.mxu0 %vm2972_vm0, %v18696_v8  ;;  %29236 = vmatpush1.msk.msra.mxu1 %vm2972_vm0, %v19519_v17  ;;  %v37440_v20 = vsel %vm5533_vm2, %v22782_v43, %v22784_v40 }
 0x404   :  { %29228 = vmatprep.subr.msk.mxu0 %vm2972_vm0, %v18701_v38  ;;  %29238 = vmatprep.subr.msk.mxu1 %vm2972_vm0, %v19522_v9  ;;  %v40628_v9 = vld [vmem:[#allocation95_spill] sm:$0xff] }
 0x405   :  { %24481 = vrot.lane.b32.xlu0 %v37131_v52, %s31948_s20  ;;  %24477 = vrot.lane.b32.xlu1 %v37086_v59, %s31948_s20  ;;  %v23617_v19 = vpop.permute.xlu0 %23616 }
 0x406   :  { %19306 = vmatprep.mubr.f32.mxu0 %v40241_v50  ;;  %19715 = vmatprep.mubr.f32.mxu1 %v40241_v50  ;;  %v37451_v21 = vsel %vm7105_vm5, %v23615_v1, %v23617_v19  ;;  %v23619_v43 = vpop.permute.xlu1 %23618  ;;  %v40627_v1 = vld [vmem:[#allocation54_spill] sm:$0xff] }
 0x407   :  { %40623 = vst [vmem:[#allocation44_spill] sm:$0xff] %v37451_v21  ;;  %29224 = vmatmul.mubr.msk.f32.vlgmr.msra.gmra.mrb[106].mxu0 %vm5554_vm4, %v37192_v35  ;;  %29237 = vmatmul.mubr.msk.f32.vlgmr.msra.gmra.mrb[102].mxu1 %vm5554_vm4, %v37410_v22  ;;  %v37464_v46 = vsel %vm7105_vm5, %v23617_v19, %v23619_v43  ;;  %v19524_v15 = vsel %vm7105_vm5, %v40627_v1, %v40626_v48 }
 0x408   :  { %40624 = vst [vmem:[#allocation73_spill] sm:$0xff] %v37464_v46  ;;  %29229 = vmatpush1.msk.msra.mxu0 %vm2972_vm0, %v18700_v3  ;;  %29239 = vmatpush1.msk.msra.mxu1 %vm2972_vm0, %v19521_v51  ;;  %v19523_v37 = vsel %vm7105_vm5, %v40621_v7, %v40627_v1  ;;  %v19527_v19 = vsel %vm7105_vm5, %v40628_v9, %v37269_v0  ;;  %v40629_v51 = vld [vmem:[#allocation7_spill] sm:$0xff] }
 0x409   :  { %29241 = vmatprep.subr.msk.mxu1 %vm2972_vm0, %v19524_v15  ;;  %29247 = vmatprep.subr.msk.mxu0 %vm2972_vm0, %v19528_v57  ;;  %v22788_v30 = vpop.permute.xlu0 %22787  ;;  %v40630_v7 = vld [vmem:[#allocation31_spill] sm:$0xff]  ;;  %v40631_v15 = vld [vmem:[#allocation22_spill] sm:$0xff] }
 0x40a   :  { %23648 = vrot.lane.b32.xlu0 %v37272_v32, %s31947_s11  ;;  %23650 = vrot.lane.b32.xlu1 %v37289_v2, %s31947_s11  ;;  %v22786_v17 = vpop.permute.xlu1 %22785  ;;  %v19526_v3 = vsel %vm7105_vm5, %v40630_v7, %v40628_v9  ;;  %v19525_v1 = vsel %vm7105_vm5, %v40626_v48, %v40630_v7  ;;  %v40632_v48 = vld [vmem:[#allocation35_spill] sm:$0xff] }
 0x40b   :  { %19448 = vmatprep.mubr.f32.mxu0 %v40241_v50  ;;  %19786 = vmatprep.mubr.f32.mxu1 %v40241_v50  ;;  %v37483_v8 = vsel %vm5533_vm2, %v22784_v40, %v22786_v17  ;;  %v37486_v38 = vsel %vm5533_vm2, %v22786_v17, %v22788_v30  ;;  %v19532_v40 = vsel %vm7105_vm5, %v37302_v53, %v40629_v51 }
 0x40c   :  { %29230 = vmatmul.mubr.msk.f32.vlgmr.msra.gmra.mrb[108].mxu0 %vm5554_vm4, %v37192_v35  ;;  %29240 = vmatmul.mubr.msk.f32.vlgmr.msra.gmra.mrb[104].mxu1 %vm5554_vm4, %v37410_v22 }
 0x40d   :  { %29242 = vmatpush1.msk.msra.mxu1 %vm2972_vm0, %v19523_v37  ;;  %29248 = vmatpush1.msk.msra.mxu0 %vm2972_vm0, %v19527_v19  ;;  %v37506_v57 = vpop.permute.xlu0 %22789  ;;  %v19536_v37 = vsel %vm7105_vm5, %v37321_v13, %v37317_v41  ;;  %v19529_v41 = vsel %vm7105_vm5, %v40625_v11, %v40632_v48 }
 0x40e   :  { %29244 = vmatprep.subr.msk.mxu1 %vm2972_vm0, %v19526_v3  ;;  %29253 = vmatprep.subr.msk.mxu0 %vm2972_vm0, %v19532_v40  ;;  %v37512_v35 = vsel %vm5533_vm2, %v22788_v30, %v37506_v57  ;;  %v37514_v0 = vpop.permute.xlu1 %20350  ;;  %v19531_v30 = vsel %vm7105_vm5, %v40631_v15, %v37302_v53  ;;  %v19530_v53 = vsel %vm7105_vm5, %v40632_v48, %v40631_v15  ;;  %v40633_v40 = vld [vmem:[#allocation41_spill] sm:$0xff]  ;;  %v40636_v15 = vld [vmem:[#allocation79_spill] sm:$0xff] }
 0x40f   :  { %25282 = vrot.lane.b32.xlu0 %v36706_v10, %s31949_s30  ;;  %25284 = vrot.lane.b32.xlu1 %v36720_v25, %s31949_s30  ;;  %v19535_v7 = vsel %vm7105_vm5, %v40633_v40, %v37321_v13  ;;  %v19534_v13 = vsel %vm7105_vm5, %v37168_v4, %v40633_v40 }
 0x410   :  { %19857 = vmatprep.mubr.f32.mxu1 %v40241_v50  ;;  %19999 = vmatprep.mubr.f32.mxu0 %v40241_v50 }
 0x411   :  { %29243 = vmatmul.mubr.msk.f32.vlgmr.msra.gmra.mrb[106].mxu1 %vm5554_vm4, %v37410_v22  ;;  %29249 = vmatmul.mubr.msk.f32.vlgmr.msra.gmra.mrb[104].mxu0 %vm5554_vm4, %v37410_v22  ;;  %v37532_v17 = vpop.permute.xlu0 %20348 }
 0x412   :  { %29245 = vmatpush1.msk.msra.mxu1 %vm2972_vm0, %v19525_v1  ;;  %29254 = vmatpush1.msk.msra.mxu0 %vm2972_vm0, %v19531_v30  ;;  %v23623_v9 = vpop.permute.xlu1 %23622  ;;  %v20363_v30 = vsel %vm7943_vm6, %v37393_v55, %v40636_v15 }
 0x413   :  { %29250 = vmatprep.subr.msk.mxu1 %vm2972_vm0, %v19530_v53  ;;  %29259 = vmatprep.subr.msk.mxu0 %vm2972_vm0, %v19536_v37  ;;  %v19533_v53 = vsel %vm7105_vm5, %v40629_v51, %v37168_v4  ;;  %v40641_v4 = vld [vmem:[#allocation99_spill] sm:$0xff] }
 0x414   :  { %24467 = vrot.lane.b32.xlu0 %v37171_v45, %s31948_s20  ;;  %25286 = vrot.lane.b32.xlu1 %v36735_v27, %s31949_s30 }
 0x415   :  { %19928 = vmatprep.mubr.f32.mxu1 %v40241_v50  ;;  %20141 = vmatprep.mubr.f32.mxu0 %v40241_v50  ;;  %v23621_v19 = vpop.permute.xlu0 %23620 }
 0x416   :  { %29246 = vmatmul.mubr.msk.f32.vlgmr.msra.gmra.mrb[108].mxu1 %vm5554_vm4, %v37410_v22  ;;  %29255 = vmatmul.mubr.msk.f32.vlgmr.msra.gmra.mrb[106].mxu0 %vm5554_vm4, %v37410_v22  ;;  %v37561_v3 = vsel %vm7105_vm5, %v23619_v43, %v23621_v19  ;;  %v37564_v11 = vsel %vm7105_vm5, %v23621_v19, %v23623_v9  ;;  %v23625_v1 = vpop.permute.xlu1 %23624  ;;  %v40639_v19 = vld [vmem:[#allocation65_spill] sm:$0xff] }
 0x417   :  { %40634 = vst [vmem:[#allocation37_spill] sm:$0xff] %v37561_v3  ;;  %40635 = vst [vmem:[#allocation18_spill] sm:$0xff] %v37564_v11  ;;  %29251 = vmatpush1.msk.msra.mxu1 %vm2972_vm0, %v19529_v41  ;;  %29260 = vmatpush1.msk.msra.mxu0 %vm2972_vm0, %v19535_v7  ;;  %v37575_v37 = vsel %vm7105_vm5, %v23623_v9, %v23625_v1  ;;  %v40638_v9 = vld [vmem:[#allocation57_spill] sm:$0xff]  ;;  %v20367_v40 = vsel %vm7943_vm6, %v37403_v16, %v40639_v19  ;;  %v40644_v3 = vld [vmem:[#allocation103_spill] sm:$0xff] }
 0x418   :  { %40637 = vst [vmem:[#allocation10_spill] sm:$0xff] %v37575_v37  ;;  %29256 = vmatprep.subr.msk.mxu1 %vm2972_vm0, %v19534_v13  ;;  %29278 = vmatprep.subr.msk.mxu0 %vm2972_vm0, %v20363_v30  ;;  %v20362_v41 = vsel %vm7943_vm6, %v40638_v9, %v37393_v55  ;;  %v40640_v7 = vld [vmem:[#allocation93_spill] sm:$0xff]  ;;  %v37610_v55 = vld [vmem:[%s39940_s3 + $0x90] sm:$0x3f] }
 0x419   :  { %25288 = vrot.lane.b32.xlu0 %v36779_v47, %s31949_s30  ;;  %24475 = vrot.lane.b32.xlu1 %v37213_v34, %s31948_s20  ;;  %v21168_v43 = vpop.permute.xlu0 %21167  ;;  %v20353_v51 = vsel %vm7943_vm6, %v40641_v4, %v40640_v7 }
 0x41a   :  { %20070 = vmatprep.mubr.f32.mxu1 %v40241_v50  ;;  %20283 = vmatprep.mubr.f32.mxu0 %v40241_v50  ;;  %v37585_v48 = vpop.permute.xlu1 %21175 }
 0x41b   :  { %29252 = vmatmul.mubr.msk.f32.vlgmr.msra.gmra.mrb[110].mxu1 %vm5554_vm4, %v37410_v22  ;;  %29261 = vmatmul.mubr.msk.f32.vlgmr.msra.gmra.mrb[108].mxu0 %vm5554_vm4, %v37410_v22 }
 0x41c   :  { %29257 = vmatpush1.msk.msra.mxu1 %vm2972_vm0, %v19533_v53  ;;  %29279 = vmatpush1.msk.msra.mxu0 %vm2972_vm0, %v20362_v41  ;;  %v20371_v53 = vsel %vm7943_vm6, %v37532_v17, %v37514_v0 }
 0x41d   :  { %29263 = vmatprep.subr.msk.mxu1 %vm2972_vm0, %v20353_v51  ;;  %29284 = vmatprep.subr.msk.mxu0 %vm2972_vm0, %v20367_v40  ;;  %v37612_v30 = vpop.permute.xlu0 %22795  ;;  %v20352_v40 = vsel %vm7943_vm6, %v36330_v42, %v40641_v4  ;;  %v40642_v51 = vld [vmem:[#allocation51_spill] sm:$0xff] }
 0x41e   :  { %25290 = vrot.lane.b32.xlu0 %v36820_v36, %s31949_s30  ;;  %25292 = vrot.lane.b32.xlu1 %v36825_v54, %s31949_s30  ;;  %v22792_v13 = vpop.permute.xlu1 %22791  ;;  %v20366_v37 = vsel %vm7943_vm6, %v40642_v51, %v37403_v16 }
 0x41f   :  { %20212 = vmatprep.mubr.f32.mxu1 %v40241_v50  ;;  %20834 = vmatprep.mubr.f32.mxu0 %v40241_v50  ;;  %v37625_v41 = vsel %vm5533_vm2, %v37506_v57, %v22792_v13  ;;  %v40643_v57 = vld [vmem:[#allocation43_spill] sm:$0xff] }
 0x420   :  { %29258 = vmatmul.mubr.msk.f32.vlgmr.msra.gmra.mrb[112].mxu1 %vm5554_vm4, %v37410_v22  ;;  %29280 = vmatmul.mubr.msk.f32.vlgmr.msra.gmra.mrb[104].mxu0 %vm5554_vm4, %v37610_v55  ;;  %v20355_v11 = vsel %vm7943_vm6, %v40644_v3, %v40643_v57 }
 0x421   :  { %29264 = vmatpush1.msk.msra.mxu1 %vm2972_vm0, %v20352_v40  ;;  %29285 = vmatpush1.msk.msra.mxu0 %vm2972_vm0, %v20366_v37  ;;  %v23627_v21 = vpop.permute.xlu0 %23626  ;;  %v40649_v40 = vld [vmem:[#allocation28_spill] sm:$0xff] }
 0x422   :  { %29266 = vmatprep.subr.msk.mxu1 %vm2972_vm0, %v20355_v11  ;;  %29290 = vmatprep.subr.msk.mxu0 %vm2972_vm0, %v20371_v53  ;;  %v37645_v42 = vsel %vm7105_vm5, %v23625_v1, %v23627_v21  ;;  %v22794_v16 = vpop.permute.xlu1 %22793  ;;  %v20354_v11 = vsel %vm7943_vm6, %v40640_v7, %v40644_v3  ;;  %v40646_v1 = vld [vmem:[#allocation50_spill] sm:$0xff]  ;;  %v40648_v53 = vld [vmem:[#allocation8_spill] sm:$0xff] }
 0x423   :  { %40645 = vst [vmem:[#allocation82_spill] sm:$0xff] %v37645_v42  ;;  %24483 = vrot.lane.b32.xlu0 %v37272_v32, %s31948_s20  ;;  %24485 = vrot.lane.b32.xlu1 %v37289_v2, %s31948_s20  ;;  %v37652_v22 = vsel %vm5533_vm2, %v22792_v13, %v22794_v16  ;;  %v37656_v37 = vsel %vm5533_vm2, %v22794_v16, %v37612_v30 }
 0x424   :  { %20479 = vmatprep.mubr.f32.mxu1 %v40241_v50  ;;  %20976 = vmatprep.mubr.f32.mxu0 %v40241_v50  ;;  %v20370_v4 = vsel %vm7943_vm6, %v40646_v1, %v37532_v17  ;;  %v20357_v3 = vsel %vm7943_vm6, %v40649_v40, %v40648_v53  ;;  %v21198_v16 = vsel %vm8781_vm7, %v21168_v43, %v37096_v28 }
 0x425   :  { %29265 = vmatmul.mubr.msk.f32.vlgmr.msra.gmra.mrb[100].mxu1 %vm5554_vm4, %v37610_v55  ;;  %29286 = vmatmul.mubr.msk.f32.vlgmr.msra.gmra.mrb[106].mxu0 %vm5554_vm4, %v37610_v55  ;;  %v37670_v13 = vpop.permute.xlu0 %23628 }
 0x426   :  { %40647 = vst [vmem:[#allocation12_spill] sm:$0xff] %v37670_v13  ;;  %29267 = vmatpush1.msk.msra.mxu1 %vm2972_vm0, %v20354_v11  ;;  %29291 = vmatpush1.msk.msra.mxu0 %vm2972_vm0, %v20370_v4  ;;  %v37679_v7 = vsel %vm7105_vm5, %v23627_v21, %v37670_v13  ;;  %v37681_v17 = vpop.permute.xlu1 %23630  ;;  %v20356_v21 = vsel %vm7943_vm6, %v40643_v57, %v40649_v40  ;;  %v40651_v4 = vld [vmem:[#allocation63_spill] sm:$0xff]  ;;  %v40653_v13 = vld [vmem:[#allocation62_spill] sm:$0xff] }
 0x427   :  { %40650 = vst [vmem:[#allocation24_spill] sm:$0xff] %v37679_v7  ;;  %29269 = vmatprep.subr.msk.mxu1 %vm2972_vm0, %v20357_v3  ;;  %25294 = vrot.lane.b32.xlu0 %v36847_v56, %s31949_s30  ;;  %v21197_v3 = vsel %vm8781_vm7, %v40651_v4, %v21168_v43  ;;  %v40652_v7 = vld [vmem:[#allocation72_spill] sm:$0xff]  ;;  %v21202_v40 = vsel %vm8781_vm7, %v37585_v48, %v37119_v5 }
 0x428   :  { %25296 = vrot.lane.b32.xlu1 %v36929_v29, %s31949_s30  ;;  %20550 = vmatprep.mubr.f32.mxu1 %v40241_v50  ;;  %v20359_v42 = vsel %vm7943_vm6, %v40653_v13, %v40652_v7  ;;  %v37718_v43 = vld [vmem:[%s39940_s3 + $0x98] sm:$0x3f] }
 0x429   :  { %29268 = vmatmul.mubr.msk.f32.vlgmr.msra.gmra.mrb[102].mxu1 %vm5554_vm4, %v37610_v55  ;;  %21118 = vmatprep.mubr.f32.mxu0 %v40241_v50  ;;  %v21184_v11 = vpop.permute.xlu0 %21183 }
 0x42a   :  { %29270 = vmatpush1.msk.msra.mxu1 %vm2972_vm0, %v20356_v21  ;;  %29292 = vmatmul.mubr.msk.f32.vlgmr.msra.gmra.mrb[108].mxu0 %vm5554_vm4, %v37610_v55  ;;  %v37705_v46 = vpop.permute.xlu1 %21185  ;;  %v40655_v21 = vld [vmem:[#allocation36_spill] sm:$0xff] }
 0x42b   :  { %40654 = vst [vmem:[#allocation33_spill] sm:$0xff] %v37705_v46  ;;  %29272 = vmatprep.subr.msk.mxu1 %vm2972_vm0, %v20359_v42  ;;  %29309 = vmatprep.subr.msk.mxu0 %vm2972_vm0, %v21198_v16  ;;  %v20358_v42 = vsel %vm7943_vm6, %v40648_v53, %v40653_v13  ;;  %v21201_v13 = vsel %vm8781_vm7, %v37074_v39, %v37585_v48 }
 0x42c   :  { %25298 = vrot.lane.b32.xlu0 %v36954_v63, %s31949_s30  ;;  %25300 = vrot.lane.b32.xlu1 %v36932_v23, %s31949_s30 }
 0x42d   :  { %20621 = vmatprep.mubr.f32.mxu1 %v40241_v50  ;;  %29310 = vmatpush1.msk.msra.mxu0 %vm2972_vm0, %v21197_v3  ;;  %v37720_v57 = vpop.permute.xlu0 %22799  ;;  %v20361_v3 = vsel %vm7943_vm6, %v40655_v21, %v40638_v9 }
 0x42e   :  { %29271 = vmatmul.mubr.msk.f32.vlgmr.msra.gmra.mrb[104].mxu1 %vm5554_vm4, %v37610_v55  ;;  %21669 = vmatprep.mubr.f32.mxu0 %v40241_v50  ;;  %v37731_v16 = vpop.permute.xlu1 %22803 }
 0x42f   :  { %29273 = vmatpush1.msk.msra.mxu1 %vm2972_vm0, %v20358_v42  ;;  %29315 = vmatprep.subr.msk.mxu0 %vm2972_vm0, %v21202_v40  ;;  %v20360_v40 = vsel %vm7943_vm6, %v40652_v7, %v40655_v21 }
 0x430   :  { %29275 = vmatprep.subr.msk.mxu1 %vm2972_vm0, %v20361_v3  ;;  %29311 = vmatmul.mubr.msk.f32.vlgmr.msra.gmra.mrb[104].mxu0 %vm5554_vm4, %v37718_v43  ;;  %v40656_v3 = vld [vmem:[#allocation64_spill] sm:$0xff] }
 0x431   :  { %29316 = vmatpush1.msk.msra.mxu0 %vm2972_vm0, %v21201_v13  ;;  %25302 = vrot.lane.b32.xlu0 %v37171_v45, %s31949_s30  ;;  %v22802_v53 = vpop.permute.xlu0 %22801  ;;  %v20365_v13 = vsel %vm7943_vm6, %v40656_v3, %v40642_v51 }
 0x432   :  { %25304 = vrot.lane.b32.xlu1 %v37008_v62, %s31949_s30  ;;  %20692 = vmatprep.mubr.f32.mxu1 %v40241_v50  ;;  %v37750_v9 = vpop.permute.xlu1 %23638  ;;  %v37754_v48 = vsel %vm5533_vm2, %v37720_v57, %v22802_v53  ;;  %v37758_v42 = vsel %vm5533_vm2, %v22802_v53, %v37731_v16  ;;  %v21206_v53 = vsel %vm8781_vm7, %v21184_v11, %v37705_v46 }
 0x433   :  { %29274 = vmatmul.mubr.msk.f32.vlgmr.msra.gmra.mrb[106].mxu1 %vm5554_vm4, %v37610_v55  ;;  %21811 = vmatprep.mubr.f32.mxu0 %v40241_v50  ;;  %v20369_v46 = vsel %vm7943_vm6, %v37223_v31, %v40646_v1  ;;  %v40657_v1 = vld [vmem:[#allocation88_spill] sm:$0xff] }
 0x434   :  { %29276 = vmatpush1.msk.msra.mxu1 %vm2972_vm0, %v20360_v40  ;;  %20763 = vmatprep.mubr.f32.mxu1 %v40241_v50  ;;  %v20364_v40 = vsel %vm7943_vm6, %v40636_v15, %v40656_v3 }
 0x435   :  { %29281 = vmatprep.subr.msk.mxu1 %vm2972_vm0, %v20365_v13  ;;  %25306 = vrot.lane.b32.xlu0 %v37027_v49, %s31949_s30  ;;  %v23637_v7 = vpop.permute.xlu0 %23636  ;;  %v21205_v13 = vsel %vm8781_vm7, %v37121_v6, %v21184_v11 }
 0x436   :  { %25308 = vrot.lane.b32.xlu1 %v37018_v44, %s31949_s30  ;;  %29317 = vmatmul.mubr.msk.f32.vlgmr.msra.gmra.mrb[106].mxu0 %vm5554_vm4, %v37718_v43  ;;  %v24450_v21 = vpop.permute.xlu1 %24449  ;;  %v37782_v51 = vsel %vm7105_vm5, %v23637_v7, %v37750_v9 }
 0x437   :  { %29277 = vmatmul.mubr.msk.f32.vlgmr.msra.gmra.mrb[108].mxu1 %vm5554_vm4, %v37610_v55  ;;  %29321 = vmatprep.subr.msk.mxu0 %vm2972_vm0, %v21206_v53  ;;  %v40658_v53 = vld [vmem:[#allocation47_spill] sm:$0xff] }
 0x438   :  { %29282 = vmatpush1.msk.msra.mxu1 %vm2972_vm0, %v20364_v40  ;;  %20905 = vmatprep.mubr.f32.mxu1 %v40241_v50  ;;  %v21188_v40 = vsel %vm8781_vm7, %v40658_v53, %v40657_v1 }
 0x439   :  { %29287 = vmatprep.subr.msk.mxu1 %vm2972_vm0, %v20369_v46  ;;  %25310 = vrot.lane.b32.xlu0 %v37213_v34, %s31949_s30  ;;  %v37800_v15 = vpop.permute.xlu0 %23634  ;;  %v20368_v46 = vsel %vm7943_vm6, %v40639_v19, %v37223_v31 }
 0x43a   :  { %25312 = vrot.lane.b32.xlu1 %v37086_v59, %s31949_s30  ;;  %29322 = vmatpush1.msk.msra.mxu0 %vm2972_vm0, %v21205_v13  ;;  %v37805_v11 = vpop.permute.xlu1 %24453  ;;  %v37809_v3 = vsel %vm7105_vm5, %v37800_v15, %v23637_v7 }
 0x43b   :  { %29283 = vmatmul.mubr.msk.f32.vlgmr.msra.gmra.mrb[110].mxu1 %vm5554_vm4, %v37610_v55  ;;  %21953 = vmatprep.mubr.f32.mxu0 %v40241_v50 }
 0x43c   :  { %29288 = vmatpush1.msk.msra.mxu1 %vm2972_vm0, %v20368_v46  ;;  %21047 = vmatprep.mubr.f32.mxu1 %v40241_v50  ;;  %v21187_v46 = vsel %vm8781_vm7, %v36468_v12, %v40658_v53  ;;  %v37857_v12 = vld [vmem:[%s39940_s3 + $0xa0] sm:$0x3f] }
 0x43d   :  { %29294 = vmatprep.subr.msk.mxu1 %vm2972_vm0, %v21188_v40  ;;  %25314 = vrot.lane.b32.xlu0 %v37126_v60, %s31949_s30  ;;  %v24448_v7 = vpop.permute.xlu0 %24447  ;;  %v40660_v40 = vld [vmem:[#allocation14_spill] sm:$0xff] }
 0x43e   :  { %25316 = vrot.lane.b32.xlu1 %v37131_v52, %s31949_s30  ;;  %29323 = vmatmul.mubr.msk.f32.vlgmr.msra.gmra.mrb[108].mxu0 %vm5554_vm4, %v37718_v43  ;;  %v37831_v31 = vsel %vm7943_vm6, %v37514_v0, %v24448_v7  ;;  %v37834_v19 = vsel %vm7943_vm6, %v24448_v7, %v24450_v21  ;;  %v37836_v13 = vpop.permute.xlu1 %22807  ;;  %v40661_v0 = vld [vmem:[#allocation21_spill] sm:$0xff] }
 0x43f   :  { %40659 = vst [vmem:[#allocation98_spill] sm:$0xff] %v37831_v31  ;;  %29289 = vmatmul.mubr.msk.f32.vlgmr.msra.gmra.mrb[112].mxu1 %vm5554_vm4, %v37610_v55  ;;  %29340 = vmatprep.subr.msk.mxu0 %vm2972_vm0, %v37171_v45  ;;  %v21190_v31 = vsel %vm8781_vm7, %v40661_v0, %v40660_v40  ;;  %v21189_v53 = vsel %vm8781_vm7, %v40657_v1, %v40661_v0 }
 0x440   :  { %29295 = vmatpush1.msk.msra.mxu1 %vm2972_vm0, %v21187_v46  ;;  %29341 = vmatpush1.msk.msra.mxu0 %vm2972_vm0, %v36932_v23 }
 0x441   :  { %29297 = vmatprep.subr.msk.mxu1 %vm2972_vm0, %v21190_v31  ;;  %29346 = vmatprep.subr.msk.mxu0 %vm2972_vm0, %v37213_v34  ;;  %v24452_v45 = vpop.permute.xlu0 %24451 }
 0x442   :  { %25318 = vrot.lane.b32.xlu0 %v37272_v32, %s31949_s30  ;;  %25320 = vrot.lane.b32.xlu1 %v37289_v2, %s31949_s30  ;;  %v37864_v55 = vsel %vm7943_vm6, %v24450_v21, %v24452_v45  ;;  %v37868_v23 = vsel %vm7943_vm6, %v24452_v45, %v37805_v11  ;;  %v37870_v34 = vpop.permute.xlu1 %23642  ;;  %v40663_v2 = vld [vmem:[#allocation49_spill] sm:$0xff]  ;;  %v40664_v21 = vld [vmem:[#allocation96_spill] sm:$0xff] }
 0x443   :  { %40662 = vst [vmem:[#allocation83_spill] sm:$0xff] %v37864_v55  ;;  %21314 = vmatprep.mubr.f32.mxu1 %v40241_v50  ;;  %22463 = vmatprep.mubr.f32.mxu0 %v40241_v50  ;;  %v21192_v7 = vsel %vm8781_vm7, %v40664_v21, %v40663_v2  ;;  %v21191_v0 = vsel %vm8781_vm7, %v40660_v40, %v40664_v21  ;;  %v40666_v45 = vld [vmem:[#allocation52_spill] sm:$0xff] }
 0x444   :  { %29296 = vmatmul.mubr.msk.f32.vlgmr.msra.gmra.mrb[100].mxu1 %vm5554_vm4, %v37718_v43  ;;  %29342 = vmatmul.mubr.msk.f32.vlgmr.msra.gmra.mrb[104].mxu0 %vm5554_vm4, %v37857_v12 }
 0x445   :  { %29298 = vmatpush1.msk.msra.mxu1 %vm2972_vm0, %v21189_v53  ;;  %29347 = vmatpush1.msk.msra.mxu0 %vm2972_vm0, %v37018_v44  ;;  %v37887_v31 = vpop.permute.xlu0 %22811 }
 0x446   :  { %29300 = vmatprep.subr.msk.mxu1 %vm2972_vm0, %v21192_v7  ;;  %29352 = vmatprep.subr.msk.mxu0 %vm2972_vm0, %v37272_v32  ;;  %v22810_v1 = vpop.permute.xlu1 %22809  ;;  %v40665_v32 = vld [vmem:[#allocation76_spill] sm:$0xff] }
 0x447   :  { %21385 = vmatprep.mubr.f32.mxu1 %v40241_v50  ;;  %22605 = vmatprep.mubr.f32.mxu0 %v40241_v50  ;;  %v37896_v46 = vsel %vm5533_vm2, %v37836_v13, %v22810_v1  ;;  %v37900_v44 = vsel %vm5533_vm2, %v22810_v1, %v37887_v31  ;;  %v21194_v53 = vsel %vm8781_vm7, %v40666_v45, %v40665_v32 }
 0x448   :  { %29299 = vmatmul.mubr.msk.f32.vlgmr.msra.gmra.mrb[102].mxu1 %vm5554_vm4, %v37718_v43  ;;  %29348 = vmatmul.mubr.msk.f32.vlgmr.msra.gmra.mrb[106].mxu0 %vm5554_vm4, %v37857_v12 }
 0x449   :  { %29301 = vmatpush1.msk.msra.mxu1 %vm2972_vm0, %v21191_v0  ;;  %29353 = vmatpush1.msk.msra.mxu0 %vm2972_vm0, %v37131_v52  ;;  %v37915_v7 = vpop.permute.xlu0 %23646  ;;  %v21193_v52 = vsel %vm8781_vm7, %v40663_v2, %v40666_v45  ;;  %v40667_v0 = vld [vmem:[#allocation102_spill] sm:$0xff] }
 0x44a   :  { %29303 = vmatprep.subr.msk.mxu1 %vm2972_vm0, %v21194_v53  ;;  %21456 = vmatprep.mubr.f32.mxu1 %v40241_v50  ;;  %v23645_v40 = vpop.permute.xlu1 %23644  ;;  %v21196_v53 = vsel %vm8781_vm7, %v40667_v0, %v40651_v4 }
 0x44b   :  { %v37921_v21 = vsel %vm7105_vm5, %v37870_v34, %v23645_v40  ;;  %v37925_v1 = vsel %vm7105_vm5, %v23645_v40, %v37915_v7  ;;  %22747 = vmatprep.mubr.f32.mxu0 %v40241_v50 }
 0x44c   :  { %29302 = vmatmul.mubr.msk.f32.vlgmr.msra.gmra.mrb[104].mxu1 %vm5554_vm4, %v37718_v43  ;;  %29354 = vmatmul.mubr.msk.f32.vlgmr.msra.gmra.mrb[108].mxu0 %vm5554_vm4, %v37857_v12 }
 0x44d   :  { %29304 = vmatpush1.msk.msra.mxu1 %vm2972_vm0, %v21193_v52  ;;  %21527 = vmatprep.mubr.f32.mxu1 %v40241_v50  ;;  %v21195_v52 = vsel %vm8781_vm7, %v40665_v32, %v40667_v0  ;;  %v21199_v32 = vsel %vm8781_vm7, %v37096_v28, %v37072_v33 }
 0x44e   :  { %29306 = vmatprep.subr.msk.mxu1 %vm2972_vm0, %v21196_v53  ;;  %v22798_v40 = vpop.permute.xlu0 %22797  ;;  %23299 = vmatprep.mubr.f32.mxu0 %v40241_v50  ;;  %v21204_v53 = vsel %vm8781_vm7, %v37248_v58, %v37121_v6  ;;  %v21203_v6 = vsel %vm8781_vm7, %v37119_v5, %v37248_v58  ;;  %v40668_v58 = vld [vmem:[#allocation16_spill] sm:$0xff] }
 0x44f   :  { %v22827_v2 = vsel %vm5533_vm2, %v37612_v30, %v22798_v40  ;;  %v22828_v45 = vsel %vm5533_vm2, %v22798_v40, %v37720_v57  ;;  %v24456_v55 = vpop.permute.xlu1 %24455  ;;  %v37959_v30 = vld [vmem:[%s39940_s3 + $0xa8] sm:$0x3f]  ;;  %v21200_v57 = vsel %vm8781_vm7, %v37072_v33, %v37074_v39 }
 0x450   :  { %29305 = vmatmul.mubr.msk.f32.vlgmr.msra.gmra.mrb[106].mxu1 %vm5554_vm4, %v37718_v43  ;;  %v37953_v4 = vsel %vm7943_vm6, %v37805_v11, %v24456_v55  ;;  %29371 = vmatprep.subr.msk.mxu0 %vm2972_vm0, %v22828_v45 }
 0x451   :  { %29307 = vmatpush1.msk.msra.mxu1 %vm2972_vm0, %v21195_v52  ;;  %21598 = vmatprep.mubr.f32.mxu1 %v40241_v50 }
 0x452   :  { %29312 = vmatprep.subr.msk.mxu1 %vm2972_vm0, %v21200_v57  ;;  %29372 = vmatpush1.msk.msra.mxu0 %vm2972_vm0, %v22827_v2 }
 0x453   :  { %v24458_v11 = vpop.permute.xlu0 %24457  ;;  %29373 = vmatmul.mubr.msk.f32.vlgmr.msra.gmra.mrb[104].mxu0 %vm5554_vm4, %v37959_v30 }
 0x454   :  { %29308 = vmatmul.mubr.msk.f32.vlgmr.msra.gmra.mrb[108].mxu1 %vm5554_vm4, %v37718_v43  ;;  %v37976_v0 = vsel %vm7943_vm6, %v24456_v55, %v24458_v11  ;;  %v22806_v39 = vpop.permute.xlu1 %22805  ;;  %23441 = vmatprep.mubr.f32.mxu0 %v40241_v50 }
 0x455   :  { %29313 = vmatpush1.msk.msra.mxu1 %vm2972_vm0, %v21199_v32  ;;  %21740 = vmatprep.mubr.f32.mxu1 %v40241_v50  ;;  %v22831_v33 = vsel %vm5533_vm2, %v37731_v16, %v22806_v39  ;;  %v22832_v28 = vsel %vm5533_vm2, %v22806_v39, %v37836_v13 }
 0x456   :  { %29318 = vmatprep.subr.msk.mxu1 %vm2972_vm0, %v21204_v53  ;;  %29377 = vmatprep.subr.msk.mxu0 %vm2972_vm0, %v22832_v28 }
 0x457   :  { %29378 = vmatpush1.msk.msra.mxu0 %vm2972_vm0, %v22831_v33 }
 0x458   :  { %29314 = vmatmul.mubr.msk.f32.vlgmr.msra.gmra.mrb[110].mxu1 %vm5554_vm4, %v37718_v43  ;;  %29379 = vmatmul.mubr.msk.f32.vlgmr.msra.gmra.mrb[106].mxu0 %vm5554_vm4, %v37959_v30 }
 0x459   :  { %29319 = vmatpush1.msk.msra.mxu1 %vm2972_vm0, %v21203_v6  ;;  %21882 = vmatprep.mubr.f32.mxu1 %v40241_v50  ;;  %v24460_v16 = vpop.permute.xlu0 %24459  ;;  %v24462_v13 = vpop.permute.xlu1 %24461 }
 0x45a   :  { %29325 = vmatprep.subr.msk.mxu1 %vm2972_vm0, %v36706_v10  ;;  %v38003_v55 = vsel %vm7943_vm6, %v24458_v11, %v24460_v16  ;;  %v38006_v5 = vsel %vm7943_vm6, %v24460_v16, %v24462_v13  ;;  %23583 = vmatprep.mubr.f32.mxu0 %v40241_v50 }
 0x45c   :  { %29320 = vmatmul.mubr.msk.f32.vlgmr.msra.gmra.mrb[112].mxu1 %vm5554_vm4, %v37718_v43 }
 0x45d   :  { %29326 = vmatpush1.msk.msra.mxu1 %vm2972_vm0, %v40668_v58  ;;  %22108 = vmatprep.mubr.f32.mxu1 %v40241_v50  ;;  %v40669_v58 = vld [vmem:[#allocation73_spill] sm:$0xff] }
 0x45e   :  { %29328 = vmatprep.subr.msk.mxu1 %vm2972_vm0, %v36735_v27  ;;  %v22814_v10 = vpop.permute.xlu0 %22813  ;;  %v38016_v40 = vpop.permute.xlu1 %24465 }
 0x460   :  { %29327 = vmatmul.mubr.msk.f32.vlgmr.msra.gmra.mrb[100].mxu1 %vm5554_vm4, %v37857_v12 }
 0x461   :  { %29329 = vmatpush1.msk.msra.mxu1 %vm2972_vm0, %v36720_v25  ;;  %22179 = vmatprep.mubr.f32.mxu1 %v40241_v50  ;;  %v22835_v25 = vsel %vm5533_vm2, %v37887_v31, %v22814_v10  ;;  %v38058_v31 = vld [vmem:[%s39940_s3 + $0xb0] sm:$0x3f] }
 0x462   :  { %29331 = vmatprep.subr.msk.mxu1 %vm2972_vm0, %v36820_v36 }
 0x463   :  { %v24464_v43 = vpop.permute.xlu0 %24463  ;;  %v22816_v2 = vpop.permute.xlu1 %22815 }
 0x464   :  { %29330 = vmatmul.mubr.msk.f32.vlgmr.msra.gmra.mrb[102].mxu1 %vm5554_vm4, %v37857_v12  ;;  %v38028_v27 = vsel %vm7943_vm6, %v24462_v13, %v24464_v43  ;;  %v38032_v45 = vsel %vm7943_vm6, %v24464_v43, %v38016_v40  ;;  %v22836_v52 = vsel %vm5533_vm2, %v22814_v10, %v22816_v2  ;;  %v40672_v2 = vld [vmem:[#allocation37_spill] sm:$0xff] }
 0x465   :  { %29332 = vmatpush1.msk.msra.mxu1 %vm2972_vm0, %v36779_v47  ;;  %22250 = vmatprep.mubr.f32.mxu1 %v40241_v50 }
 0x466   :  { %29334 = vmatprep.subr.msk.mxu1 %vm2972_vm0, %v36847_v56  ;;  %29383 = vmatprep.subr.msk.mxu0 %vm2972_vm0, %v22836_v52  ;;  %v40673_v52 = vld [vmem:[#allocation82_spill] sm:$0xff] }
 0x467   :  { %29384 = vmatpush1.msk.msra.mxu0 %vm2972_vm0, %v22835_v25 }
 0x468   :  { %29333 = vmatmul.mubr.msk.f32.vlgmr.msra.gmra.mrb[104].mxu1 %vm5554_vm4, %v37857_v12  ;;  %v23633_v36 = vpop.permute.xlu0 %23632  ;;  %v24472_v57 = vpop.permute.xlu1 %24471  ;;  %29385 = vmatmul.mubr.msk.f32.vlgmr.msra.gmra.mrb[108].mxu0 %vm5554_vm4, %v37959_v30 }
 0x469   :  { %29335 = vmatpush1.msk.msra.mxu1 %vm2972_vm0, %v36825_v54  ;;  %22321 = vmatprep.mubr.f32.mxu1 %v40241_v50  ;;  %v23662_v47 = vsel %vm7105_vm5, %v37681_v17, %v23633_v36  ;;  %v23663_v56 = vsel %vm7105_vm5, %v23633_v36, %v37800_v15  ;;  %v26115_v54 = vld [vmem:[%s39941_s4] sm:$0x3f] }
 0x46a   :  { %29337 = vmatprep.subr.msk.mxu1 %vm2972_vm0, %v36954_v63  ;;  %29402 = vmatprep.subr.msk.mxu0 %vm2972_vm0, %v23663_v56  ;;  %v40675_v56 = vld [vmem:[#allocation10_spill] sm:$0xff] }
 0x46b   :  { %29403 = vmatpush1.msk.msra.mxu0 %vm2972_vm0, %v23662_v47  ;;  %24134 = vmatprep.mubr.f32.mxu0 %v40241_v50 }
 0x46c   :  { %29336 = vmatmul.mubr.msk.f32.vlgmr.msra.gmra.mrb[106].mxu1 %vm5554_vm4, %v37857_v12  ;;  %29404 = vmatmul.mubr.msk.f32.vlgmr.msra.gmra.mrb[104].mxu0 %vm5554_vm4, %v38058_v31 }
 0x46d   :  { %29338 = vmatpush1.msk.msra.mxu1 %vm2972_vm0, %v36929_v29  ;;  %22392 = vmatprep.mubr.f32.mxu1 %v40241_v50  ;;  %v38075_v63 = vpop.permute.xlu0 %24473  ;;  %v24470_v15 = vpop.permute.xlu1 %24469 }
 0x46e   :  { %29343 = vmatprep.subr.msk.mxu1 %vm2972_vm0, %v37027_v49  ;;  %v38081_v11 = vsel %vm7943_vm6, %v24472_v57, %v38075_v63  ;;  %v38084_v32 = vsel %vm7943_vm6, %v24470_v15, %v24472_v57  ;;  %24276 = vmatprep.mubr.f32.mxu0 %v40241_v50  ;;  %v40674_v57 = vld [vmem:[#allocation12_spill] sm:$0xff] }
 0x46f   :  { %26118 = vperm.xlu0 %31162, %v26115_v54   ;;  %v23661_v47 = vsel %vm7105_vm5, %v40674_v57, %v37681_v17  ;;  %v26524_v57 = vld [vmem:[%s39942_s5 + $0x148] sm:$0xff] }
 0x470   :  { %29339 = vmatmul.mubr.msk.f32.vlgmr.msra.gmra.mrb[108].mxu1 %vm5554_vm4, %v37857_v12 }
 0x471   :  { %29344 = vmatpush1.msk.msra.mxu1 %vm2972_vm0, %v37008_v62  ;;  %22534 = vmatprep.mubr.f32.mxu1 %v40241_v50 }
 0x472   :  { %29349 = vmatprep.subr.msk.mxu1 %vm2972_vm0, %v37126_v60  ;;  %v23641_v29 = vpop.permute.xlu0 %23640  ;;  %v24480_v49 = vpop.permute.xlu1 %24479 }
 0x473   :  { %v23666_v39 = vsel %vm7105_vm5, %v37750_v9, %v23641_v29  ;;  %v23667_v53 = vsel %vm7105_vm5, %v23641_v29, %v37870_v34  ;;  %v40676_v29 = vld [vmem:[#allocation24_spill] sm:$0xff] }
 0x474   :  { %29345 = vmatmul.mubr.msk.f32.vlgmr.msra.gmra.mrb[110].mxu1 %vm5554_vm4, %v37857_v12  ;;  %29408 = vmatprep.subr.msk.mxu0 %vm2972_vm0, %v23667_v53 }
 0x475   :  { %29350 = vmatpush1.msk.msra.mxu1 %vm2972_vm0, %v37086_v59  ;;  %22676 = vmatprep.mubr.f32.mxu1 %v40241_v50 }
 0x476   :  { %29356 = vmatprep.subr.msk.mxu1 %vm2972_vm0, %v37350_v61  ;;  %29409 = vmatpush1.msk.msra.mxu0 %vm2972_vm0, %v23666_v39 }
 0x477   :  { %v38107_v62 = vpop.permute.xlu0 %24481  ;;  %v24478_v60 = vpop.permute.xlu1 %24477  ;;  %29410 = vmatmul.mubr.msk.f32.vlgmr.msra.gmra.mrb[106].mxu0 %vm5554_vm4, %v38058_v31 }
 0x478   :  { %29351 = vmatmul.mubr.msk.f32.vlgmr.msra.gmra.mrb[112].mxu1 %vm5554_vm4, %v37857_v12  ;;  %v38115_v9 = vsel %vm7943_vm6, %v24480_v49, %v38107_v62  ;;  %v38118_v59 = vsel %vm7943_vm6, %v24478_v60, %v24480_v49  ;;  %24418 = vmatprep.mubr.f32.mxu0 %v40241_v50  ;;  %v38280_v49 = vld [vmem:[%s39940_s3 + $0xc0] sm:$0x3f] }
 0x479   :  { %29357 = vmatpush1.msk.msra.mxu1 %vm2972_vm0, %v37345_v26  ;;  %22944 = vmatprep.mubr.f32.mxu1 %v40241_v50 }
 0x47a   :  { %29359 = vmatprep.subr.msk.mxu1 %vm2972_vm0, %v37440_v20 }
 0x47c   :  { %29358 = vmatmul.mubr.msk.f32.vlgmr.msra.gmra.mrb[100].mxu1 %vm5554_vm4, %v37959_v30  ;;  %v23649_v61 = vpop.permute.xlu0 %23648  ;;  %v23651_v12 = vpop.permute.xlu1 %23650 }
 0x47d   :  { %29360 = vmatpush1.msk.msra.mxu1 %vm2972_vm0, %v37371_v14  ;;  %23015 = vmatprep.mubr.f32.mxu1 %v40241_v50  ;;  %v23670_v34 = vsel %vm7105_vm5, %v37915_v7, %v23649_v61  ;;  %v23671_v26 = vsel %vm7105_vm5, %v23649_v61, %v23651_v12  ;;  %v40677_v61 = vld [vmem:[#allocation98_spill] sm:$0xff] }
 0x47e   :  { %29362 = vmatprep.subr.msk.mxu1 %vm2972_vm0, %v37486_v38  ;;  %29414 = vmatprep.subr.msk.mxu0 %vm2972_vm0, %v23671_v26 }
 0x47f   :  { %29415 = vmatpush1.msk.msra.mxu0 %vm2972_vm0, %v23670_v34  ;;  %v40678_v34 = vld [vmem:[#allocation83_spill] sm:$0xff] }
 0x480   :  { %29361 = vmatmul.mubr.msk.f32.vlgmr.msra.gmra.mrb[102].mxu1 %vm5554_vm4, %v37959_v30  ;;  %29416 = vmatmul.mubr.msk.f32.vlgmr.msra.gmra.mrb[108].mxu0 %vm5554_vm4, %v38058_v31 }
 0x481   :  { %29363 = vmatpush1.msk.msra.mxu1 %vm2972_vm0, %v37483_v8  ;;  %23086 = vmatprep.mubr.f32.mxu1 %v40241_v50  ;;  %v38145_v14 = vpop.permute.xlu0 %25282  ;;  %v25285_v20 = vpop.permute.xlu1 %25284 }
 0x482   :  { %29365 = vmatprep.subr.msk.mxu1 %vm2972_vm0, %v37625_v41  ;;  %v38151_v38 = vsel %vm8781_vm7, %v38145_v14, %v25285_v20  ;;  %24969 = vmatprep.mubr.f32.mxu0 %v40241_v50 }
 0x484   :  { %29364 = vmatmul.mubr.msk.f32.vlgmr.msra.gmra.mrb[104].mxu1 %vm5554_vm4, %v37959_v30 }
 0x485   :  { %29366 = vmatpush1.msk.msra.mxu1 %vm2972_vm0, %v37512_v35  ;;  %23157 = vmatprep.mubr.f32.mxu1 %v40241_v50  ;;  %v38176_v35 = vld [vmem:[%s39940_s3 + $0xb8] sm:$0x3f] }
 0x486   :  { %29368 = vmatprep.subr.msk.mxu1 %vm2972_vm0, %v37656_v37  ;;  %v24468_v8 = vpop.permute.xlu0 %24467  ;;  %v38161_v7 = vpop.permute.xlu1 %25286 }
 0x487   :  { %v24497_v41 = vsel %vm7943_vm6, %v38016_v40, %v24468_v8  ;;  %v24498_v33 = vsel %vm7943_vm6, %v24468_v8, %v24470_v15  ;;  %v38168_v28 = vsel %vm8781_vm7, %v25285_v20, %v38161_v7  ;;  %v40671_v40 = vld [vmem:[#allocation18_spill] sm:$0xff]  ;;  %v26531_v20 = vld [vmem:[%s39942_s5 + $0x180] sm:$0xff] }
 0x488   :  { %29367 = vmatmul.mubr.msk.f32.vlgmr.msra.gmra.mrb[106].mxu1 %vm5554_vm4, %v37959_v30  ;;  %29433 = vmatprep.subr.msk.mxu0 %vm2972_vm0, %v24498_v33 }
 0x489   :  { %29369 = vmatpush1.msk.msra.mxu1 %vm2972_vm0, %v37652_v22  ;;  %23228 = vmatprep.mubr.f32.mxu1 %v40241_v50 }
 0x48a   :  { %29374 = vmatprep.subr.msk.mxu1 %vm2972_vm0, %v37758_v42  ;;  %29434 = vmatpush1.msk.msra.mxu0 %vm2972_vm0, %v24497_v41  ;;  %v26516_v41 = vld [vmem:[%s39942_s5 + $0x108] sm:$0xff] }
 0x48b   :  { %v38184_v37 = vpop.permute.xlu0 %25288  ;;  %v24476_v6 = vpop.permute.xlu1 %24475  ;;  %29435 = vmatmul.mubr.msk.f32.vlgmr.msra.gmra.mrb[104].mxu0 %vm5554_vm4, %v38176_v35 }
 0x48c   :  { %29370 = vmatmul.mubr.msk.f32.vlgmr.msra.gmra.mrb[108].mxu1 %vm5554_vm4, %v37959_v30  ;;  %v24501_v16 = vsel %vm7943_vm6, %v38075_v63, %v24476_v6  ;;  %v24502_v22 = vsel %vm7943_vm6, %v24476_v6, %v24478_v60  ;;  %25111 = vmatprep.mubr.f32.mxu0 %v40241_v50  ;;  %v26517_v6 = vld [vmem:[%s39942_s5 + $0x110] sm:$0xff] }
 0x48d   :  { %29375 = vmatpush1.msk.msra.mxu1 %vm2972_vm0, %v37754_v48  ;;  %23370 = vmatprep.mubr.f32.mxu1 %v40241_v50 }
 0x48e   :  { %29380 = vmatprep.subr.msk.mxu1 %vm2972_vm0, %v37900_v44  ;;  %29439 = vmatprep.subr.msk.mxu0 %vm2972_vm0, %v24502_v22 }
 0x48f   :  { %29440 = vmatpush1.msk.msra.mxu0 %vm2972_vm0, %v24501_v16  ;;  %v26518_v16 = vld [vmem:[%s39942_s5 + $0x118] sm:$0xff] }
 0x490   :  { %29376 = vmatmul.mubr.msk.f32.vlgmr.msra.gmra.mrb[110].mxu1 %vm5554_vm4, %v37959_v30  ;;  %v38203_v42 = vpop.permute.xlu0 %25290  ;;  %v38205_v13 = vpop.permute.xlu1 %25292  ;;  %29441 = vmatmul.mubr.msk.f32.vlgmr.msra.gmra.mrb[106].mxu0 %vm5554_vm4, %v38176_v35  ;;  %v30229_v22 = vpack.c.bf16 %v26518_v16, %v26517_v6 }
 0x491   :  { %29381 = vmatpush1.msk.msra.mxu1 %vm2972_vm0, %v37896_v46  ;;  %23512 = vmatprep.mubr.f32.mxu1 %v40241_v50  ;;  %v38215_v48 = vsel %vm8781_vm7, %v38184_v37, %v38203_v42 }
 0x492   :  { %29387 = vmatprep.subr.msk.mxu1 %vm2972_vm0, %v37429_v24  ;;  %25253 = vmatprep.mubr.f32.mxu0 %v40241_v50 }
 0x494   :  { %29382 = vmatmul.mubr.msk.f32.vlgmr.msra.gmra.mrb[112].mxu1 %vm5554_vm4, %v37959_v30 }
 0x495   :  { %29388 = vmatpush1.msk.msra.mxu1 %vm2972_vm0, %v37379_v18  ;;  %23779 = vmatprep.mubr.f32.mxu1 %v40241_v50  ;;  %v24484_v46 = vpop.permute.xlu0 %24483  ;;  %v24486_v44 = vpop.permute.xlu1 %24485  ;;  %v40670_v18 = vld [vmem:[#allocation44_spill] sm:$0xff] }
 0x496   :  { %29390 = vmatprep.subr.msk.mxu1 %vm2972_vm0, %v40669_v58  ;;  %v24505_v10 = vsel %vm7943_vm6, %v38107_v62, %v24484_v46  ;;  %v24506_v24 = vsel %vm7943_vm6, %v24484_v46, %v24486_v44  ;;  %v26519_v46 = vld [vmem:[%s39942_s5 + $0x120] sm:$0xff]  ;;  %v26520_v44 = vld [vmem:[%s39942_s5 + $0x128] sm:$0xff] }
 0x497   :  { %29445 = vmatprep.subr.msk.mxu0 %vm2972_vm0, %v24506_v24  ;;  %v30233_v58 = vpack.c.bf16 %v26520_v44, %v26519_v46  ;;  %v26538_v24 = vld [vmem:[%s39942_s5 + $0x1b8] sm:$0xff] }
 0x498   :  { %29389 = vmatmul.mubr.msk.f32.vlgmr.msra.gmra.mrb[100].mxu1 %vm5554_vm4, %v38058_v31  ;;  %29446 = vmatpush1.msk.msra.mxu0 %vm2972_vm0, %v24505_v10  ;;  %v26537_v10 = vld [vmem:[%s39942_s5 + $0x1b0] sm:$0xff] }
 0x499   :  { %29391 = vmatpush1.msk.msra.mxu1 %vm2972_vm0, %v40670_v18  ;;  %23850 = vmatprep.mubr.f32.mxu1 %v40241_v50  ;;  %v38237_v30 = vpop.permute.xlu0 %25294  ;;  %v30235_v18 = vpack.c.bf16 %v26538_v24, %v26537_v10  ;;  %v31953_v10 = vmov 1934713408  }
 0x49a   :  { %29393 = vmatprep.subr.msk.mxu1 %vm2972_vm0, %v40671_v40  ;;  %v38241_v43 = vpop.permute.xlu1 %25296  ;;  %29447 = vmatmul.mubr.msk.f32.vlgmr.msra.gmra.mrb[108].mxu0 %vm5554_vm4, %v38176_v35  ;;  %v26522_v40 = vld [vmem:[%s39942_s5 + $0x138] sm:$0xff]  ;;  %v26228_v24 = vunpack.c.l.s4 %v31953_v10 }
 0x49b   :  { %25804 = vmatprep.mubr.f32.mxu0 %v40241_v50 }
 0x49c   :  { %29392 = vmatmul.mubr.msk.f32.vlgmr.msra.gmra.mrb[102].mxu1 %vm5554_vm4, %v38058_v31 }
 0x49d   :  { %29394 = vmatpush1.msk.msra.mxu1 %vm2972_vm0, %v40672_v2  ;;  %23921 = vmatprep.mubr.f32.mxu1 %v40241_v50  ;;  %v26539_v2 = vld [vmem:[%s39942_s5 + $0x1c0] sm:$0xff] }
 0x49e   :  { %29396 = vmatprep.subr.msk.mxu1 %vm2972_vm0, %v40673_v52  ;;  %v38253_v25 = vpop.permute.xlu0 %25298  ;;  %v38255_v36 = vpop.permute.xlu1 %25300  ;;  %v26540_v52 = vld [vmem:[%s39942_s5 + $0x1c8] sm:$0xff] }
 0x4a0   :  { %29395 = vmatmul.mubr.msk.f32.vlgmr.msra.gmra.mrb[104].mxu1 %vm5554_vm4, %v38058_v31 }
 0x4a1   :  { %29397 = vmatpush1.msk.msra.mxu1 %vm2972_vm0, %v40675_v56  ;;  %23992 = vmatprep.mubr.f32.mxu1 %v40241_v50  ;;  %v26541_v56 = vld [vmem:[%s39942_s5 + $0x1d0] sm:$0xff] }
 0x4a2   :  { %29399 = vmatprep.subr.msk.mxu1 %vm2972_vm0, %v23661_v47 }
 0x4a3   :  { %v25303_v54 = vpop.permute.xlu0 %25302 }
 0x4a4   :  { %v25332_v63 = vsel %vm8781_vm7, %v38255_v36, %v25303_v54  ;;  %29398 = vmatmul.mubr.msk.f32.vlgmr.msra.gmra.mrb[106].mxu1 %vm5554_vm4, %v38058_v31  ;;  %v38270_v15 = vpop.permute.xlu1 %25304 }
 0x4a5   :  { %29400 = vmatpush1.msk.msra.mxu1 %vm2972_vm0, %v40676_v29  ;;  %v25333_v17 = vsel %vm8781_vm7, %v25303_v54, %v38270_v15  ;;  %24063 = vmatprep.mubr.f32.mxu1 %v40241_v50  ;;  %v26542_v54 = vld [vmem:[%s39942_s5 + $0x1d8] sm:$0xff] }
 0x4a6   :  { %29405 = vmatprep.subr.msk.mxu1 %vm2972_vm0, %v37782_v51  ;;  %29464 = vmatprep.subr.msk.mxu0 %vm2972_vm0, %v25333_v17  ;;  %v26526_v29 = vld [vmem:[%s39942_s5 + $0x158] sm:$0xff] }
 0x4a7   :  { %29465 = vmatpush1.msk.msra.mxu0 %vm2972_vm0, %v25332_v63  ;;  %v38286_v39 = vpop.permute.xlu0 %25306  ;;  %v30243_v63 = vpack.c.bf16 %v26542_v54, %v26541_v56 }
 0x4a8   :  { %29401 = vmatmul.mubr.msk.f32.vlgmr.msra.gmra.mrb[108].mxu1 %vm5554_vm4, %v38058_v31  ;;  %29466 = vmatmul.mubr.msk.f32.vlgmr.msra.gmra.mrb[104].mxu0 %vm5554_vm4, %v38280_v49  ;;  %v38292_v53 = vpop.permute.xlu1 %25308 }
 0x4a9   :  { %29406 = vmatpush1.msk.msra.mxu1 %vm2972_vm0, %v37809_v3  ;;  %24205 = vmatprep.mubr.f32.mxu1 %v40241_v50 }
 0x4aa   :  { %29411 = vmatprep.subr.msk.mxu1 %vm2972_vm0, %v37925_v1  ;;  %25946 = vmatprep.mubr.f32.mxu0 %v40241_v50 }
 0x4ab   :  { %v25311_v51 = vpop.permute.xlu0 %25310 }
 0x4ac   :  { %v25336_v62 = vsel %vm8781_vm7, %v38292_v53, %v25311_v51  ;;  %29407 = vmatmul.mubr.msk.f32.vlgmr.msra.gmra.mrb[110].mxu1 %vm5554_vm4, %v38058_v31  ;;  %v38304_v60 = vpop.permute.xlu1 %25312 }
 0x4ad   :  { %29412 = vmatpush1.msk.msra.mxu1 %vm2972_vm0, %v37921_v21  ;;  %v25337_v3 = vsel %vm8781_vm7, %v25311_v51, %v38304_v60  ;;  %24347 = vmatprep.mubr.f32.mxu1 %v40241_v50  ;;  %v26527_v51 = vld [vmem:[%s39942_s5 + $0x160] sm:$0xff] }
 0x4ae   :  { %29418 = vmatprep.subr.msk.mxu1 %vm2972_vm0, %v37834_v19  ;;  %29470 = vmatprep.subr.msk.mxu0 %vm2972_vm0, %v25337_v3  ;;  %v26545_v3 = vld [vmem:[%s39942_s5 + $0x1f0] sm:$0xff] }
 0x4af   :  { %29471 = vmatpush1.msk.msra.mxu0 %vm2972_vm0, %v25336_v62  ;;  %v38315_v1 = vpop.permute.xlu0 %25314  ;;  %v26528_v62 = vld [vmem:[%s39942_s5 + $0x168] sm:$0xff] }
 0x4b0   :  { %29413 = vmatmul.mubr.msk.f32.vlgmr.msra.gmra.mrb[112].mxu1 %vm5554_vm4, %v38058_v31  ;;  %29472 = vmatmul.mubr.msk.f32.vlgmr.msra.gmra.mrb[106].mxu0 %vm5554_vm4, %v38280_v49  ;;  %v38321_v21 = vpop.permute.xlu1 %25316 }
 0x4b1   :  { %29419 = vmatpush1.msk.msra.mxu1 %vm2972_vm0, %v40677_v61  ;;  %24614 = vmatprep.mubr.f32.mxu1 %v40241_v50  ;;  %v26529_v61 = vld [vmem:[%s39942_s5 + $0x170] sm:$0xff] }
 0x4b2   :  { %29421 = vmatprep.subr.msk.mxu1 %vm2972_vm0, %v37868_v23  ;;  %26088 = vmatprep.mubr.f32.mxu0 %v40241_v50  ;;  %v40679_v23 = vld [vmem:[#allocation33_spill] sm:$0xff] }
 0x4b4   :  { %v25319_v19 = vpop.permute.xlu0 %25318  ;;  %29420 = vmatmul.mubr.msk.f32.vlgmr.msra.gmra.mrb[100].mxu1 %vm5554_vm4, %v38176_v35  ;;  %v25321_v31 = vpop.permute.xlu1 %25320 }
 0x4b5   :  { %v25340_v12 = vsel %vm8781_vm7, %v38321_v21, %v25319_v19  ;;  %29422 = vmatpush1.msk.msra.mxu1 %vm2972_vm0, %v40678_v34  ;;  %v25341_v26 = vsel %vm8781_vm7, %v25319_v19, %v25321_v31  ;;  %24685 = vmatprep.mubr.f32.mxu1 %v40241_v50  ;;  %v26530_v19 = vld [vmem:[%s39942_s5 + $0x178] sm:$0xff]  ;;  %v26500_v34 = vld [vmem:[%s39942_s5 + $0x88] sm:$0xff] }
 0x4b6   :  { %29424 = vmatprep.subr.msk.mxu1 %vm2972_vm0, %v37976_v0  ;;  %29476 = vmatprep.subr.msk.mxu0 %vm2972_vm0, %v25341_v26  ;;  %v25325_v0 = vsel %vm8781_vm7, %v38161_v7, %v38184_v37  ;;  %v26515_v7 = vld [vmem:[%s39942_s5 + $0x100] sm:$0xff]  ;;  %v30253_v31 = vpack.c.bf16 %v26530_v19, %v26529_v61 }
 0x4b7   :  { %29477 = vmatpush1.msk.msra.mxu0 %vm2972_vm0, %v25340_v12  ;;  %v30225_v33 = vpack.c.bf16 %v26516_v41, %v26515_v7  ;;  %v26499_v12 = vld [vmem:[%s39942_s5 + $0x80] sm:$0xff] }
 0x4b8   :  { %29423 = vmatmul.mubr.msk.f32.vlgmr.msra.gmra.mrb[102].mxu1 %vm5554_vm4, %v38176_v35  ;;  %29478 = vmatmul.mubr.msk.f32.vlgmr.msra.gmra.mrb[108].mxu0 %vm5554_vm4, %v38280_v49  ;;  %v30255_v26 = vpack.c.bf16 %v26500_v34, %v26499_v12 }
 0x4b9   :  { %29425 = vmatpush1.msk.msra.mxu1 %vm2972_vm0, %v37953_v4  ;;  %24756 = vmatprep.mubr.f32.mxu1 %v40241_v50  ;;  %v25322_v4 = vsel %vm8781_vm7, %v40679_v23, %v38145_v14  ;;  %v25338_v14 = vsel %vm8781_vm7, %v38304_v60, %v38315_v1  ;;  %v30249_v60 = vpack.c.bf16 %v26528_v62, %v26527_v51 }
 0x4ba   :  { %29427 = vmatprep.subr.msk.mxu1 %vm2972_vm0, %v38006_v5  ;;  %v25329_v5 = vsel %vm8781_vm7, %v38237_v30, %v38241_v43 }
 0x4bc   :  { %29426 = vmatmul.mubr.msk.f32.vlgmr.msra.gmra.mrb[104].mxu1 %vm5554_vm4, %v38176_v35 }
 0x4bd   :  { %29428 = vmatpush1.msk.msra.mxu1 %vm2972_vm0, %v38003_v55  ;;  %24827 = vmatprep.mubr.f32.mxu1 %v40241_v50  ;;  %v25327_v55 = vsel %vm8781_vm7, %v38203_v42, %v38205_v13  ;;  %v26535_v42 = vld [vmem:[%s39942_s5 + $0x1a0] sm:$0xff] }
 0x4be   :  { %29430 = vmatprep.subr.msk.mxu1 %vm2972_vm0, %v38032_v45  ;;  %v25331_v45 = vsel %vm8781_vm7, %v38253_v25, %v38255_v36  ;;  %v26523_v36 = vld [vmem:[%s39942_s5 + $0x140] sm:$0xff] }
 0x4bf   :  { %v30241_v47 = vpack.c.bf16 %v26524_v57, %v26523_v36 }
 0x4c0   :  { %29429 = vmatmul.mubr.msk.f32.vlgmr.msra.gmra.mrb[106].mxu1 %vm5554_vm4, %v38176_v35 }
 0x4c1   :  { %29431 = vmatpush1.msk.msra.mxu1 %vm2972_vm0, %v38028_v27  ;;  %24898 = vmatprep.mubr.f32.mxu1 %v40241_v50  ;;  %v25328_v27 = vsel %vm8781_vm7, %v38205_v13, %v38237_v30  ;;  %v26536_v13 = vld [vmem:[%s39942_s5 + $0x1a8] sm:$0xff]  ;;  %v26521_v30 = vld [vmem:[%s39942_s5 + $0x130] sm:$0xff] }
 0x4c2   :  { %29436 = vmatprep.subr.msk.mxu1 %vm2972_vm0, %v38081_v11  ;;  %v25330_v11 = vsel %vm8781_vm7, %v38241_v43, %v38253_v25  ;;  %v30237_v43 = vpack.c.bf16 %v26522_v40, %v26521_v30  ;;  %v30239_v25 = vpack.c.bf16 %v26540_v52, %v26539_v2  ;;  %v26229_v2 = vunpack.c.0.s8 %v26228_v24 }
 0x4c4   :  { %29432 = vmatmul.mubr.msk.f32.vlgmr.msra.gmra.mrb[108].mxu1 %vm5554_vm4, %v38176_v35 }
 0x4c5   :  { %29437 = vmatpush1.msk.msra.mxu1 %vm2972_vm0, %v38084_v32  ;;  %25040 = vmatprep.mubr.f32.mxu1 %v40241_v50  ;;  %v25335_v32 = vsel %vm8781_vm7, %v38286_v39, %v38292_v53 }
 0x4c6   :  { %29442 = vmatprep.subr.msk.mxu1 %vm2972_vm0, %v38115_v9  ;;  %v25334_v9 = vsel %vm8781_vm7, %v38270_v15, %v38286_v39  ;;  %v26525_v15 = vld [vmem:[%s39942_s5 + $0x150] sm:$0xff]  ;;  %v26544_v39 = vld [vmem:[%s39942_s5 + $0x1e8] sm:$0xff] }
 0x4c7   :  { %v30245_v17 = vpack.c.bf16 %v26526_v29, %v26525_v15 }
 0x4c8   :  { %29438 = vmatmul.mubr.msk.f32.vlgmr.msra.gmra.mrb[110].mxu1 %vm5554_vm4, %v38176_v35 }
 0x4c9   :  { %29443 = vmatpush1.msk.msra.mxu1 %vm2972_vm0, %v38118_v59  ;;  %25182 = vmatprep.mubr.f32.mxu1 %v40241_v50  ;;  %v25339_v59 = vsel %vm8781_vm7, %v38315_v1, %v38321_v21  ;;  %v26546_v1 = vld [vmem:[%s39942_s5 + $0x1f8] sm:$0xff] }
 0x4ca   :  { %29449 = vmatprep.subr.msk.mxu1 %vm2972_vm0, %v38151_v38  ;;  %v26532_v38 = vld [vmem:[%s39942_s5 + $0x188] sm:$0xff]  ;;  %v30251_v21 = vpack.c.bf16 %v26546_v1, %v26545_v3  ;;  %v38594_v1 = vld [vmem:[%s39942_s5 + $0x90] sm:$0xff] }
 0x4cb   :  { %v30223_v8 = vpack.c.bf16 %v26532_v38, %v26531_v20 }
 0x4cc   :  { %29444 = vmatmul.mubr.msk.f32.vlgmr.msra.gmra.mrb[112].mxu1 %vm5554_vm4, %v38176_v35  ;;  %v26534_v35 = vld [vmem:[%s39942_s5 + $0x198] sm:$0xff] }
 0x4cd   :  { %29450 = vmatpush1.msk.msra.mxu1 %vm2972_vm0, %v25322_v4  ;;  %25449 = vmatprep.mubr.f32.mxu1 %v40241_v50 }
 0x4ce   :  { %29452 = vmatprep.subr.msk.mxu1 %vm2972_vm0, %v25325_v0  ;;  %30224 = vmatprep.subr.bf16.mxu0 %v30223_v8  ;;  %v31952_v0 = vmov 1983009808  }
 0x4cf   :  { %30226 = vmatpush3.bf16.msra.mxu0 %v30225_v33 }
 0x4d0   :  { %29451 = vmatmul.mubr.msk.f32.vlgmr.msra.gmra.mrb[100].mxu1 %vm5554_vm4, %v38280_v49 }
 0x4d1   :  { %29453 = vmatpush1.msk.msra.mxu1 %vm2972_vm0, %v38168_v28  ;;  %25520 = vmatprep.mubr.f32.mxu1 %v40241_v50  ;;  %v26533_v28 = vld [vmem:[%s39942_s5 + $0x190] sm:$0xff] }
 0x4d2   :  { %29455 = vmatprep.subr.msk.mxu1 %vm2972_vm0, %v25327_v55  ;;  %v30227_v37 = vpack.c.bf16 %v26534_v35, %v26533_v28  ;;  %v26164_v55 = vunpack.c.l.s4 %v31952_v0 }
 0x4d4   :  { %29454 = vmatmul.mubr.msk.f32.vlgmr.msra.gmra.mrb[102].mxu1 %vm5554_vm4, %v38280_v49  ;;  %30228 = vmatprep.subr.bf16.mxu0 %v30227_v37 }
 0x4d5   :  { %29456 = vmatpush1.msk.msra.mxu1 %vm2972_vm0, %v38215_v48  ;;  %25591 = vmatprep.mubr.f32.mxu1 %v40241_v50  ;;  %v30231_v48 = vpack.c.bf16 %v26536_v13, %v26535_v42 }
 0x4d6   :  { %29458 = vmatprep.subr.msk.mxu1 %vm2972_vm0, %v25329_v5  ;;  %30230 = vmatpush3.bf16.msra.mxu0 %v30229_v22  ;;  %v26166_v5 = vlaneseq }
 0x4d7   :  { %30232 = vmatprep.subr.bf16.mxu0 %v30231_v48 }
 0x4d8   :  { %29457 = vmatmul.mubr.msk.f32.vlgmr.msra.gmra.mrb[104].mxu1 %vm5554_vm4, %v38280_v49 }
 0x4d9   :  { %29459 = vmatpush1.msk.msra.mxu1 %vm2972_vm0, %v25328_v27  ;;  %25662 = vmatprep.mubr.f32.mxu1 %v40241_v50 }
 0x4da   :  { %29461 = vmatprep.subr.msk.mxu1 %vm2972_vm0, %v25331_v45  ;;  %30234 = vmatpush3.bf16.msra.mxu0 %v30233_v58 }
 0x4db   :  { %30236 = vmatprep.subr.bf16.mxu0 %v30235_v18 }
 0x4dc   :  { %29460 = vmatmul.mubr.msk.f32.vlgmr.msra.gmra.mrb[106].mxu1 %vm5554_vm4, %v38280_v49 }
 0x4dd   :  { %29462 = vmatpush1.msk.msra.mxu1 %vm2972_vm0, %v25330_v11  ;;  %25733 = vmatprep.mubr.f32.mxu1 %v40241_v50  ;;  %v26165_v11 = vunpack.c.0.s8 %v26164_v55 }
 0x4de   :  { %29467 = vmatprep.subr.msk.mxu1 %vm2972_vm0, %v25335_v32  ;;  %30238 = vmatpush3.bf16.msra.mxu0 %v30237_v43  ;;  %v26167_v32 = vshrl.u32 %v26166_v5, 7 }
 0x4df   :  { %30240 = vmatprep.subr.bf16.mxu0 %v30239_v25 }
 0x4e0   :  { %29463 = vmatmul.mubr.msk.f32.vlgmr.msra.gmra.mrb[108].mxu1 %vm5554_vm4, %v38280_v49  ;;  %v38559_v41 = vsub.s32 %v26165_v11, %v26167_v32 }
 0x4e1   :  { %29468 = vmatpush1.msk.msra.mxu1 %vm2972_vm0, %v25334_v9  ;;  %25875 = vmatprep.mubr.f32.mxu1 %v40241_v50 }
 0x4e2   :  { %29473 = vmatprep.subr.msk.mxu1 %vm2972_vm0, %v25339_v59  ;;  %30242 = vmatpush3.bf16.msra.mxu0 %v30241_v47 }
 0x4e3   :  { %30244 = vmatprep.subr.bf16.mxu0 %v30243_v63 }
 0x4e4   :  { %29469 = vmatmul.mubr.msk.f32.vlgmr.msra.gmra.mrb[110].mxu1 %vm5554_vm4, %v38280_v49 }
 0x4e5   :  { %29474 = vmatpush1.msk.msra.mxu1 %vm2972_vm0, %v25338_v14  ;;  %26017 = vmatprep.mubr.f32.mxu1 %v40241_v50 }
 0x4e6   :  { %30246 = vmatpush3.bf16.msra.mxu0 %v30245_v17  ;;  %v38575_v17 = vsub.s32 %v26229_v2, %v26167_v32 }
 0x4e8   :  { %29475 = vmatmul.mubr.msk.f32.vlgmr.msra.gmra.mrb[112].mxu1 %vm5554_vm4, %v38280_v49  ;;  %v26543_v49 = vld [vmem:[%s39942_s5 + $0x1e0] sm:$0xff] }
 0x4e9   :  { %30115 = vmatprep.mubr.msk.f32.mxu1 %vm31951_vm3, %v40241_v50  ;;  %v30247_v53 = vpack.c.bf16 %v26544_v39, %v26543_v49  ;;  %v38580_v49 = vld [vmem:[%s39942_s5] sm:$0xff]  ;;  %v38585_v39 = vld [vmem:[%s39942_s5 + $0x8] sm:$0xff] }
 0x4eb   :  { %30248 = vmatprep.subr.bf16.mxu0 %v30247_v53 }
 0x4ec   :  { %30250 = vmatpush3.bf16.msra.mxu0 %v30249_v60 }
 0x4ed   :  { %30252 = vmatprep.subr.bf16.mxu0 %v30251_v21  ;;  %v38599_v21 = vld [vmem:[%s39942_s5 + $0x98] sm:$0xff] }
 0x4ee   :  { %v38553_v27 = vpop.permute.xlu0 %26118  ;;  %v30259_v11 = vpack.c.bf16 %v38599_v21, %v38594_v1  ;;  %v26505_v1 = vld [vmem:[%s39942_s5 + $0xb0] sm:$0xff]  ;;  %v26506_v21 = vld [vmem:[%s39942_s5 + $0xb8] sm:$0xff] }
 0x4f0   :  { %30254 = vmatpush3.bf16.msra.mxu0 %v30253_v31 }
 0x4f1   :  { %30256 = vmatprep.subr.bf16.mxu0 %v30255_v26 }
 0x57b   :  { %v25806_v23 = vpop.f32.mrb[104].mxu0 }
 0x57c   :  { %v25808_v4 = vpop.f32.mrb[105].mxu0  ;;  %v26131_v45 = vadd.f32 %v38553_v27, %v25806_v23 }
 0x57d   :  { %v26132_v9 = vadd.f32 %v38553_v27, %v25808_v4  ;;  %v30257_v4 = vpack.c.bf16 %v38585_v39, %v38580_v49  ;;  %v26487_v49 = vld [vmem:[%s39942_s5 + $0x20] sm:$0xff]  ;;  %v26488_v39 = vld [vmem:[%s39942_s5 + $0x28] sm:$0xff] }
 0x57e   :  { %v26151_v8 = vmax.f32 %v26131_v45, 0.0 }
 0x57f   :  { %v26152_v33 = vmax.f32 %v26132_v9, 0.0 }
 0x583   :  { %v25948_v59 = vpop.f32.mrb[106].mxu0 }
 0x584   :  { %v26135_v14 = vadd.f32 %v38553_v27, %v25948_v59  ;;  %v25950_v20 = vpop.f32.mrb[107].mxu0 }
 0x585   :  { %v26136_v38 = vadd.f32 %v38553_v27, %v25950_v20 }
 0x586   :  { %v26155_v7 = vmax.f32 %v26135_v14, 0.0 }
 0x587   :  { %v26156_v28 = vmax.f32 %v26136_v38, 0.0 }
 0x588   :  { %v26209_v35 = vcombine.low %v26151_v8, %v26155_v7  ;;  %v38561_v37 = vcombine.high %v26151_v8, %v26155_v7 }
 0x589   :  { %v26370_v6 = vcombine.low %v26152_v33, %v26156_v28  ;;  %v38563_v16 = vcombine.high %v26152_v33, %v26156_v28 }
 0x58a   :  { %v26224_v22 = vrot.slane %v38561_v37, %v38559_v41  ;;  %v38612_v32 = vrot.slane %v26209_v35, %v38559_v41 }
 0x58b   :  { %v26385_v42 = vrot.slane %v38563_v16, %v38559_v41  ;;  %v26090_v13 = vpop.f32.mrb[108].mxu0  ;;  %v38615_v9 = vrot.slane %v26370_v6, %v38559_v41 }
 0x58c   :  { %v26092_v48 = vpop.f32.mrb[109].mxu0  ;;  %v38588_v53 = vadd.f32 %v38553_v27, %v26090_v13 }
 0x58d   :  { %v38602_v61 = vadd.f32 %v38553_v27, %v26092_v48 }
 0x58e   :  { %v26159_v38 = vmax.f32 %v38588_v53, 0.0 }
 0x58f   :  { %v26160_v8 = vmax.f32 %v38602_v61, 0.0 }
 0x5a3   :  { %v25451_v46 = vpop.f32.mrb[100].mxu1 }
 0x5a4   :  { %v25453_v44 = vpop.f32.mrb[101].mxu1  ;;  %v26121_v30 = vadd.f32 %v38553_v27, %v25451_v46 }
 0x5a5   :  { %v26122_v40 = vadd.f32 %v38553_v27, %v25453_v44 }
 0x5a6   :  { %v26141_v57 = vmax.f32 %v26121_v30, 0.0 }
 0x5a7   :  { %v25522_v58 = vpop.f32.mrb[102].mxu1  ;;  %v26142_v54 = vmax.f32 %v26122_v40, 0.0 }
 0x5a8   :  { %v25524_v18 = vpop.f32.mrb[103].mxu1  ;;  %v26123_v47 = vadd.f32 %v38553_v27, %v25522_v58 }
 0x5a9   :  { %v26124_v63 = vadd.f32 %v38553_v27, %v25524_v18 }
 0x5aa   :  { %v26143_v34 = vmax.f32 %v26123_v47, 0.0 }
 0x5ab   :  { %v25593_v43 = vpop.f32.mrb[104].mxu1  ;;  %v26144_v0 = vmax.f32 %v26124_v63, 0.0  ;;  %v26293_v63 = vrot.slane %v26159_v38, %v38559_v41 }
 0x5ac   :  { %v26125_v52 = vadd.f32 %v38553_v27, %v25593_v43  ;;  %v25595_v25 = vpop.f32.mrb[105].mxu1 }
 0x5ad   :  { %v26126_v36 = vadd.f32 %v38553_v27, %v25595_v25 }
 0x5ae   :  { %v26145_v56 = vmax.f32 %v26125_v52, 0.0 }
 0x5af   :  { %v26146_v15 = vmax.f32 %v26126_v36, 0.0  ;;  %v25664_v29 = vpop.f32.mrb[106].mxu1 }
 0x5b0   :  { %v26161_v51 = vcombine.low %v26141_v57, %v26145_v56  ;;  %v26162_v62 = vcombine.high %v26141_v57, %v26145_v56  ;;  %v26127_v60 = vadd.f32 %v38553_v27, %v25664_v29  ;;  %v25666_v3 = vpop.f32.mrb[107].mxu1 }
 0x5b1   :  { %v26322_v19 = vcombine.low %v26142_v54, %v26146_v15  ;;  %v26323_v31 = vcombine.high %v26142_v54, %v26146_v15  ;;  %v26128_v12 = vadd.f32 %v38553_v27, %v25666_v3 }
 0x5b2   :  { %v26176_v26 = vrot.slane %v26162_v62, %v38559_v41  ;;  %v26147_v23 = vmax.f32 %v26127_v60, 0.0  ;;  %v26169_v28 = vrot.slane %v26161_v51, %v38559_v41  ;;  %v26454_v62 = vrot.slane %v26160_v8, %v38559_v41 }
 0x5b3   :  { %v26337_v55 = vrot.slane %v26323_v31, %v38559_v41  ;;  %v26148_v5 = vmax.f32 %v26128_v12, 0.0  ;;  %v25735_v45 = vpop.f32.mrb[108].mxu1  ;;  %v26330_v6 = vrot.slane %v26322_v19, %v38559_v41 }
 0x5b4   :  { %v26177_v59 = vcombine.low %v26143_v34, %v26147_v23  ;;  %v26178_v14 = vcombine.high %v26143_v34, %v26147_v23  ;;  %v25737_v20 = vpop.f32.mrb[109].mxu1  ;;  %v26129_v35 = vadd.f32 %v38553_v27, %v25735_v45 }
 0x5b5   :  { %v26338_v7 = vcombine.low %v26144_v0, %v26148_v5  ;;  %v26339_v33 = vcombine.high %v26144_v0, %v26148_v5  ;;  %v26130_v58 = vadd.f32 %v38553_v27, %v25737_v20 }
 0x5b6   :  { %v26185_v13 = vrot.slane %v26177_v59, %v38559_v41  ;;  %v26192_v48 = vrot.slane %v26178_v14, %v38559_v41  ;;  %v26149_v56 = vmax.f32 %v26129_v35, 0.0 }
 0x5b7   :  { %v26346_v46 = vrot.slane %v26338_v7, %v38559_v41  ;;  %v26353_v44 = vrot.slane %v26339_v33, %v38559_v41  ;;  %v25877_v10 = vpop.f32.mrb[110].mxu1  ;;  %v26150_v15 = vmax.f32 %v26130_v58, 0.0 }
 0x5b8   :  { %v26225_v24 = vcombine.low %v26169_v28, %v26185_v13  ;;  %v26226_v18 = vcombine.high %v26169_v28, %v26185_v13  ;;  %v26241_v30 = vcombine.low %v26176_v26, %v26192_v48  ;;  %v26133_v40 = vadd.f32 %v38553_v27, %v25877_v10  ;;  %v25879_v43 = vpop.f32.mrb[111].mxu1 }
 0x5b9   :  { %v26386_v2 = vcombine.low %v26330_v6, %v26346_v46  ;;  %v26387_v52 = vcombine.high %v26330_v6, %v26346_v46  ;;  %v26402_v25 = vcombine.low %v26337_v55, %v26353_v44  ;;  %v26134_v36 = vadd.f32 %v38553_v27, %v25879_v43 }
 0x5ba   :  { %v38630_v57 = vrot.slane %v26226_v18, %v38575_v17  ;;  %v38633_v47 = vrot.slane %v26241_v30, %v38575_v17  ;;  %v26153_v54 = vmax.f32 %v26133_v40, 0.0  ;;  %v38642_v31 = vrot.slane %v26225_v24, %v38575_v17 }
 0x5bb   :  { %v26154_v29 = vmax.f32 %v26134_v36, 0.0  ;;  %v26019_v53 = vpop.f32.mrb[112].mxu1  ;;  %v38637_v51 = vrot.slane %v26402_v25, %v38575_v17  ;;  %v26394_v5 = vrot.slane %v26386_v2, %v38575_v17  ;;  %v38651_v20 = vrot.slane %v26387_v52, %v38575_v17  ;;  %v26485_v2 = vld [vmem:[%s39942_s5 + $0x10] sm:$0xff]  ;;  %v26486_v52 = vld [vmem:[%s39942_s5 + $0x18] sm:$0xff] }
 0x5bc   :  { %v26193_v60 = vcombine.low %v26149_v56, %v26153_v54  ;;  %v26194_v3 = vcombine.high %v26149_v56, %v26153_v54  ;;  %v26137_v61 = vadd.f32 %v38553_v27, %v26019_v53  ;;  %v26021_v19 = vpop.f32.mrb[113].mxu1  ;;  %v26503_v54 = vld [vmem:[%s39942_s5 + $0xa0] sm:$0xff] }
 0x5bd   :  { %v26354_v12 = vcombine.low %v26150_v15, %v26154_v29  ;;  %v26355_v34 = vcombine.high %v26150_v15, %v26154_v29  ;;  %v26138_v26 = vadd.f32 %v38553_v27, %v26021_v19 }
 0x5be   :  { %v26201_v23 = vrot.slane %v26193_v60, %v38559_v41  ;;  %v26208_v0 = vrot.slane %v26194_v3, %v38559_v41  ;;  %v26157_v55 = vmax.f32 %v26137_v61, 0.0  ;;  %v30261_v61 = vpack.c.bf16 %v26486_v52, %v26485_v2  ;;  %v26497_v52 = vld [vmem:[%s39942_s5 + $0x70] sm:$0xff] }
 0x5bf   :  { %v26362_v45 = vrot.slane %v26354_v12, %v38559_v41  ;;  %v26369_v59 = vrot.slane %v26355_v34, %v38559_v41  ;;  %v26158_v14 = vmax.f32 %v26138_v26, 0.0 }
 0x5c0   :  { %v26249_v7 = vcombine.low %v26201_v23, %v38612_v32  ;;  %v26250_v33 = vcombine.high %v26201_v23, %v38612_v32  ;;  %v26265_v27 = vcombine.low %v26208_v0, %v26224_v22  ;;  %v26285_v28 = vrot.slane %v26157_v55, %v38559_v41 }
 0x5c1   :  { %v26410_v13 = vcombine.low %v26362_v45, %v38615_v9  ;;  %v26411_v48 = vcombine.high %v26362_v45, %v38615_v9  ;;  %v26426_v35 = vcombine.low %v26369_v59, %v26385_v42  ;;  %v29479_v6 = vcombine.high %v26157_v55, %v26159_v38  ;;  %v26489_v55 = vld [vmem:[%s39942_s5 + $0x30] sm:$0xff]  ;;  %v26508_v45 = vld [vmem:[%s39942_s5 + $0xc8] sm:$0xff] }
 0x5c2   :  { %v38665_v46 = vrot.slane %v26249_v7, %v38575_v17  ;;  %v38668_v32 = vrot.slane %v26250_v33, %v38575_v17  ;;  %v38671_v37 = vrot.slane %v26265_v27, %v38575_v17  ;;  %v26295_v22 = vcombine.low %v26285_v28, %v26293_v63  ;;  %v26491_v7 = vld [vmem:[%s39942_s5 + $0x40] sm:$0xff]  ;;  %v26492_v33 = vld [vmem:[%s39942_s5 + $0x48] sm:$0xff]  ;;  %v26509_v27 = vld [vmem:[%s39942_s5 + $0xd0] sm:$0xff] }
 0x5c3   :  { %v26296_v44 = vcombine.high %v26285_v28, %v26293_v63  ;;  %v26446_v58 = vrot.slane %v26158_v14, %v38559_v41  ;;  %v29480_v10 = vcombine.high %v26158_v14, %v26160_v8  ;;  %v26418_v9 = vrot.slane %v26410_v13, %v38575_v17  ;;  %v26504_v63 = vld [vmem:[%s39942_s5 + $0xa8] sm:$0xff]  ;;  %v26510_v28 = vld [vmem:[%s39942_s5 + $0xd8] sm:$0xff] }
 0x5c4   :  { %v26273_v16 = vcombine.low %v38642_v31, %v38665_v46  ;;  %v26275_v42 = vcombine.low %v38630_v57, %v38668_v32  ;;  %v26276_v38 = vcombine.high %v38630_v57, %v38668_v32  ;;  %v26277_v24 = vcombine.low %v38633_v47, %v38671_v37  ;;  %v26937_v57 = vld [vmem:[%s39942_s5 + $0x4b0] sm:$0xff]  ;;  %v26938_v32 = vld [vmem:[%s39942_s5 + $0x4b8] sm:$0xff] }
 0x5c5   :  { %v26278_v18 = vcombine.high %v38633_v47, %v38671_v37  ;;  %v26456_v30 = vcombine.low %v26446_v58, %v26454_v62  ;;  %v26457_v41 = vcombine.high %v26446_v58, %v26454_v62  ;;  %v26435_v8 = vcombine.high %v26394_v5, %v26418_v9  ;;  %v27149_v37 = vld [vmem:[%s39942_s5 + $0x930] sm:$0xff] }
 0x5c6   :  { %v26274_v40 = vcombine.high %v38642_v31, %v38665_v46  ;;  %v38688_v43 = vrot.slane %v26295_v22, %v38575_v17  ;;  %v26434_v25 = vcombine.low %v26394_v5, %v26418_v9  ;;  %v38697_v36 = vrot.slane %v26411_v48, %v38575_v17  ;;  %v26490_v5 = vld [vmem:[%s39942_s5 + $0x38] sm:$0xff]  ;;  %v26511_v22 = vld [vmem:[%s39942_s5 + $0xe0] sm:$0xff]  ;;  %v26719_v31 = vld [vmem:[%s39942_s5 + $0x2b0] sm:$0xff] }
 0x5c7   :  { %26611 = vmatprep.mubr.f32.mxu0 %v26435_v8  ;;  %v38700_v56 = vrot.slane %v26456_v30, %v38575_v17  ;;  %v38709_v15 = vrot.slane %v26457_v41, %v38575_v17  ;;  %v38712_v29 = vrot.slane %v26296_v44, %v38575_v17  ;;  %v38715_v53 = vrot.slane %v26426_v35, %v38575_v17  ;;  %v26493_v35 = vld [vmem:[%s39942_s5 + $0x50] sm:$0xff]  ;;  %v26512_v44 = vld [vmem:[%s39942_s5 + $0xe8] sm:$0xff]  ;;  %v26495_v9 = vld [vmem:[%s39942_s5 + $0x60] sm:$0xff] }
 0x5c8   :  { %26612 = vmatmul.mubr.f32.vlgmr.msra.gmra.mrb[110].mxu0 %v26274_v40  ;;  %v26436_v62 = vcombine.low %v38651_v20, %v38697_v36  ;;  %v26437_v60 = vcombine.high %v38651_v20, %v38697_v36  ;;  %v26319_v12 = vcombine.high %v38688_v43, %v40241_v50  ;;  %v30263_v34 = vpack.c.bf16 %v26504_v63, %v26503_v54  ;;  %v26496_v30 = vld [vmem:[%s39942_s5 + $0x68] sm:$0xff]  ;;  %v26513_v41 = vld [vmem:[%s39942_s5 + $0xf0] sm:$0xff]  ;;  %v26514_v8 = vld [vmem:[%s39942_s5 + $0xf8] sm:$0xff] }
 0x5c9   :  { %30258 = vmatpush3.bf16.msra.mxu0 %v30257_v4  ;;  %v26480_v3 = vcombine.high %v38700_v56, %v40241_v50  ;;  %v26438_v19 = vcombine.low %v38637_v51, %v38715_v53  ;;  %v38740_v4 = vrot.slane %v29480_v10, %v38575_v17  ;;  %v26439_v26 = vcombine.high %v38637_v51, %v38715_v53  ;;  %v26713_v54 = vld [vmem:[%s39942_s5 + $0x280] sm:$0xff]  ;;  %v26714_v63 = vld [vmem:[%s39942_s5 + $0x288] sm:$0xff]  ;;  %v26720_v46 = vld [vmem:[%s39942_s5 + $0x2b8] sm:$0xff] }
 0x5ca   :  { %30260 = vmatprep.subr.bf16.mxu0 %v30259_v11  ;;  %v38749_v11 = vrot.slane %v29479_v6, %v38575_v17  ;;  %v30265_v23 = vpack.c.bf16 %v26488_v39, %v26487_v49  ;;  %v30267_v0 = vpack.c.bf16 %v26506_v21, %v26505_v1  ;;  %v26507_v17 = vld [vmem:[%s39942_s5 + $0xc0] sm:$0xff]  ;;  %v30269_v59 = vpack.c.bf16 %v26490_v5, %v26489_v55  ;;  %v26494_v6 = vld [vmem:[%s39942_s5 + $0x58] sm:$0xff]  ;;  %v26715_v49 = vld [vmem:[%s39942_s5 + $0x290] sm:$0xff] }
 0x5cb   :  { %26616 = vmatprep.mubr.f32.mxu0 %v26480_v3  ;;  %v30271_v14 = vpack.c.bf16 %v26508_v45, %v26507_v17  ;;  %v30273_v13 = vpack.c.bf16 %v26492_v33, %v26491_v7  ;;  %v30275_v48 = vpack.c.bf16 %v26510_v28, %v26509_v27  ;;  %v30277_v58 = vpack.c.bf16 %v26494_v6, %v26493_v35  ;;  %v26716_v39 = vld [vmem:[%s39942_s5 + $0x298] sm:$0xff]  ;;  %v26717_v55 = vld [vmem:[%s39942_s5 + $0x2a0] sm:$0xff]  ;;  %v26718_v5 = vld [vmem:[%s39942_s5 + $0x2a8] sm:$0xff] }
 0x5cc   :  { %26617 = vmatmul.mubr.f32.gmra.mrb[112].mxu0 %v26319_v12  ;;  %v30279_v10 = vpack.c.bf16 %v26512_v44, %v26511_v22  ;;  %v30281_v40 = vpack.c.bf16 %v26496_v30, %v26495_v9  ;;  %v30283_v2 = vpack.c.bf16 %v26514_v8, %v26513_v41  ;;  %v26697_v12 = vld [vmem:[%s39942_s5 + $0x200] sm:$0xff]  ;;  %v30291_v21 = vpack.c.bf16 %v26716_v39, %v26715_v49  ;;  %v26703_v33 = vld [vmem:[%s39942_s5 + $0x230] sm:$0xff]  ;;  %v26704_v27 = vld [vmem:[%s39942_s5 + $0x238] sm:$0xff] }
 0x5cd   :  { %30262 = vmatpush3.bf16.msra.mxu0 %v30261_v61  ;;  %26686 = vmatprep.mubr.f32.mxu0 %v26434_v25  ;;  %v26498_v25 = vld [vmem:[%s39942_s5 + $0x78] sm:$0xff]  ;;  %v30287_v61 = vpack.c.bf16 %v26714_v63, %v26713_v54  ;;  %v30295_v45 = vpack.c.bf16 %v26718_v5, %v26717_v55  ;;  %v31954_v7 = vmov 0.0|0.0   ;;  %v26722_v28 = vld [vmem:[%s39942_s5 + $0x2c8] sm:$0xff]  ;;  %v26723_v6 = vld [vmem:[%s39942_s5 + $0x2d0] sm:$0xff] }
 0x5ce   :  { %30264 = vmatprep.subr.bf16.mxu0 %v30263_v34  ;;  %v30285_v3 = vpack.c.bf16 %v26498_v25, %v26497_v52  ;;  %v26698_v34 = vld [vmem:[%s39942_s5 + $0x208] sm:$0xff]  ;;  %30575 = vmatprep.subr.bf16.mxu1 %v31954_v7  ;;  %v26724_v22 = vld [vmem:[%s39942_s5 + $0x2d8] sm:$0xff]  ;;  %v26725_v30 = vld [vmem:[%s39942_s5 + $0x2e0] sm:$0xff] }
 0x5cf   :  { %v30289_v1 = vpack.c.bf16 %v26698_v34, %v26697_v12  ;;  %v26706_v35 = vld [vmem:[%s39942_s5 + $0x248] sm:$0xff]  ;;  %v26708_v9 = vld [vmem:[%s39942_s5 + $0x258] sm:$0xff]  ;;  %v26727_v25 = vld [vmem:[%s39942_s5 + $0x2f0] sm:$0xff] }
 0x5d0   :  { %v26726_v41 = vld [vmem:[%s39942_s5 + $0x2e8] sm:$0xff]  ;;  %v26728_v54 = vld [vmem:[%s39942_s5 + $0x2f8] sm:$0xff]  ;;  %v26822_v34 = vld [vmem:[%s39942_s5 + $0x380] sm:$0xff] }
 0x5d1   :  { %30266 = vmatpush3.bf16.msra.mxu0 %v30265_v23  ;;  %v26699_v23 = vld [vmem:[%s39942_s5 + $0x210] sm:$0xff]  ;;  %v26710_v52 = vld [vmem:[%s39942_s5 + $0x268] sm:$0xff]  ;;  %v26712_v12 = vld [vmem:[%s39942_s5 + $0x278] sm:$0xff] }
 0x5d2   :  { %30268 = vmatprep.subr.bf16.mxu0 %v30267_v0  ;;  %v26700_v0 = vld [vmem:[%s39942_s5 + $0x218] sm:$0xff]  ;;  %v26823_v49 = vld [vmem:[%s39942_s5 + $0x388] sm:$0xff] }
 0x5d3   :  { %v30293_v17 = vpack.c.bf16 %v26700_v0, %v26699_v23  ;;  %v26807_v23 = vld [vmem:[%s39942_s5 + $0x308] sm:$0xff]  ;;  %v26824_v0 = vld [vmem:[%s39942_s5 + $0x390] sm:$0xff]  ;;  %v26825_v55 = vld [vmem:[%s39942_s5 + $0x398] sm:$0xff] }
 0x5d4   :  { %v26831_v20 = vld [vmem:[%s39942_s5 + $0x3c8] sm:$0xff] }
 0x5d5   :  { %30270 = vmatpush3.bf16.msra.mxu0 %v30269_v59  ;;  %v26701_v59 = vld [vmem:[%s39942_s5 + $0x220] sm:$0xff]  ;;  %v27049_v51 = vld [vmem:[%s39942_s5 + $0x5c8] sm:$0xff] }
 0x5d6   :  { %30272 = vmatprep.subr.bf16.mxu0 %v30271_v14  ;;  %v26702_v14 = vld [vmem:[%s39942_s5 + $0x228] sm:$0xff] }
 0x5d9   :  { %30274 = vmatpush3.bf16.msra.mxu0 %v30273_v13 }
 0x5da   :  { %30276 = vmatprep.subr.bf16.mxu0 %v30275_v48  ;;  %v26705_v48 = vld [vmem:[%s39942_s5 + $0x240] sm:$0xff] }
 0x5db   :  { %v30305_v44 = vpack.c.bf16 %v26706_v35, %v26705_v48  ;;  %v26830_v48 = vld [vmem:[%s39942_s5 + $0x3c0] sm:$0xff] }
 0x5dc   :  { %v26814_v35 = vld [vmem:[%s39942_s5 + $0x340] sm:$0xff] }
 0x5dd   :  { %30278 = vmatpush3.bf16.msra.mxu0 %v30277_v58  ;;  %v30307_v58 = vpack.c.bf16 %v26724_v22, %v26723_v6  ;;  %v26815_v6 = vld [vmem:[%s39942_s5 + $0x348] sm:$0xff]  ;;  %v26832_v22 = vld [vmem:[%s39942_s5 + $0x3d0] sm:$0xff] }
 0x5de   :  { %30280 = vmatprep.subr.bf16.mxu0 %v30279_v10  ;;  %v26707_v10 = vld [vmem:[%s39942_s5 + $0x250] sm:$0xff] }
 0x5df   :  { %v30309_v8 = vpack.c.bf16 %v26708_v9, %v26707_v10  ;;  %v26816_v9 = vld [vmem:[%s39942_s5 + $0x350] sm:$0xff] }
 0x5e1   :  { %30282 = vmatpush3.bf16.msra.mxu0 %v30281_v40  ;;  %v30311_v40 = vpack.c.bf16 %v26726_v41, %v26725_v30  ;;  %v26817_v30 = vld [vmem:[%s39942_s5 + $0x358] sm:$0xff]  ;;  %v26834_v41 = vld [vmem:[%s39942_s5 + $0x3e0] sm:$0xff] }
 0x5e2   :  { %30284 = vmatprep.subr.bf16.mxu0 %v30283_v2  ;;  %v26709_v2 = vld [vmem:[%s39942_s5 + $0x260] sm:$0xff] }
 0x5e3   :  { %v30313_v63 = vpack.c.bf16 %v26710_v52, %v26709_v2  ;;  %v26818_v52 = vld [vmem:[%s39942_s5 + $0x360] sm:$0xff] }
 0x5e5   :  { %30286 = vmatpush3.bf16.msra.mxu0 %v30285_v3  ;;  %v30315_v3 = vpack.c.bf16 %v26728_v54, %v26727_v25  ;;  %v26819_v25 = vld [vmem:[%s39942_s5 + $0x368] sm:$0xff]  ;;  %v26836_v54 = vld [vmem:[%s39942_s5 + $0x3f0] sm:$0xff] }
 0x5e6   :  { %30288 = vmatprep.subr.bf16.mxu0 %v30287_v61  ;;  %v26711_v61 = vld [vmem:[%s39942_s5 + $0x270] sm:$0xff] }
 0x5e7   :  { %v30317_v39 = vpack.c.bf16 %v26712_v12, %v26711_v61  ;;  %v26820_v12 = vld [vmem:[%s39942_s5 + $0x370] sm:$0xff] }
 0x5e8   :  { %26687 = vmatmul.mubr.f32.vlgmr.msra.gmra.mrb[114].mxu0 %v26273_v16  ;;  %v30297_v16 = vpack.c.bf16 %v26702_v14, %v26701_v59  ;;  %v26809_v59 = vld [vmem:[%s39942_s5 + $0x318] sm:$0xff]  ;;  %v26826_v14 = vld [vmem:[%s39942_s5 + $0x3a0] sm:$0xff] }
 0x5e9   :  { %26691 = vmatprep.mubr.f32.mxu0 %v38700_v56  ;;  %30290 = vmatpush3.bf16.msra.mxu0 %v30289_v1  ;;  %v30299_v56 = vpack.c.bf16 %v26720_v46, %v26719_v31  ;;  %v30319_v1 = vpack.c.bf16 %v26823_v49, %v26822_v34  ;;  %v26827_v31 = vld [vmem:[%s39942_s5 + $0x3a8] sm:$0xff]  ;;  %v26821_v34 = vld [vmem:[%s39942_s5 + $0x378] sm:$0xff]  ;;  %v26931_v49 = vld [vmem:[%s39942_s5 + $0x480] sm:$0xff] }
 0x5ea   :  { %30292 = vmatprep.subr.bf16.mxu0 %v30291_v21  ;;  %v26806_v21 = vld [vmem:[%s39942_s5 + $0x300] sm:$0xff] }
 0x5eb   :  { %v30321_v5 = vpack.c.bf16 %v26807_v23, %v26806_v21  ;;  %v26915_v23 = vld [vmem:[%s39942_s5 + $0x400] sm:$0xff] }
 0x5ec   :  { %26692 = vmatmul.mubr.f32.gmra.mrb[116].mxu0 %v38688_v43  ;;  %v26721_v43 = vld [vmem:[%s39942_s5 + $0x2c0] sm:$0xff] }
 0x5ed   :  { %30294 = vmatpush3.bf16.msra.mxu0 %v30293_v17  ;;  %26793 = vmatprep.mubr.f32.mxu0 %v26436_v62  ;;  %v30301_v62 = vpack.c.bf16 %v26704_v27, %v26703_v33  ;;  %v30303_v13 = vpack.c.bf16 %v26722_v28, %v26721_v43  ;;  %v30323_v17 = vpack.c.bf16 %v26825_v55, %v26824_v0  ;;  %v26811_v33 = vld [vmem:[%s39942_s5 + $0x328] sm:$0xff]  ;;  %v26828_v27 = vld [vmem:[%s39942_s5 + $0x3b0] sm:$0xff] }
 0x5ee   :  { %30296 = vmatprep.subr.bf16.mxu0 %v30295_v45  ;;  %v26808_v45 = vld [vmem:[%s39942_s5 + $0x310] sm:$0xff]  ;;  %v26916_v0 = vld [vmem:[%s39942_s5 + $0x408] sm:$0xff] }
 0x5ef   :  { %v30325_v46 = vpack.c.bf16 %v26809_v59, %v26808_v45  ;;  %v26933_v55 = vld [vmem:[%s39942_s5 + $0x490] sm:$0xff] }
 0x5f0   :  { %v26917_v59 = vld [vmem:[%s39942_s5 + $0x410] sm:$0xff] }
 0x5f1   :  { %30298 = vmatpush3.bf16.msra.mxu0 %v30297_v16  ;;  %v30327_v16 = vpack.c.bf16 %v26827_v31, %v26826_v14  ;;  %v26918_v14 = vld [vmem:[%s39942_s5 + $0x418] sm:$0xff]  ;;  %v26481_v31 = vcombine.high %v38709_v15, %v40241_v50 }
 0x5f2   :  { %30300 = vmatprep.subr.bf16.mxu0 %v30299_v56  ;;  %v26810_v56 = vld [vmem:[%s39942_s5 + $0x320] sm:$0xff] }
 0x5f3   :  { %v30329_v43 = vpack.c.bf16 %v26811_v33, %v26810_v56  ;;  %v30357_v56 = vpack.c.bf16 %v26918_v14, %v26917_v59  ;;  %v26320_v33 = vcombine.high %v38712_v29, %v40241_v50  ;;  %v27045_v59 = vld [vmem:[%s39942_s5 + $0x5a8] sm:$0xff] }
 0x5f5   :  { %30302 = vmatpush3.bf16.msra.mxu0 %v30301_v62  ;;  %v26812_v62 = vld [vmem:[%s39942_s5 + $0x330] sm:$0xff] }
 0x5f6   :  { %30304 = vmatprep.subr.bf16.mxu0 %v30303_v13  ;;  %v26813_v13 = vld [vmem:[%s39942_s5 + $0x338] sm:$0xff] }
 0x5f7   :  { %v30333_v36 = vpack.c.bf16 %v26813_v13, %v26812_v62  ;;  %v26939_v62 = vld [vmem:[%s39942_s5 + $0x4c0] sm:$0xff]  ;;  %v26940_v13 = vld [vmem:[%s39942_s5 + $0x4c8] sm:$0xff] }
 0x5f9   :  { %30306 = vmatpush3.bf16.msra.mxu0 %v30305_v44  ;;  %v26833_v44 = vld [vmem:[%s39942_s5 + $0x3d8] sm:$0xff] }
 0x5fa   :  { %30308 = vmatprep.subr.bf16.mxu0 %v30307_v58  ;;  %v30337_v58 = vpack.c.bf16 %v26815_v6, %v26814_v35  ;;  %v30339_v10 = vpack.c.bf16 %v26833_v44, %v26832_v22  ;;  %v26942_v35 = vld [vmem:[%s39942_s5 + $0x4d8] sm:$0xff]  ;;  %v26925_v44 = vld [vmem:[%s39942_s5 + $0x450] sm:$0xff] }
 0x5fd   :  { %30310 = vmatpush3.bf16.msra.mxu0 %v30309_v8  ;;  %v26835_v8 = vld [vmem:[%s39942_s5 + $0x3e8] sm:$0xff] }
 0x5fe   :  { %30312 = vmatprep.subr.bf16.mxu0 %v30311_v40  ;;  %v30341_v40 = vpack.c.bf16 %v26817_v30, %v26816_v9  ;;  %v30343_v2 = vpack.c.bf16 %v26835_v8, %v26834_v41  ;;  %v26944_v9 = vld [vmem:[%s39942_s5 + $0x4e8] sm:$0xff]  ;;  %v26927_v8 = vld [vmem:[%s39942_s5 + $0x460] sm:$0xff] }
 0x601   :  { %30314 = vmatpush3.bf16.msra.mxu0 %v30313_v63  ;;  %v26837_v63 = vld [vmem:[%s39942_s5 + $0x3f8] sm:$0xff] }
 0x602   :  { %30316 = vmatprep.subr.bf16.mxu0 %v30315_v3  ;;  %v30345_v3 = vpack.c.bf16 %v26819_v25, %v26818_v52  ;;  %v30347_v61 = vpack.c.bf16 %v26837_v63, %v26836_v54  ;;  %v26946_v52 = vld [vmem:[%s39942_s5 + $0x4f8] sm:$0xff]  ;;  %v26929_v63 = vld [vmem:[%s39942_s5 + $0x470] sm:$0xff] }
 0x605   :  { %30318 = vmatpush3.bf16.msra.mxu0 %v30317_v39  ;;  %v26932_v39 = vld [vmem:[%s39942_s5 + $0x488] sm:$0xff] }
 0x606   :  { %30320 = vmatprep.subr.bf16.mxu0 %v30319_v1  ;;  %v30349_v1 = vpack.c.bf16 %v26821_v34, %v26820_v12  ;;  %v30351_v21 = vpack.c.bf16 %v26932_v39, %v26931_v49  ;;  %v27041_v12 = vld [vmem:[%s39942_s5 + $0x588] sm:$0xff]  ;;  %v27024_v39 = vld [vmem:[%s39942_s5 + $0x500] sm:$0xff] }
 0x608   :  { %26794 = vmatmul.mubr.f32.vlgmr.msra.gmra.mrb[118].mxu0 %v26275_v42  ;;  %v26829_v42 = vld [vmem:[%s39942_s5 + $0x3b8] sm:$0xff] }
 0x609   :  { %26798 = vmatprep.mubr.f32.mxu0 %v38709_v15  ;;  %30322 = vmatpush3.bf16.msra.mxu0 %v30321_v5  ;;  %v30331_v28 = vpack.c.bf16 %v26829_v42, %v26828_v27  ;;  %v26934_v5 = vld [vmem:[%s39942_s5 + $0x498] sm:$0xff]  ;;  %v26919_v27 = vld [vmem:[%s39942_s5 + $0x420] sm:$0xff]  ;;  %v26920_v42 = vld [vmem:[%s39942_s5 + $0x428] sm:$0xff] }
 0x60a   :  { %30324 = vmatprep.subr.bf16.mxu0 %v30323_v17  ;;  %v30353_v17 = vpack.c.bf16 %v26916_v0, %v26915_v23  ;;  %v30355_v45 = vpack.c.bf16 %v26934_v5, %v26933_v55  ;;  %v27043_v23 = vld [vmem:[%s39942_s5 + $0x598] sm:$0xff]  ;;  %v27026_v5 = vld [vmem:[%s39942_s5 + $0x510] sm:$0xff] }
 0x60c   :  { %26799 = vmatmul.mubr.f32.gmra.mrb[120].mxu0 %v38712_v29  ;;  %v30363_v29 = vpack.c.bf16 %v26938_v32, %v26937_v57  ;;  %v27048_v57 = vld [vmem:[%s39942_s5 + $0x5c0] sm:$0xff] }
 0x60d   :  { %30326 = vmatpush3.bf16.msra.mxu0 %v30325_v46  ;;  %26902 = vmatprep.mubr.f32.mxu0 %v26437_v60  ;;  %v30335_v60 = vpack.c.bf16 %v26831_v20, %v26830_v48  ;;  %v26935_v46 = vld [vmem:[%s39942_s5 + $0x4a0] sm:$0xff]  ;;  %v30367_v48 = vpack.c.bf16 %v26940_v13, %v26939_v62  ;;  %v27034_v13 = vld [vmem:[%s39942_s5 + $0x550] sm:$0xff] }
 0x60e   :  { %30328 = vmatprep.subr.bf16.mxu0 %v30327_v16  ;;  %v26936_v16 = vld [vmem:[%s39942_s5 + $0x4a8] sm:$0xff]  ;;  %v26923_v20 = vld [vmem:[%s39942_s5 + $0x440] sm:$0xff] }
 0x60f   :  { %v30359_v15 = vpack.c.bf16 %v26936_v16, %v26935_v46  ;;  %v27028_v46 = vld [vmem:[%s39942_s5 + $0x520] sm:$0xff]  ;;  %v27029_v16 = vld [vmem:[%s39942_s5 + $0x528] sm:$0xff] }
 0x610   :  { %v27032_v32 = vld [vmem:[%s39942_s5 + $0x540] sm:$0xff] }
 0x611   :  { %30330 = vmatpush3.bf16.msra.mxu0 %v30329_v43  ;;  %v26921_v43 = vld [vmem:[%s39942_s5 + $0x430] sm:$0xff] }
 0x612   :  { %30332 = vmatprep.subr.bf16.mxu0 %v30331_v28  ;;  %v26922_v28 = vld [vmem:[%s39942_s5 + $0x438] sm:$0xff] }
 0x615   :  { %30334 = vmatpush3.bf16.msra.mxu0 %v30333_v36  ;;  %v26924_v36 = vld [vmem:[%s39942_s5 + $0x448] sm:$0xff] }
 0x616   :  { %30336 = vmatprep.subr.bf16.mxu0 %v30335_v60  ;;  %v26941_v60 = vld [vmem:[%s39942_s5 + $0x4d0] sm:$0xff]  ;;  %v30369_v6 = vpack.c.bf16 %v26924_v36, %v26923_v20  ;;  %v27053_v20 = vld [vmem:[%s39942_s5 + $0x5e8] sm:$0xff] }
 0x617   :  { %v30371_v22 = vpack.c.bf16 %v26942_v35, %v26941_v60  ;;  %v27036_v35 = vld [vmem:[%s39942_s5 + $0x560] sm:$0xff] }
 0x619   :  { %30338 = vmatpush3.bf16.msra.mxu0 %v30337_v58  ;;  %v26926_v58 = vld [vmem:[%s39942_s5 + $0x458] sm:$0xff] }
 0x61a   :  { %30340 = vmatprep.subr.bf16.mxu0 %v30339_v10  ;;  %v26943_v10 = vld [vmem:[%s39942_s5 + $0x4e0] sm:$0xff]  ;;  %v30373_v30 = vpack.c.bf16 %v26926_v58, %v26925_v44  ;;  %v27055_v44 = vld [vmem:[%s39942_s5 + $0x5f8] sm:$0xff] }
 0x61b   :  { %v30375_v41 = vpack.c.bf16 %v26944_v9, %v26943_v10  ;;  %v27038_v9 = vld [vmem:[%s39942_s5 + $0x570] sm:$0xff] }
 0x61d   :  { %30342 = vmatpush3.bf16.msra.mxu0 %v30341_v40  ;;  %v26928_v40 = vld [vmem:[%s39942_s5 + $0x468] sm:$0xff] }
 0x61e   :  { %30344 = vmatprep.subr.bf16.mxu0 %v30343_v2  ;;  %v26945_v2 = vld [vmem:[%s39942_s5 + $0x4f0] sm:$0xff]  ;;  %v30377_v25 = vpack.c.bf16 %v26928_v40, %v26927_v8  ;;  %v27143_v8 = vld [vmem:[%s39942_s5 + $0x900] sm:$0xff]  ;;  %v27144_v40 = vld [vmem:[%s39942_s5 + $0x908] sm:$0xff] }
 0x61f   :  { %v30379_v54 = vpack.c.bf16 %v26946_v52, %v26945_v2  ;;  %v30416_v2 = vpack.c.bf16 %v27144_v40, %v27143_v8  ;;  %v27145_v52 = vld [vmem:[%s39942_s5 + $0x910] sm:$0xff]  ;;  %v27501_v8 = vld [vmem:[%s39942_s5 + $0x860] sm:$0xff]  ;;  %v27502_v40 = vld [vmem:[%s39942_s5 + $0x868] sm:$0xff] }
 0x621   :  { %30346 = vmatpush3.bf16.msra.mxu0 %v30345_v3  ;;  %v26930_v3 = vld [vmem:[%s39942_s5 + $0x478] sm:$0xff] }
 0x622   :  { %30348 = vmatprep.subr.bf16.mxu0 %v30347_v61  ;;  %v27040_v61 = vld [vmem:[%s39942_s5 + $0x580] sm:$0xff]  ;;  %v30381_v34 = vpack.c.bf16 %v26930_v3, %v26929_v63  ;;  %v26321_v3 = vcombine.high %v38749_v11, %v40241_v50 }
 0x623   :  { %v30383_v49 = vpack.c.bf16 %v27041_v12, %v27040_v61  ;;  %v27147_v61 = vld [vmem:[%s39942_s5 + $0x920] sm:$0xff] }
 0x624   :  { %v27151_v12 = vld [vmem:[%s39942_s5 + $0x940] sm:$0xff] }
 0x625   :  { %30350 = vmatpush3.bf16.msra.mxu0 %v30349_v1  ;;  %v27025_v1 = vld [vmem:[%s39942_s5 + $0x508] sm:$0xff] }
 0x626   :  { %30352 = vmatprep.subr.bf16.mxu0 %v30351_v21  ;;  %v27042_v21 = vld [vmem:[%s39942_s5 + $0x590] sm:$0xff]  ;;  %v30385_v0 = vpack.c.bf16 %v27025_v1, %v27024_v39  ;;  %v27154_v1 = vld [vmem:[%s39942_s5 + $0x958] sm:$0xff] }
 0x627   :  { %v30387_v55 = vpack.c.bf16 %v27043_v23, %v27042_v21  ;;  %v27153_v39 = vld [vmem:[%s39942_s5 + $0x950] sm:$0xff]  ;;  %v27155_v23 = vld [vmem:[%s39942_s5 + $0x960] sm:$0xff] }
 0x628   :  { %26903 = vmatmul.mubr.f32.vlgmr.msra.gmra.mrb[122].mxu0 %v26276_v38  ;;  %v30361_v38 = vpack.c.bf16 %v26920_v42, %v26919_v27  ;;  %v27030_v27 = vld [vmem:[%s39942_s5 + $0x530] sm:$0xff]  ;;  %v27031_v42 = vld [vmem:[%s39942_s5 + $0x538] sm:$0xff]  ;;  %v30431_v21 = vpack.c.bf16 %v27154_v1, %v27153_v39 }
 0x629   :  { %26907 = vmatprep.mubr.f32.mxu0 %v26481_v31  ;;  %30354 = vmatpush3.bf16.msra.mxu0 %v30353_v17  ;;  %v27027_v17 = vld [vmem:[%s39942_s5 + $0x518] sm:$0xff]  ;;  %v30397_v53 = vpack.c.bf16 %v27031_v42, %v27030_v27  ;;  %v27491_v27 = vld [vmem:[%s39942_s5 + $0x810] sm:$0xff] }
 0x62a   :  { %30356 = vmatprep.subr.bf16.mxu0 %v30355_v45  ;;  %v27044_v45 = vld [vmem:[%s39942_s5 + $0x5a0] sm:$0xff]  ;;  %v30389_v14 = vpack.c.bf16 %v27027_v17, %v27026_v5  ;;  %v27157_v5 = vld [vmem:[%s39942_s5 + $0x970] sm:$0xff]  ;;  %v27158_v17 = vld [vmem:[%s39942_s5 + $0x978] sm:$0xff] }
 0x62b   :  { %v30391_v31 = vpack.c.bf16 %v27045_v59, %v27044_v45  ;;  %v30437_v45 = vpack.c.bf16 %v27158_v17, %v27157_v5  ;;  %v27142_v59 = vld [vmem:[%s39938_s1] sm:$0x3]  ;;  %v27245_v1 = vld [vmem:[%s39942_s5 + $0x9d0] sm:$0xff]  ;;  %s31955_s1 = smov [#allocation2]  }
 0x62c   :  { %26908 = vmatmul.mubr.f32.gmra.mrb[124].mxu0 %v26320_v33  ;;  %v30393_v33 = vpack.c.bf16 %v27029_v16, %v27028_v46  ;;  %s28091_s30 = sshll.u32 %s31955_s1, 4  ;;  %s28092_s30 = int_to_ptr.vmem [resolvable:$true] %s28091_s30 }
 0x62d   :  { %30358 = vmatpush3.bf16.msra.mxu0 %v30357_v56  ;;  %27011 = vmatprep.mubr.f32.mxu0 %v26438_v19  ;;  %v30365_v19 = vpack.c.bf16 %v26922_v28, %v26921_v43  ;;  %v27046_v56 = vld [vmem:[%s39942_s5 + $0x5b0] sm:$0xff]  ;;  %v27051_v43 = vld [vmem:[%s39942_s5 + $0x5d8] sm:$0xff]  ;;  %p31926_p1 = scmp.lt.s32.totalorder %s28092_s30, %s28092_s30 }
 0x62e   :  { %30360 = vmatprep.subr.bf16.mxu0 %v30359_v15 }
 0x631   :  { %30362 = vmatpush3.bf16.msra.mxu0 %v30361_v38  ;;  %v27033_v38 = vld [vmem:[%s39942_s5 + $0x548] sm:$0xff] }
 0x632   :  { %30364 = vmatprep.subr.bf16.mxu0 %v30363_v29  ;;  %v27050_v29 = vld [vmem:[%s39942_s5 + $0x5d0] sm:$0xff]  ;;  %v30401_v28 = vpack.c.bf16 %v27033_v38, %v27032_v32 }
 0x633   :  { %v30403_v62 = vpack.c.bf16 %v27051_v43, %v27050_v29  ;;  %v27495_v38 = vld [vmem:[%s39942_s5 + $0x830] sm:$0xff]  ;;  %v27496_v29 = vld [vmem:[%s39942_s5 + $0x838] sm:$0xff] }
 0x634   :  { %v30585_v43 = vpack.c.bf16 %v27496_v29, %v27495_v38 }
 0x635   :  { %30366 = vmatpush3.bf16.msra.mxu0 %v30365_v19  ;;  %v27035_v19 = vld [vmem:[%s39942_s5 + $0x558] sm:$0xff] }
 0x636   :  { %30368 = vmatprep.subr.bf16.mxu0 %v30367_v48  ;;  %v27052_v48 = vld [vmem:[%s39942_s5 + $0x5e0] sm:$0xff]  ;;  %v30405_v36 = vpack.c.bf16 %v27035_v19, %v27034_v13 }
 0x637   :  { %v30407_v60 = vpack.c.bf16 %v27053_v20, %v27052_v48 }
 0x639   :  { %30370 = vmatpush3.bf16.msra.mxu0 %v30369_v6  ;;  %v27037_v6 = vld [vmem:[%s39942_s5 + $0x568] sm:$0xff] }
 0x63a   :  { %30372 = vmatprep.subr.bf16.mxu0 %v30371_v22  ;;  %v27054_v22 = vld [vmem:[%s39942_s5 + $0x5f0] sm:$0xff]  ;;  %v30409_v58 = vpack.c.bf16 %v27037_v6, %v27036_v35 }
 0x63b   :  { %v30411_v10 = vpack.c.bf16 %v27055_v44, %v27054_v22  ;;  %v27499_v44 = vld [vmem:[%s39942_s5 + $0x850] sm:$0xff] }
 0x63d   :  { %30374 = vmatpush3.bf16.msra.mxu0 %v30373_v30  ;;  %v27039_v30 = vld [vmem:[%s39942_s5 + $0x578] sm:$0xff] }
 0x63e   :  { %30376 = vmatprep.subr.bf16.mxu0 %v30375_v41  ;;  %v30413_v41 = vpack.c.bf16 %v27039_v30, %v27038_v9  ;;  %v27235_v9 = vld [vmem:[%s39942_s5 + $0x980] sm:$0xff]  ;;  %v27236_v30 = vld [vmem:[%s39942_s5 + $0x988] sm:$0xff] }
 0x641   :  { %30378 = vmatpush3.bf16.msra.mxu0 %v30377_v25  ;;  %v27146_v25 = vld [vmem:[%s39942_s5 + $0x918] sm:$0xff] }
 0x642   :  { %30380 = vmatprep.subr.bf16.mxu0 %v30379_v54  ;;  %v26482_v54 = vcombine.high %v38740_v4, %v40241_v50  ;;  %v30419_v63 = vpack.c.bf16 %v27146_v25, %v27145_v52  ;;  %v30594_v52 = vpack.c.bf16 %v27502_v40, %v27501_v8  ;;  %v27238_v25 = vld [vmem:[%s39942_s5 + $0x998] sm:$0xff]  ;;  %v29482_v40 = vld [vmem:[%s39943_s6 + $0x2] ss:$0 sm:$0xff] }
 0x645   :  { %30382 = vmatpush3.bf16.msra.mxu0 %v30381_v34  ;;  %v27152_v34 = vld [vmem:[%s39942_s5 + $0x948] sm:$0xff] }
 0x646   :  { %30384 = vmatprep.subr.bf16.mxu0 %v30383_v49  ;;  %v30428_v49 = vpack.c.bf16 %v27152_v34, %v27151_v12  ;;  %v27243_v34 = vld [vmem:[%s39942_s5 + $0x9c0] sm:$0xff] }
 0x648   :  { %27012 = vmatmul.mubr.f32.vlgmr.msra.gmra.mrb[126].mxu0 %v26277_v24  ;;  %v27047_v24 = vld [vmem:[%s39942_s5 + $0x5b8] sm:$0xff] }
 0x649   :  { %27016 = vmatprep.mubr.f32.mxu0 %v38740_v4  ;;  %30386 = vmatpush3.bf16.msra.mxu0 %v30385_v0  ;;  %v30395_v15 = vpack.c.bf16 %v27047_v24, %v27046_v56  ;;  %v27148_v4 = vld [vmem:[%s39942_s5 + $0x928] sm:$0xff] }
 0x64a   :  { %30388 = vmatprep.subr.bf16.mxu0 %v30387_v55  ;;  %v30422_v47 = vpack.c.bf16 %v27148_v4, %v27147_v61  ;;  %v27156_v0 = vld [vmem:[%s39942_s5 + $0x968] sm:$0xff]  ;;  %v27239_v4 = vld [vmem:[%s39942_s5 + $0x9a0] sm:$0xff] }
 0x64b   :  { %v30434_v55 = vpack.c.bf16 %v27156_v0, %v27155_v23  ;;  %v27247_v0 = vld [vmem:[%s39942_s5 + $0x9e0] sm:$0xff] }
 0x64c   :  { %27017 = vmatmul.mubr.f32.gmra.mrb[128].mxu0 %v38749_v11 }
 0x64d   :  { %30390 = vmatpush3.bf16.msra.mxu0 %v30389_v14  ;;  %27120 = vmatprep.mubr.f32.mxu0 %v26439_v26  ;;  %v30399_v26 = vpack.c.bf16 %v27049_v51, %v27048_v57  ;;  %v27492_v57 = vld [vmem:[%s39942_s5 + $0x818] sm:$0xff] }
 0x64e   :  { %30392 = vmatprep.subr.bf16.mxu0 %v30391_v31  ;;  %v30579_v51 = vpack.c.bf16 %v27492_v57, %v27491_v27 }
 0x651   :  { %30394 = vmatpush3.bf16.msra.mxu0 %v30393_v33  ;;  %v27489_v33 = vld [vmem:[%s39942_s5 + $0x800] sm:$0xff] }
 0x652   :  { %30396 = vmatprep.subr.bf16.mxu0 %v30395_v15  ;;  %v27490_v15 = vld [vmem:[%s39942_s5 + $0x808] sm:$0xff] }
 0x653   :  { %v30576_v42 = vpack.c.bf16 %v27490_v15, %v27489_v33 }
 0x655   :  { %30398 = vmatpush3.bf16.msra.mxu0 %v30397_v53  ;;  %30577 = vmatpush3.bf16.msra.mxu1 %v30576_v42  ;;  %v27493_v53 = vld [vmem:[%s39942_s5 + $0x820] sm:$0xff] }
 0x656   :  { %30400 = vmatprep.subr.bf16.mxu0 %v30399_v26  ;;  %30578 = vmatprep.subr.bf16.mxu1 %v31954_v7  ;;  %v27494_v26 = vld [vmem:[%s39942_s5 + $0x828] sm:$0xff] }
 0x657   :  { %v30582_v32 = vpack.c.bf16 %v27494_v26, %v27493_v53 }
 0x659   :  { %30402 = vmatpush3.bf16.msra.mxu0 %v30401_v28  ;;  %30580 = vmatpush3.bf16.msra.mxu1 %v30579_v51  ;;  %v27497_v28 = vld [vmem:[%s39942_s5 + $0x840] sm:$0xff] }
 0x65a   :  { %30404 = vmatprep.subr.bf16.mxu0 %v30403_v62  ;;  %30581 = vmatprep.subr.bf16.mxu1 %v31954_v7  ;;  %v27498_v62 = vld [vmem:[%s39942_s5 + $0x848] sm:$0xff] }
 0x65b   :  { %v30588_v13 = vpack.c.bf16 %v27498_v62, %v27497_v28 }
 0x65d   :  { %30406 = vmatpush3.bf16.msra.mxu0 %v30405_v36  ;;  %30583 = vmatpush3.bf16.msra.mxu1 %v30582_v32 }
 0x65e   :  { %30408 = vmatprep.subr.bf16.mxu0 %v30407_v60  ;;  %30584 = vmatprep.subr.bf16.mxu1 %v31954_v7 }
 0x661   :  { %30410 = vmatpush3.bf16.msra.mxu0 %v30409_v58  ;;  %30586 = vmatpush3.bf16.msra.mxu1 %v30585_v43  ;;  %v27500_v58 = vld [vmem:[%s39942_s5 + $0x858] sm:$0xff] }
 0x662   :  { %30412 = vmatprep.subr.bf16.mxu0 %v30411_v10  ;;  %30587 = vmatprep.subr.bf16.mxu1 %v31954_v7  ;;  %v30591_v10 = vpack.c.bf16 %v27500_v58, %v27499_v44 }
 0x665   :  { %30414 = vmatpush3.bf16.msra.mxu0 %v30413_v41  ;;  %30589 = vmatpush3.bf16.msra.mxu1 %v30588_v13  ;;  %v30440_v41 = vpack.c.bf16 %v27236_v30, %v27235_v9 }
 0x666   :  { %30415 = vmatprep.subr.bf16.mxu0 %v31954_v7  ;;  %30590 = vmatprep.subr.bf16.mxu1 %v31954_v7 }
 0x668   :  { %27121 = vmatmul.mubr.f32.vlgmr.msra.gmra.mrb[130].mxu0 %v26278_v18  ;;  %v27150_v18 = vld [vmem:[%s39942_s5 + $0x938] sm:$0xff] }
 0x669   :  { %27125 = vmatprep.mubr.f32.mxu0 %v26482_v54  ;;  %30417 = vmatpush3.bf16.msra.mxu0 %v30416_v2  ;;  %v30425_v11 = vpack.c.bf16 %v27150_v18, %v27149_v37  ;;  %v27237_v2 = vld [vmem:[%s39942_s5 + $0x990] sm:$0xff] }
 0x66a   :  { %30418 = vmatprep.subr.bf16.mxu0 %v31954_v7  ;;  %30592 = vmatpush3.bf16.msra.mxu1 %v30591_v10  ;;  %v27503_v54 = vld [vmem:[%s39942_s5 + $0x870] sm:$0xff] }
 0x66b   :  { %30593 = vmatprep.subr.bf16.mxu1 %v31954_v7  ;;  %v27241_v18 = vld [vmem:[%s39942_s5 + $0x9b0] sm:$0xff] }
 0x66c   :  { %27126 = vmatmul.mubr.f32.gmra.mrb[132].mxu0 %v26321_v3  ;;  %v30443_v3 = vpack.c.bf16 %v27238_v25, %v27237_v2  ;;  %v27327_v2 = vld [vmem:[%s39942_s5 + $0xa00] sm:$0xff] }
 0x66d   :  { %30420 = vmatpush3.bf16.msra.mxu0 %v30419_v63  ;;  %29975 = vmatprep.mubr.msk.f32.mxu0 %vm31951_vm3, %v40241_v50  ;;  %v27504_v63 = vld [vmem:[%s39942_s5 + $0x878] sm:$0xff] }
 0x66e   :  { %30421 = vmatprep.subr.bf16.mxu0 %v31954_v7  ;;  %30595 = vmatpush3.bf16.msra.mxu1 %v30594_v52  ;;  %v30597_v61 = vpack.c.bf16 %v27504_v63, %v27503_v54  ;;  %v27328_v52 = vld [vmem:[%s39942_s5 + $0xa08] sm:$0xff] }
 0x66f   :  { %30596 = vmatprep.subr.bf16.mxu1 %v31954_v7 }
 0x671   :  { %30423 = vmatpush3.bf16.msra.mxu0 %v30422_v47  ;;  %v27240_v47 = vld [vmem:[%s39942_s5 + $0x9a8] sm:$0xff] }
 0x672   :  { %30424 = vmatprep.subr.bf16.mxu0 %v31954_v7  ;;  %v30446_v37 = vpack.c.bf16 %v27240_v47, %v27239_v4  ;;  %30598 = vmatpush3.bf16.msra.mxu1 %v30597_v61  ;;  %v27329_v4 = vld [vmem:[%s39942_s5 + $0xa10] sm:$0xff]  ;;  %v27330_v47 = vld [vmem:[%s39942_s5 + $0xa18] sm:$0xff] }
 0x673   :  { %30623 = vmatprep.subr.bf16.mxu1 %v31954_v7 }
 0x675   :  { %30426 = vmatpush3.bf16.msra.mxu0 %v30425_v11  ;;  %v27242_v11 = vld [vmem:[%s39942_s5 + $0x9b8] sm:$0xff] }
 0x676   :  { %30427 = vmatprep.subr.bf16.mxu0 %v31954_v7  ;;  %v30449_v12 = vpack.c.bf16 %v27242_v11, %v27241_v18  ;;  %v27331_v18 = vld [vmem:[%s39942_s5 + $0xa20] sm:$0xff]  ;;  %v27332_v11 = vld [vmem:[%s39942_s5 + $0xa28] sm:$0xff] }
 0x679   :  { %30429 = vmatpush3.bf16.msra.mxu0 %v30428_v49  ;;  %v27244_v49 = vld [vmem:[%s39942_s5 + $0x9c8] sm:$0xff] }
 0x67a   :  { %30430 = vmatprep.subr.bf16.mxu0 %v31954_v7  ;;  %v30452_v39 = vpack.c.bf16 %v27244_v49, %v27243_v34  ;;  %v27333_v34 = vld [vmem:[%s39942_s5 + $0xa30] sm:$0xff]  ;;  %v27334_v49 = vld [vmem:[%s39942_s5 + $0xa38] sm:$0xff] }
 0x67d   :  { %30432 = vmatpush3.bf16.msra.mxu0 %v30431_v21  ;;  %v27246_v21 = vld [vmem:[%s39942_s5 + $0x9d8] sm:$0xff] }
 0x67e   :  { %30433 = vmatprep.subr.bf16.mxu0 %v31954_v7  ;;  %v30455_v23 = vpack.c.bf16 %v27246_v21, %v27245_v1  ;;  %v27335_v1 = vld [vmem:[%s39942_s5 + $0xa40] sm:$0xff]  ;;  %v27336_v21 = vld [vmem:[%s39942_s5 + $0xa48] sm:$0xff] }
 0x681   :  { %30435 = vmatpush3.bf16.msra.mxu0 %v30434_v55  ;;  %v27248_v55 = vld [vmem:[%s39942_s5 + $0x9e8] sm:$0xff] }
 0x682   :  { %30436 = vmatprep.subr.bf16.mxu0 %v31954_v7 }
 0x685   :  { %30438 = vmatpush3.bf16.msra.mxu0 %v30437_v45 }
 0x686   :  { %30439 = vmatprep.subr.bf16.mxu0 %v31954_v7 }
 0x688   :  { %29976 = vmatmul.mubr.f32.vlgmr.msra.gmra.mrb[134].mxu0 %v27142_v59  ;;  %v30458_v59 = vpack.c.bf16 %v27248_v55, %v27247_v0  ;;  %v27337_v0 = vld [vmem:[%s39942_s5 + $0xa50] sm:$0xff]  ;;  %v27338_v55 = vld [vmem:[%s39942_s5 + $0xa58] sm:$0xff] }
 0x689   :  { %30010 = vmatprep.mubr.msk.f32.mxu0 %vm31951_vm3, %v40241_v50  ;;  %30441 = vmatpush3.bf16.msra.mxu0 %v30440_v41 }
 0x68a   :  { %30442 = vmatprep.subr.bf16.mxu0 %v31954_v7 }
 0x68d   :  { %30444 = vmatpush3.bf16.msra.mxu0 %v30443_v3  ;;  %v30464_v3 = vpack.c.bf16 %v27328_v52, %v27327_v2  ;;  %v27425_v52 = vld [vmem:[%s39942_s5 + $0x600] sm:$0xff] }
 0x68e   :  { %30445 = vmatprep.subr.bf16.mxu0 %v31954_v7 }
 0x691   :  { %30447 = vmatpush3.bf16.msra.mxu0 %v30446_v37  ;;  %v30467_v37 = vpack.c.bf16 %v27330_v47, %v27329_v4 }
 0x692   :  { %30448 = vmatprep.subr.bf16.mxu0 %v31954_v7 }
 0x695   :  { %30450 = vmatpush3.bf16.msra.mxu0 %v30449_v12  ;;  %v30470_v12 = vpack.c.bf16 %v27332_v11, %v27331_v18 }
 0x696   :  { %30451 = vmatprep.subr.bf16.mxu0 %v31954_v7 }
 0x699   :  { %30453 = vmatpush3.bf16.msra.mxu0 %v30452_v39  ;;  %v30473_v39 = vpack.c.bf16 %v27334_v49, %v27333_v34  ;;  %v27445_v49 = vld [vmem:[%s39942_s5 + $0x6a0] sm:$0xff] }
 0x69a   :  { %30454 = vmatprep.subr.bf16.mxu0 %v31954_v7 }
 0x69b   :  { %v29527_v14 = vpop.f32.mrb[110].mxu0 }
 0x69c   :  { %v29528_v31 = vpop.f32.mrb[111].mxu0 }
 0x69d   :  { %v29529_v46 = vadd.f32 %v29528_v31, %v29527_v14  ;;  %30456 = vmatpush3.bf16.msra.mxu0 %v30455_v23  ;;  %v27249_v14 = vld [vmem:[%s39942_s5 + $0x9f0] sm:$0xff]  ;;  %v27250_v31 = vld [vmem:[%s39942_s5 + $0x9f8] sm:$0xff]  ;;  %v30476_v23 = vpack.c.bf16 %v27336_v21, %v27335_v1 }
 0x69e   :  { %30457 = vmatprep.subr.bf16.mxu0 %v31954_v7  ;;  %v30461_v33 = vpack.c.bf16 %v27250_v31, %v27249_v14  ;;  %v27341_v14 = vld [vmem:[%s39942_s5 + $0xa70] sm:$0xff]  ;;  %v27342_v31 = vld [vmem:[%s39942_s5 + $0xa78] sm:$0xff] }
 0x69f   :  { %v29530_v16 = vpop.f32.mrb[112].mxu0 }
 0x6a0   :  { %v29531_v56 = vpop.f32.mrb[113].mxu0 }
 0x6a1   :  { %v29532_v24 = vadd.f32 %v29531_v56, %v29530_v16  ;;  %30459 = vmatpush3.bf16.msra.mxu0 %v30458_v59 }
 0x6a2   :  { %30460 = vmatprep.subr.bf16.mxu0 %v31954_v7 }
 0x6a5   :  { %30462 = vmatpush3.bf16.msra.mxu0 %v30461_v33  ;;  %v27505_v33 = vld [vmem:[%s39942_s5 + $0x880] sm:$0xff] }
 0x6a6   :  { %30463 = vmatprep.subr.bf16.mxu0 %v31954_v7 }
 0x6bb   :  { %v29565_v19 = vpop.f32.mrb[114].mxu0 }
 0x6bc   :  { %v29566_v48 = vpop.f32.mrb[115].mxu0 }
 0x6bd   :  { %v29567_v20 = vadd.f32 %v29566_v48, %v29565_v19 }
 0x6bf   :  { %v26689_v36 = vadd.f32 %v29567_v20, %v29529_v46  ;;  %v29568_v60 = vpop.f32.mrb[116].mxu0 }
 0x6c0   :  { %v29569_v35 = vpop.f32.mrb[117].mxu0 }
 0x6c1   :  { %v29570_v6 = vadd.f32 %v29569_v35, %v29568_v60 }
 0x6c3   :  { %v26694_v22 = vadd.f32 %v29570_v6, %v29532_v24  ;;  %v29481_v6 = vld [vmem:[%s39943_s6] ss:$0 sm:$0xff] }
 0x6db   :  { %v29603_v5 = vpop.f32.mrb[118].mxu0 }
 0x6dc   :  { %v29604_v17 = vpop.f32.mrb[119].mxu0 }
 0x6dd   :  { %v29605_v45 = vadd.f32 %v29604_v17, %v29603_v5  ;;  %v30479_v5 = vpack.c.bf16 %v27338_v55, %v27337_v0  ;;  %v27339_v17 = vld [vmem:[%s39942_s5 + $0xa60] sm:$0xff]  ;;  %v27430_v0 = vld [vmem:[%s39942_s5 + $0x628] sm:$0xff]  ;;  %v27447_v55 = vld [vmem:[%s39942_s5 + $0x6b0] sm:$0xff] }
 0x6df   :  { %v26804_v46 = vadd.f32 %v29605_v45, %v26689_v36  ;;  %v29606_v16 = vpop.f32.mrb[120].mxu0  ;;  %v27340_v45 = vld [vmem:[%s39942_s5 + $0xa68] sm:$0xff] }
 0x6e0   :  { %v29607_v56 = vpop.f32.mrb[121].mxu0  ;;  %v30482_v59 = vpack.c.bf16 %v27340_v45, %v27339_v17 }
 0x6e1   :  { %v29608_v24 = vadd.f32 %v29607_v56, %v29606_v16 }
 0x6e3   :  { %v26805_v15 = vadd.f32 %v29608_v24, %v26694_v22  ;;  %v29483_v24 = vld [vmem:[%s39943_s6 + $0x3] ss:$0 sm:$0xff] }
 0x6fb   :  { %v29641_v27 = vpop.f32.mrb[122].mxu0 }
 0x6fc   :  { %v29642_v42 = vpop.f32.mrb[123].mxu0 }
 0x6fd   :  { %v29643_v57 = vadd.f32 %v29642_v42, %v29641_v27 }
 0x6ff   :  { %v26913_v51 = vadd.f32 %v29643_v57, %v26804_v46  ;;  %v29644_v53 = vpop.f32.mrb[124].mxu0  ;;  %v30485_v46 = vpack.c.bf16 %v27342_v31, %v27341_v14  ;;  %v27432_v14 = vld [vmem:[%s39942_s5 + $0x638] sm:$0xff]  ;;  %v27449_v31 = vld [vmem:[%s39942_s5 + $0x6c0] sm:$0xff] }
 0x700   :  { %v29645_v26 = vpop.f32.mrb[125].mxu0 }
 0x701   :  { %v29646_v32 = vadd.f32 %v29645_v26, %v29644_v53  ;;  %v27507_v26 = vld [vmem:[%s39942_s5 + $0x890] sm:$0xff] }
 0x703   :  { %v26914_v38 = vadd.f32 %v29646_v32, %v26805_v15  ;;  %v27506_v15 = vld [vmem:[%s39942_s5 + $0x888] sm:$0xff]  ;;  %v27508_v32 = vld [vmem:[%s39942_s5 + $0x898] sm:$0xff] }
 0x71b   :  { %v29679_v29 = vpop.f32.mrb[126].mxu0 }
 0x71c   :  { %v29680_v43 = vpop.f32.mrb[127].mxu0 }
 0x71d   :  { %v29681_v28 = vadd.f32 %v29680_v43, %v29679_v29  ;;  %v27509_v29 = vld [vmem:[%s39942_s5 + $0x8a0] sm:$0xff]  ;;  %v27510_v43 = vld [vmem:[%s39942_s5 + $0x8a8] sm:$0xff] }
 0x71f   :  { %v27022_v62 = vadd.f32 %v29681_v28, %v26913_v51  ;;  %v29682_v13 = vpop.f32.mrb[128].mxu0  ;;  %v30488_v51 = vpack.c.bf16 %v27506_v15, %v27505_v33  ;;  %v30494_v28 = vpack.c.bf16 %v27510_v43, %v27509_v29  ;;  %v27433_v33 = vld [vmem:[%s39942_s5 + $0x640] sm:$0xff]  ;;  %v27434_v15 = vld [vmem:[%s39942_s5 + $0x648] sm:$0xff] }
 0x720   :  { %v29683_v19 = vpop.f32.mrb[129].mxu0 }
 0x721   :  { %v29684_v48 = vadd.f32 %v29683_v19, %v29682_v13  ;;  %v27512_v13 = vld [vmem:[%s39942_s5 + $0x8b8] sm:$0xff] }
 0x723   :  { %v27023_v20 = vadd.f32 %v29684_v48, %v26914_v38  ;;  %v30491_v38 = vpack.c.bf16 %v27508_v32, %v27507_v26  ;;  %v27513_v48 = vld [vmem:[%s39942_s5 + $0x8c0] sm:$0xff]  ;;  %v27436_v26 = vld [vmem:[%s39942_s5 + $0x658] sm:$0xff] }
 0x724   :  { %v27453_v32 = vld [vmem:[%s39942_s5 + $0x6e0] sm:$0xff] }
 0x73b   :  { %v29717_v36 = vpop.f32.mrb[130].mxu0 }
 0x73c   :  { %v29718_v60 = vpop.f32.mrb[131].mxu0 }
 0x73d   :  { %v29719_v35 = vadd.f32 %v29718_v60, %v29717_v36  ;;  %v27515_v60 = vld [vmem:[%s39942_s5 + $0x8d0] sm:$0xff] }
 0x73f   :  { %v27131_v22 = vadd.f32 %v29719_v35, %v27022_v62  ;;  %v29720_v44 = vpop.f32.mrb[132].mxu0  ;;  %v27511_v62 = vld [vmem:[%s39942_s5 + $0x8b0] sm:$0xff]  ;;  %v27516_v35 = vld [vmem:[%s39942_s5 + $0x8d8] sm:$0xff] }
 0x740   :  { %v29721_v58 = vpop.f32.mrb[133].mxu0  ;;  %v30497_v19 = vpack.c.bf16 %v27512_v13, %v27511_v62  ;;  %v27438_v62 = vld [vmem:[%s39942_s5 + $0x668] sm:$0xff]  ;;  %v27455_v13 = vld [vmem:[%s39942_s5 + $0x6f0] sm:$0xff] }
 0x741   :  { %v39412_v10 = vadd.f32 %v29481_v6, %v27131_v22  ;;  %v29722_v9 = vadd.f32 %v29721_v58, %v29720_v44  ;;  %v27517_v22 = vld [vmem:[%s39942_s5 + $0x8e0] sm:$0xff]  ;;  %v27518_v44 = vld [vmem:[%s39942_s5 + $0x8e8] sm:$0xff] }
 0x742   :  { %v30506_v58 = vpack.c.bf16 %v27518_v44, %v27517_v22 }
 0x743   :  { %v27132_v30 = vadd.f32 %v29722_v9, %v27023_v20  ;;  %v27514_v20 = vld [vmem:[%s39942_s5 + $0x8c8] sm:$0xff]  ;;  %v27519_v9 = vld [vmem:[%s39942_s5 + $0x8f0] sm:$0xff] }
 0x744   :  { %v30500_v36 = vpack.c.bf16 %v27514_v20, %v27513_v48 }
 0x745   :  { %v27139_v41 = vadd.f32 %v29481_v6, %v27132_v30  ;;  %v30503_v6 = vpack.c.bf16 %v27516_v35, %v27515_v60  ;;  %v27520_v30 = vld [vmem:[%s39942_s5 + $0x8f8] sm:$0xff]  ;;  %v27473_v35 = vld [vmem:[%s39942_s5 + $0x780] sm:$0xff] }
 0x746   :  { %v27440_v60 = vld [vmem:[%s39942_s5 + $0x678] sm:$0xff] }
 0x747   :  { %v27141_v8 = vmax.f32 %v27139_v41, 0.0  ;;  %v30509_v41 = vpack.c.bf16 %v27520_v30, %v27519_v9  ;;  %v27458_v9 = vld [vmem:[%s39942_s5 + $0x708] sm:$0xff]  ;;  %v27475_v30 = vld [vmem:[%s39942_s5 + $0x790] sm:$0xff] }
 0x749   :  { %30116 = vmatmul.mubr.f32.vlgmr.msra.gmra.mrb[114].mxu1 %v27141_v8  ;;  %v27441_v8 = vld [vmem:[%s39942_s5 + $0x680] sm:$0xff] }
 0x74a   :  { %30185 = vmatprep.mubr.msk.f32.mxu1 %vm31951_vm3, %v40241_v50 }
 0x75b   :  { %v27230_v25 = vpop.f32.mrb[134].mxu0 }
 0x75c   :  { %v27231_v54 = vadd.f32 %v29482_v40, %v27230_v25  ;;  %v29977_v63 = vpop.f32.mrb[135].mxu0  ;;  %v27442_v40 = vld [vmem:[%s39942_s5 + $0x688] sm:$0xff] }
 0x75d   :  { %v30511_v2 = vpack.c.bf16 %v27442_v40, %v27441_v8  ;;  %v27426_v25 = vld [vmem:[%s39942_s5 + $0x608] sm:$0xff]  ;;  %v29484_v63 = vld [vmem:[%s39943_s6 + $0x4] ss:$0 sm:$0xff] }
 0x75e   :  { %v27234_v61 = vmax.f32 %v27231_v54, 0.0  ;;  %v39552_v54 = vmax.f32 %v39412_v10, 0.0  ;;  %v30513_v47 = vpack.c.bf16 %v27426_v25, %v27425_v52  ;;  %v27427_v10 = vld [vmem:[%s39942_s5 + $0x610] sm:$0xff]  ;;  %v27460_v52 = vld [vmem:[%s39942_s5 + $0x718] sm:$0xff] }
 0x760   :  { %30011 = vmatmul.mubr.f32.vlgmr.msra.gmra.mrb[136].mxu0 %v27234_v61  ;;  %v27444_v61 = vld [vmem:[%s39942_s5 + $0x698] sm:$0xff]  ;;  %v27419_v34 = vrot.slane %v39552_v54, 2  ;;  %v27423_v25 = vrot.slane %v39552_v54, 6 }
 0x761   :  { %30465 = vmatpush3.bf16.msra.mxu0 %v30464_v3  ;;  %30045 = vmatprep.mubr.msk.f32.mxu0 %vm31951_vm3, %v40241_v50  ;;  %v27443_v3 = vld [vmem:[%s39942_s5 + $0x690] sm:$0xff] }
 0x762   :  { %30466 = vmatprep.subr.bf16.mxu0 %v31954_v7  ;;  %v30515_v11 = vpack.c.bf16 %v27444_v61, %v27443_v3  ;;  %v27478_v3 = vld [vmem:[%s39942_s5 + $0x7a8] sm:$0xff] }
 0x765   :  { %30468 = vmatpush3.bf16.msra.mxu0 %v30467_v37 }
 0x766   :  { %30469 = vmatprep.subr.bf16.mxu0 %v31954_v7 }
 0x769   :  { %30471 = vmatpush3.bf16.msra.mxu0 %v30470_v12  ;;  %v27428_v12 = vld [vmem:[%s39942_s5 + $0x618] sm:$0xff] }
 0x76a   :  { %30472 = vmatprep.subr.bf16.mxu0 %v31954_v7  ;;  %v30517_v1 = vpack.c.bf16 %v27428_v12, %v27427_v10 }
 0x76d   :  { %30474 = vmatpush3.bf16.msra.mxu0 %v30473_v39  ;;  %v27446_v39 = vld [vmem:[%s39942_s5 + $0x6a8] sm:$0xff] }
 0x76e   :  { %30475 = vmatprep.subr.bf16.mxu0 %v31954_v7  ;;  %v30519_v21 = vpack.c.bf16 %v27446_v39, %v27445_v49  ;;  %v27464_v49 = vld [vmem:[%s39942_s5 + $0x738] sm:$0xff]  ;;  %v27481_v39 = vld [vmem:[%s39942_s5 + $0x7c0] sm:$0xff] }
 0x771   :  { %30477 = vmatpush3.bf16.msra.mxu0 %v30476_v23  ;;  %v27429_v23 = vld [vmem:[%s39942_s5 + $0x620] sm:$0xff] }
 0x772   :  { %30478 = vmatprep.subr.bf16.mxu0 %v31954_v7  ;;  %v30521_v17 = vpack.c.bf16 %v27430_v0, %v27429_v23  ;;  %v27465_v0 = vld [vmem:[%s39942_s5 + $0x740] sm:$0xff] }
 0x775   :  { %30480 = vmatpush3.bf16.msra.mxu0 %v30479_v5  ;;  %v27448_v5 = vld [vmem:[%s39942_s5 + $0x6b8] sm:$0xff] }
 0x776   :  { %30481 = vmatprep.subr.bf16.mxu0 %v31954_v7  ;;  %v30523_v45 = vpack.c.bf16 %v27448_v5, %v27447_v55  ;;  %v27466_v55 = vld [vmem:[%s39942_s5 + $0x748] sm:$0xff]  ;;  %v27483_v5 = vld [vmem:[%s39942_s5 + $0x7d0] sm:$0xff] }
 0x779   :  { %30483 = vmatpush3.bf16.msra.mxu0 %v30482_v59  ;;  %v27431_v59 = vld [vmem:[%s39942_s5 + $0x630] sm:$0xff] }
 0x77a   :  { %30484 = vmatprep.subr.bf16.mxu0 %v31954_v7 }
 0x77d   :  { %30486 = vmatpush3.bf16.msra.mxu0 %v30485_v46  ;;  %v27450_v46 = vld [vmem:[%s39942_s5 + $0x6c8] sm:$0xff] }
 0x77e   :  { %30487 = vmatprep.subr.bf16.mxu0 %v31954_v7 }
 0x81c   :  { %v39477_v16 = vpop.f32.mrb[114].mxu1 }
 0x81d   :  { %v30117_v56 = vpop.f32.mrb[115].mxu1 }
 0x81e   :  { %v30525_v56 = vpack.c.bf16 %v27432_v14, %v27431_v59  ;;  %v27467_v14 = vld [vmem:[%s39942_s5 + $0x750] sm:$0xff] }
 0x833   :  { %v27322_v27 = vpop.f32.mrb[136].mxu0 }
 0x834   :  { %v27323_v42 = vadd.f32 %v29483_v24, %v27322_v27  ;;  %v30012_v57 = vpop.f32.mrb[137].mxu0  ;;  %v30527_v24 = vpack.c.bf16 %v27450_v46, %v27449_v31  ;;  %v27451_v27 = vld [vmem:[%s39942_s5 + $0x6d0] sm:$0xff]  ;;  %v27468_v31 = vld [vmem:[%s39942_s5 + $0x758] sm:$0xff]  ;;  %v27485_v46 = vld [vmem:[%s39942_s5 + $0x7e0] sm:$0xff] }
 0x835   :  { %v30529_v57 = vpack.c.bf16 %v27434_v15, %v27433_v33  ;;  %v27469_v15 = vld [vmem:[%s39942_s5 + $0x760] sm:$0xff] }
 0x836   :  { %v27326_v53 = vmax.f32 %v27323_v42, 0.0  ;;  %v27452_v42 = vld [vmem:[%s39942_s5 + $0x6d8] sm:$0xff] }
 0x838   :  { %30046 = vmatmul.mubr.f32.vlgmr.msra.gmra.mrb[138].mxu0 %v27326_v53  ;;  %v27435_v53 = vld [vmem:[%s39942_s5 + $0x650] sm:$0xff] }
 0x839   :  { %30489 = vmatpush3.bf16.msra.mxu0 %v30488_v51  ;;  %30080 = vmatprep.mubr.msk.f32.mxu0 %vm31951_vm3, %v40241_v50  ;;  %v30531_v51 = vpack.c.bf16 %v27452_v42, %v27451_v27  ;;  %v30533_v29 = vpack.c.bf16 %v27436_v26, %v27435_v53  ;;  %v27470_v27 = vld [vmem:[%s39942_s5 + $0x768] sm:$0xff]  ;;  %v27487_v42 = vld [vmem:[%s39942_s5 + $0x7f0] sm:$0xff] }
 0x83a   :  { %30490 = vmatprep.subr.bf16.mxu0 %v31954_v7  ;;  %v27471_v26 = vld [vmem:[%s39942_s5 + $0x770] sm:$0xff] }
 0x83d   :  { %30492 = vmatpush3.bf16.msra.mxu0 %v30491_v38  ;;  %v27454_v38 = vld [vmem:[%s39942_s5 + $0x6e8] sm:$0xff] }
 0x83e   :  { %30493 = vmatprep.subr.bf16.mxu0 %v31954_v7  ;;  %v30535_v43 = vpack.c.bf16 %v27454_v38, %v27453_v32  ;;  %v27472_v32 = vld [vmem:[%s39942_s5 + $0x778] sm:$0xff] }
 0x83f   :  { %v30573_v38 = vpack.c.bf16 %v27472_v32, %v27471_v26 }
 0x841   :  { %30495 = vmatpush3.bf16.msra.mxu0 %v30494_v28  ;;  %v27437_v28 = vld [vmem:[%s39942_s5 + $0x660] sm:$0xff] }
 0x842   :  { %30496 = vmatprep.subr.bf16.mxu0 %v31954_v7  ;;  %v30537_v48 = vpack.c.bf16 %v27438_v62, %v27437_v28  ;;  %v27809_v28 = vld [vmem:[%s39942_s5 + $0xa88] sm:$0xff]  ;;  %v27810_v62 = vld [vmem:[%s39942_s5 + $0xa90] sm:$0xff] }
 0x845   :  { %30498 = vmatpush3.bf16.msra.mxu0 %v30497_v19  ;;  %v27456_v19 = vld [vmem:[%s39942_s5 + $0x6f8] sm:$0xff] }
 0x846   :  { %30499 = vmatprep.subr.bf16.mxu0 %v31954_v7  ;;  %v30539_v20 = vpack.c.bf16 %v27456_v19, %v27455_v13 }
 0x849   :  { %30501 = vmatpush3.bf16.msra.mxu0 %v30500_v36  ;;  %v27439_v36 = vld [vmem:[%s39942_s5 + $0x670] sm:$0xff] }
 0x84a   :  { %30502 = vmatprep.subr.bf16.mxu0 %v31954_v7  ;;  %v30541_v22 = vpack.c.bf16 %v27440_v60, %v27439_v36  ;;  %v27814_v60 = vld [vmem:[%s39942_s5 + $0xab0] sm:$0xff] }
 0x84d   :  { %30504 = vmatpush3.bf16.msra.mxu0 %v30503_v6  ;;  %v27474_v6 = vld [vmem:[%s39942_s5 + $0x788] sm:$0xff] }
 0x84e   :  { %30505 = vmatprep.subr.bf16.mxu0 %v31954_v7  ;;  %v30543_v44 = vpack.c.bf16 %v27474_v6, %v27473_v35  ;;  %v27815_v35 = vld [vmem:[%s39942_s5 + $0xab8] sm:$0xff] }
 0x84f   :  { %v30609_v6 = vpack.c.bf16 %v27815_v35, %v27814_v60  ;;  %v27999_v60 = vld [vmem:[%s39942_s5 + $0xbb8] sm:$0xff] }
 0x851   :  { %30507 = vmatpush3.bf16.msra.mxu0 %v30506_v58  ;;  %v27457_v58 = vld [vmem:[%s39942_s5 + $0x700] sm:$0xff] }
 0x852   :  { %30508 = vmatprep.subr.bf16.mxu0 %v31954_v7  ;;  %v30545_v8 = vpack.c.bf16 %v27458_v9, %v27457_v58  ;;  %v27818_v9 = vld [vmem:[%s39942_s5 + $0xad0] sm:$0xff] }
 0x855   :  { %30510 = vmatpush3.bf16.msra.mxu0 %v30509_v41  ;;  %v27476_v41 = vld [vmem:[%s39942_s5 + $0x798] sm:$0xff] }
 0x856   :  { %30512 = vmatprep.subr.bf16.mxu0 %v30511_v2  ;;  %v30547_v40 = vpack.c.bf16 %v27476_v41, %v27475_v30  ;;  %v27459_v2 = vld [vmem:[%s39942_s5 + $0x710] sm:$0xff]  ;;  %v27819_v30 = vld [vmem:[%s39942_s5 + $0xad8] sm:$0xff] }
 0x857   :  { %v30549_v61 = vpack.c.bf16 %v27460_v52, %v27459_v2  ;;  %v30615_v41 = vpack.c.bf16 %v27819_v30, %v27818_v9  ;;  %v27822_v52 = vld [vmem:[%s39942_s5 + $0xaf0] sm:$0xff]  ;;  %v28003_v9 = vld [vmem:[%s39942_s5 + $0xbd8] sm:$0xff] }
 0x90b   :  { %v27414_v4 = vpop.f32.mrb[138].mxu0 }
 0x90c   :  { %v27415_v37 = vadd.f32 %v29484_v63, %v27414_v4  ;;  %v30047_v18 = vpop.f32.mrb[139].mxu0  ;;  %v27477_v63 = vld [vmem:[%s39942_s5 + $0x7a0] sm:$0xff] }
 0x90d   :  { %v30551_v4 = vpack.c.bf16 %v27478_v3, %v27477_v63  ;;  %v27479_v18 = vld [vmem:[%s39942_s5 + $0x7b0] sm:$0xff]  ;;  %v27900_v3 = vld [vmem:[%s39942_s5 + $0xb00] sm:$0xff] }
 0x90e   :  { %30081 = vmatmul.mubr.f32.vlgmr.msra.gmra.mrb[140].mxu0 %v27415_v37  ;;  %v27462_v37 = vld [vmem:[%s39942_s5 + $0x728] sm:$0xff] }
 0x90f   :  { %30514 = vmatpush3.bf16.msra.mxu0 %v30513_v47  ;;  %27655 = vmatprep.mubr.f32.mxu0 %v27419_v34  ;;  %v27461_v47 = vld [vmem:[%s39942_s5 + $0x720] sm:$0xff]  ;;  %v27463_v34 = vld [vmem:[%s39942_s5 + $0x730] sm:$0xff] }
 0x910   :  { %30516 = vmatprep.subr.bf16.mxu0 %v30515_v11  ;;  %v27480_v11 = vld [vmem:[%s39942_s5 + $0x7b8] sm:$0xff]  ;;  %v30553_v10 = vpack.c.bf16 %v27462_v37, %v27461_v47 }
 0x911   :  { %v30555_v12 = vpack.c.bf16 %v27480_v11, %v27479_v18  ;;  %v27903_v37 = vld [vmem:[%s39942_s5 + $0xb18] sm:$0xff]  ;;  %v27904_v11 = vld [vmem:[%s39942_s5 + $0xb20] sm:$0xff] }
 0x913   :  { %30518 = vmatpush3.bf16.msra.mxu0 %v30517_v1  ;;  %v27482_v1 = vld [vmem:[%s39942_s5 + $0x7c8] sm:$0xff] }
 0x914   :  { %30520 = vmatprep.subr.bf16.mxu0 %v30519_v21  ;;  %v30557_v21 = vpack.c.bf16 %v27464_v49, %v27463_v34  ;;  %v30559_v23 = vpack.c.bf16 %v27482_v1, %v27481_v39  ;;  %v27906_v34 = vld [vmem:[%s39942_s5 + $0xb30] sm:$0xff]  ;;  %v27907_v49 = vld [vmem:[%s39942_s5 + $0xb38] sm:$0xff]  ;;  %v27908_v1 = vld [vmem:[%s39942_s5 + $0xb40] sm:$0xff] }
 0x915   :  { %v30633_v39 = vpack.c.bf16 %v27907_v49, %v27906_v34 }
 0x917   :  { %30522 = vmatpush3.bf16.msra.mxu0 %v30521_v17  ;;  %v27484_v17 = vld [vmem:[%s39942_s5 + $0x7d8] sm:$0xff] }
 0x918   :  { %30524 = vmatprep.subr.bf16.mxu0 %v30523_v45  ;;  %v30561_v45 = vpack.c.bf16 %v27466_v55, %v27465_v0  ;;  %v30563_v59 = vpack.c.bf16 %v27484_v17, %v27483_v5  ;;  %v27910_v0 = vld [vmem:[%s39942_s5 + $0xb50] sm:$0xff]  ;;  %v27911_v55 = vld [vmem:[%s39942_s5 + $0xb58] sm:$0xff]  ;;  %v27912_v17 = vld [vmem:[%s39942_s5 + $0xb60] sm:$0xff] }
 0x919   :  { %v30639_v5 = vpack.c.bf16 %v27911_v55, %v27910_v0 }
 0x91b   :  { %30526 = vmatpush3.bf16.msra.mxu0 %v30525_v56  ;;  %v27486_v56 = vld [vmem:[%s39942_s5 + $0x7e8] sm:$0xff] }
 0x91c   :  { %30528 = vmatprep.subr.bf16.mxu0 %v30527_v24  ;;  %v30565_v24 = vpack.c.bf16 %v27468_v31, %v27467_v14  ;;  %v30567_v33 = vpack.c.bf16 %v27486_v56, %v27485_v46 }
 0x91f   :  { %30530 = vmatpush3.bf16.msra.mxu0 %v30529_v57  ;;  %v27488_v57 = vld [vmem:[%s39942_s5 + $0x7f8] sm:$0xff] }
 0x920   :  { %30532 = vmatprep.subr.bf16.mxu0 %v30531_v51  ;;  %v30569_v51 = vpack.c.bf16 %v27470_v27, %v27469_v15  ;;  %v30571_v53 = vpack.c.bf16 %v27488_v57, %v27487_v42 }
 0x923   :  { %30534 = vmatpush3.bf16.msra.mxu0 %v30533_v29  ;;  %v27421_v29 = vrot.slane %v39552_v54, 4 }
 0x924   :  { %30536 = vmatprep.subr.bf16.mxu0 %v30535_v43  ;;  %v27808_v43 = vld [vmem:[%s39942_s5 + $0xa80] sm:$0xff] }
 0x925   :  { %v30600_v13 = vpack.c.bf16 %v27809_v28, %v27808_v43  ;;  %v27992_v28 = vld [vmem:[%s39942_s5 + $0xb80] sm:$0xff] }
 0x927   :  { %30538 = vmatpush3.bf16.msra.mxu0 %v30537_v48  ;;  %v27812_v48 = vld [vmem:[%s39942_s5 + $0xaa0] sm:$0xff] }
 0x928   :  { %30540 = vmatprep.subr.bf16.mxu0 %v30539_v20  ;;  %v27813_v20 = vld [vmem:[%s39942_s5 + $0xaa8] sm:$0xff] }
 0x929   :  { %v30606_v36 = vpack.c.bf16 %v27813_v20, %v27812_v48  ;;  %v27997_v48 = vld [vmem:[%s39942_s5 + $0xba8] sm:$0xff] }
 0x92b   :  { %30542 = vmatpush3.bf16.msra.mxu0 %v30541_v22  ;;  %v27816_v22 = vld [vmem:[%s39942_s5 + $0xac0] sm:$0xff] }
 0x92c   :  { %30544 = vmatprep.subr.bf16.mxu0 %v30543_v44  ;;  %v27817_v44 = vld [vmem:[%s39942_s5 + $0xac8] sm:$0xff] }
 0x92d   :  { %v30612_v58 = vpack.c.bf16 %v27817_v44, %v27816_v22  ;;  %v28001_v22 = vld [vmem:[%s39942_s5 + $0xbc8] sm:$0xff] }
 0x92e   :  { %27656 = vmatmul.mubr.f32.vlgmr.msra.gmra.mrb[142].mxu0 %v39552_v54  ;;  %v27811_v54 = vld [vmem:[%s39942_s5 + $0xa98] sm:$0xff] }
 0x92f   :  { %30546 = vmatpush3.bf16.msra.mxu0 %v30545_v8  ;;  %27725 = vmatprep.mubr.f32.mxu0 %v27423_v25  ;;  %v30603_v19 = vpack.c.bf16 %v27811_v54, %v27810_v62  ;;  %v27820_v8 = vld [vmem:[%s39942_s5 + $0xae0] sm:$0xff]  ;;  %v27823_v25 = vld [vmem:[%s39942_s5 + $0xaf8] sm:$0xff] }
 0x930   :  { %30548 = vmatprep.subr.bf16.mxu0 %v30547_v40  ;;  %v27821_v40 = vld [vmem:[%s39942_s5 + $0xae8] sm:$0xff]  ;;  %v30621_v63 = vpack.c.bf16 %v27823_v25, %v27822_v52 }
 0x931   :  { %v30618_v2 = vpack.c.bf16 %v27821_v40, %v27820_v8  ;;  %v28005_v8 = vld [vmem:[%s39942_s5 + $0xbe8] sm:$0xff] }
 0x933   :  { %30550 = vmatpush3.bf16.msra.mxu0 %v30549_v61  ;;  %v27901_v61 = vld [vmem:[%s39942_s5 + $0xb08] sm:$0xff] }
 0x934   :  { %30552 = vmatprep.subr.bf16.mxu0 %v30551_v4  ;;  %v27902_v4 = vld [vmem:[%s39942_s5 + $0xb10] sm:$0xff]  ;;  %v30624_v47 = vpack.c.bf16 %v27901_v61, %v27900_v3 }
 0x935   :  { %v30627_v18 = vpack.c.bf16 %v27903_v37, %v27902_v4  ;;  %v28006_v61 = vld [vmem:[%s39942_s5 + $0xbf0] sm:$0xff]  ;;  %v28007_v4 = vld [vmem:[%s39942_s5 + $0xbf8] sm:$0xff] }
 0x936   :  { %30625 = vmatpush3.bf16.msra.mxu1 %v30624_v47  ;;  %v30669_v47 = vpack.c.bf16 %v28007_v4, %v28006_v61 }
 0x937   :  { %30554 = vmatpush3.bf16.msra.mxu0 %v30553_v10  ;;  %30626 = vmatprep.subr.bf16.mxu1 %v31954_v7  ;;  %v27905_v10 = vld [vmem:[%s39942_s5 + $0xb28] sm:$0xff] }
 0x938   :  { %30556 = vmatprep.subr.bf16.mxu0 %v30555_v12  ;;  %v30630_v12 = vpack.c.bf16 %v27905_v10, %v27904_v11 }
 0x93a   :  { %30628 = vmatpush3.bf16.msra.mxu1 %v30627_v18 }
 0x93b   :  { %30558 = vmatpush3.bf16.msra.mxu0 %v30557_v21  ;;  %30629 = vmatprep.subr.bf16.mxu1 %v31954_v7  ;;  %v27909_v21 = vld [vmem:[%s39942_s5 + $0xb48] sm:$0xff] }
 0x93c   :  { %30560 = vmatprep.subr.bf16.mxu0 %v30559_v23  ;;  %v30636_v23 = vpack.c.bf16 %v27909_v21, %v27908_v1 }
 0x93e   :  { %30631 = vmatpush3.bf16.msra.mxu1 %v30630_v12  ;;  %v29488_v12 = vld [vmem:[%s39943_s6 + $0x7] ss:$0 sm:$0xff] }
 0x93f   :  { %30562 = vmatpush3.bf16.msra.mxu0 %v30561_v45  ;;  %30632 = vmatprep.subr.bf16.mxu1 %v31954_v7  ;;  %v27913_v45 = vld [vmem:[%s39942_s5 + $0xb68] sm:$0xff] }
 0x940   :  { %30564 = vmatprep.subr.bf16.mxu0 %v30563_v59  ;;  %v30642_v59 = vpack.c.bf16 %v27913_v45, %v27912_v17 }
 0x942   :  { %30634 = vmatpush3.bf16.msra.mxu1 %v30633_v39 }
 0x943   :  { %30566 = vmatpush3.bf16.msra.mxu0 %v30565_v24  ;;  %30635 = vmatprep.subr.bf16.mxu1 %v31954_v7 }
 0x944   :  { %30568 = vmatprep.subr.bf16.mxu0 %v30567_v33 }
 0x946   :  { %30637 = vmatpush3.bf16.msra.mxu1 %v30636_v23 }
 0x947   :  { %30570 = vmatpush3.bf16.msra.mxu0 %v30569_v51  ;;  %30638 = vmatprep.subr.bf16.mxu1 %v31954_v7  ;;  %v29485_v51 = vld [vmem:[%s39943_s6 + $0x1] ss:$0 sm:$0xff] }
 0x948   :  { %30572 = vmatprep.subr.bf16.mxu0 %v30571_v53 }
 0x94a   :  { %30640 = vmatpush3.bf16.msra.mxu1 %v30639_v5 }
 0x94b   :  { %30574 = vmatpush3.bf16.msra.mxu0 %v30573_v38  ;;  %30641 = vmatprep.subr.bf16.mxu1 %v31954_v7  ;;  %v27914_v38 = vld [vmem:[%s39942_s5 + $0xb70] sm:$0xff] }
 0x94c   :  { %30599 = vmatprep.subr.bf16.mxu0 %v31954_v7 }
 0x94e   :  { %27726 = vmatmul.mubr.f32.vlgmr.msra.gmra.mrb[144].mxu0 %v27421_v29  ;;  %30643 = vmatpush3.bf16.msra.mxu1 %v30642_v59  ;;  %v27915_v29 = vld [vmem:[%s39942_s5 + $0xb78] sm:$0xff] }
 0x94f   :  { %30150 = vmatprep.mubr.msk.f32.mxu0 %vm31951_vm3, %v40241_v50  ;;  %30601 = vmatpush3.bf16.msra.mxu0 %v30600_v13  ;;  %v30645_v43 = vpack.c.bf16 %v27915_v29, %v27914_v38  ;;  %v27995_v13 = vld [vmem:[%s39942_s5 + $0xb98] sm:$0xff] }
 0x950   :  { %30602 = vmatprep.subr.bf16.mxu0 %v31954_v7  ;;  %30644 = vmatprep.subr.bf16.mxu1 %v31954_v7 }
 0x952   :  { %30646 = vmatpush3.bf16.msra.mxu1 %v30645_v43 }
 0x953   :  { %30604 = vmatpush3.bf16.msra.mxu0 %v30603_v19  ;;  %v27996_v19 = vld [vmem:[%s39942_s5 + $0xba0] sm:$0xff] }
 0x954   :  { %30605 = vmatprep.subr.bf16.mxu0 %v31954_v7  ;;  %v30654_v20 = vpack.c.bf16 %v27997_v48, %v27996_v19 }
 0x957   :  { %30607 = vmatpush3.bf16.msra.mxu0 %v30606_v36  ;;  %v27998_v36 = vld [vmem:[%s39942_s5 + $0xbb0] sm:$0xff] }
 0x958   :  { %30608 = vmatprep.subr.bf16.mxu0 %v31954_v7  ;;  %v30657_v35 = vpack.c.bf16 %v27999_v60, %v27998_v36 }
 0x95b   :  { %30610 = vmatpush3.bf16.msra.mxu0 %v30609_v6  ;;  %v28000_v6 = vld [vmem:[%s39942_s5 + $0xbc0] sm:$0xff] }
 0x95c   :  { %30611 = vmatprep.subr.bf16.mxu0 %v31954_v7  ;;  %v30660_v44 = vpack.c.bf16 %v28001_v22, %v28000_v6 }
 0x95f   :  { %30613 = vmatpush3.bf16.msra.mxu0 %v30612_v58  ;;  %v28002_v58 = vld [vmem:[%s39942_s5 + $0xbd0] sm:$0xff] }
 0x960   :  { %30614 = vmatprep.subr.bf16.mxu0 %v31954_v7  ;;  %v30663_v30 = vpack.c.bf16 %v28003_v9, %v28002_v58 }
 0x963   :  { %30616 = vmatpush3.bf16.msra.mxu0 %v30615_v41  ;;  %v28004_v41 = vld [vmem:[%s39942_s5 + $0xbe0] sm:$0xff] }
 0x964   :  { %30617 = vmatprep.subr.bf16.mxu0 %v31954_v7  ;;  %v30666_v40 = vpack.c.bf16 %v28005_v8, %v28004_v41 }
 0x967   :  { %30619 = vmatpush3.bf16.msra.mxu0 %v30618_v2  ;;  %v29486_v2 = vld [vmem:[%s39943_s6 + $0x5] ss:$0 sm:$0xff] }
 0x968   :  { %30620 = vmatprep.subr.bf16.mxu0 %v31954_v7 }
 0x96b   :  { %30622 = vmatpush3.bf16.msra.mxu0 %v30621_v63 }
 0x96c   :  { %30647 = vmatprep.subr.bf16.mxu0 %v31954_v7 }
 0x9e1   :  { %v27587_v14 = vpop.f32.mrb[140].mxu0 }
 0x9e2   :  { %v30082_v31 = vpop.f32.mrb[141].mxu0 }
 0xa01   :  { %v29823_v46 = vpop.f32.mrb[142].mxu0 }
 0xa02   :  { %v29824_v56 = vpop.f32.mrb[143].mxu0 }
 0xa03   :  { %v29825_v24 = vadd.f32 %v29824_v56, %v29823_v46 }
 0xa05   :  { %v27658_v33 = vadd.f32 %v29825_v24, %v27587_v14 }
 0xa21   :  { %v29858_v15 = vpop.f32.mrb[144].mxu0 }
 0xa22   :  { %v29859_v27 = vpop.f32.mrb[145].mxu0 }
 0xa23   :  { %v29860_v42 = vadd.f32 %v29859_v27, %v29858_v15 }
 0xa25   :  { %v27728_v57 = vadd.f32 %v29860_v42, %v27658_v33 }
 0xa27   :  { %v27798_v53 = vadd.f32 %v39477_v16, %v27728_v57  ;;  %v27993_v16 = vld [vmem:[%s39942_s5 + $0xb88] sm:$0xff] }
 0xa28   :  { %v30648_v62 = vpack.c.bf16 %v27993_v16, %v27992_v28 }
 0xa29   :  { %v27806_v26 = vadd.f32 %v29485_v51, %v27798_v53 }
 0xa2b   :  { %v27807_v32 = vmax.f32 %v27806_v26, 0.0 }
 0xa2d   :  { %30151 = vmatmul.mubr.f32.vlgmr.msra.gmra.mrb[146].mxu0 %v27807_v32 }
 0xa2e   :  { %30220 = vmatprep.mubr.msk.f32.mxu0 %vm31951_vm3, %v40241_v50  ;;  %v27994_v50 = vld [vmem:[%s39942_s5 + $0xb90] sm:$0xff]  ;;  %30649 = vmatpush3.bf16.msra.mxu0 %v30648_v62  ;;  %s31921_s5 = scalar_lea.vmem %s28092_s30, 32 }
 0xa2f   :  { %v30651_v54 = vpack.c.bf16 %v27995_v13, %v27994_v50  ;;  %30650 = vmatprep.subr.bf16.mxu0 %v31954_v7  ;;  %p31922_p0 = scmp.ne.s32.totalorder %s28092_s30, %s31921_s5  ;;  %p31927_p2 = scmp.lt.s32.totalorder %s31921_s5, %s31921_s5 }
 0xa31   :  { %p31928_p3 = por %p31927_p2, %p31926_p1 }
 0xa32   :  { %30652 = vmatpush3.bf16.msra.mxu0 %v30651_v54 }
 0xa33   :  { %30653 = vmatprep.subr.bf16.mxu0 %v31954_v7  ;;  %p31929_p4 = pnand %p31928_p3, %p31922_p0 }
 0xa36   :  { %30655 = vmatpush3.bf16.msra.mxu0 %v30654_v20 }
 0xa37   :  { %30656 = vmatprep.subr.bf16.mxu0 %v31954_v7 }
 0xa3a   :  { %30658 = vmatpush3.bf16.msra.mxu0 %v30657_v35 }
 0xa3b   :  { %30659 = vmatprep.subr.bf16.mxu0 %v31954_v7 }
 0xa3e   :  { %30661 = vmatpush3.bf16.msra.mxu0 %v30660_v44 }
 0xa3f   :  { %30662 = vmatprep.subr.bf16.mxu0 %v31954_v7 }
 0xa42   :  { %30664 = vmatpush3.bf16.msra.mxu0 %v30663_v30 }
 0xa43   :  { %30665 = vmatprep.subr.bf16.mxu0 %v31954_v7 }
 0xa46   :  { %30667 = vmatpush3.bf16.msra.mxu0 %v30666_v40 }
 0xa47   :  { %30668 = vmatprep.subr.bf16.mxu0 %v31954_v7  ;;  %v29487_v7 = vld [vmem:[%s39943_s6 + $0x6] ss:$0 sm:$0xff] }
 0xa4a   :  { %30670 = vmatpush3.bf16.msra.mxu0 %v30669_v47 }
 0xb00   :  { %v27895_v52 = vpop.f32.mrb[146].mxu0 }
 0xb01   :  { %v27896_v25 = vadd.f32 %v29486_v2, %v27895_v52  ;;  %v30152_v63 = vpop.f32.mrb[147].mxu0 }
 0xb03   :  { %v27899_v3 = vmax.f32 %v27896_v25, 0.0 }
 0xb05   :  { %30186 = vmatmul.mubr.f32.vlgmr.msra.gmra.mrb[116].mxu1 %v27899_v3 }
 0xbd8   :  { %v27987_v37 = vpop.f32.mrb[116].mxu1 }
 0xbd9   :  { %v27988_v18 = vadd.f32 %v29487_v7, %v27987_v37  ;;  %v30187_v11 = vpop.f32.mrb[117].mxu1 }
 0xbdb   :  { %v27991_v10 = vmax.f32 %v27988_v18, 0.0 }
 0xbdd   :  { %30221 = vmatmul.mubr.f32.vlgmr.msra.gmra.mrb[148].mxu0 %v27991_v10 }
 0xcb0   :  { %v28079_v34 = vpop.f32.mrb[148].mxu0 }
 0xcb1   :  { %v28080_v49 = vadd.f32 %v29488_v12, %v28079_v34  ;;  %v30222_v39 = vpop.f32.mrb[149].mxu0 }
 0xcb3   :  { %28084 = vst.msk [vmem:[#allocation2] sm:$0x3] %vm28083_vm8, %v28080_v49 }
 0xcb4   :  { %31932 = shalt.err (!%p31929_p4)
}
 0xcb5   :  { %s31933_s16 = scalar_lea.hbm %s39944_s7, 32 }
 0xcb6   :  { %p31934_p5 = scmp.ne.s32.totalorder %s39944_s7, %s31933_s16  ;;  %p31937_p6 = scmp.lt.u32.totalorder %s31933_s16, %s39944_s7 }
 0xcb8   :  { %p31939_p7 = pnand %p31937_p6, %p31934_p5 }
 0xcba   :  { %31942 = shalt.err (!%p31939_p7)
}
 0xcbb   :  { %28094 = dma.vmem_to_hbm [thread:$0]  %s28092_s30, 32, %s39944_s7, [#allocation3]  }
 0xcbc   :  { %31943 = dma.done.wait [#allocation3], 32  }
 0xcbd   :  { %31944 = vsyncadd [#allocation3], 4294967264 }
 0xcbe   :  { %28098 = vsyncpa [#allocation3], 1 }

</bundles_post_ra>
